<compile_context>
chip_gen: v7x
topology: tpu7x:2x2x1
jax: 0.10.0
libtpu: 0.0.40
codegen_flags: <defaults>
</compile_context>

<pallas_src>
import jax
import jax.numpy as jnp
from jax.experimental import pallas as pl
from jax.experimental.pallas import tpu as pltpu

PH = 3    # top/bottom halo rows (covers the dilation-3 SAC branch)
WL = 16   # left halo cols: interior column start aligned to the bf16 sublane tile
WR = 16   # right halo cols: keeps padded width a multiple of 16


# ------------------------------ fused kernel --------------------------------

def _make_defuse_kernel(H, W, C, num_convs, groups, eps):
    HW = H * W
    cpg = C // groups

    def kernel(*refs):
        # ---- unpack refs (inputs..., out, scratch) --------------------------
        it = iter(refs)
        agg_ref = next(it)        # (H, W, C)            f32
        appr_ref = next(it)       # (H, W, C)            f32
        sac_w1_ref = next(it)     # (9, C, C)            bf16
        sac_w3_ref = next(it)     # (9, C, C)            bf16
        sac_b_ref = next(it)      # (1, C)               f32
        sac_sw_ref = next(it)     # (1, C)               f32
        sac_sb_ref = next(it)     # (1, 1)               f32
        if num_convs:
            tw_w_ref = next(it)   # (num_convs*9, C, C)  bf16
            tw_b_ref = next(it)   # (num_convs, 1, C)    f32
            gn_g_ref = next(it)   # (num_convs, 1, C)    f32
            gn_b_ref = next(it)   # (num_convs, 1, C)    f32
            gmask_ref = next(it)  # (C, C)               f32 (1.0 where same GN group)
        wt_w_ref = next(it)       # (2, C)               f32
        wt_b_ref = next(it)       # (1, 2)               f32
        o_ref = next(it)          # (H, W, C)            f32
        xpad_ref = next(it)       # (H+2*PH, WL+W+WR, C) bf16 scratch (halo'd activation)

        # Borders stay zero; the interior is overwritten before every conv.
        # (Unconditional: scratch is per-core under a megacore split, do not gate on id.)
        xpad_ref[...] = jnp.zeros(xpad_ref.shape, xpad_ref.dtype)

        def fill_pad(x_hw_c_f32):
            # Single f32->bf16 cast per conv; interior store starts at a sublane-aligned
            # column (WL=16) so the big store is unmasked.
            xpad_ref[PH:PH + H, WL:WL + W, :] = (
                x_hw_c_f32.astype(jnp.bfloat16).reshape(H, W, C))

        def conv3x3(tap_weight, dil):
            # 3x3 (possibly dilated) conv as 9 accumulated bf16 MXU dots on shifted
            # windows of the bf16 halo buffer -- no im2col scratch traffic.
            acc = None
            for t in range(9):
                dy = (t // 3 - 1) * dil
                dx = (t % 3 - 1) * dil
                patch = xpad_ref[PH + dy:PH + dy + H, WL + dx:WL + dx + W, :]
                part = jnp.dot(patch.reshape(HW, C), tap_weight(t),
                               preferred_element_type=jnp.float32)
                acc = part if acc is None else acc + part
            return acc

        x_agg = agg_ref[...].reshape(HW, C)     # f32
        x_appr = appr_ref[...].reshape(HW, C)   # f32

        # ---- SAC-like conv (dil=1 / dil=3 branches + per-pixel sigmoid switch) + appr
        fill_pad(x_agg)
        sac_b = sac_b_ref[...]
        a = conv3x3(lambda t: sac_w1_ref[t], 1) + sac_b
        b = conv3x3(lambda t: sac_w3_ref[t], 3) + sac_b
        # switch logit as a VPU/XLU lane reduction (no degenerate 1-column MXU dot)
        logit = jnp.sum(x_agg * sac_sw_ref[...], axis=-1, keepdims=True) + sac_sb_ref[...]
        s = jax.nn.sigmoid(logit)
        x = s * a + (1.0 - s) * b + x_appr                        # (HW, C) f32

        # ---- conv tower: [conv3x3 -> GroupNorm(groups) -> ReLU] * num_convs ----------
        if num_convs:
            inv_n = 1.0 / float(HW * cpg)
            gmask = gmask_ref[...]

            def layer(i, xc):
                fill_pad(xc)
                y = conv3x3(lambda t: tw_w_ref[i * 9 + t], 1) + tw_b_ref[i]
                # single-pass GroupNorm stats: one (2,C)x(C,C) group-mask dot
                s1 = jnp.sum(y, axis=0, keepdims=True)            # (1, C)
                s2 = jnp.sum(y * y, axis=0, keepdims=True)        # (1, C)
                g = jnp.dot(jnp.concatenate([s1, s2], axis=0), gmask,
                            preferred_element_type=jnp.float32) * inv_n
                mean = g[0:1, :]
                var = g[1:2, :] - mean * mean
                scale = jax.lax.rsqrt(var + eps) * gn_g_ref[i]    # (1, C)
                shift = gn_b_ref[i] - mean * scale                # (1, C)
                return jnp.maximum(y * scale + shift, 0.0)

            x = jax.lax.fori_loop(0, num_convs, layer, x)

        # ---- weight head: 1x1 conv (C->2) + Hsigmoid; fuse; ReLU ----------------------
        wt_w = wt_w_ref[...]
        wt_b = wt_b_ref[...]
        l1 = jnp.sum(x * wt_w[0:1, :], axis=-1, keepdims=True) + wt_b[0:1, 0:1]
        l2 = jnp.sum(x * wt_w[1:2, :], axis=-1, keepdims=True) + wt_b[0:1, 1:2]
        w1 = jnp.clip(l1 + 3.0, 0.0, 6.0) * (1.0 / 6.0)   # Hsigmoid = relu6(x+3)/6
        w2 = jnp.clip(l2 + 3.0, 0.0, 6.0) * (1.0 / 6.0)
        out = jnp.maximum(w1 * x + w2 * x_appr, 0.0)
        o_ref[...] = out.reshape(H, W, C)

    return kernel


# ------------------------------ parameter packing (init-time) ----------------

def pack_params(params, C, num_convs, groups):
    """One-time repack of module parameters into kernel-ready layouts."""
    p = {}
    p['sac_w1'] = params['sac_w'].reshape(9, C, C).astype(jnp.bfloat16)
    p['sac_w3'] = (params['sac_w'] + params['sac_dw']).reshape(9, C, C).astype(jnp.bfloat16)
    p['sac_b'] = params['sac_b'].reshape(1, C).astype(jnp.float32)
    p['sac_sw'] = params['sac_sw'].reshape(1, C).astype(jnp.float32)
    p['sac_sb'] = params['sac_sb'].reshape(1, 1).astype(jnp.float32)
    if num_convs:
        p['tw_w'] = jnp.concatenate(
            [params[f'tower_w{i}'].reshape(9, C, C) for i in range(num_convs)],
            axis=0).astype(jnp.bfloat16)                               # (num_convs*9, C, C)
        p['tw_b'] = jnp.stack([params[f'tower_b{i}'].reshape(1, C)
                               for i in range(num_convs)]).astype(jnp.float32)
        p['gn_g'] = jnp.stack([params[f'gn_g{i}'].reshape(1, C)
                               for i in range(num_convs)]).astype(jnp.float32)
        p['gn_b'] = jnp.stack([params[f'gn_b{i}'].reshape(1, C)
                               for i in range(num_convs)]).astype(jnp.float32)
        cidx = jnp.arange(C) // (C // groups)
        p['gmask'] = (cidx[:, None] == cidx[None, :]).astype(jnp.float32)   # (C, C)
    p['wt_w'] = params['wt_w'].T.astype(jnp.float32)                        # (2, C)
    p['wt_b'] = params['wt_b'].reshape(1, 2).astype(jnp.float32)
    return p


# ------------------------------ module forward -------------------------------

def defuse_forward(agg, appr, pk, num_convs, groups, eps=1e-5):
    """agg, appr: (N, H, W, C) float32 (NHWC); pk = pack_params(...) output."""
    N, H, W, C = agg.shape
    assert C % groups == 0 and W % 8 == 0

    img = lambda: pl.BlockSpec((None, H, W, C), lambda n: (n, 0, 0, 0))
    cst = lambda a: pl.BlockSpec(a.shape, lambda n, _s=a.shape: tuple(0 for _ in _s))

    inputs = [agg, appr, pk['sac_w1'], pk['sac_w3'], pk['sac_b'], pk['sac_sw'], pk['sac_sb']]
    in_specs = [img(), img()] + [cst(a) for a in inputs[2:]]
    if num_convs:
        more = [pk['tw_w'], pk['tw_b'], pk['gn_g'], pk['gn_b'], pk['gmask']]
        inputs += more
        in_specs += [cst(a) for a in more]
    tail = [pk['wt_w'], pk['wt_b']]
    inputs += tail
    in_specs += [cst(a) for a in tail]

    kernel = _make_defuse_kernel(H, W, C, num_convs, groups, eps)
    out = pl.pallas_call(
        kernel,
        out_shape=jax.ShapeDtypeStruct((N, H, W, C), jnp.float32),
        grid=(N,),
        in_specs=in_specs,
        out_specs=pl.BlockSpec((None, H, W, C), lambda n: (n, 0, 0, 0)),
        scratch_shapes=[
            pltpu.VMEM((H + 2 * PH, WL + W + WR, C), jnp.bfloat16),  # bf16 halo'd activation
        ],
        compiler_params=pltpu.CompilerParams(
            # N=2 -> both v7x TensorCores; harmless on single-TC v5e/v6e.
            dimension_semantics=("parallel",),
            vmem_limit_bytes=32 * 1024 * 1024),
    )(*inputs)
    return out


# ------------------------------ pure-JAX reference ---------------------------
# Matches the kernel's numerics policy: bf16 conv operands, f32 accumulation/stats.

def _conv_ref(x, w, b, dilation):
    y = jax.lax.conv_general_dilated(
        x.astype(jnp.bfloat16), w.astype(jnp.bfloat16),
        window_strides=(1, 1), padding=[(dilation, dilation)] * 2,
        rhs_dilation=(dilation, dilation),
        dimension_numbers=('NHWC', 'HWIO', 'NHWC'),
        preferred_element_type=jnp.float32)
    return y + b.reshape(1, 1, 1, -1)


def _gn_ref(x, gamma, beta, groups, eps):
    N, H, W, C = x.shape
    xr = x.reshape(N, H, W, groups, C // groups)
    mean = xr.mean(axis=(1, 2, 4), keepdims=True)
    var = ((xr - mean) ** 2).mean(axis=(1, 2, 4), keepdims=True)
    xn = ((xr - mean) * jax.lax.rsqrt(var + eps)).reshape(N, H, W, C)
    return xn * gamma.reshape(1, 1, 1, C) + beta.reshape(1, 1, 1, C)


def defuse_forward_ref(agg, appr, params, num_convs, groups, eps=1e-5):
    """agg, appr: (N, C, H, W); returns (N, C, H, W)."""
    x_agg = jnp.transpose(agg, (0, 2, 3, 1))
    x_appr = jnp.transpose(appr, (0, 2, 3, 1))
    a = _conv_ref(x_agg, params['sac_w'], params['sac_b'], 1)
    b = _conv_ref(x_agg, params['sac_w'] + params['sac_dw'], params['sac_b'], 3)
    logit = jnp.einsum('nhwc,c->nhw', x_agg, params['sac_sw'][:, 0])[..., None] \
        + params['sac_sb'][0, 0]
    s = jax.nn.sigmoid(logit)
    x = s * a + (1.0 - s) * b + x_appr
    for i in range(num_convs):
        x = _conv_ref(x, params[f'tower_w{i}'], params[f'tower_b{i}'], 1)
        x = jax.nn.relu(_gn_ref(x, params[f'gn_g{i}'], params[f'gn_b{i}'], groups, eps))
    logits = jnp.einsum('nhwc,ck->nhwk', x, params['wt_w']) + params['wt_b'].reshape(1, 1, 1, 2)
    w = jnp.clip(logits + 3.0, 0.0, 6.0) / 6.0
    y = w[..., 0:1] * x + w[..., 1:2] * x_appr
    return jnp.transpose(jax.nn.relu(y), (0, 3, 1, 2))


# ------------------------------ parameter init --------------------------------

def init_params(key, C, num_convs):
    """Deterministic init. kaiming_normal_(a=1) -> std = 1/sqrt(fan_in)."""
    ks = jax.random.split(key, 5 + num_convs)
    p = {}
    p['sac_w'] = jax.random.normal(ks[0], (3, 3, C, C), jnp.float32) / jnp.sqrt(9.0 * C)
    p['sac_dw'] = jax.random.normal(ks[1], (3, 3, C, C), jnp.float32) * (0.1 / jnp.sqrt(9.0 * C))
    p['sac_b'] = jnp.zeros((1, C), jnp.float32)
    p['sac_sw'] = jax.random.normal(ks[2], (C, 1), jnp.float32) / jnp.sqrt(float(C))
    p['sac_sb'] = jnp.zeros((1, 1), jnp.float32)
    for i in range(num_convs):
        p[f'tower_w{i}'] = jax.random.normal(ks[4 + i], (3, 3, C, C), jnp.float32) / jnp.sqrt(9.0 * C)
        p[f'tower_b{i}'] = jnp.full((1, C), 1e-6, jnp.float32)
        p[f'gn_g{i}'] = jnp.ones((1, C), jnp.float32)
        p[f'gn_b{i}'] = jnp.zeros((1, C), jnp.float32)
    p['wt_w'] = jax.random.normal(ks[3], (C, 2), jnp.float32) / jnp.sqrt(float(C))
    p['wt_b'] = jnp.full((1, 2), 1e-6, jnp.float32)
    return p


# ----------------------------------- main --------------------------------------

if __name__ == "__main__":
    N, C, H, W = 2, 64, 16, 16          # C=64 so GroupNorm(32, C) is valid
    NUM_CONVS, GROUPS = 1, 32

    key = jax.random.PRNGKey(0)
    k_agg, k_appr, k_par = jax.random.split(key, 3)
    agg = jax.random.normal(k_agg, (N, C, H, W), jnp.float32)    # torch NCHW layout
    appr = jax.random.normal(k_appr, (N, C, H, W), jnp.float32)
    params = init_params(k_par, C, NUM_CONVS)
    packed = pack_params(params, C, NUM_CONVS, GROUPS)           # one-time repack

    # NCHW -> NHWC once at the torch-layout boundary; kernel works natively in NHWC.
    agg_nhwc = jnp.transpose(agg, (0, 2, 3, 1))
    appr_nhwc = jnp.transpose(appr, (0, 2, 3, 1))

    out = defuse_forward(agg_nhwc, appr_nhwc, packed, NUM_CONVS, GROUPS)
    out = jax.block_until_ready(out)
    out_nchw = jnp.transpose(out, (0, 3, 1, 2))

    ref = defuse_forward_ref(agg, appr, params, NUM_CONVS, GROUPS)
    assert out_nchw.shape == (N, C, H, W)
    assert bool(jnp.isfinite(out_nchw).all())
    err = float(jnp.max(jnp.abs(out_nchw - ref)))
    assert err < 4e-2, f"mismatch vs pure-JAX reference: {err}"

    print("KERNEL_OK")
</pallas_src>

<mosaic_0001>
module attributes {stable_mosaic.version = 11 : i64} {
  func.func @kernel(%arg0: i32, %arg1: memref<1x16x16x64xf32, #tpu.memory_space<vmem>>, %arg2: memref<1x16x16x64xf32, #tpu.memory_space<vmem>>, %arg3: memref<9x64x64xbf16, #tpu.memory_space<vmem>>, %arg4: memref<9x64x64xbf16, #tpu.memory_space<vmem>>, %arg5: memref<1x64xf32, #tpu.memory_space<vmem>>, %arg6: memref<1x64xf32, #tpu.memory_space<vmem>>, %arg7: memref<1x1xf32, #tpu.memory_space<vmem>>, %arg8: memref<9x64x64xbf16, #tpu.memory_space<vmem>>, %arg9: memref<1x1x64xf32, #tpu.memory_space<vmem>>, %arg10: memref<1x1x64xf32, #tpu.memory_space<vmem>>, %arg11: memref<1x1x64xf32, #tpu.memory_space<vmem>>, %arg12: memref<64x64xf32, #tpu.memory_space<vmem>>, %arg13: memref<2x64xf32, #tpu.memory_space<vmem>>, %arg14: memref<1x2xf32, #tpu.memory_space<vmem>>, %arg15: memref<1x16x16x64xf32, #tpu.memory_space<vmem>>, %arg16: memref<22x48x64xbf16, #tpu.memory_space<vmem>>) attributes {dimension_semantics = [#tpu.dimension_semantics<parallel>], iteration_bounds = array<i64: 2>, scalar_prefetch = 0 : i64, scratch_operands = 1 : i64, tpu.core_type = #tpu.core_type<tc>, window_params = [{transform_indices = @transform_0, window_bounds = array<i64: 1, 16, 16, 64>}, {transform_indices = @transform_1, window_bounds = array<i64: 1, 16, 16, 64>}, {pipeline_mode = #tpu.pipeline_mode<synchronous>, transform_indices = @transform_2, window_bounds = array<i64: 9, 64, 64>}, {pipeline_mode = #tpu.pipeline_mode<synchronous>, transform_indices = @transform_3, window_bounds = array<i64: 9, 64, 64>}, {pipeline_mode = #tpu.pipeline_mode<synchronous>, transform_indices = @transform_4, window_bounds = array<i64: 1, 64>}, {pipeline_mode = #tpu.pipeline_mode<synchronous>, transform_indices = @transform_5, window_bounds = array<i64: 1, 64>}, {pipeline_mode = #tpu.pipeline_mode<synchronous>, transform_indices = @transform_6, window_bounds = array<i64: 1, 1>}, {pipeline_mode = #tpu.pipeline_mode<synchronous>, transform_indices = @transform_7, window_bounds = array<i64: 9, 64, 64>}, {pipeline_mode = #tpu.pipeline_mode<synchronous>, transform_indices = @transform_8, window_bounds = array<i64: 1, 1, 64>}, {pipeline_mode = #tpu.pipeline_mode<synchronous>, transform_indices = @transform_9, window_bounds = array<i64: 1, 1, 64>}, {pipeline_mode = #tpu.pipeline_mode<synchronous>, transform_indices = @transform_10, window_bounds = array<i64: 1, 1, 64>}, {pipeline_mode = #tpu.pipeline_mode<synchronous>, transform_indices = @transform_11, window_bounds = array<i64: 64, 64>}, {pipeline_mode = #tpu.pipeline_mode<synchronous>, transform_indices = @transform_12, window_bounds = array<i64: 2, 64>}, {pipeline_mode = #tpu.pipeline_mode<synchronous>, transform_indices = @transform_13, window_bounds = array<i64: 1, 2>}, {transform_indices = @transform_14, window_bounds = array<i64: 1, 16, 16, 64>}]} {
    %cst = arith.constant 0.000000e+00 : bf16
    %0 = vector.broadcast %cst : bf16 to vector<22x48x64xbf16>
    %c0 = arith.constant 0 : index
    %c0_0 = arith.constant 0 : index
    %c0_1 = arith.constant 0 : index
    %1 = vector.load %arg16[%c0, %c0_0, %c0_1] : memref<22x48x64xbf16, #tpu.memory_space<vmem>>, vector<22x48x64xbf16>
    tpu.vector_store %arg16[%c0, %c0_0, %c0_1], %0 {strides = array<i32>} : memref<22x48x64xbf16, #tpu.memory_space<vmem>>, vector<22x48x64xbf16>,
    %c0_2 = arith.constant 0 : index
    %c0_3 = arith.constant 0 : index
    %c0_4 = arith.constant 0 : index
    %c0_5 = arith.constant 0 : index
    %2 = vector.load %arg1[%c0_2, %c0_3, %c0_4, %c0_5] : memref<1x16x16x64xf32, #tpu.memory_space<vmem>>, vector<1x16x16x64xf32>
    %3 = vector.shape_cast %2 : vector<1x16x16x64xf32> to vector<16x16x64xf32>
    %4 = vector.shape_cast %3 : vector<16x16x64xf32> to vector<256x64xf32>
    %c0_6 = arith.constant 0 : index
    %c0_7 = arith.constant 0 : index
    %c0_8 = arith.constant 0 : index
    %c0_9 = arith.constant 0 : index
    %5 = vector.load %arg2[%c0_6, %c0_7, %c0_8, %c0_9] : memref<1x16x16x64xf32, #tpu.memory_space<vmem>>, vector<1x16x16x64xf32>
    %6 = vector.shape_cast %5 : vector<1x16x16x64xf32> to vector<16x16x64xf32>
    %7 = vector.shape_cast %6 : vector<16x16x64xf32> to vector<256x64xf32>
    %8 = arith.truncf %4 : vector<256x64xf32> to vector<256x64xbf16>
    %9 = vector.shape_cast %8 : vector<256x64xbf16> to vector<16x16x64xbf16>
    %c3 = arith.constant 3 : index
    %c16 = arith.constant 16 : index
    %c0_10 = arith.constant 0 : index
    %10 = vector.load %arg16[%c3, %c16, %c0_10] : memref<22x48x64xbf16, #tpu.memory_space<vmem>>, vector<16x16x64xbf16>
    tpu.vector_store %arg16[%c3, %c16, %c0_10], %9 {strides = array<i32>} : memref<22x48x64xbf16, #tpu.memory_space<vmem>>, vector<16x16x64xbf16>,
    %c0_11 = arith.constant 0 : index
    %c0_12 = arith.constant 0 : index
    %11 = vector.load %arg5[%c0_11, %c0_12] : memref<1x64xf32, #tpu.memory_space<vmem>>, vector<1x64xf32>
    %c2 = arith.constant 2 : index
    %c15 = arith.constant 15 : index
    %c0_13 = arith.constant 0 : index
    %12 = vector.load %arg16[%c2, %c15, %c0_13] : memref<22x48x64xbf16, #tpu.memory_space<vmem>>, vector<16x16x64xbf16>
    %13 = vector.shape_cast %12 : vector<16x16x64xbf16> to vector<256x64xbf16>
    %c0_14 = arith.constant 0 : index
    %c0_15 = arith.constant 0 : index
    %c0_16 = arith.constant 0 : index
    %14 = vector.load %arg3[%c0_14, %c0_15, %c0_16] : memref<9x64x64xbf16, #tpu.memory_space<vmem>>, vector<1x64x64xbf16>
    %15 = vector.shape_cast %14 : vector<1x64x64xbf16> to vector<64x64xbf16>
    %cst_17 = arith.constant dense<0.000000e+00> : vector<256x64xf32>
    %16 = tpu.matmul %13, %15, %cst_17 {dimension_numbers = #tpu.dot_dimension_numbers<[1], [0], [0], [1], [0, 0, 1, 1], [], []>} : vector<256x64xbf16>, vector<64x64xbf16>, vector<256x64xf32> -> vector<256x64xf32>
    %c2_18 = arith.constant 2 : index
    %c16_19 = arith.constant 16 : index
    %c0_20 = arith.constant 0 : index
    %17 = vector.load %arg16[%c2_18, %c16_19, %c0_20] : memref<22x48x64xbf16, #tpu.memory_space<vmem>>, vector<16x16x64xbf16>
    %18 = vector.shape_cast %17 : vector<16x16x64xbf16> to vector<256x64xbf16>
    %c1 = arith.constant 1 : index
    %c0_21 = arith.constant 0 : index
    %c0_22 = arith.constant 0 : index
    %19 = vector.load %arg3[%c1, %c0_21, %c0_22] : memref<9x64x64xbf16, #tpu.memory_space<vmem>>, vector<1x64x64xbf16>
    %20 = vector.shape_cast %19 : vector<1x64x64xbf16> to vector<64x64xbf16>
    %cst_23 = arith.constant dense<0.000000e+00> : vector<256x64xf32>
    %21 = tpu.matmul %18, %20, %cst_23 {dimension_numbers = #tpu.dot_dimension_numbers<[1], [0], [0], [1], [0, 0, 1, 1], [], []>} : vector<256x64xbf16>, vector<64x64xbf16>, vector<256x64xf32> -> vector<256x64xf32>
    %22 = arith.addf %16, %21 : vector<256x64xf32>
    %c2_24 = arith.constant 2 : index
    %c17 = arith.constant 17 : index
    %c0_25 = arith.constant 0 : index
    %23 = vector.load %arg16[%c2_24, %c17, %c0_25] : memref<22x48x64xbf16, #tpu.memory_space<vmem>>, vector<16x16x64xbf16>
    %24 = vector.shape_cast %23 : vector<16x16x64xbf16> to vector<256x64xbf16>
    %c2_26 = arith.constant 2 : index
    %c0_27 = arith.constant 0 : index
    %c0_28 = arith.constant 0 : index
    %25 = vector.load %arg3[%c2_26, %c0_27, %c0_28] : memref<9x64x64xbf16, #tpu.memory_space<vmem>>, vector<1x64x64xbf16>
    %26 = vector.shape_cast %25 : vector<1x64x64xbf16> to vector<64x64xbf16>
    %cst_29 = arith.constant dense<0.000000e+00> : vector<256x64xf32>
    %27 = tpu.matmul %24, %26, %cst_29 {dimension_numbers = #tpu.dot_dimension_numbers<[1], [0], [0], [1], [0, 0, 1, 1], [], []>} : vector<256x64xbf16>, vector<64x64xbf16>, vector<256x64xf32> -> vector<256x64xf32>
    %28 = arith.addf %22, %27 : vector<256x64xf32>
    %c3_30 = arith.constant 3 : index
    %c15_31 = arith.constant 15 : index
    %c0_32 = arith.constant 0 : index
    %29 = vector.load %arg16[%c3_30, %c15_31, %c0_32] : memref<22x48x64xbf16, #tpu.memory_space<vmem>>, vector<16x16x64xbf16>
    %30 = vector.shape_cast %29 : vector<16x16x64xbf16> to vector<256x64xbf16>
    %c3_33 = arith.constant 3 : index
    %c0_34 = arith.constant 0 : index
    %c0_35 = arith.constant 0 : index
    %31 = vector.load %arg3[%c3_33, %c0_34, %c0_35] : memref<9x64x64xbf16, #tpu.memory_space<vmem>>, vector<1x64x64xbf16>
    %32 = vector.shape_cast %31 : vector<1x64x64xbf16> to vector<64x64xbf16>
    %cst_36 = arith.constant dense<0.000000e+00> : vector<256x64xf32>
    %33 = tpu.matmul %30, %32, %cst_36 {dimension_numbers = #tpu.dot_dimension_numbers<[1], [0], [0], [1], [0, 0, 1, 1], [], []>} : vector<256x64xbf16>, vector<64x64xbf16>, vector<256x64xf32> -> vector<256x64xf32>
    %34 = arith.addf %28, %33 : vector<256x64xf32>
    %c3_37 = arith.constant 3 : index
    %c16_38 = arith.constant 16 : index
    %c0_39 = arith.constant 0 : index
    %35 = vector.load %arg16[%c3_37, %c16_38, %c0_39] : memref<22x48x64xbf16, #tpu.memory_space<vmem>>, vector<16x16x64xbf16>
    %36 = vector.shape_cast %35 : vector<16x16x64xbf16> to vector<256x64xbf16>
    %c4 = arith.constant 4 : index
    %c0_40 = arith.constant 0 : index
    %c0_41 = arith.constant 0 : index
    %37 = vector.load %arg3[%c4, %c0_40, %c0_41] : memref<9x64x64xbf16, #tpu.memory_space<vmem>>, vector<1x64x64xbf16>
    %38 = vector.shape_cast %37 : vector<1x64x64xbf16> to vector<64x64xbf16>
    %cst_42 = arith.constant dense<0.000000e+00> : vector<256x64xf32>
    %39 = tpu.matmul %36, %38, %cst_42 {dimension_numbers = #tpu.dot_dimension_numbers<[1], [0], [0], [1], [0, 0, 1, 1], [], []>} : vector<256x64xbf16>, vector<64x64xbf16>, vector<256x64xf32> -> vector<256x64xf32>
    %40 = arith.addf %34, %39 : vector<256x64xf32>
    %c3_43 = arith.constant 3 : index
    %c17_44 = arith.constant 17 : index
    %c0_45 = arith.constant 0 : index
    %41 = vector.load %arg16[%c3_43, %c17_44, %c0_45] : memref<22x48x64xbf16, #tpu.memory_space<vmem>>, vector<16x16x64xbf16>
    %42 = vector.shape_cast %41 : vector<16x16x64xbf16> to vector<256x64xbf16>
    %c5 = arith.constant 5 : index
    %c0_46 = arith.constant 0 : index
    %c0_47 = arith.constant 0 : index
    %43 = vector.load %arg3[%c5, %c0_46, %c0_47] : memref<9x64x64xbf16, #tpu.memory_space<vmem>>, vector<1x64x64xbf16>
    %44 = vector.shape_cast %43 : vector<1x64x64xbf16> to vector<64x64xbf16>
    %cst_48 = arith.constant dense<0.000000e+00> : vector<256x64xf32>
    %45 = tpu.matmul %42, %44, %cst_48 {dimension_numbers = #tpu.dot_dimension_numbers<[1], [0], [0], [1], [0, 0, 1, 1], [], []>} : vector<256x64xbf16>, vector<64x64xbf16>, vector<256x64xf32> -> vector<256x64xf32>
    %46 = arith.addf %40, %45 : vector<256x64xf32>
    %c4_49 = arith.constant 4 : index
    %c15_50 = arith.constant 15 : index
    %c0_51 = arith.constant 0 : index
    %47 = vector.load %arg16[%c4_49, %c15_50, %c0_51] : memref<22x48x64xbf16, #tpu.memory_space<vmem>>, vector<16x16x64xbf16>
    %48 = vector.shape_cast %47 : vector<16x16x64xbf16> to vector<256x64xbf16>
    %c6 = arith.constant 6 : index
    %c0_52 = arith.constant 0 : index
    %c0_53 = arith.constant 0 : index
    %49 = vector.load %arg3[%c6, %c0_52, %c0_53] : memref<9x64x64xbf16, #tpu.memory_space<vmem>>, vector<1x64x64xbf16>
    %50 = vector.shape_cast %49 : vector<1x64x64xbf16> to vector<64x64xbf16>
    %cst_54 = arith.constant dense<0.000000e+00> : vector<256x64xf32>
    %51 = tpu.matmul %48, %50, %cst_54 {dimension_numbers = #tpu.dot_dimension_numbers<[1], [0], [0], [1], [0, 0, 1, 1], [], []>} : vector<256x64xbf16>, vector<64x64xbf16>, vector<256x64xf32> -> vector<256x64xf32>
    %52 = arith.addf %46, %51 : vector<256x64xf32>
    %c4_55 = arith.constant 4 : index
    %c16_56 = arith.constant 16 : index
    %c0_57 = arith.constant 0 : index
    %53 = vector.load %arg16[%c4_55, %c16_56, %c0_57] : memref<22x48x64xbf16, #tpu.memory_space<vmem>>, vector<16x16x64xbf16>
    %54 = vector.shape_cast %53 : vector<16x16x64xbf16> to vector<256x64xbf16>
    %c7 = arith.constant 7 : index
    %c0_58 = arith.constant 0 : index
    %c0_59 = arith.constant 0 : index
    %55 = vector.load %arg3[%c7, %c0_58, %c0_59] : memref<9x64x64xbf16, #tpu.memory_space<vmem>>, vector<1x64x64xbf16>
    %56 = vector.shape_cast %55 : vector<1x64x64xbf16> to vector<64x64xbf16>
    %cst_60 = arith.constant dense<0.000000e+00> : vector<256x64xf32>
    %57 = tpu.matmul %54, %56, %cst_60 {dimension_numbers = #tpu.dot_dimension_numbers<[1], [0], [0], [1], [0, 0, 1, 1], [], []>} : vector<256x64xbf16>, vector<64x64xbf16>, vector<256x64xf32> -> vector<256x64xf32>
    %58 = arith.addf %52, %57 : vector<256x64xf32>
    %c4_61 = arith.constant 4 : index
    %c17_62 = arith.constant 17 : index
    %c0_63 = arith.constant 0 : index
    %59 = vector.load %arg16[%c4_61, %c17_62, %c0_63] : memref<22x48x64xbf16, #tpu.memory_space<vmem>>, vector<16x16x64xbf16>
    %60 = vector.shape_cast %59 : vector<16x16x64xbf16> to vector<256x64xbf16>
    %c8 = arith.constant 8 : index
    %c0_64 = arith.constant 0 : index
    %c0_65 = arith.constant 0 : index
    %61 = vector.load %arg3[%c8, %c0_64, %c0_65] : memref<9x64x64xbf16, #tpu.memory_space<vmem>>, vector<1x64x64xbf16>
    %62 = vector.shape_cast %61 : vector<1x64x64xbf16> to vector<64x64xbf16>
    %cst_66 = arith.constant dense<0.000000e+00> : vector<256x64xf32>
    %63 = tpu.matmul %60, %62, %cst_66 {dimension_numbers = #tpu.dot_dimension_numbers<[1], [0], [0], [1], [0, 0, 1, 1], [], []>} : vector<256x64xbf16>, vector<64x64xbf16>, vector<256x64xf32> -> vector<256x64xf32>
    %64 = arith.addf %58, %63 : vector<256x64xf32>
    %65 = vector.broadcast %11 : vector<1x64xf32> to vector<256x64xf32>
    %66 = arith.addf %64, %65 : vector<256x64xf32>
    %c0_67 = arith.constant 0 : index
    %c13 = arith.constant 13 : index
    %c0_68 = arith.constant 0 : index
    %67 = vector.load %arg16[%c0_67, %c13, %c0_68] : memref<22x48x64xbf16, #tpu.memory_space<vmem>>, vector<16x16x64xbf16>
    %68 = vector.shape_cast %67 : vector<16x16x64xbf16> to vector<256x64xbf16>
    %c0_69 = arith.constant 0 : index
    %c0_70 = arith.constant 0 : index
    %c0_71 = arith.constant 0 : index
    %69 = vector.load %arg4[%c0_69, %c0_70, %c0_71] : memref<9x64x64xbf16, #tpu.memory_space<vmem>>, vector<1x64x64xbf16>
    %70 = vector.shape_cast %69 : vector<1x64x64xbf16> to vector<64x64xbf16>
    %cst_72 = arith.constant dense<0.000000e+00> : vector<256x64xf32>
    %71 = tpu.matmul %68, %70, %cst_72 {dimension_numbers = #tpu.dot_dimension_numbers<[1], [0], [0], [1], [0, 0, 1, 1], [], []>} : vector<256x64xbf16>, vector<64x64xbf16>, vector<256x64xf32> -> vector<256x64xf32>
    %c0_73 = arith.constant 0 : index
    %c16_74 = arith.constant 16 : index
    %c0_75 = arith.constant 0 : index
    %72 = vector.load %arg16[%c0_73, %c16_74, %c0_75] : memref<22x48x64xbf16, #tpu.memory_space<vmem>>, vector<16x16x64xbf16>
    %73 = vector.shape_cast %72 : vector<16x16x64xbf16> to vector<256x64xbf16>
    %c1_76 = arith.constant 1 : index
    %c0_77 = arith.constant 0 : index
    %c0_78 = arith.constant 0 : index
    %74 = vector.load %arg4[%c1_76, %c0_77, %c0_78] : memref<9x64x64xbf16, #tpu.memory_space<vmem>>, vector<1x64x64xbf16>
    %75 = vector.shape_cast %74 : vector<1x64x64xbf16> to vector<64x64xbf16>
    %cst_79 = arith.constant dense<0.000000e+00> : vector<256x64xf32>
    %76 = tpu.matmul %73, %75, %cst_79 {dimension_numbers = #tpu.dot_dimension_numbers<[1], [0], [0], [1], [0, 0, 1, 1], [], []>} : vector<256x64xbf16>, vector<64x64xbf16>, vector<256x64xf32> -> vector<256x64xf32>
    %77 = arith.addf %71, %76 : vector<256x64xf32>
    %c0_80 = arith.constant 0 : index
    %c19 = arith.constant 19 : index
    %c0_81 = arith.constant 0 : index
    %78 = vector.load %arg16[%c0_80, %c19, %c0_81] : memref<22x48x64xbf16, #tpu.memory_space<vmem>>, vector<16x16x64xbf16>
    %79 = vector.shape_cast %78 : vector<16x16x64xbf16> to vector<256x64xbf16>
    %c2_82 = arith.constant 2 : index
    %c0_83 = arith.constant 0 : index
    %c0_84 = arith.constant 0 : index
    %80 = vector.load %arg4[%c2_82, %c0_83, %c0_84] : memref<9x64x64xbf16, #tpu.memory_space<vmem>>, vector<1x64x64xbf16>
    %81 = vector.shape_cast %80 : vector<1x64x64xbf16> to vector<64x64xbf16>
    %cst_85 = arith.constant dense<0.000000e+00> : vector<256x64xf32>
    %82 = tpu.matmul %79, %81, %cst_85 {dimension_numbers = #tpu.dot_dimension_numbers<[1], [0], [0], [1], [0, 0, 1, 1], [], []>} : vector<256x64xbf16>, vector<64x64xbf16>, vector<256x64xf32> -> vector<256x64xf32>
    %83 = arith.addf %77, %82 : vector<256x64xf32>
    %c3_86 = arith.constant 3 : index
    %c13_87 = arith.constant 13 : index
    %c0_88 = arith.constant 0 : index
    %84 = vector.load %arg16[%c3_86, %c13_87, %c0_88] : memref<22x48x64xbf16, #tpu.memory_space<vmem>>, vector<16x16x64xbf16>
    %85 = vector.shape_cast %84 : vector<16x16x64xbf16> to vector<256x64xbf16>
    %c3_89 = arith.constant 3 : index
    %c0_90 = arith.constant 0 : index
    %c0_91 = arith.constant 0 : index
    %86 = vector.load %arg4[%c3_89, %c0_90, %c0_91] : memref<9x64x64xbf16, #tpu.memory_space<vmem>>, vector<1x64x64xbf16>
    %87 = vector.shape_cast %86 : vector<1x64x64xbf16> to vector<64x64xbf16>
    %cst_92 = arith.constant dense<0.000000e+00> : vector<256x64xf32>
    %88 = tpu.matmul %85, %87, %cst_92 {dimension_numbers = #tpu.dot_dimension_numbers<[1], [0], [0], [1], [0, 0, 1, 1], [], []>} : vector<256x64xbf16>, vector<64x64xbf16>, vector<256x64xf32> -> vector<256x64xf32>
    %89 = arith.addf %83, %88 : vector<256x64xf32>
    %c3_93 = arith.constant 3 : index
    %c16_94 = arith.constant 16 : index
    %c0_95 = arith.constant 0 : index
    %90 = vector.load %arg16[%c3_93, %c16_94, %c0_95] : memref<22x48x64xbf16, #tpu.memory_space<vmem>>, vector<16x16x64xbf16>
    %91 = vector.shape_cast %90 : vector<16x16x64xbf16> to vector<256x64xbf16>
    %c4_96 = arith.constant 4 : index
    %c0_97 = arith.constant 0 : index
    %c0_98 = arith.constant 0 : index
    %92 = vector.load %arg4[%c4_96, %c0_97, %c0_98] : memref<9x64x64xbf16, #tpu.memory_space<vmem>>, vector<1x64x64xbf16>
    %93 = vector.shape_cast %92 : vector<1x64x64xbf16> to vector<64x64xbf16>
    %cst_99 = arith.constant dense<0.000000e+00> : vector<256x64xf32>
    %94 = tpu.matmul %91, %93, %cst_99 {dimension_numbers = #tpu.dot_dimension_numbers<[1], [0], [0], [1], [0, 0, 1, 1], [], []>} : vector<256x64xbf16>, vector<64x64xbf16>, vector<256x64xf32> -> vector<256x64xf32>
    %95 = arith.addf %89, %94 : vector<256x64xf32>
    %c3_100 = arith.constant 3 : index
    %c19_101 = arith.constant 19 : index
    %c0_102 = arith.constant 0 : index
    %96 = vector.load %arg16[%c3_100, %c19_101, %c0_102] : memref<22x48x64xbf16, #tpu.memory_space<vmem>>, vector<16x16x64xbf16>
    %97 = vector.shape_cast %96 : vector<16x16x64xbf16> to vector<256x64xbf16>
    %c5_103 = arith.constant 5 : index
    %c0_104 = arith.constant 0 : index
    %c0_105 = arith.constant 0 : index
    %98 = vector.load %arg4[%c5_103, %c0_104, %c0_105] : memref<9x64x64xbf16, #tpu.memory_space<vmem>>, vector<1x64x64xbf16>
    %99 = vector.shape_cast %98 : vector<1x64x64xbf16> to vector<64x64xbf16>
    %cst_106 = arith.constant dense<0.000000e+00> : vector<256x64xf32>
    %100 = tpu.matmul %97, %99, %cst_106 {dimension_numbers = #tpu.dot_dimension_numbers<[1], [0], [0], [1], [0, 0, 1, 1], [], []>} : vector<256x64xbf16>, vector<64x64xbf16>, vector<256x64xf32> -> vector<256x64xf32>
    %101 = arith.addf %95, %100 : vector<256x64xf32>
    %c6_107 = arith.constant 6 : index
    %c13_108 = arith.constant 13 : index
    %c0_109 = arith.constant 0 : index
    %102 = vector.load %arg16[%c6_107, %c13_108, %c0_109] : memref<22x48x64xbf16, #tpu.memory_space<vmem>>, vector<16x16x64xbf16>
    %103 = vector.shape_cast %102 : vector<16x16x64xbf16> to vector<256x64xbf16>
    %c6_110 = arith.constant 6 : index
    %c0_111 = arith.constant 0 : index
    %c0_112 = arith.constant 0 : index
    %104 = vector.load %arg4[%c6_110, %c0_111, %c0_112] : memref<9x64x64xbf16, #tpu.memory_space<vmem>>, vector<1x64x64xbf16>
    %105 = vector.shape_cast %104 : vector<1x64x64xbf16> to vector<64x64xbf16>
    %cst_113 = arith.constant dense<0.000000e+00> : vector<256x64xf32>
    %106 = tpu.matmul %103, %105, %cst_113 {dimension_numbers = #tpu.dot_dimension_numbers<[1], [0], [0], [1], [0, 0, 1, 1], [], []>} : vector<256x64xbf16>, vector<64x64xbf16>, vector<256x64xf32> -> vector<256x64xf32>
    %107 = arith.addf %101, %106 : vector<256x64xf32>
    %c6_114 = arith.constant 6 : index
    %c16_115 = arith.constant 16 : index
    %c0_116 = arith.constant 0 : index
    %108 = vector.load %arg16[%c6_114, %c16_115, %c0_116] : memref<22x48x64xbf16, #tpu.memory_space<vmem>>, vector<16x16x64xbf16>
    %109 = vector.shape_cast %108 : vector<16x16x64xbf16> to vector<256x64xbf16>
    %c7_117 = arith.constant 7 : index
    %c0_118 = arith.constant 0 : index
    %c0_119 = arith.constant 0 : index
    %110 = vector.load %arg4[%c7_117, %c0_118, %c0_119] : memref<9x64x64xbf16, #tpu.memory_space<vmem>>, vector<1x64x64xbf16>
    %111 = vector.shape_cast %110 : vector<1x64x64xbf16> to vector<64x64xbf16>
    %cst_120 = arith.constant dense<0.000000e+00> : vector<256x64xf32>
    %112 = tpu.matmul %109, %111, %cst_120 {dimension_numbers = #tpu.dot_dimension_numbers<[1], [0], [0], [1], [0, 0, 1, 1], [], []>} : vector<256x64xbf16>, vector<64x64xbf16>, vector<256x64xf32> -> vector<256x64xf32>
    %113 = arith.addf %107, %112 : vector<256x64xf32>
    %c6_121 = arith.constant 6 : index
    %c19_122 = arith.constant 19 : index
    %c0_123 = arith.constant 0 : index
    %114 = vector.load %arg16[%c6_121, %c19_122, %c0_123] : memref<22x48x64xbf16, #tpu.memory_space<vmem>>, vector<16x16x64xbf16>
    %115 = vector.shape_cast %114 : vector<16x16x64xbf16> to vector<256x64xbf16>
    %c8_124 = arith.constant 8 : index
    %c0_125 = arith.constant 0 : index
    %c0_126 = arith.constant 0 : index
    %116 = vector.load %arg4[%c8_124, %c0_125, %c0_126] : memref<9x64x64xbf16, #tpu.memory_space<vmem>>, vector<1x64x64xbf16>
    %117 = vector.shape_cast %116 : vector<1x64x64xbf16> to vector<64x64xbf16>
    %cst_127 = arith.constant dense<0.000000e+00> : vector<256x64xf32>
    %118 = tpu.matmul %115, %117, %cst_127 {dimension_numbers = #tpu.dot_dimension_numbers<[1], [0], [0], [1], [0, 0, 1, 1], [], []>} : vector<256x64xbf16>, vector<64x64xbf16>, vector<256x64xf32> -> vector<256x64xf32>
    %119 = arith.addf %113, %118 : vector<256x64xf32>
    %120 = vector.broadcast %11 : vector<1x64xf32> to vector<256x64xf32>
    %121 = arith.addf %119, %120 : vector<256x64xf32>
    %c0_128 = arith.constant 0 : index
    %c0_129 = arith.constant 0 : index
    %122 = vector.load %arg6[%c0_128, %c0_129] : memref<1x64xf32, #tpu.memory_space<vmem>>, vector<1x64xf32>
    %123 = vector.broadcast %122 : vector<1x64xf32> to vector<256x64xf32>
    %124 = arith.mulf %4, %123 : vector<256x64xf32>
    %cst_130 = arith.constant dense<0.000000e+00> : vector<256xf32>
    %125 = vector.multi_reduction <add>, %124, %cst_130 [1] : vector<256x64xf32> to vector<256xf32>
    %126 = vector.shape_cast %125 : vector<256xf32> to vector<256x1xf32>
    %c0_131 = arith.constant 0 : index
    %c0_132 = arith.constant 0 : index
    %127 = vector.load %arg7[%c0_131, %c0_132] : memref<1x1xf32, #tpu.memory_space<vmem>>, vector<1x1xf32>
    %128 = vector.broadcast %127 : vector<1x1xf32> to vector<256x1xf32>
    %129 = arith.addf %126, %128 : vector<256x1xf32>
    %130 = arith.negf %129 : vector<256x1xf32>
    %131 = math.exp %130 : vector<256x1xf32>
    %cst_133 = arith.constant 1.000000e+00 : f32
    %132 = vector.broadcast %cst_133 : f32 to vector<256x1xf32>
    %133 = arith.addf %132, %131 : vector<256x1xf32>
    %134 = arith.divf %132, %133 : vector<256x1xf32>
    %135 = vector.broadcast %134 : vector<256x1xf32> to vector<256x64xf32>
    %136 = arith.mulf %135, %66 : vector<256x64xf32>
    %cst_134 = arith.constant 1.000000e+00 : f32
    %137 = vector.broadcast %cst_134 : f32 to vector<256x1xf32>
    %138 = arith.subf %137, %134 : vector<256x1xf32>
    %139 = vector.broadcast %138 : vector<256x1xf32> to vector<256x64xf32>
    %140 = arith.mulf %139, %121 : vector<256x64xf32>
    %141 = arith.addf %136, %140 : vector<256x64xf32>
    %142 = arith.addf %141, %7 : vector<256x64xf32>
    %c0_135 = arith.constant 0 : index
    %c0_136 = arith.constant 0 : index
    %143 = vector.load %arg12[%c0_135, %c0_136] : memref<64x64xf32, #tpu.memory_space<vmem>>, vector<64x64xf32>
    %c0_i32 = arith.constant 0 : i32
    %144 = arith.truncf %142 : vector<256x64xf32> to vector<256x64xbf16>
    %145 = vector.shape_cast %144 : vector<256x64xbf16> to vector<16x16x64xbf16>
    %c3_137 = arith.constant 3 : index
    %c16_138 = arith.constant 16 : index
    %c0_139 = arith.constant 0 : index
    %146 = vector.load %arg16[%c3_137, %c16_138, %c0_139] : memref<22x48x64xbf16, #tpu.memory_space<vmem>>, vector<16x16x64xbf16>
    tpu.vector_store %arg16[%c3_137, %c16_138, %c0_139], %145 {strides = array<i32>} : memref<22x48x64xbf16, #tpu.memory_space<vmem>>, vector<16x16x64xbf16>,
    %c2_140 = arith.constant 2 : index
    %c15_141 = arith.constant 15 : index
    %c0_142 = arith.constant 0 : index
    %147 = vector.load %arg16[%c2_140, %c15_141, %c0_142] : memref<22x48x64xbf16, #tpu.memory_space<vmem>>, vector<16x16x64xbf16>
    %148 = vector.shape_cast %147 : vector<16x16x64xbf16> to vector<256x64xbf16>
    %c9_i32 = arith.constant 9 : i32
    %149 = arith.muli %c0_i32, %c9_i32 : i32
    %c0_i32_143 = arith.constant 0 : i32
    %150 = arith.addi %149, %c0_i32_143 : i32
    %151 = arith.index_cast %150 : i32 to index
    %c0_144 = arith.constant 0 : index
    %c0_145 = arith.constant 0 : index
    %152 = vector.load %arg8[%151, %c0_144, %c0_145] : memref<9x64x64xbf16, #tpu.memory_space<vmem>>, vector<1x64x64xbf16>
    %153 = vector.shape_cast %152 : vector<1x64x64xbf16> to vector<64x64xbf16>
    %cst_146 = arith.constant dense<0.000000e+00> : vector<256x64xf32>
    %154 = tpu.matmul %148, %153, %cst_146 {dimension_numbers = #tpu.dot_dimension_numbers<[1], [0], [0], [1], [0, 0, 1, 1], [], []>} : vector<256x64xbf16>, vector<64x64xbf16>, vector<256x64xf32> -> vector<256x64xf32>
    %c2_147 = arith.constant 2 : index
    %c16_148 = arith.constant 16 : index
    %c0_149 = arith.constant 0 : index
    %155 = vector.load %arg16[%c2_147, %c16_148, %c0_149] : memref<22x48x64xbf16, #tpu.memory_space<vmem>>, vector<16x16x64xbf16>
    %156 = vector.shape_cast %155 : vector<16x16x64xbf16> to vector<256x64xbf16>
    %c9_i32_150 = arith.constant 9 : i32
    %157 = arith.muli %c0_i32, %c9_i32_150 : i32
    %c1_i32 = arith.constant 1 : i32
    %158 = arith.addi %157, %c1_i32 : i32
    %159 = arith.index_cast %158 : i32 to index
    %c0_151 = arith.constant 0 : index
    %c0_152 = arith.constant 0 : index
    %160 = vector.load %arg8[%159, %c0_151, %c0_152] : memref<9x64x64xbf16, #tpu.memory_space<vmem>>, vector<1x64x64xbf16>
    %161 = vector.shape_cast %160 : vector<1x64x64xbf16> to vector<64x64xbf16>
    %cst_153 = arith.constant dense<0.000000e+00> : vector<256x64xf32>
    %162 = tpu.matmul %156, %161, %cst_153 {dimension_numbers = #tpu.dot_dimension_numbers<[1], [0], [0], [1], [0, 0, 1, 1], [], []>} : vector<256x64xbf16>, vector<64x64xbf16>, vector<256x64xf32> -> vector<256x64xf32>
    %163 = arith.addf %154, %162 : vector<256x64xf32>
    %c2_154 = arith.constant 2 : index
    %c17_155 = arith.constant 17 : index
    %c0_156 = arith.constant 0 : index
    %164 = vector.load %arg16[%c2_154, %c17_155, %c0_156] : memref<22x48x64xbf16, #tpu.memory_space<vmem>>, vector<16x16x64xbf16>
    %165 = vector.shape_cast %164 : vector<16x16x64xbf16> to vector<256x64xbf16>
    %c9_i32_157 = arith.constant 9 : i32
    %166 = arith.muli %c0_i32, %c9_i32_157 : i32
    %c2_i32 = arith.constant 2 : i32
    %167 = arith.addi %166, %c2_i32 : i32
    %168 = arith.index_cast %167 : i32 to index
    %c0_158 = arith.constant 0 : index
    %c0_159 = arith.constant 0 : index
    %169 = vector.load %arg8[%168, %c0_158, %c0_159] : memref<9x64x64xbf16, #tpu.memory_space<vmem>>, vector<1x64x64xbf16>
    %170 = vector.shape_cast %169 : vector<1x64x64xbf16> to vector<64x64xbf16>
    %cst_160 = arith.constant dense<0.000000e+00> : vector<256x64xf32>
    %171 = tpu.matmul %165, %170, %cst_160 {dimension_numbers = #tpu.dot_dimension_numbers<[1], [0], [0], [1], [0, 0, 1, 1], [], []>} : vector<256x64xbf16>, vector<64x64xbf16>, vector<256x64xf32> -> vector<256x64xf32>
    %172 = arith.addf %163, %171 : vector<256x64xf32>
    %c3_161 = arith.constant 3 : index
    %c15_162 = arith.constant 15 : index
    %c0_163 = arith.constant 0 : index
    %173 = vector.load %arg16[%c3_161, %c15_162, %c0_163] : memref<22x48x64xbf16, #tpu.memory_space<vmem>>, vector<16x16x64xbf16>
    %174 = vector.shape_cast %173 : vector<16x16x64xbf16> to vector<256x64xbf16>
    %c9_i32_164 = arith.constant 9 : i32
    %175 = arith.muli %c0_i32, %c9_i32_164 : i32
    %c3_i32 = arith.constant 3 : i32
    %176 = arith.addi %175, %c3_i32 : i32
    %177 = arith.index_cast %176 : i32 to index
    %c0_165 = arith.constant 0 : index
    %c0_166 = arith.constant 0 : index
    %178 = vector.load %arg8[%177, %c0_165, %c0_166] : memref<9x64x64xbf16, #tpu.memory_space<vmem>>, vector<1x64x64xbf16>
    %179 = vector.shape_cast %178 : vector<1x64x64xbf16> to vector<64x64xbf16>
    %cst_167 = arith.constant dense<0.000000e+00> : vector<256x64xf32>
    %180 = tpu.matmul %174, %179, %cst_167 {dimension_numbers = #tpu.dot_dimension_numbers<[1], [0], [0], [1], [0, 0, 1, 1], [], []>} : vector<256x64xbf16>, vector<64x64xbf16>, vector<256x64xf32> -> vector<256x64xf32>
    %181 = arith.addf %172, %180 : vector<256x64xf32>
    %c3_168 = arith.constant 3 : index
    %c16_169 = arith.constant 16 : index
    %c0_170 = arith.constant 0 : index
    %182 = vector.load %arg16[%c3_168, %c16_169, %c0_170] : memref<22x48x64xbf16, #tpu.memory_space<vmem>>, vector<16x16x64xbf16>
    %183 = vector.shape_cast %182 : vector<16x16x64xbf16> to vector<256x64xbf16>
    %c9_i32_171 = arith.constant 9 : i32
    %184 = arith.muli %c0_i32, %c9_i32_171 : i32
    %c4_i32 = arith.constant 4 : i32
    %185 = arith.addi %184, %c4_i32 : i32
    %186 = arith.index_cast %185 : i32 to index
    %c0_172 = arith.constant 0 : index
    %c0_173 = arith.constant 0 : index
    %187 = vector.load %arg8[%186, %c0_172, %c0_173] : memref<9x64x64xbf16, #tpu.memory_space<vmem>>, vector<1x64x64xbf16>
    %188 = vector.shape_cast %187 : vector<1x64x64xbf16> to vector<64x64xbf16>
    %cst_174 = arith.constant dense<0.000000e+00> : vector<256x64xf32>
    %189 = tpu.matmul %183, %188, %cst_174 {dimension_numbers = #tpu.dot_dimension_numbers<[1], [0], [0], [1], [0, 0, 1, 1], [], []>} : vector<256x64xbf16>, vector<64x64xbf16>, vector<256x64xf32> -> vector<256x64xf32>
    %190 = arith.addf %181, %189 : vector<256x64xf32>
    %c3_175 = arith.constant 3 : index
    %c17_176 = arith.constant 17 : index
    %c0_177 = arith.constant 0 : index
    %191 = vector.load %arg16[%c3_175, %c17_176, %c0_177] : memref<22x48x64xbf16, #tpu.memory_space<vmem>>, vector<16x16x64xbf16>
    %192 = vector.shape_cast %191 : vector<16x16x64xbf16> to vector<256x64xbf16>
    %c9_i32_178 = arith.constant 9 : i32
    %193 = arith.muli %c0_i32, %c9_i32_178 : i32
    %c5_i32 = arith.constant 5 : i32
    %194 = arith.addi %193, %c5_i32 : i32
    %195 = arith.index_cast %194 : i32 to index
    %c0_179 = arith.constant 0 : index
    %c0_180 = arith.constant 0 : index
    %196 = vector.load %arg8[%195, %c0_179, %c0_180] : memref<9x64x64xbf16, #tpu.memory_space<vmem>>, vector<1x64x64xbf16>
    %197 = vector.shape_cast %196 : vector<1x64x64xbf16> to vector<64x64xbf16>
    %cst_181 = arith.constant dense<0.000000e+00> : vector<256x64xf32>
    %198 = tpu.matmul %192, %197, %cst_181 {dimension_numbers = #tpu.dot_dimension_numbers<[1], [0], [0], [1], [0, 0, 1, 1], [], []>} : vector<256x64xbf16>, vector<64x64xbf16>, vector<256x64xf32> -> vector<256x64xf32>
    %199 = arith.addf %190, %198 : vector<256x64xf32>
    %c4_182 = arith.constant 4 : index
    %c15_183 = arith.constant 15 : index
    %c0_184 = arith.constant 0 : index
    %200 = vector.load %arg16[%c4_182, %c15_183, %c0_184] : memref<22x48x64xbf16, #tpu.memory_space<vmem>>, vector<16x16x64xbf16>
    %201 = vector.shape_cast %200 : vector<16x16x64xbf16> to vector<256x64xbf16>
    %c9_i32_185 = arith.constant 9 : i32
    %202 = arith.muli %c0_i32, %c9_i32_185 : i32
    %c6_i32 = arith.constant 6 : i32
    %203 = arith.addi %202, %c6_i32 : i32
    %204 = arith.index_cast %203 : i32 to index
    %c0_186 = arith.constant 0 : index
    %c0_187 = arith.constant 0 : index
    %205 = vector.load %arg8[%204, %c0_186, %c0_187] : memref<9x64x64xbf16, #tpu.memory_space<vmem>>, vector<1x64x64xbf16>
    %206 = vector.shape_cast %205 : vector<1x64x64xbf16> to vector<64x64xbf16>
    %cst_188 = arith.constant dense<0.000000e+00> : vector<256x64xf32>
    %207 = tpu.matmul %201, %206, %cst_188 {dimension_numbers = #tpu.dot_dimension_numbers<[1], [0], [0], [1], [0, 0, 1, 1], [], []>} : vector<256x64xbf16>, vector<64x64xbf16>, vector<256x64xf32> -> vector<256x64xf32>
    %208 = arith.addf %199, %207 : vector<256x64xf32>
    %c4_189 = arith.constant 4 : index
    %c16_190 = arith.constant 16 : index
    %c0_191 = arith.constant 0 : index
    %209 = vector.load %arg16[%c4_189, %c16_190, %c0_191] : memref<22x48x64xbf16, #tpu.memory_space<vmem>>, vector<16x16x64xbf16>
    %210 = vector.shape_cast %209 : vector<16x16x64xbf16> to vector<256x64xbf16>
    %c9_i32_192 = arith.constant 9 : i32
    %211 = arith.muli %c0_i32, %c9_i32_192 : i32
    %c7_i32 = arith.constant 7 : i32
    %212 = arith.addi %211, %c7_i32 : i32
    %213 = arith.index_cast %212 : i32 to index
    %c0_193 = arith.constant 0 : index
    %c0_194 = arith.constant 0 : index
    %214 = vector.load %arg8[%213, %c0_193, %c0_194] : memref<9x64x64xbf16, #tpu.memory_space<vmem>>, vector<1x64x64xbf16>
    %215 = vector.shape_cast %214 : vector<1x64x64xbf16> to vector<64x64xbf16>
    %cst_195 = arith.constant dense<0.000000e+00> : vector<256x64xf32>
    %216 = tpu.matmul %210, %215, %cst_195 {dimension_numbers = #tpu.dot_dimension_numbers<[1], [0], [0], [1], [0, 0, 1, 1], [], []>} : vector<256x64xbf16>, vector<64x64xbf16>, vector<256x64xf32> -> vector<256x64xf32>
    %217 = arith.addf %208, %216 : vector<256x64xf32>
    %c4_196 = arith.constant 4 : index
    %c17_197 = arith.constant 17 : index
    %c0_198 = arith.constant 0 : index
    %218 = vector.load %arg16[%c4_196, %c17_197, %c0_198] : memref<22x48x64xbf16, #tpu.memory_space<vmem>>, vector<16x16x64xbf16>
    %219 = vector.shape_cast %218 : vector<16x16x64xbf16> to vector<256x64xbf16>
    %c9_i32_199 = arith.constant 9 : i32
    %220 = arith.muli %c0_i32, %c9_i32_199 : i32
    %c8_i32 = arith.constant 8 : i32
    %221 = arith.addi %220, %c8_i32 : i32
    %222 = arith.index_cast %221 : i32 to index
    %c0_200 = arith.constant 0 : index
    %c0_201 = arith.constant 0 : index
    %223 = vector.load %arg8[%222, %c0_200, %c0_201] : memref<9x64x64xbf16, #tpu.memory_space<vmem>>, vector<1x64x64xbf16>
    %224 = vector.shape_cast %223 : vector<1x64x64xbf16> to vector<64x64xbf16>
    %cst_202 = arith.constant dense<0.000000e+00> : vector<256x64xf32>
    %225 = tpu.matmul %219, %224, %cst_202 {dimension_numbers = #tpu.dot_dimension_numbers<[1], [0], [0], [1], [0, 0, 1, 1], [], []>} : vector<256x64xbf16>, vector<64x64xbf16>, vector<256x64xf32> -> vector<256x64xf32>
    %226 = arith.addf %217, %225 : vector<256x64xf32>
    %227 = arith.index_cast %c0_i32 : i32 to index
    %c0_203 = arith.constant 0 : index
    %c0_204 = arith.constant 0 : index
    %228 = vector.load %arg9[%227, %c0_203, %c0_204] : memref<1x1x64xf32, #tpu.memory_space<vmem>>, vector<1x1x64xf32>
    %229 = vector.shape_cast %228 : vector<1x1x64xf32> to vector<1x64xf32>
    %230 = vector.broadcast %229 : vector<1x64xf32> to vector<256x64xf32>
    %231 = arith.addf %226, %230 : vector<256x64xf32>
    %cst_205 = arith.constant dense<0.000000e+00> : vector<64xf32>
    %232 = vector.multi_reduction <add>, %231, %cst_205 [0] : vector<256x64xf32> to vector<64xf32>
    %233 = vector.shape_cast %232 : vector<64xf32> to vector<1x64xf32>
    %234 = arith.mulf %231, %231 : vector<256x64xf32>
    %cst_206 = arith.constant dense<0.000000e+00> : vector<64xf32>
    %235 = vector.multi_reduction <add>, %234, %cst_206 [0] : vector<256x64xf32> to vector<64xf32>
    %236 = vector.shape_cast %235 : vector<64xf32> to vector<1x64xf32>
    %237 = tpu.concatenate %233, %236 in 0 : vector<1x64xf32>, vector<1x64xf32> -> vector<2x64xf32>
    %cst_207 = arith.constant dense<0.000000e+00> : vector<2x64xf32>
    %238 = tpu.matmul %237, %143, %cst_207 {dimension_numbers = #tpu.dot_dimension_numbers<[1], [0], [0], [1], [0, 0, 1, 1], [], []>} : vector<2x64xf32>, vector<64x64xf32>, vector<2x64xf32> -> vector<2x64xf32>
    %cst_208 = arith.constant 0.001953125 : f32
    %239 = vector.broadcast %cst_208 : f32 to vector<2x64xf32>
    %240 = arith.mulf %238, %239 : vector<2x64xf32>
    %241 = vector.extract_strided_slice %240 {offsets = [0, 0], sizes = [1, 64], strides = [1, 1]} : vector<2x64xf32> to vector<1x64xf32>
    %242 = vector.extract_strided_slice %240 {offsets = [1, 0], sizes = [1, 64], strides = [1, 1]} : vector<2x64xf32> to vector<1x64xf32>
    %243 = arith.mulf %241, %241 : vector<1x64xf32>
    %244 = arith.subf %242, %243 : vector<1x64xf32>
    %cst_209 = arith.constant 9.99999974E-6 : f32
    %245 = vector.broadcast %cst_209 : f32 to vector<1x64xf32>
    %246 = arith.addf %244, %245 : vector<1x64xf32>
    %247 = math.rsqrt %246 : vector<1x64xf32>
    %248 = arith.index_cast %c0_i32 : i32 to index
    %c0_210 = arith.constant 0 : index
    %c0_211 = arith.constant 0 : index
    %249 = vector.load %arg10[%248, %c0_210, %c0_211] : memref<1x1x64xf32, #tpu.memory_space<vmem>>, vector<1x1x64xf32>
    %250 = vector.shape_cast %249 : vector<1x1x64xf32> to vector<1x64xf32>
    %251 = arith.mulf %247, %250 : vector<1x64xf32>
    %252 = arith.index_cast %c0_i32 : i32 to index
    %c0_212 = arith.constant 0 : index
    %c0_213 = arith.constant 0 : index
    %253 = vector.load %arg11[%252, %c0_212, %c0_213] : memref<1x1x64xf32, #tpu.memory_space<vmem>>, vector<1x1x64xf32>
    %254 = vector.shape_cast %253 : vector<1x1x64xf32> to vector<1x64xf32>
    %255 = arith.mulf %241, %251 : vector<1x64xf32>
    %256 = arith.subf %254, %255 : vector<1x64xf32>
    %257 = vector.broadcast %251 : vector<1x64xf32> to vector<256x64xf32>
    %258 = arith.mulf %231, %257 : vector<256x64xf32>
    %259 = vector.broadcast %256 : vector<1x64xf32> to vector<256x64xf32>
    %260 = arith.addf %258, %259 : vector<256x64xf32>
    %cst_214 = arith.constant 0.000000e+00 : f32
    %261 = vector.broadcast %cst_214 : f32 to vector<256x64xf32>
    %262 = arith.maximumf %260, %261 : vector<256x64xf32>
    %c1_i32_215 = arith.constant 1 : i32
    %c0_216 = arith.constant 0 : index
    %c0_217 = arith.constant 0 : index
    %263 = vector.load %arg13[%c0_216, %c0_217] : memref<2x64xf32, #tpu.memory_space<vmem>>, vector<2x64xf32>
    %c0_218 = arith.constant 0 : index
    %c0_219 = arith.constant 0 : index
    %264 = vector.load %arg14[%c0_218, %c0_219] : memref<1x2xf32, #tpu.memory_space<vmem>>, vector<1x2xf32>
    %265 = vector.extract_strided_slice %263 {offsets = [0, 0], sizes = [1, 64], strides = [1, 1]} : vector<2x64xf32> to vector<1x64xf32>
    %266 = vector.broadcast %265 : vector<1x64xf32> to vector<256x64xf32>
    %267 = arith.mulf %262, %266 : vector<256x64xf32>
    %cst_220 = arith.constant dense<0.000000e+00> : vector<256xf32>
    %268 = vector.multi_reduction <add>, %267, %cst_220 [1] : vector<256x64xf32> to vector<256xf32>
    %269 = vector.shape_cast %268 : vector<256xf32> to vector<256x1xf32>
    %270 = vector.extract_strided_slice %264 {offsets = [0, 0], sizes = [1, 1], strides = [1, 1]} : vector<1x2xf32> to vector<1x1xf32>
    %271 = vector.broadcast %270 : vector<1x1xf32> to vector<256x1xf32>
    %272 = arith.addf %269, %271 : vector<256x1xf32>
    %273 = vector.extract_strided_slice %263 {offsets = [1, 0], sizes = [1, 64], strides = [1, 1]} : vector<2x64xf32> to vector<1x64xf32>
    %274 = vector.broadcast %273 : vector<1x64xf32> to vector<256x64xf32>
    %275 = arith.mulf %262, %274 : vector<256x64xf32>
    %cst_221 = arith.constant dense<0.000000e+00> : vector<256xf32>
    %276 = vector.multi_reduction <add>, %275, %cst_221 [1] : vector<256x64xf32> to vector<256xf32>
    %277 = vector.shape_cast %276 : vector<256xf32> to vector<256x1xf32>
    %278 = vector.extract_strided_slice %264 {offsets = [0, 1], sizes = [1, 1], strides = [1, 1]} : vector<1x2xf32> to vector<1x1xf32>
    %279 = vector.broadcast %278 : vector<1x1xf32> to vector<256x1xf32>
    %280 = arith.addf %277, %279 : vector<256x1xf32>
    %cst_222 = arith.constant 3.000000e+00 : f32
    %281 = vector.broadcast %cst_222 : f32 to vector<256x1xf32>
    %282 = arith.addf %272, %281 : vector<256x1xf32>
    %cst_223 = arith.constant 0.000000e+00 : f32
    %cst_224 = arith.constant 6.000000e+00 : f32
    %283 = vector.broadcast %cst_223 : f32 to vector<256x1xf32>
    %284 = arith.maximumf %283, %282 : vector<256x1xf32>
    %285 = vector.broadcast %cst_224 : f32 to vector<256x1xf32>
    %286 = arith.minimumf %285, %284 : vector<256x1xf32>
    %cst_225 = arith.constant 0.166666672 : f32
    %287 = vector.broadcast %cst_225 : f32 to vector<256x1xf32>
    %288 = arith.mulf %286, %287 : vector<256x1xf32>
    %cst_226 = arith.constant 3.000000e+00 : f32
    %289 = vector.broadcast %cst_226 : f32 to vector<256x1xf32>
    %290 = arith.addf %280, %289 : vector<256x1xf32>
    %cst_227 = arith.constant 0.000000e+00 : f32
    %cst_228 = arith.constant 6.000000e+00 : f32
    %291 = vector.broadcast %cst_227 : f32 to vector<256x1xf32>
    %292 = arith.maximumf %291, %290 : vector<256x1xf32>
    %293 = vector.broadcast %cst_228 : f32 to vector<256x1xf32>
    %294 = arith.minimumf %293, %292 : vector<256x1xf32>
    %cst_229 = arith.constant 0.166666672 : f32
    %295 = vector.broadcast %cst_229 : f32 to vector<256x1xf32>
    %296 = arith.mulf %294, %295 : vector<256x1xf32>
    %297 = vector.broadcast %288 : vector<256x1xf32> to vector<256x64xf32>
    %298 = arith.mulf %297, %262 : vector<256x64xf32>
    %299 = vector.broadcast %296 : vector<256x1xf32> to vector<256x64xf32>
    %300 = arith.mulf %299, %7 : vector<256x64xf32>
    %301 = arith.addf %298, %300 : vector<256x64xf32>
    %cst_230 = arith.constant 0.000000e+00 : f32
    %302 = vector.broadcast %cst_230 : f32 to vector<256x64xf32>
    %303 = arith.maximumf %301, %302 : vector<256x64xf32>
    %304 = vector.shape_cast %303 : vector<256x64xf32> to vector<16x16x64xf32>
    %c0_231 = arith.constant 0 : index
    %c0_232 = arith.constant 0 : index
    %c0_233 = arith.constant 0 : index
    %c0_234 = arith.constant 0 : index
    %305 = vector.load %arg15[%c0_231, %c0_232, %c0_233, %c0_234] : memref<1x16x16x64xf32, #tpu.memory_space<vmem>>, vector<1x16x16x64xf32>
    %306 = vector.shape_cast %305 : vector<1x16x16x64xf32> to vector<16x16x64xf32>
    %307 = vector.shape_cast %304 : vector<16x16x64xf32> to vector<1x16x16x64xf32>
    tpu.vector_store %arg15[%c0_231, %c0_232, %c0_233, %c0_234], %307 {strides = array<i32>} : memref<1x16x16x64xf32, #tpu.memory_space<vmem>>, vector<1x16x16x64xf32>,
    return
  }
  func.func @transform_0(%arg0: i32) -> (i32, i32, i32, i32) {
    %c0_i32 = arith.constant 0 : i32
    %c0_i32_0 = arith.constant 0 : i32
    %c0_i32_1 = arith.constant 0 : i32
    %c0_i32_2 = arith.constant 0 : i32
    return %arg0, %c0_i32, %c0_i32_0, %c0_i32_1 : i32, i32, i32, i32
  }
  func.func @transform_1(%arg0: i32) -> (i32, i32, i32, i32) {
    %c0_i32 = arith.constant 0 : i32
    %c0_i32_0 = arith.constant 0 : i32
    %c0_i32_1 = arith.constant 0 : i32
    %c0_i32_2 = arith.constant 0 : i32
    return %arg0, %c0_i32, %c0_i32_0, %c0_i32_1 : i32, i32, i32, i32
  }
  func.func @transform_2(%arg0: i32) -> (i32, i32, i32) {
    %c0_i32 = arith.constant 0 : i32
    %c0_i32_0 = arith.constant 0 : i32
    %c0_i32_1 = arith.constant 0 : i32
    %c0_i32_2 = arith.constant 0 : i32
    return %c0_i32, %c0_i32_0, %c0_i32_1 : i32, i32, i32
  }
  func.func @transform_3(%arg0: i32) -> (i32, i32, i32) {
    %c0_i32 = arith.constant 0 : i32
    %c0_i32_0 = arith.constant 0 : i32
    %c0_i32_1 = arith.constant 0 : i32
    %c0_i32_2 = arith.constant 0 : i32
    return %c0_i32, %c0_i32_0, %c0_i32_1 : i32, i32, i32
  }
  func.func @transform_4(%arg0: i32) -> (i32, i32) {
    %c0_i32 = arith.constant 0 : i32
    %c0_i32_0 = arith.constant 0 : i32
    %c0_i32_1 = arith.constant 0 : i32
    return %c0_i32, %c0_i32_0 : i32, i32
  }
  func.func @transform_5(%arg0: i32) -> (i32, i32) {
    %c0_i32 = arith.constant 0 : i32
    %c0_i32_0 = arith.constant 0 : i32
    %c0_i32_1 = arith.constant 0 : i32
    return %c0_i32, %c0_i32_0 : i32, i32
  }
  func.func @transform_6(%arg0: i32) -> (i32, i32) {
    %c0_i32 = arith.constant 0 : i32
    %c0_i32_0 = arith.constant 0 : i32
    %c0_i32_1 = arith.constant 0 : i32
    return %c0_i32, %c0_i32_0 : i32, i32
  }
  func.func @transform_7(%arg0: i32) -> (i32, i32, i32) {
    %c0_i32 = arith.constant 0 : i32
    %c0_i32_0 = arith.constant 0 : i32
    %c0_i32_1 = arith.constant 0 : i32
    %c0_i32_2 = arith.constant 0 : i32
    return %c0_i32, %c0_i32_0, %c0_i32_1 : i32, i32, i32
  }
  func.func @transform_8(%arg0: i32) -> (i32, i32, i32) {
    %c0_i32 = arith.constant 0 : i32
    %c0_i32_0 = arith.constant 0 : i32
    %c0_i32_1 = arith.constant 0 : i32
    %c0_i32_2 = arith.constant 0 : i32
    return %c0_i32, %c0_i32_0, %c0_i32_1 : i32, i32, i32
  }
  func.func @transform_9(%arg0: i32) -> (i32, i32, i32) {
    %c0_i32 = arith.constant 0 : i32
    %c0_i32_0 = arith.constant 0 : i32
    %c0_i32_1 = arith.constant 0 : i32
    %c0_i32_2 = arith.constant 0 : i32
    return %c0_i32, %c0_i32_0, %c0_i32_1 : i32, i32, i32
  }
  func.func @transform_10(%arg0: i32) -> (i32, i32, i32) {
    %c0_i32 = arith.constant 0 : i32
    %c0_i32_0 = arith.constant 0 : i32
    %c0_i32_1 = arith.constant 0 : i32
    %c0_i32_2 = arith.constant 0 : i32
    return %c0_i32, %c0_i32_0, %c0_i32_1 : i32, i32, i32
  }
  func.func @transform_11(%arg0: i32) -> (i32, i32) {
    %c0_i32 = arith.constant 0 : i32
    %c0_i32_0 = arith.constant 0 : i32
    %c0_i32_1 = arith.constant 0 : i32
    return %c0_i32, %c0_i32_0 : i32, i32
  }
  func.func @transform_12(%arg0: i32) -> (i32, i32) {
    %c0_i32 = arith.constant 0 : i32
    %c0_i32_0 = arith.constant 0 : i32
    %c0_i32_1 = arith.constant 0 : i32
    return %c0_i32, %c0_i32_0 : i32, i32
  }
  func.func @transform_13(%arg0: i32) -> (i32, i32) {
    %c0_i32 = arith.constant 0 : i32
    %c0_i32_0 = arith.constant 0 : i32
    %c0_i32_1 = arith.constant 0 : i32
    return %c0_i32, %c0_i32_0 : i32, i32
  }
  func.func @transform_14(%arg0: i32) -> (i32, i32, i32, i32) {
    %c0_i32 = arith.constant 0 : i32
    %c0_i32_0 = arith.constant 0 : i32
    %c0_i32_1 = arith.constant 0 : i32
    %c0_i32_2 = arith.constant 0 : i32
    return %arg0, %c0_i32, %c0_i32_0, %c0_i32_1 : i32, i32, i32, i32
  }
}

</mosaic_0001>

<bundles_post_ra>
// kernel: tpu_custom_call.1
= control target key start
LH: loop header
LB: loop body
LE: loop exit
PB: predicated region body
PF: predicated region fallthrough
CT: control target
= control target key end

     0   :  { %s22897_s0 = inlined_call_operand.hbm [shape: f32[2,16,16,64], index: 0, kind: input, shape index: {}]   ;;  %s22898_s1 = inlined_call_operand.hbm [shape: f32[2,16,16,64], index: 1, kind: input, shape index: {}]   ;;  %s22899_s2 = inlined_call_operand.hbm [shape: bf16[9,64,64], index: 2, kind: input, shape index: {}]   ;;  %s22900_s3 = inlined_call_operand.hbm [shape: bf16[9,64,64], index: 3, kind: input, shape index: {}]   ;;  %s22901_s4 = inlined_call_operand.vmem [shape: f32[1,64], index: 4, kind: input, shape index: {}]   ;;  %s22902_s5 = inlined_call_operand.vmem [shape: f32[1,64], index: 5, kind: input, shape index: {}]   ;;  %s22903_s6 = inlined_call_operand.<no memory space> [shape: f32[1,1], index: 6, kind: input, shape index: {}]   ;;  %s22904_s7 = inlined_call_operand.hbm [shape: bf16[9,64,64], index: 7, kind: input, shape index: {}]   ;;  %s22905_s8 = inlined_call_operand.vmem [shape: f32[1,1,64], index: 8, kind: input, shape index: {}]   ;;  %s22906_s9 = inlined_call_operand.vmem [shape: f32[1,1,64], index: 9, kind: input, shape index: {}]   ;;  %s22907_s10 = inlined_call_operand.vmem [shape: f32[1,1,64], index: 10, kind: input, shape index: {}]   ;;  %s22908_s11 = inlined_call_operand.hbm [shape: f32[64,64], index: 11, kind: input, shape index: {}]   ;;  %s22909_s12 = inlined_call_operand.vmem [shape: f32[2,64], index: 12, kind: input, shape index: {}]   ;;  %s22910_s13 = inlined_call_operand.vmem [shape: f32[1,2], index: 13, kind: input, shape index: {}]   ;;  %s22911_s14 = inlined_call_operand.hbm [shape: f32[2,16,16,64], index: 14, kind: output, shape index: {}]  }
   0x1   :  { %22960 = sst [smem:[#allocation88_spill]] %s22897_s0  ;;  %v19_v0 = vstv %s22903_s6 }
   0x2   :  { %22961 = sst [smem:[#allocation89_spill]] %s22899_s2  ;;  %20 = vst [vmem:[#allocation3] sm:$0x1] %v19_v0 }
   0x3   :  { %22962 = sst [smem:[#allocation90_spill]] %s22900_s3 }
   0x4   :  { %22963 = sst [smem:[#allocation91_spill]] %s22906_s9 }
   0x5   :  { %22964 = sst [smem:[#allocation92_spill]] %s22907_s10 }
   0x6   :  { %22965 = sst [smem:[#allocation93_spill]] %s22909_s12 }
   0x7   :  { %22966 = sst [smem:[#allocation94_spill]] %s22910_s13 }
   0x8   :  { %22967 = sst [smem:[#allocation95_spill]] %s22911_s14 }
   0x9   :  { %21 = vsyncpa [#allocation5], 0 }
   0xa   :  { %23 = vsyncpa [#allocation5 + $0x1], 0 }
   0xb   :  { %24 = vsyncpa [#allocation8], 0 }
   0xc   :  { %26 = vsyncpa [#allocation8 + $0x1], 0 }
   0xd   :  { %27 = vsyncpa [#allocation11], 0 }
   0xe   :  { %28 = vsyncpa [#allocation14], 0 }
   0xf   :  { %29 = vsyncpa [#allocation6], 0 }
  0x10   :  { %31 = vsyncpa [#allocation6 + $0x1], 0  ;;  %s18775_s15 = smov 0   ;;  %s18777_s16 = smov 0  }
  0x11   :  { %s18779_s17 = smov 0   ;;  %s18781_s18 = smov 0  }
  0x12 LB: > { %22968 = sst [smem:[#allocation22_spill]] %s18665_s15  ;;  %s18796_s6 = sadd.s32 4294967295, %s18677_s18   ;;  %s18677_s18 = sphi %s18781_s18, %s23193_s18   ;;  %s18673_s17 = sphi %s18779_s17, %s23192_s17   ;;  %s18669_s16 = sphi %s18777_s16, %s23191_s16   ;;  %s18665_s15 = sphi %s18775_s15, %s23190_s15  }
  0x13   : > { %s14950_s19 = sadd.s32 4294967294, %s18677_s18   ;;  %p57_p0 = scmp.ne.s32.totalorder %s18669_s16, %s18665_s15 }
  0x14   : > { %p22915_p1 = scmp.eq.s32.totalorder %s18796_s6, 0  ;;  %p365_p3 = scmp.eq.s32.totalorder %s14950_s19, 1 }
  0x15   : > { %p14951_p5 = scmp.ge.s32.totalorder %s18677_s18, 1  ;;  %p372_p7 = scmp.lt.s32.totalorder %s18677_s18, 3 }
  0x16   : > { %p18805_p4 = por %p22915_p1, %p57_p0  ;;  %p18810_p6 = por %p365_p3, %p57_p0 }
  0x17   : > { %p18815_p8 = pnand %p14951_p5, %p372_p7  ;;  %s18679_s23 = smov [#allocation9]  }
  0x18   : > { %s22969_s20 = scalar_select %p18805_p4, 1, 0 }
  0x19   : > { %s22970_s21 = scalar_select %p18810_p6, 1, 0 }
  0x1a   : > { %s22972_s22 = scalar_select %p18815_p8, 1, 0 }
  0x1b   : > { %22971 = sst [smem:[#allocation23_spill]] %s22970_s21  ;;  %s384_s24 = sshll.u32 %s18679_s23, 4  ;;  %s18819_s24 = int_to_ptr.vmem [resolvable:$true] %s384_s24 }
  0x1c   : > { %p18016_p9 = pneg %p18815_p8  ;;  %s18680_s26 = smov [#allocation10]  }
  0x1d   : > { %s397_s27 = sshll.u32 %s18680_s26, 4  ;;  %s18681_s28 = smov [#allocation12]   ;;  %s18830_s27 = int_to_ptr.vmem [resolvable:$true] %s397_s27 }
  0x1e   : > { %p18826_p11 = pnand %p18016_p9, %p22915_p1  ;;  %s18832_s29 = sshll.u32 %s18681_s28, 4  ;;  %s420_s29 = int_to_ptr.vmem [resolvable:$true] %s18832_s29 }
  0x1f   : > { %s22974_s2 = sld [smem:[#allocation89_spill]] }
  0x20   : > { %p18842_p13 = pneg %p18826_p11 }
  0x25   : > { %s18423_s23 = scalar_lea.hbm %s22974_s2, 4608 }
  0x26   : > { %p18424_p12 = scmp.ne.s32.totalorder %s22974_s2, %s18423_s23  ;;  %p18430_p5 = scmp.lt.u32.totalorder %s18423_s23, %s22974_s2 }
  0x28   : > { %p18426_p0 = pnand %p18842_p13, %p18424_p12 }
  0x2a   : > { %p18427_p3 = pneg %p18426_p0 }
  0x2c   : > { %p18432_p7 = pnand %p18430_p5, %p18427_p3 }
  0x2e   : > { %18435 = shalt.err (!%p18432_p7)
}
  0x2f   : > { %s18436_s15 = scalar_lea.vmem %s18819_s24, 4608  ;;  %p18444_p2 = scmp.lt.s32.totalorder %s18819_s24, %s18819_s24 }
  0x30   : > { %p18437_p9 = scmp.ne.s32.totalorder %s18819_s24, %s18436_s15  ;;  %p18445_p6 = scmp.lt.s32.totalorder %s18436_s15, %s18436_s15 }
  0x32   : > { %p18439_p10 = pnand %p18437_p9, %p18842_p13  ;;  %p18446_p12 = por %p18445_p6, %p18444_p2 }
  0x34   : > { %p18440_p1 = pneg %p18439_p10 }
  0x36   : > { %p18447_p0 = pnand %p18446_p12, %p18440_p1 }
  0x38   : > { %18450 = shalt.err (!%p18447_p0)
}
  0x39   : > { %s18682_s21 = smov 64   ;;  %s18683_s30 = smov 4  }
  0x3a   : > { %18019 = dma.hbm_to_vmem [thread:$0]  (!%p18826_p11), %s22974_s2, 4608, %s18819_s24, [#allocation8], %s18682_s21, %s18682_s21, %s18683_s30  }
  0x3b   : > { %s22976_s3 = sld [smem:[#allocation90_spill]] }
  0x41   : > { %s18451_s15 = scalar_lea.hbm %s22976_s3, 4608 }
  0x42   : > { %p18452_p1 = scmp.ne.s32.totalorder %s22976_s3, %s18451_s15  ;;  %p18458_p10 = scmp.lt.u32.totalorder %s18451_s15, %s22976_s3 }
  0x44   : > { %p18454_p2 = pnand %p18452_p1, %p18842_p13 }
  0x46   : > { %p18455_p6 = pneg %p18454_p2 }
  0x48   : > { %p18460_p3 = pnand %p18458_p10, %p18455_p6 }
  0x4a   : > { %18463 = shalt.err (!%p18460_p3)
}
  0x4b   : > { %s18464_s24 = scalar_lea.vmem %s18830_s27, 4608  ;;  %p18472_p12 = scmp.lt.s32.totalorder %s18830_s27, %s18830_s27 }
  0x4c   : > { %p18465_p5 = scmp.ne.s32.totalorder %s18830_s27, %s18464_s24  ;;  %p18473_p0 = scmp.lt.s32.totalorder %s18464_s24, %s18464_s24 }
  0x4e   : > { %p18467_p7 = pnand %p18465_p5, %p18842_p13  ;;  %p18474_p1 = por %p18473_p0, %p18472_p12 }
  0x50   : > { %p18468_p9 = pneg %p18467_p7 }
  0x52   : > { %p18475_p2 = pnand %p18474_p1, %p18468_p9 }
  0x54   : > { %18478 = shalt.err (!%p18475_p2)
}
  0x55   : > { %18022 = dma.hbm_to_vmem [thread:$0]  (!%p18826_p11), %s22976_s3, 4608, %s18830_s27, [#allocation11], %s18682_s21, %s18682_s21, %s18683_s30  }
  0x56   : > { %s18479_s19 = scalar_lea.hbm %s22904_s7, 4608 }
  0x57   : > { %p18480_p6 = scmp.ne.s32.totalorder %s22904_s7, %s18479_s19  ;;  %p18486_p5 = scmp.lt.u32.totalorder %s18479_s19, %s22904_s7 }
  0x59   : > { %p18482_p10 = pnand %p18480_p6, %p18842_p13 }
  0x5b   : > { %p18483_p3 = pneg %p18482_p10 }
  0x5d   : > { %p18488_p7 = pnand %p18486_p5, %p18483_p3 }
  0x5f   : > { %18491 = shalt.err (!%p18488_p7)
}
  0x60   : > { %s18492_s24 = scalar_lea.vmem %s420_s29, 4608  ;;  %p18500_p1 = scmp.lt.s32.totalorder %s420_s29, %s420_s29 }
  0x61   : > { %p18493_p9 = scmp.ne.s32.totalorder %s420_s29, %s18492_s24  ;;  %p18501_p2 = scmp.lt.s32.totalorder %s18492_s24, %s18492_s24 }
  0x63   : > { %p18495_p12 = pnand %p18493_p9, %p18842_p13  ;;  %p18502_p4 = por %p18501_p2, %p18500_p1 }
  0x65   : > { %p18496_p0 = pneg %p18495_p12 }
  0x67   : > { %p18503_p8 = pnand %p18502_p4, %p18496_p0 }
  0x69   : > { %18506 = shalt.err (!%p18503_p8)
}
  0x6a   : > { %18025 = dma.hbm_to_vmem [thread:$0]  (!%p18826_p11), %s22904_s7, 4608, %s420_s29, [#allocation11], %s18682_s21, %s18682_s21, %s18683_s30  }
  0x6b   : > { %s18684_s10 = smov [#allocation13]   ;;  %s18507_s23 = scalar_lea.hbm %s22908_s11, 1024 }
  0x6c   : > { %s441_s12 = sshll.u32 %s18684_s10, 4  ;;  %p18508_p4 = scmp.ne.s32.totalorder %s22908_s11, %s18507_s23  ;;  %s442_s12 = int_to_ptr.vmem [resolvable:$true] %s441_s12 }
  0x6d   : > { %p18514_p10 = scmp.lt.u32.totalorder %s18507_s23, %s22908_s11 }
  0x6e   : > { %p18510_p8 = pnand %p18508_p4, %p18842_p13 }
  0x70   : > { %p18511_p6 = pneg %p18510_p8 }
  0x72   : > { %p18516_p3 = pnand %p18514_p10, %p18511_p6 }
  0x74   : > { %18519 = shalt.err (!%p18516_p3)
}
  0x75   : > { %s18520_s29 = scalar_lea.vmem %s442_s12, 1024  ;;  %p18528_p12 = scmp.lt.s32.totalorder %s442_s12, %s442_s12 }
  0x76   : > { %p18521_p5 = scmp.ne.s32.totalorder %s442_s12, %s18520_s29  ;;  %p18529_p0 = scmp.lt.s32.totalorder %s18520_s29, %s18520_s29 }
  0x78   : > { %p18523_p7 = pnand %p18521_p5, %p18842_p13  ;;  %p18530_p1 = por %p18529_p0, %p18528_p12 }
  0x7a   : > { %p18524_p9 = pneg %p18523_p7 }
  0x7c   : > { %p18531_p2 = pnand %p18530_p1, %p18524_p9 }
  0x7e   : > { %18534 = shalt.err (!%p18531_p2)
}
  0x7f   : > { %s22918_s21 = smov 128   ;;  %s22920_s14 = smov 8  }
  0x80   : > { %18028 = dma.hbm_to_vmem [thread:$0]  (!%p18826_p11), %s22908_s11, 1024, %s442_s12, [#allocation14], %s22918_s21, %s22918_s21, %s22920_s14  }
  0x81   : > { %s18936_s9 = sadd.s32 1, %s18677_s18   ;;  %s44_s13 = sadd.s32 1, %s18673_s17 }
  0x82   : > { %s41_s10 = ssub.s32 %s18677_s18, %s18936_s9  ;;  %p51_p4 = scmp.ne.s32.totalorder %s18673_s17, %s18669_s16 }
  0x83   : > { %p42_p13 = scmp.eq.s32.totalorder %s41_s10, 0  ;;  %p52_p8 = scmp.eq.s32.totalorder %s18677_s18, 0 }
  0x84   : > { %p22977_p10 = scmp.eq.s32.totalorder %s18796_s6, 1  ;;  %p18044_p5 = scmp.lt.s32.totalorder %s18677_s18, 2 }
  0x85   : > { %s18945_s19 = scalar_select %p42_p13, %s18673_s17, %s44_s13  }
  0x86   : > { %p53_p6 = por %p52_p8, %p51_p4  ;;  %p18949_p3 = por %p22977_p10, %p51_p4 }
  0x87   : > { %s461_s23 = sand.u32 1, %s18673_s17   ;;  %s15555_s12 = sshll.u32 %s18677_s18, 12 }
  0x88   : > { %s14957_s26 = sshll.u32 %s461_s23, 8  ;;  %s22979_s0 = sld [smem:[#allocation88_spill]] }
  0x89   : > { %s465_s29 = scalar_lea.vmem [#allocation4], %s14957_s26  ;;  %p18963_p11 = pnand %p18044_p5, %p53_p6 }
  0x8a   : > { %s472_s30 = sshll.u32 %s465_s29, 4  ;;  %s18970_s28 = scalar_lea.hbm %s22898_s1, %s15555_s12  ;;  %s18961_s30 = int_to_ptr.vmem [resolvable:$true] %s472_s30 }
  0x8b   : > { %s486_s15 = scalar_lea.vmem [#allocation7], %s14957_s26  ;;  %s18974_s14 = scalar_lea.sflag [#allocation5], %s461_s23 }
  0x8c   : > { %s18972_s21 = sshll.u32 %s486_s15, 4  ;;  %p18537_p9 = pneg %p18963_p11  ;;  %s19006_s21 = int_to_ptr.vmem [resolvable:$true] %s18972_s21 }
  0x8e   : > { %s18959_s24 = scalar_lea.hbm %s22979_s0, %s15555_s12  ;;  %s18540_s10 = scalar_lea.hbm %s22979_s0, 8192 }
  0x8f   : > { %s18535_s29 = scalar_lea.hbm %s18959_s24, 4096  ;;  %p18541_p1 = scmp.lt.u32.totalorder %s18959_s24, %s22979_s0 }
  0x90   : > { %p18536_p7 = scmp.ne.s32.totalorder %s18959_s24, %s18535_s29  ;;  %p18542_p2 = scmp.lt.u32.totalorder %s18540_s10, %s18535_s29 }
  0x91   : > { %p18544_p4 = scmp.lt.u32.totalorder %s18535_s29, %s18959_s24 }
  0x92   : > { %p18538_p12 = pnand %p18537_p9, %p18536_p7  ;;  %p18543_p13 = por %p18542_p2, %p18541_p1 }
  0x94   : > { %p18539_p0 = pneg %p18538_p12  ;;  %p18545_p8 = por %p18544_p4, %p18543_p13 }
  0x96   : > { %p18546_p6 = pnand %p18545_p8, %p18539_p0 }
  0x98   : > { %18549 = shalt.err (!%p18546_p6)
}
  0x99   : > { %s18550_s23 = scalar_lea.vmem %s18961_s30, 4096  ;;  %s18687_s2 = smov [#allocation4]  }
  0x9a   : > { %p18551_p10 = scmp.ne.s32.totalorder %s18961_s30, %s18550_s23  ;;  %s18555_s3 = sshll.u32 %s18687_s2, 4  ;;  %s18556_s3 = int_to_ptr.vmem [resolvable:$false] %s18555_s3 }
  0x9b   : > { %s18557_s26 = scalar_lea.vmem %s18556_s3, 8192  ;;  %p18558_p12 = scmp.lt.s32.totalorder %s18961_s30, %s18556_s3 }
  0x9c   : > { %p18553_p5 = pnand %p18551_p10, %p18537_p9  ;;  %p18559_p1 = scmp.lt.s32.totalorder %s18557_s26, %s18550_s23 }
  0x9e   : > { %p18554_p7 = pneg %p18553_p5  ;;  %p18560_p2 = por %p18559_p1, %p18558_p12 }
  0xa0   : > { %p18561_p13 = pnand %p18560_p2, %p18554_p7 }
  0xa2   : > { %18564 = shalt.err (!%p18561_p13)
}
  0xa3   : > { %s22981_s15 = smov 8   ;;  %s22982_s29 = smov 128  }
  0xa4   : > { %18032 = dma.hbm_to_vmem [thread:$0]  (!%p18963_p11), %s18959_s24, 4096, %s18961_s30, %s18974_s14, %s22982_s29, %s22982_s29, %s22981_s15  }
  0xa5   : > { %s482_s10 = sand.u32 1, %s18677_s18   ;;  %s18565_s12 = scalar_lea.hbm %s18970_s28, 4096 }
  0xa6   : > { %s19009_s13 = scalar_lea.sflag [#allocation8], %s482_s10  ;;  %p18566_p0 = scmp.ne.s32.totalorder %s18970_s28, %s18565_s12 }
  0xa7   : > { %s18570_s3 = scalar_lea.hbm %s22898_s1, 8192  ;;  %p18571_p6 = scmp.lt.u32.totalorder %s18970_s28, %s22898_s1 }
  0xa8   : > { %p18568_p4 = pnand %p18566_p0, %p18537_p9  ;;  %p18572_p10 = scmp.lt.u32.totalorder %s18570_s3, %s18565_s12 }
  0xa9   : > { %p18574_p7 = scmp.lt.u32.totalorder %s18565_s12, %s18970_s28 }
  0xaa   : > { %p18569_p8 = pneg %p18568_p4  ;;  %p18573_p5 = por %p18572_p10, %p18571_p6 }
  0xac   : > { %p18575_p12 = por %p18574_p7, %p18573_p5 }
  0xae   : > { %p18576_p1 = pnand %p18575_p12, %p18569_p8 }
  0xb0   : > { %18579 = shalt.err (!%p18576_p1)
}
  0xb1   : > { %s18580_s14 = scalar_lea.vmem %s19006_s21, 4096  ;;  %s18688_s24 = smov [#allocation7]  }
  0xb2   : > { %p18581_p2 = scmp.ne.s32.totalorder %s19006_s21, %s18580_s14  ;;  %s18585_s30 = sshll.u32 %s18688_s24, 4  ;;  %s18586_s30 = int_to_ptr.vmem [resolvable:$false] %s18585_s30 }
  0xb3   : > { %s18587_s0 = scalar_lea.vmem %s18586_s30, 8192  ;;  %p18588_p4 = scmp.lt.s32.totalorder %s19006_s21, %s18586_s30 }
  0xb4   : > { %p18583_p13 = pnand %p18581_p2, %p18537_p9  ;;  %p18589_p6 = scmp.lt.s32.totalorder %s18587_s0, %s18580_s14 }
  0xb6   : > { %p18584_p0 = pneg %p18583_p13  ;;  %p18590_p10 = por %p18589_p6, %p18588_p4 }
  0xb8   : > { %p18591_p5 = pnand %p18590_p10, %p18584_p0 }
  0xba   : > { %18594 = shalt.err (!%p18591_p5)
}
  0xbb   : > { %18035 = dma.hbm_to_vmem [thread:$0]  (!%p18963_p11), %s18970_s28, 4096, %s19006_s21, %s19009_s13, %s22982_s29, %s22982_s29, %s22981_s15  }
  0xbc   : > { %p22983_p9 = scmp.ne.s32.totalorder %s22972_s22, 0 }
  0xbe   : > { %505 = sbr.rel (%p22983_p9) target bundleno = 2768 (0xad0), region = 76 }
  0xc5   : > { %s19041_s10 = sand.u32 1, %s18669_s16   ;;  %p22984_p8 = scmp.ne.s32.totalorder %s22969_s20, 0 }
  0xc6   : > { %s19044_s12 = sshll.u32 %s19041_s10, 8  ;;  %s508_s27 = scalar_lea.sflag [#allocation5], %s19041_s10 }
  0xc7   : > { %s19048_s23 = scalar_lea.vmem [#allocation4], %s19044_s12 }
  0xc8   : > { %18640 = dma.done.wait (%p22984_p8), %s508_s27, 4096  }
  0xc9   : > { %18642 = vsyncadd (%p22984_p8), %s508_s27, 4294963200  ;;  %s516_s22 = sand.u32 1, %s18796_s6   ;;  %s19056_s28 = scalar_lea.vmem [#allocation7], %s19044_s12 }
  0xca   : > { %s517_s21 = scalar_lea.sflag [#allocation8], %s516_s22 }
  0xcb   : > { %18644 = dma.done.wait (%p22984_p8), %s517_s21, 4096  }
  0xcc   : > { %18646 = vsyncadd (%p22984_p8), %s517_s21, 4294963200  ;;  %p22985_p11 = scmp.eq.s32.totalorder %s18796_s6, 0 }
  0xce   : > { %18648 = dma.done.wait (%p22985_p11), [#allocation8], 4608   ;;  %p22986_p7 = pmov %p22985_p11 }
  0xd0   : > { %18650 = vsyncadd (%p22986_p7), [#allocation8], 4294962688  ;;  %p22987_p12 = pmov %p22986_p7 }
  0xd1   : > { %p22988_p1 = pmov %p22986_p7 }
  0xd2   : > { %18652 = dma.done.wait (%p22987_p12), [#allocation11], 9216  }
  0xd3   : > { %18654 = vsyncadd (%p22988_p1), [#allocation11], 4294958080  ;;  %p22989_p2 = pmov %p22988_p1 }
  0xd4   : > { %p22990_p13 = pmov %p22988_p1 }
  0xd5   : > { %18656 = dma.done.wait (%p22989_p2), [#allocation14], 1024  }
  0xd6   : > { %18658 = vsyncadd (%p22990_p13), [#allocation14], 4294966272  ;;  %vm587_vm0 = vcmask 523264   ;;  %v18689_v1 = vmov 0   ;;  %v18101_v2 = vld [vmem:[#allocation9 + $0x20] sm:$0xff]   ;;  %v656_v4 = vld [vmem:[%s19048_s23 + $0x10] sm:$0xff] }
  0xd7   : > { %601 = vst.msk [vmem:[#allocation2 + $0x68] sm:$0xff] %vm587_vm0, %v18689_v1  ;;  %588 = vst.msk [vmem:[#allocation2] sm:$0xff] %vm587_vm0, %v18689_v1  ;;  %18098 = vset.pattern.permute.xlu1 %v18689_v1  ;;  %18097 = vset.pattern.permute.xlu0 %v18689_v1  ;;  %v18102_v3 = vld [vmem:[#allocation9 + $0x80] sm:$0xff]   ;;  %v19212_v5 = vld [vmem:[%s22902_s5] ss:$0 sm:$0xff]  ;;  %vm18691_vm5 = vmmov 0  }
  0xd8   : > { %589 = vst.msk [vmem:[#allocation2 + $0x8] sm:$0xff] %vm587_vm0, %v18689_v1  ;;  %590 = vst.msk [vmem:[#allocation2 + $0x10] sm:$0xff] %vm587_vm0, %v18689_v1  ;;  %16107 = vmatprep.subr.bf16.mxu1 %v18101_v2  ;;  %v654_v6 = vld [vmem:[%s19048_s23] sm:$0xff]  ;;  %16267 = vmatprep.subr.bf16.mxu0 %v18102_v3  ;;  %v8744_v7 = vmul.f32 %v19212_v5, %v656_v4  ;;  %v18103_v9 = vld [vmem:[#allocation9 + $0x28] sm:$0xff]   ;;  %vm1477_vm1 = vsmask.f32 7424 }
  0xd9   : > { %591 = vst.msk [vmem:[#allocation2 + $0x18] sm:$0xff] %vm587_vm0, %v18689_v1  ;;  %592 = vst.msk [vmem:[#allocation2 + $0x20] sm:$0xff] %vm587_vm0, %v18689_v1  ;;  %16108 = vmatpush3.bf16.msra.mxu1 %v18101_v2  ;;  %v8742_v8 = vmul.f32 %v19212_v5, %v654_v6  ;;  %16268 = vmatpush3.bf16.msra.mxu0 %v18102_v3  ;;  %v18104_v10 = vld [vmem:[#allocation9 + $0x88] sm:$0xff]   ;;  %v657_v13 = vld [vmem:[%s19048_s23 + $0x18] sm:$0xff]  ;;  %vm785_vm2 = vsmask.f32 256 }
  0xda   : > { %593 = vst.msk [vmem:[#allocation2 + $0x28] sm:$0xff] %vm587_vm0, %v18689_v1  ;;  %594 = vst.msk [vmem:[#allocation2 + $0x30] sm:$0xff] %vm587_vm0, %v18689_v1  ;;  %v8780_v11 = vsel %vm587_vm0, %v8744_v7, 0.0  ;;  %16109 = vmatprep.subr.bf16.mxu1 %v18103_v9  ;;  %v655_v14 = vld [vmem:[%s19048_s23 + $0x8] sm:$0xff]  ;;  %v8745_v15 = vmul.f32 %v19212_v5, %v657_v13  ;;  %v719_v16 = vpack.c.bf16 %v657_v13, %v656_v4  ;;  %v18105_v18 = vld [vmem:[#allocation9 + $0x30] sm:$0xff]   ;;  %16269 = vmatprep.subr.bf16.mxu0 %v18104_v10  ;;  %vm13527_vm6 = vcmask 1040384  }
  0xdb   : > { %595 = vst.msk [vmem:[#allocation2 + $0x38] sm:$0xff] %vm587_vm0, %v18689_v1  ;;  %596 = vst.msk [vmem:[#allocation2 + $0x40] sm:$0xff] %vm587_vm0, %v18689_v1  ;;  %v8774_v12 = vsel %vm587_vm0, %v8742_v8, 0.0  ;;  %8781 = vadd.xlane.f32.xlu1 %v8780_v11  ;;  %v8743_v17 = vmul.f32 %v19212_v5, %v655_v14  ;;  %v718_v19 = vpack.c.bf16 %v655_v14, %v654_v6  ;;  %v18106_v20 = vld [vmem:[#allocation9 + $0x90] sm:$0xff]   ;;  %v659_v21 = vld [vmem:[%s19048_s23 + $0x28] sm:$0xff]  ;;  %s23149_s0 = sld [smem:[#allocation91_spill]] }
  0xdc   : > { %597 = vst.msk [vmem:[#allocation2 + $0x48] sm:$0xff] %vm587_vm0, %v18689_v1  ;;  %598 = vst.msk [vmem:[#allocation2 + $0x50] sm:$0xff] %vm587_vm0, %v18689_v1  ;;  %8775 = vadd.xlane.f32.xlu0 %v8774_v12  ;;  %v8783_v22 = vsel %vm587_vm0, %v8745_v15, 0.0  ;;  %v8747_v24 = vmul.f32 %v19212_v5, %v659_v21  ;;  %v18107_v25 = vld [vmem:[#allocation9 + $0x38] sm:$0xff]   ;;  %v18109_v31 = vld [vmem:[#allocation9] sm:$0xff]   ;;  %s23150_s22 = sld [smem:[#allocation92_spill]] }
  0xdd   : > { %599 = vst.msk [vmem:[#allocation2 + $0x58] sm:$0xff] %vm587_vm0, %v18689_v1  ;;  %600 = vst.msk [vmem:[#allocation2 + $0x60] sm:$0xff] %vm587_vm0, %v18689_v1  ;;  %16110 = vmatpush3.bf16.msra.mxu1 %v18103_v9  ;;  %16270 = vmatpush3.bf16.msra.mxu0 %v18104_v10  ;;  %v8777_v23 = vsel %vm587_vm0, %v8743_v17, 0.0  ;;  %v18108_v26 = vld [vmem:[#allocation9 + $0x98] sm:$0xff]   ;;  %v663_v32 = vld [vmem:[%s19048_s23 + $0x48] sm:$0xff]  ;;  %s23151_s15 = sld [smem:[#allocation93_spill]] }
  0xde   : > { %602 = vst.msk [vmem:[#allocation2 + $0x70] sm:$0xff] %vm587_vm0, %v18689_v1  ;;  %603 = vst.msk [vmem:[#allocation2 + $0x78] sm:$0xff] %vm587_vm0, %v18689_v1  ;;  %16111 = vmatprep.subr.bf16.mxu1 %v18105_v18  ;;  %16271 = vmatprep.subr.bf16.mxu0 %v18106_v20  ;;  %v661_v27 = vld [vmem:[%s19048_s23 + $0x38] sm:$0xff]  ;;  %v8789_v29 = vsel %vm587_vm0, %v8747_v24, 0.0  ;;  %v658_v33 = vld [vmem:[%s19048_s23 + $0x20] sm:$0xff]  ;;  %v8751_v42 = vmul.f32 %v19212_v5, %v663_v32  ;;  %s23160_s2 = sld [smem:[#allocation94_spill]] }
  0xdf   : > { %604 = vst.msk [vmem:[#allocation2 + $0x80] sm:$0xff] %vm587_vm0, %v18689_v1  ;;  %605 = vst.msk [vmem:[#allocation2 + $0x88] sm:$0xff] %vm587_vm0, %v18689_v1  ;;  %8784 = vadd.xlane.f32.xlu1 %v8783_v22  ;;  %v8749_v30 = vmul.f32 %v19212_v5, %v661_v27  ;;  %v720_v34 = vpack.c.bf16 %v659_v21, %v658_v33  ;;  %v660_v35 = vld [vmem:[%s19048_s23 + $0x30] sm:$0xff]  ;;  %v8746_v36 = vmul.f32 %v19212_v5, %v658_v33  ;;  %v665_v37 = vld [vmem:[%s19048_s23 + $0x58] sm:$0xff]  ;;  %vm4523_vm3 = vsmask.f32 1280 }
  0xe0   : > { %606 = vst.msk [vmem:[#allocation2 + $0x90] sm:$0xff] %vm587_vm0, %v18689_v1  ;;  %607 = vst.msk [vmem:[#allocation2 + $0x98] sm:$0xff] %vm587_vm0, %v18689_v1  ;;  %8778 = vadd.xlane.f32.xlu0 %v8777_v23  ;;  %v721_v38 = vpack.c.bf16 %v661_v27, %v660_v35  ;;  %v8748_v39 = vmul.f32 %v19212_v5, %v660_v35  ;;  %v662_v40 = vld [vmem:[%s19048_s23 + $0x40] sm:$0xff]  ;;  %v664_v44 = vld [vmem:[%s19048_s23 + $0x50] sm:$0xff]  ;;  %v8801_v55 = vsel %vm587_vm0, %v8751_v42, 0.0  ;;  %s22697_s3 = scalar_lea.vmem [#allocation15], %s19044_s12 }
  0xe1   : > { %608 = vst.msk [vmem:[#allocation2 + $0xa0] sm:$0xff] %vm587_vm0, %v18689_v1  ;;  %609 = vst.msk [vmem:[#allocation2 + $0xa8] sm:$0xff] %vm587_vm0, %v18689_v1  ;;  %16112 = vmatpush3.bf16.msra.mxu1 %v18105_v18  ;;  %16272 = vmatpush3.bf16.msra.mxu0 %v18106_v20  ;;  %v8795_v41 = vsel %vm587_vm0, %v8749_v30, 0.0  ;;  %v722_v43 = vpack.c.bf16 %v663_v32, %v662_v40  ;;  %v8786_v47 = vsel %vm587_vm0, %v8746_v36, 0.0  ;;  %v18110_v48 = vld [vmem:[#allocation9 + $0x8] sm:$0xff]   ;;  %v666_v49 = vld [vmem:[%s19048_s23 + $0x60] sm:$0xff] }
  0xe2   : > { %610 = vst.msk [vmem:[#allocation2 + $0xb0] sm:$0xff] %vm587_vm0, %v18689_v1  ;;  %611 = vst.msk [vmem:[#allocation2 + $0xb8] sm:$0xff] %vm587_vm0, %v18689_v1  ;;  %v19230_v28 = vld [vmem:[#allocation2 + $0x38] sm:$0xff]  ;;  %16113 = vmatprep.subr.bf16.mxu1 %v18107_v25  ;;  %16273 = vmatprep.subr.bf16.mxu0 %v18108_v26  ;;  %v8792_v50 = vsel %vm587_vm0, %v8748_v39, 0.0  ;;  %v8750_v52 = vmul.f32 %v19212_v5, %v662_v40  ;;  %v723_v53 = vpack.c.bf16 %v665_v37, %v664_v44  ;;  %v19263_v54 = vld [vmem:[%s19048_s23 + $0x70] sm:$0xff]  ;;  %s15557_s12 = sshll.u32 %s18796_s6, 12 }
  0xe3   : > { %612 = vst.msk [vmem:[#allocation2 + $0xc0] sm:$0xff] %vm587_vm0, %v18689_v1  ;;  %613 = vst.msk [vmem:[#allocation2 + $0xc8] sm:$0xff] %vm587_vm0, %v18689_v1  ;;  %16115 = vmatprep.mubr.msk.bf16.mxu1 %vm587_vm0, %v19230_v28  ;;  %8790 = vadd.xlane.f32.xlu1 %v8789_v29  ;;  %v667_v51 = vld [vmem:[%s19048_s23 + $0x68] sm:$0xff]  ;;  %v8753_v56 = vmul.f32 %v19212_v5, %v665_v37  ;;  %v669_v57 = vld [vmem:[%s19048_s23 + $0x78] sm:$0xff]  ;;  %v8752_v2 = vmul.f32 %v19212_v5, %v664_v44  ;;  %vm5327_vm4 = vsmask.f32 6400 }
  0xe4   : > { %614 = vst.msk [vmem:[#allocation2 + $0xd0] sm:$0xff] %vm587_vm0, %v18689_v1  ;;  %615 = vst.msk [vmem:[#allocation2 + $0xd8] sm:$0xff] %vm587_vm0, %v18689_v1  ;;  %8787 = vadd.xlane.f32.xlu0 %v8786_v47  ;;  %v724_v58 = vpack.c.bf16 %v667_v51, %v666_v49  ;;  %v18111_v59 = vld [vmem:[#allocation9 + $0xa0] sm:$0xff]   ;;  %v18112_v61 = vld [vmem:[#allocation9 + $0xa8] sm:$0xff]   ;;  %v725_v63 = vpack.c.bf16 %v669_v57, %v19263_v54  ;;  %v8755_v6 = vmul.f32 %v19212_v5, %v667_v51  ;;  %s14816_s26 = sshll.u32 %s22697_s3, 4  ;;  %s23185_s30 = sld [smem:[#allocation95_spill]]  ;;  %s22851_s26 = int_to_ptr.vmem [resolvable:$true] %s14816_s26 }
  0xe5   : > { %616 = vst.msk [vmem:[#allocation2 + $0xe0] sm:$0xff] %vm587_vm0, %v18689_v1  ;;  %617 = vst.msk [vmem:[#allocation2 + $0xe8] sm:$0xff] %vm587_vm0, %v18689_v1  ;;  %16114 = vmatpush3.bf16.msra.mxu1 %v18107_v25  ;;  %16274 = vmatpush3.bf16.msra.mxu0 %v18108_v26  ;;  %v19274_v60 = vld [vmem:[%s19048_s23 + $0x80] sm:$0xff]  ;;  %v671_v62 = vld [vmem:[%s19048_s23 + $0x88] sm:$0xff]  ;;  %v8807_v4 = vsel %vm587_vm0, %v8753_v56, 0.0  ;;  %v8804_v14 = vsel %vm587_vm0, %v8752_v2, 0.0  ;;  %v8754_v15 = vmul.f32 %v19212_v5, %v666_v49 }
  0xe6   : > { %618 = vst.msk [vmem:[#allocation2 + $0xf0] sm:$0xff] %vm587_vm0, %v18689_v1  ;;  %619 = vst.msk [vmem:[#allocation2 + $0xf8] sm:$0xff] %vm587_vm0, %v18689_v1  ;;  %16147 = vmatprep.subr.bf16.mxu1 %v18109_v31  ;;  %16307 = vmatprep.subr.bf16.mxu0 %v18111_v59  ;;  %v18113_v3 = vld [vmem:[#allocation9 + $0x10] sm:$0xff]   ;;  %v726_v7 = vpack.c.bf16 %v671_v62, %v19274_v60  ;;  %v673_v10 = vld [vmem:[%s19048_s23 + $0x98] sm:$0xff]  ;;  %v8813_v18 = vsel %vm587_vm0, %v8755_v6, 0.0  ;;  %v8756_v29 = vmul.f32 %v19212_v5, %v19263_v54  ;;  %s14803_s6 = scalar_lea.sflag [#allocation6], %s19041_s10 }
  0xe7   : > { %620 = vst.msk [vmem:[#allocation2 + $0x100] sm:$0xff] %vm587_vm0, %v18689_v1  ;;  %621 = vst.msk [vmem:[#allocation2 + $0x108] sm:$0xff] %vm587_vm0, %v18689_v1  ;;  %8796 = vadd.xlane.f32.xlu1 %v8795_v41  ;;  %v19290_v8 = vld [vmem:[%s19048_s23 + $0x90] sm:$0xff]  ;;  %v19296_v11 = vld [vmem:[%s19048_s23 + $0xa0] sm:$0xff]  ;;  %v8810_v27 = vsel %vm587_vm0, %v8754_v15, 0.0  ;;  %v8759_v32 = vmul.f32 %v19212_v5, %v671_v62  ;;  %v8758_v37 = vmul.f32 %v19212_v5, %v19274_v60  ;;  %s18694_s27 = smov [#allocation15]  }
  0xe8   : > { %622 = vst.msk [vmem:[#allocation2 + $0x110] sm:$0xff] %vm587_vm0, %v18689_v1  ;;  %623 = vst.msk [vmem:[#allocation2 + $0x118] sm:$0xff] %vm587_vm0, %v18689_v1  ;;  %8793 = vadd.xlane.f32.xlu0 %v8792_v50  ;;  %v18114_v13 = vld [vmem:[#allocation9 + $0xb0] sm:$0xff]   ;;  %v727_v17 = vpack.c.bf16 %v673_v10, %v19290_v8  ;;  %v19317_v21 = vld [vmem:[%s19048_s23 + $0xb8] sm:$0xff]  ;;  %v8816_v36 = vsel %vm587_vm0, %v8756_v29, 0.0  ;;  %v8761_v39 = vmul.f32 %v19212_v5, %v673_v10 }
  0xe9   : > { %624 = vst.msk [vmem:[#allocation2 + $0x120] sm:$0xff] %vm587_vm0, %v18689_v1  ;;  %625 = vst.msk [vmem:[#allocation2 + $0x128] sm:$0xff] %vm587_vm0, %v18689_v1  ;;  %v19321_v22 = vld [vmem:[%s19048_s23 + $0xb0] sm:$0xff]  ;;  %v18115_v23 = vld [vmem:[#allocation9 + $0xb8] sm:$0xff]   ;;  %v8760_v49 = vmul.f32 %v19212_v5, %v19290_v8  ;;  %v8762_v62 = vmul.f32 %v19212_v5, %v19296_v11 }
  0xea   : > { %626 = vst.msk [vmem:[#allocation2 + $0x130] sm:$0xff] %vm587_vm0, %v18689_v1  ;;  %627 = vst.msk [vmem:[#allocation2 + $0x138] sm:$0xff] %vm587_vm0, %v18689_v1  ;;  %v729_v24 = vpack.c.bf16 %v19317_v21, %v19321_v22  ;;  %v19327_v25 = vld [vmem:[%s19048_s23 + $0xc0] sm:$0xff]  ;;  %v19330_v26 = vld [vmem:[%s19048_s23 + $0xc8] sm:$0xff]  ;;  %v8764_v10 = vmul.f32 %v19212_v5, %v19321_v22 }
  0xeb   : > { %628 = vst.msk [vmem:[#allocation2 + $0x140] sm:$0xff] %vm587_vm0, %v18689_v1  ;;  %629 = vst.msk [vmem:[#allocation2 + $0x148] sm:$0xff] %vm587_vm0, %v18689_v1  ;;  %8802 = vadd.xlane.f32.xlu1 %v8801_v55  ;;  %v18116_v30 = vld [vmem:[#allocation9 + $0x18] sm:$0xff]   ;;  %v19357_v40 = vld [vmem:[%s19048_s23 + $0xd0] sm:$0xff]  ;;  %v8834_v8 = vsel %vm587_vm0, %v8762_v62, 0.0 }
  0xec   : > { %630 = vst.msk [vmem:[#allocation2 + $0x150] sm:$0xff] %vm587_vm0, %v18689_v1  ;;  %631 = vst.msk [vmem:[#allocation2 + $0x158] sm:$0xff] %vm587_vm0, %v18689_v1  ;;  %v19360_v41 = vld [vmem:[%s19048_s23 + $0xd8] sm:$0xff]  ;;  %v19369_v44 = vld [vmem:[%s19048_s23 + $0xe8] sm:$0xff]  ;;  %v8840_v22 = vsel %vm587_vm0, %v8764_v10, 0.0 }
  0xed   : > { %632 = vst.msk [vmem:[#allocation2 + $0x160] sm:$0xff] %vm587_vm0, %v18689_v1  ;;  %633 = vst.msk [vmem:[#allocation2 + $0x168] sm:$0xff] %vm587_vm0, %v18689_v1  ;;  %v19371_v47 = vld [vmem:[#allocation9 + $0x40] sm:$0xff]   ;;  %v731_v51 = vpack.c.bf16 %v19360_v41, %v19357_v40 }
  0xee   : > { %634 = vst.msk [vmem:[#allocation2 + $0x170] sm:$0xff] %vm587_vm0, %v18689_v1  ;;  %635 = vst.msk [vmem:[#allocation2 + $0x178] sm:$0xff] %vm587_vm0, %v18689_v1  ;;  %v2701_v50 = vld [vmem:[#allocation2 + $0x58] sm:$0x1] }
  0xef   : > { %636 = vst.msk [vmem:[#allocation2 + $0x180] sm:$0xff] %vm587_vm0, %v18689_v1  ;;  %637 = vst.msk [vmem:[#allocation2 + $0x188] sm:$0xff] %vm587_vm0, %v18689_v1  ;;  %8808 = vadd.xlane.f32.xlu1 %v8807_v4  ;;  %v19381_v54 = vld [vmem:[#allocation9 + $0xc0] sm:$0xff]   ;;  %v2740_v60 = vshll.u32 %v2701_v50, 16 }
  0xf0   : > { %638 = vst.msk [vmem:[#allocation2 + $0x190] sm:$0xff] %vm587_vm0, %v18689_v1  ;;  %639 = vst.msk [vmem:[#allocation2 + $0x198] sm:$0xff] %vm587_vm0, %v18689_v1 }
  0xf1   : > { %640 = vst.msk [vmem:[#allocation2 + $0x1a0] sm:$0xff] %vm587_vm0, %v18689_v1  ;;  %641 = vst.msk [vmem:[#allocation2 + $0x1a8] sm:$0xff] %vm587_vm0, %v18689_v1  ;;  %v2742_v6 = vrot.slane %v2740_v60, 1  ;;  %v8769_v60 = vmul.f32 %v19212_v5, %v19360_v41 }
  0xf2   : > { %642 = vst.msk [vmem:[#allocation2 + $0x1b0] sm:$0xff] %vm587_vm0, %v18689_v1  ;;  %643 = vst.msk [vmem:[#allocation2 + $0x1b8] sm:$0xff] %vm587_vm0, %v18689_v1 }
  0xf3   : > { %644 = vst.msk [vmem:[#allocation2 + $0x1c0] sm:$0xff] %vm587_vm0, %v18689_v1  ;;  %645 = vst.msk [vmem:[#allocation2 + $0x1c8] sm:$0xff] %vm587_vm0, %v18689_v1  ;;  %8814 = vadd.xlane.f32.xlu1 %v8813_v18 }
  0xf4   : > { %646 = vst.msk [vmem:[#allocation2 + $0x1d0] sm:$0xff] %vm587_vm0, %v18689_v1  ;;  %647 = vst.msk [vmem:[#allocation2 + $0x1d8] sm:$0xff] %vm587_vm0, %v18689_v1 }
  0xf5   : > { %648 = vst.msk [vmem:[#allocation2 + $0x1e0] sm:$0xff] %vm587_vm0, %v18689_v1  ;;  %649 = vst.msk [vmem:[#allocation2 + $0x1e8] sm:$0xff] %vm587_vm0, %v18689_v1 }
  0xf6   : > { %650 = vst.msk [vmem:[#allocation2 + $0x1f0] sm:$0xff] %vm587_vm0, %v18689_v1  ;;  %651 = vst.msk [vmem:[#allocation2 + $0x1f8] sm:$0xff] %vm587_vm0, %v18689_v1 }
  0xf7   : > { %652 = vst.msk [vmem:[#allocation2 + $0x200] sm:$0xff] %vm587_vm0, %v18689_v1  ;;  %653 = vst.msk [vmem:[#allocation2 + $0x208] sm:$0xff] %vm587_vm0, %v18689_v1  ;;  %v8798_v1 = vsel %vm587_vm0, %v8750_v52, 0.0  ;;  %v8831_v52 = vsel %vm587_vm0, %v8761_v39, 0.0 }
  0xf8   : > { %736 = vst.msk [vmem:[#allocation2 + $0x68] sm:$0xff] %vm587_vm0, %v719_v16  ;;  %735 = vst.msk [vmem:[#allocation2 + $0x50] sm:$0xff] %vm587_vm0, %v718_v19  ;;  %8799 = vadd.xlane.f32.xlu0 %v8798_v1  ;;  %v675_v16 = vld [vmem:[%s19048_s23 + $0xa8] sm:$0xff]  ;;  %v8757_v19 = vmul.f32 %v19212_v5, %v669_v57  ;;  %v8765_v1 = vmul.f32 %v19212_v5, %v19317_v21 }
  0xf9   : > { %737 = vst.msk [vmem:[#allocation2 + $0x80] sm:$0xff] %vm587_vm0, %v720_v34  ;;  %738 = vst.msk [vmem:[#allocation2 + $0x98] sm:$0xff] %vm587_vm0, %v721_v38  ;;  %v728_v20 = vpack.c.bf16 %v675_v16, %v19296_v11  ;;  %v730_v34 = vpack.c.bf16 %v19330_v26, %v19327_v25  ;;  %v8825_v38 = vsel %vm587_vm0, %v8759_v32, 0.0  ;;  %v2705_v11 = vld [vmem:[#allocation2 + $0x88] sm:$0x1] }
  0xfa   : > { %739 = vst.msk [vmem:[#allocation2 + $0xb0] sm:$0xff] %vm587_vm0, %v722_v43  ;;  %740 = vst.msk [vmem:[#allocation2 + $0xc8] sm:$0xff] %vm587_vm0, %v723_v53  ;;  %v19366_v43 = vld [vmem:[%s19048_s23 + $0xe0] sm:$0xff]  ;;  %v8763_v53 = vmul.f32 %v19212_v5, %v675_v16  ;;  %v2764_v21 = vshll.u32 %v2705_v11, 16  ;;  %v2707_v32 = vld [vmem:[#allocation2 + $0xa0] sm:$0x1] }
  0xfb   : > { %741 = vst.msk [vmem:[#allocation2 + $0xe0] sm:$0xff] %vm587_vm0, %v724_v58  ;;  %742 = vst.msk [vmem:[#allocation2 + $0xf8] sm:$0xff] %vm587_vm0, %v725_v63  ;;  %v732_v56 = vpack.c.bf16 %v19369_v44, %v19366_v43 }
  0xfc   : > { %743 = vst.msk [vmem:[#allocation2 + $0x110] sm:$0xff] %vm587_vm0, %v726_v7  ;;  %744 = vst.msk [vmem:[#allocation2 + $0x128] sm:$0xff] %vm587_vm0, %v727_v17  ;;  %8805 = vadd.xlane.f32.xlu0 %v8804_v14  ;;  %v8837_v63 = vsel %vm587_vm0, %v8763_v53, 0.0  ;;  %v2703_v7 = vld [vmem:[#allocation2 + $0x70] sm:$0x1]  ;;  %v2776_v53 = vshll.u32 %v2707_v32, 16 }
  0xfd   : > { %745 = vst.msk [vmem:[#allocation2 + $0x140] sm:$0xff] %vm587_vm0, %v728_v20  ;;  %746 = vst.msk [vmem:[#allocation2 + $0x158] sm:$0xff] %vm587_vm0, %v729_v24  ;;  %v2752_v17 = vshll.u32 %v2703_v7, 16  ;;  %v753_v7 = vld [vmem:[#allocation2 + $0x30] sm:$0x80] }
  0xfe   : > { %747 = vst.msk [vmem:[#allocation2 + $0x170] sm:$0xff] %vm587_vm0, %v730_v34  ;;  %748 = vst.msk [vmem:[#allocation2 + $0x188] sm:$0xff] %vm587_vm0, %v731_v51  ;;  %v8767_v34 = vmul.f32 %v19212_v5, %v19330_v26 }
  0xff   : > { %v19247_v45 = vld [vmem:[#allocation2 + $0x50] sm:$0xff]  ;;  %v19249_v46 = vld [vmem:[#allocation2 + $0x68] sm:$0xff]  ;;  %749 = vst.msk [vmem:[#allocation2 + $0x1a0] sm:$0xff] %vm587_vm0, %v732_v56  ;;  %v2754_v29 = vrot.slane %v2752_v17, 1  ;;  %v8771_v17 = vmul.f32 %v19212_v5, %v19369_v44 }
 0x100   : > { %16275 = vmatprep.mubr.msk.bf16.mxu0 %vm587_vm0, %v19247_v45  ;;  %16116 = vmatmul.mubr.msk.bf16.vlgmr.msra.gmra.mrb[0].mxu1 %vm587_vm0, %v19247_v45  ;;  %v19279_v0 = vld [vmem:[#allocation2 + $0x80] sm:$0xff]  ;;  %v19292_v9 = vld [vmem:[#allocation2 + $0x98] sm:$0xff]  ;;  %v806_v42 = vshll.u32 %v19247_v45, 16  ;;  %v803_v57 = vshrl.u32 %v19247_v45, 16  ;;  %v1996_v2 = vshll.u32 %v19249_v46, 16  ;;  %v1993_v14 = vshrl.u32 %v19249_v46, 16 }
 0x101   : > { %16276 = vmatmul.mubr.msk.bf16.vlgmr.msra.gmra.mrb[0].mxu0 %vm587_vm0, %v19249_v46  ;;  %16148 = vmatpush3.bf16.msra.mxu1 %v18109_v31  ;;  %v19298_v12 = vld [vmem:[#allocation2 + $0xb0] sm:$0xff]  ;;  %v8819_v31 = vsel %vm587_vm0, %v8757_v19, 0.0  ;;  %v19338_v33 = vld [vmem:[#allocation2 + $0xc8] sm:$0xff]  ;;  %v827_v18 = vshrl.u32 %v19279_v0, 16  ;;  %v842_v24 = vshll.u32 %v19292_v9, 16  ;;  %v8849_v50 = vsel %vm587_vm0, %v8767_v34, 0.0 }
 0x102   : > { %16119 = vmatprep.mubr.msk.bf16.mxu1 %vm587_vm0, %v19249_v46  ;;  %16149 = vmatprep.subr.bf16.mxu1 %v18110_v48  ;;  %v19342_v35 = vld [vmem:[#allocation2 + $0xe0] sm:$0xff]  ;;  %v19383_v55 = vld [vmem:[#allocation2 + $0xf8] sm:$0xff]  ;;  %v2749_v16 = vrot.slane %v1996_v2, 1  ;;  %v851_v39 = vshrl.u32 %v19298_v12, 16  ;;  %v866_v62 = vshll.u32 %v19338_v33, 16  ;;  %v8861_v44 = vsel %vm587_vm0, %v8771_v17, 0.0 }
 0x103   : > { %16308 = vmatpush3.bf16.msra.mxu0 %v18111_v59  ;;  %16279 = vmatprep.mubr.msk.bf16.mxu0 %vm587_vm0, %v19279_v0  ;;  %v19389_v58 = vld [vmem:[#allocation2 + $0x110] sm:$0xff]  ;;  %v2737_v59 = vrot.slane %v806_v42, 1  ;;  %v19418_v15 = vld [vmem:[#allocation2 + $0x128] sm:$0xff]  ;;  %v878_v10 = vshll.u32 %v19342_v35, 16  ;;  %v875_v32 = vshrl.u32 %v19342_v35, 16 }
 0x104   : > { %16309 = vmatprep.subr.bf16.mxu0 %v18112_v61  ;;  %8811 = vadd.xlane.f32.xlu0 %v8810_v27  ;;  %v2750_v27 = vor.u32 %v2749_v16, %v1993_v14  ;;  %v794_v16 = vshll.u32 %v19230_v28, 16  ;;  %v759_v45 = vld [vmem:[#allocation2 + $0x78] sm:$0x80] }
 0x105   : > { %16150 = vmatpush3.bf16.msra.mxu1 %v18110_v48  ;;  %8820 = vadd.xlane.f32.xlu1 %v8819_v31  ;;  %v8822_v48 = vsel %vm587_vm0, %v8758_v37, 0.0  ;;  %v2738_v4 = vor.u32 %v2737_v59, %v803_v57  ;;  %v2766_v31 = vrot.slane %v2764_v21, 1  ;;  %v19479_v21 = vld [vmem:[#allocation2 + $0x170] sm:$0xff] }
 0x106   : > { %16151 = vmatprep.subr.bf16.mxu1 %v18113_v3  ;;  %v2755_v51 = vsel %vm1477_vm1, %v2750_v27, %v2754_v29  ;;  %v684_v27 = vld [vmem:[%s19048_s23 + $0xf0] sm:$0xff]  ;;  %v685_v29 = vld [vmem:[%s19048_s23 + $0xf8] sm:$0xff] }
 0x107   : > { %16310 = vmatpush3.bf16.msra.mxu0 %v18112_v61  ;;  %v8828_v61 = vsel %vm587_vm0, %v8760_v49, 0.0  ;;  %v2743_v19 = vsel %vm1477_vm1, %v2738_v4, %v2742_v6  ;;  %v2773_v49 = vrot.slane %v842_v24, 1  ;;  %v791_v4 = vshrl.u32 %v19230_v28, 16  ;;  %v19514_v17 = vld [vmem:[#allocation2 + $0x1a0] sm:$0xff] }
 0x108   : > { %16120 = vmatmul.mubr.msk.bf16.gmra.mrb[4].mxu1 %vm587_vm0, %v19279_v0  ;;  %16311 = vmatprep.subr.bf16.mxu0 %v18114_v13  ;;  %v2778_v6 = vrot.slane %v2776_v53, 1  ;;  %v787_v28 = vshrl.u32 %v753_v7, 16  ;;  %v757_v7 = vld [vmem:[#allocation2 + $0x60] sm:$0x80] }
 0x109   : > { %16280 = vmatmul.mubr.msk.bf16.gmra.mrb[4].mxu0 %vm587_vm0, %v19292_v9  ;;  %16123 = vmatprep.mubr.msk.bf16.mxu1 %vm587_vm0, %v19292_v9 }
 0x10a   : > { %16283 = vmatprep.mubr.msk.bf16.mxu0 %vm587_vm0, %v19298_v12  ;;  %16152 = vmatpush3.bf16.msra.mxu1 %v18113_v3  ;;  %v830_v3 = vshll.u32 %v19279_v0, 16  ;;  %v763_v0 = vld [vmem:[#allocation2 + $0xa8] sm:$0x80] }
 0x10b   : > { %16312 = vmatpush3.bf16.msra.mxu0 %v18114_v13  ;;  %16153 = vmatprep.subr.bf16.mxu1 %v18116_v30  ;;  %v8843_v13 = vsel %vm587_vm0, %v8765_v1, 0.0  ;;  %v8855_v1 = vsel %vm587_vm0, %v8769_v60, 0.0  ;;  %v755_v60 = vld [vmem:[#allocation2 + $0x48] sm:$0x80] }
 0x10c   : > { %16313 = vmatprep.subr.bf16.mxu0 %v18115_v23  ;;  %8817 = vadd.xlane.f32.xlu0 %v8816_v36  ;;  %v2761_v20 = vrot.slane %v830_v3, 1  ;;  %v839_v36 = vshrl.u32 %v19292_v9, 16 }
 0x10d   : > { %8826 = vadd.xlane.f32.xlu1 %v8825_v38  ;;  %v2709_v38 = vld [vmem:[#allocation2 + $0xb8] sm:$0x1] }
 0x10e   : > { %16154 = vmatpush3.bf16.msra.mxu1 %v18116_v30  ;;  %v854_v30 = vshll.u32 %v19298_v12, 16  ;;  %v2788_v59 = vshll.u32 %v2709_v38, 16  ;;  %v2774_v41 = vor.u32 %v2773_v49, %v839_v36  ;;  %v733_v49 = vpack.c.bf16 %v685_v29, %v684_v27 }
 0x10f   : > { %16314 = vmatpush3.bf16.msra.mxu0 %v18115_v23  ;;  %16187 = vmatprep.subr.bf16.mxu1 %v19371_v47  ;;  %v8766_v23 = vmul.f32 %v19212_v5, %v19327_v25  ;;  %v2762_v25 = vor.u32 %v2761_v20, %v827_v18  ;;  %v863_v20 = vshrl.u32 %v19338_v33, 16 }
 0x110   : > { %16124 = vmatmul.mubr.msk.bf16.gmra.mrb[8].mxu1 %vm587_vm0, %v19298_v12  ;;  %8823 = vadd.xlane.f32.xlu0 %v8822_v48  ;;  %v19447_v48 = vld [vmem:[#allocation2 + $0x140] sm:$0xff]  ;;  %v2785_v56 = vrot.slane %v854_v30, 1  ;;  %750 = vst.msk [vmem:[#allocation2 + $0x1b8] sm:$0xff] %vm587_vm0, %v733_v49 }
 0x111   : > { %16284 = vmatmul.mubr.msk.bf16.gmra.mrb[8].mxu0 %vm587_vm0, %v19338_v33  ;;  %16127 = vmatprep.mubr.msk.bf16.mxu1 %vm587_vm0, %v19338_v33  ;;  %v8846_v37 = vsel %vm587_vm0, %v8766_v23, 0.0  ;;  %v2767_v26 = vsel %vm1477_vm1, %v2762_v25, %v2766_v31  ;;  %v793_v25 = vrot.slane %v791_v4, 7  ;;  %v19486_v31 = vld [vmem:[#allocation2 + $0x188] sm:$0xff]  ;;  %v2715_v4 = vld [vmem:[#allocation2 + $0x100] sm:$0x1]  ;;  %v865_v9 = vrot.slane %v863_v20, 7 }
 0x112   : > { %16287 = vmatprep.mubr.msk.bf16.mxu0 %vm587_vm0, %v19342_v35  ;;  %16347 = vmatprep.subr.bf16.mxu0 %v19381_v54  ;;  %v2786_v11 = vor.u32 %v2785_v56, %v851_v39  ;;  %v890_v56 = vshll.u32 %v19383_v55, 16 }
 0x113   : > { %8832 = vadd.xlane.f32.xlu1 %v8831_v52  ;;  %v19453_v52 = vld [vmem:[#allocation2 + $0x158] sm:$0xff] }
 0x114   : > { %8829 = vadd.xlane.f32.xlu0 %v8828_v61  ;;  %v18120_v61 = vld [vmem:[#allocation9 + $0xc8] sm:$0xff]  }
 0x117   : > { %8838 = vadd.xlane.f32.xlu1 %v8837_v63  ;;  %v2711_v63 = vld [vmem:[#allocation2 + $0xd0] sm:$0x1] }
 0x118   : > { %16128 = vmatmul.mubr.msk.bf16.gmra.mrb[12].mxu1 %vm587_vm0, %v19342_v35  ;;  %8835 = vadd.xlane.f32.xlu0 %v8834_v8  ;;  %v2713_v8 = vld [vmem:[#allocation2 + $0xe8] sm:$0x1]  ;;  %v2800_v23 = vshll.u32 %v2711_v63, 16 }
 0x119   : > { %16288 = vmatmul.mubr.msk.bf16.gmra.mrb[12].mxu0 %vm587_vm0, %v19383_v55  ;;  %16131 = vmatprep.mubr.msk.bf16.mxu1 %vm587_vm0, %v19383_v55  ;;  %v2812_v38 = vshll.u32 %v2713_v8, 16  ;;  %v2717_v8 = vld [vmem:[#allocation2 + $0x118] sm:$0x1] }
 0x11a   : > { %16291 = vmatprep.mubr.msk.bf16.mxu0 %vm587_vm0, %v19389_v58  ;;  %v2802_v53 = vrot.slane %v2800_v23, 1  ;;  %v2824_v23 = vshll.u32 %v2715_v4, 16 }
 0x11b   : > { %8844 = vadd.xlane.f32.xlu1 %v8843_v13  ;;  %v2790_v13 = vrot.slane %v2788_v59, 1  ;;  %v789_v59 = vrot.slane %v787_v28, 7  ;;  %v8770_v28 = vmul.f32 %v19212_v5, %v19366_v43 }
 0x11c   : > { %8841 = vadd.xlane.f32.xlu0 %v8840_v22  ;;  %v2797_v22 = vrot.slane %v866_v62, 1 }
 0x11d   : > { %v2791_v34 = vsel %vm1477_vm1, %v2786_v11, %v2790_v13  ;;  %v8768_v11 = vmul.f32 %v19212_v5, %v19357_v40  ;;  %v887_v13 = vshrl.u32 %v19383_v55, 16  ;;  %v811_v40 = vshrl.u32 %v757_v7, 16 }
 0x11e   : > { %v923_v7 = vshrl.u32 %v19447_v48, 16 }
 0x11f   : > { %8850 = vadd.xlane.f32.xlu1 %v8849_v50  ;;  %v18123_v50 = vld [vmem:[#allocation9 + $0xd8] sm:$0xff]   ;;  %v8852_v27 = vsel %vm587_vm0, %v8768_v11, 0.0  ;;  %v813_v43 = vrot.slane %v811_v40, 7  ;;  %v19568_v40 = vld [vmem:[#allocation9 + $0xe0] sm:$0xff]  }
 0x120   : > { %16132 = vmatmul.mubr.msk.bf16.gmra.mrb[16].mxu1 %vm587_vm0, %v19389_v58  ;;  %8847 = vadd.xlane.f32.xlu0 %v8846_v37  ;;  %v2809_v37 = vrot.slane %v878_v10, 1 }
 0x121   : > { %16292 = vmatmul.mubr.msk.bf16.gmra.mrb[16].mxu0 %vm587_vm0, %v19418_v15  ;;  %16135 = vmatprep.mubr.msk.bf16.mxu1 %vm587_vm0, %v19418_v15 }
 0x122   : > { %16315 = vmatprep.mubr.msk.bf16.mxu0 %vm587_vm0, %v2743_v19  ;;  %v18122_v19 = vld [vmem:[#allocation9 + $0xd0] sm:$0xff]   ;;  %v2810_v63 = vor.u32 %v2809_v37, %v875_v32 }
 0x123   : > { %8856 = vadd.xlane.f32.xlu1 %v8855_v1  ;;  %v2814_v1 = vrot.slane %v2812_v38, 1  ;;  %v926_v38 = vshll.u32 %v19447_v48, 16 }
 0x124   : > { %8853 = vadd.xlane.f32.xlu0 %v8852_v27 }
 0x125   : > { %v2815_v29 = vsel %vm1477_vm1, %v2810_v63, %v2814_v1  ;;  %v911_v63 = vshrl.u32 %v19418_v15, 16  ;;  %v2721_v1 = vld [vmem:[#allocation2 + $0x148] sm:$0x1] }
 0x127   : > { %8862 = vadd.xlane.f32.xlu1 %v8861_v44 }
 0x128   : > { %16136 = vmatmul.mubr.msk.bf16.gmra.mrb[20].mxu1 %vm587_vm0, %v19447_v48 }
 0x129   : > { %16316 = vmatmul.mubr.msk.bf16.vlgmr.msra.gmra.mrb[0].mxu0 %vm587_vm0, %v2755_v51  ;;  %16139 = vmatprep.mubr.msk.bf16.mxu1 %vm587_vm0, %v19453_v52  ;;  %v2798_v51 = vor.u32 %v2797_v22, %v863_v20  ;;  %v799_v22 = vshrl.u32 %v755_v60, 16  ;;  %v829_v60 = vrot.slane %v827_v18, 7 }
 0x12a   : > { %16319 = vmatprep.mubr.msk.bf16.mxu0 %vm587_vm0, %v2767_v26  ;;  %16348 = vmatpush3.bf16.msra.mxu0 %v19381_v54  ;;  %v2779_v54 = vsel %vm1477_vm1, %v2774_v41, %v2778_v6  ;;  %v796_v26 = vor.u32 %v794_v16, %v793_v25  ;;  %v805_v41 = vrot.slane %v803_v57, 7  ;;  %v1995_v6 = vrot.slane %v1993_v14, 7 }
 0x12b   : > { %16349 = vmatprep.subr.bf16.mxu0 %v18120_v61  ;;  %v899_v16 = vshrl.u32 %v19389_v58, 16  ;;  %v2821_v14 = vrot.slane %v890_v56, 1  ;;  %v801_v37 = vrot.slane %v799_v22, 7  ;;  %v2857_v22 = vrot.slane %v926_v38, 1 }
 0x12c   : > { %v797_v57 = vsel %vm785_vm2, %v789_v59, %v796_v26  ;;  %v808_v44 = vor.u32 %v806_v42, %v805_v41  ;;  %v19539_v5 = vor.u32 %v1996_v2, %v1995_v6  ;;  %v2719_v42 = vld [vmem:[#allocation2 + $0x130] sm:$0x1]  ;;  %v761_v26 = vld [vmem:[#allocation2 + $0x90] sm:$0x80]  ;;  %v8858_v59 = vsel %vm587_vm0, %v8770_v28, 0.0 }
 0x12d   : > { %v2822_v49 = vor.u32 %v2821_v14, %v887_v13  ;;  %8859 = vadd.xlane.f32.xlu0 %v8858_v59  ;;  %v823_v2 = vshrl.u32 %v759_v45, 16  ;;  %v2848_v41 = vshll.u32 %v2719_v42, 16  ;;  %v841_v6 = vrot.slane %v839_v36, 7  ;;  %v18118_v14 = vld [vmem:[#allocation9 + $0x48] sm:$0xff]   ;;  %v2725_v42 = vld [vmem:[#allocation2 + $0x178] sm:$0x1] }
 0x12e   : > { %16350 = vmatpush3.bf16.msra.mxu0 %v18120_v61  ;;  %v902_v61 = vshll.u32 %v19389_v58, 16  ;;  %v809_v46 = vsel %vm785_vm2, %v801_v37, %v808_v44  ;;  %v835_v11 = vshrl.u32 %v761_v26, 16  ;;  %v821_v18 = vsel %vm785_vm2, %v813_v43, %v19539_v5  ;;  %v3203_v58 = vld [vmem:[#allocation2 + $0x90] sm:$0x80] }
 0x12f   : > { %16351 = vmatprep.subr.bf16.mxu0 %v18122_v19  ;;  %v825_v36 = vrot.slane %v823_v2, 7  ;;  %v950_v28 = vshll.u32 %v19479_v21, 16  ;;  %v2858_v44 = vor.u32 %v2857_v22, %v923_v7  ;;  %v853_v45 = vrot.slane %v851_v39, 7 }
 0x130   : > { %16140 = vmatmul.mubr.msk.bf16.gmra.mrb[24].mxu1 %vm587_vm0, %v19479_v21  ;;  %v2833_v25 = vrot.slane %v902_v61, 1  ;;  %v947_v43 = vshrl.u32 %v19479_v21, 16  ;;  %v847_v26 = vshrl.u32 %v763_v0, 16  ;;  %v971_v0 = vshrl.u32 %v19514_v17, 16 }
 0x131   : > { %16320 = vmatmul.mubr.msk.bf16.gmra.mrb[4].mxu0 %vm587_vm0, %v2779_v54  ;;  %16143 = vmatprep.mubr.msk.bf16.mxu1 %vm587_vm0, %v19486_v31  ;;  %v2836_v54 = vshll.u32 %v2717_v8, 16  ;;  %v2881_v2 = vrot.slane %v950_v28, 1 }
 0x132   : > { %16323 = vmatprep.mubr.msk.bf16.mxu0 %vm587_vm0, %v2791_v34  ;;  %16352 = vmatpush3.bf16.msra.mxu0 %v18122_v19  ;;  %v2803_v19 = vsel %vm1477_vm1, %v2798_v51, %v2802_v53  ;;  %v914_v34 = vshll.u32 %v19418_v15, 16  ;;  %v2834_v51 = vor.u32 %v2833_v25, %v899_v16  ;;  %v938_v25 = vshll.u32 %v19453_v52, 16 }
 0x133   : > { %16353 = vmatprep.subr.bf16.mxu0 %v18123_v50  ;;  %v2838_v53 = vrot.slane %v2836_v54, 1  ;;  %v837_v54 = vrot.slane %v835_v11, 7  ;;  %v974_v11 = vshll.u32 %v19514_v17, 16 }
 0x134   : > { %v2845_v4 = vrot.slane %v914_v34, 1  ;;  %v2869_v39 = vrot.slane %v938_v25, 1 }
 0x136   : > { %16354 = vmatpush3.bf16.msra.mxu0 %v18123_v50  ;;  %v2826_v50 = vrot.slane %v2824_v23, 1  ;;  %v19564_v23 = vor.u32 %v830_v3, %v829_v60  ;;  %v2846_v27 = vor.u32 %v2845_v4, %v911_v63  ;;  %v18121_v3 = vld [vmem:[#allocation9 + $0x50] sm:$0xff]   ;;  %v2884_v4 = vshll.u32 %v2725_v42, 16 }
 0x137   : > { %16387 = vmatprep.subr.bf16.mxu0 %v19568_v40 }
 0x138   : > { %16144 = vmatmul.mubr.msk.bf16.gmra.mrb[28].mxu1 %vm587_vm0, %v19514_v17  ;;  %v2827_v8 = vsel %vm1477_vm1, %v2822_v49, %v2826_v50  ;;  %v2723_v49 = vld [vmem:[#allocation2 + $0x160] sm:$0x1]  ;;  %v765_v50 = vld [vmem:[#allocation2 + $0xc0] sm:$0x80]  ;;  %v2886_v12 = vrot.slane %v2884_v4, 1 }
 0x139   : > { %16324 = vmatmul.mubr.msk.bf16.gmra.mrb[8].mxu0 %vm587_vm0, %v2803_v19  ;;  %16155 = vmatprep.mubr.msk.bf16.mxu1 %vm587_vm0, %v797_v57  ;;  %v2839_v19 = vsel %vm1477_vm1, %v2834_v51, %v2838_v53  ;;  %v2860_v57 = vshll.u32 %v2721_v1, 16  ;;  %v833_v51 = vsel %vm785_vm2, %v825_v36, %v19564_v23  ;;  %v2872_v60 = vshll.u32 %v2723_v49, 16  ;;  %v18124_v1 = vld [vmem:[#allocation9 + $0x58] sm:$0xff]  }
 0x13a   : > { %16327 = vmatprep.mubr.msk.bf16.mxu0 %vm587_vm0, %v2815_v29  ;;  %v2850_v29 = vrot.slane %v2848_v41, 1  ;;  %v859_v20 = vshrl.u32 %v765_v50, 16  ;;  %v877_v41 = vrot.slane %v875_v32, 7  ;;  %v2727_v36 = vld [vmem:[#allocation2 + $0x190] sm:$0x1] }
 0x13b   : > { %v2862_v37 = vrot.slane %v2860_v57, 1  ;;  %v19615_v57 = vor.u32 %v866_v62, %v865_v9  ;;  %v2905_v9 = vrot.slane %v974_v11, 1 }
 0x13c   : > { %v2851_v53 = vsel %vm1477_vm1, %v2846_v27, %v2850_v29  ;;  %v861_v22 = vrot.slane %v859_v20, 7  ;;  %v2882_v27 = vor.u32 %v2881_v2, %v947_v43  ;;  %v19619_v29 = vld [vmem:[#allocation9 + $0x60] sm:$0xff]   ;;  %v2731_v2 = vld [vmem:[#allocation2 + $0x1c0] sm:$0x1] }
 0x13e   : > { %v869_v50 = vsel %vm785_vm2, %v861_v22, %v19615_v57  ;;  %v2887_v42 = vsel %vm1477_vm1, %v2882_v27, %v2886_v12  ;;  %v2920_v22 = vshll.u32 %v2731_v2, 16  ;;  %v3205_v2 = vld [vmem:[#allocation2 + $0xa8] sm:$0x80] }
 0x13f   : > { %v3268_v48 = vshrl.u32 %v3205_v2, 16  ;;  %v19732_v2 = vld [vmem:[#allocation2 + $0x80] sm:$0xff] }
 0x140   : > { %16156 = vmatmul.mubr.msk.bf16.vlgmr.msra.gmra.mrb[0].mxu1 %vm587_vm0, %v809_v46  ;;  %v2863_v46 = vsel %vm1477_vm1, %v2858_v44, %v2862_v37  ;;  %v2729_v44 = vld [vmem:[#allocation2 + $0x1a8] sm:$0x1]  ;;  %v2896_v37 = vshll.u32 %v2727_v36, 16 }
 0x141   : > { %16328 = vmatmul.mubr.msk.bf16.gmra.mrb[12].mxu0 %vm587_vm0, %v2827_v8  ;;  %16188 = vmatpush3.bf16.msra.mxu1 %v19371_v47  ;;  %v19575_v47 = vor.u32 %v842_v24, %v841_v6  ;;  %v935_v24 = vshrl.u32 %v19453_v52, 16  ;;  %v889_v6 = vrot.slane %v887_v13, 7  ;;  %v962_v8 = vshll.u32 %v19486_v31, 16 }
 0x142   : > { %16159 = vmatprep.mubr.msk.bf16.mxu1 %vm587_vm0, %v821_v18  ;;  %16331 = vmatprep.mubr.msk.bf16.mxu0 %vm587_vm0, %v2839_v19  ;;  %v849_v18 = vrot.slane %v847_v26, 7  ;;  %v19608_v19 = vor.u32 %v854_v30, %v853_v45  ;;  %v2874_v13 = vrot.slane %v2872_v60, 1  ;;  %v769_v30 = vld [vmem:[#allocation2 + $0xf0] sm:$0x80]  ;;  %v2898_v60 = vrot.slane %v2896_v37, 1 }
 0x143   : > { %16189 = vmatprep.subr.bf16.mxu1 %v18118_v14  ;;  %v845_v59 = vsel %vm785_vm2, %v837_v54, %v19575_v47  ;;  %v2870_v32 = vor.u32 %v2869_v39, %v935_v24  ;;  %v959_v54 = vshrl.u32 %v19486_v31, 16  ;;  %v883_v45 = vshrl.u32 %v769_v30, 16 }
 0x144   : > { %v857_v33 = vsel %vm785_vm2, %v849_v18, %v19608_v19  ;;  %v2906_v18 = vor.u32 %v2905_v9, %v971_v0  ;;  %v777_v9 = vld [vmem:[#allocation2 + $0x150] sm:$0x80] }
 0x145   : > { %16190 = vmatpush3.bf16.msra.mxu1 %v18118_v14  ;;  %v767_v14 = vld [vmem:[#allocation2 + $0xd8] sm:$0x80]  ;;  %v2875_v49 = vsel %vm1477_vm1, %v2870_v32, %v2874_v13  ;;  %v885_v20 = vrot.slane %v883_v45, 7  ;;  %v913_v32 = vrot.slane %v911_v63, 7  ;;  %v3199_v13 = vld [vmem:[#allocation2 + $0x60] sm:$0x80] }
 0x146   : > { %16191 = vmatprep.subr.bf16.mxu1 %v18121_v3  ;;  %v871_v62 = vshrl.u32 %v767_v14, 16  ;;  %v3232_v30 = vshrl.u32 %v3199_v13, 16  ;;  %v3201_v45 = vld [vmem:[#allocation2 + $0x78] sm:$0x80]  ;;  %v3207_v13 = vld [vmem:[#allocation2 + $0xc0] sm:$0x80] }
 0x147   : > { %v916_v37 = vor.u32 %v914_v34, %v913_v32  ;;  %v3244_v34 = vshrl.u32 %v3201_v45, 16  ;;  %v781_v32 = vld [vmem:[#allocation2 + $0x180] sm:$0x80] }
 0x148   : > { %16160 = vmatmul.mubr.msk.bf16.gmra.mrb[4].mxu1 %vm587_vm0, %v833_v51  ;;  %v2908_v51 = vshll.u32 %v2729_v44, 16  ;;  %v873_v26 = vrot.slane %v871_v62, 7  ;;  %v2922_v62 = vrot.slane %v2920_v22, 1 }
 0x149   : > { %16332 = vmatmul.mubr.msk.bf16.gmra.mrb[16].mxu0 %vm587_vm0, %v2851_v53  ;;  %16163 = vmatprep.mubr.msk.bf16.mxu1 %vm587_vm0, %v845_v59  ;;  %v19633_v53 = vld [vmem:[#allocation2 + $0x1b8] sm:$0xff]  ;;  %v19641_v59 = vor.u32 %v878_v10, %v877_v41  ;;  %v773_v10 = vld [vmem:[#allocation2 + $0x120] sm:$0x80]  ;;  %v901_v41 = vrot.slane %v899_v16, 7 }
 0x14a   : > { %16335 = vmatprep.mubr.msk.bf16.mxu0 %vm587_vm0, %v2863_v46  ;;  %16192 = vmatpush3.bf16.msra.mxu1 %v18121_v3  ;;  %v2893_v3 = vrot.slane %v962_v8, 1  ;;  %v771_v46 = vld [vmem:[#allocation2 + $0x108] sm:$0x80]  ;;  %v2915_v4 = vshll.u32 %v19633_v53, 16  ;;  %v2910_v35 = vrot.slane %v2908_v51, 1  ;;  %v2913_v36 = vshrl.u32 %v19633_v53, 16 }
 0x14b   : > { %16193 = vmatprep.subr.bf16.mxu1 %v18124_v1  ;;  %v881_v55 = vsel %vm785_vm2, %v873_v26, %v19641_v59  ;;  %v907_v12 = vshrl.u32 %v773_v10, 16  ;;  %v19668_v44 = vor.u32 %v902_v61, %v901_v41  ;;  %v937_v61 = vrot.slane %v935_v24, 7 }
 0x14c   : > { %v2894_v39 = vor.u32 %v2893_v3, %v959_v54  ;;  %v2917_v27 = vrot.slane %v2915_v4, 1  ;;  %v2911_v16 = vsel %vm1477_vm1, %v2906_v18, %v2910_v35  ;;  %v3246_v18 = vrot.slane %v3244_v34, 7  ;;  %v19725_v34 = vld [vmem:[#allocation2 + $0x68] sm:$0xff] }
 0x14d   : > { %v909_v3 = vrot.slane %v907_v12, 7  ;;  %v940_v10 = vor.u32 %v938_v25, %v937_v61  ;;  %v783_v12 = vld [vmem:[#allocation2 + $0x198] sm:$0x80] }
 0x14e   : > { %16194 = vmatpush3.bf16.msra.mxu1 %v18124_v1  ;;  %v892_v1 = vor.u32 %v890_v56, %v889_v6  ;;  %v2899_v56 = vsel %vm1477_vm1, %v2894_v39, %v2898_v60  ;;  %v895_v6 = vshrl.u32 %v771_v46, 16  ;;  %v931_v60 = vshrl.u32 %v777_v9, 16 }
 0x14f   : > { %16227 = vmatprep.subr.bf16.mxu1 %v19619_v29  ;;  %v917_v15 = vsel %vm785_vm2, %v909_v3, %v916_v37  ;;  %v3254_v52 = vsel %vm785_vm2, %v3246_v18, %v19564_v23  ;;  %v967_v45 = vshrl.u32 %v783_v12, 16  ;;  %v1452_v12 = vld [vmem:[#allocation2 + $0x88] sm:$0x1] }
 0x150   : > { %16164 = vmatmul.mubr.msk.bf16.gmra.mrb[8].mxu1 %vm587_vm0, %v857_v33  ;;  %v893_v14 = vsel %vm785_vm2, %v885_v20, %v892_v1  ;;  %v897_v63 = vrot.slane %v895_v6, 7  ;;  %v2918_v33 = vor.u32 %v2917_v27, %v2913_v36  ;;  %v3256_v1 = vshrl.u32 %v3203_v58, 16 }
 0x151   : > { %16336 = vmatmul.mubr.msk.bf16.gmra.mrb[20].mxu0 %vm587_vm0, %v2875_v49  ;;  %16167 = vmatprep.mubr.msk.bf16.mxu1 %vm587_vm0, %v869_v50  ;;  %v775_v49 = vld [vmem:[#allocation2 + $0x138] sm:$0x80]  ;;  %v3234_v50 = vrot.slane %v3232_v30, 7  ;;  %v933_v35 = vrot.slane %v931_v60, 7  ;;  %v955_v27 = vshrl.u32 %v781_v32, 16  ;;  %v3280_v30 = vshrl.u32 %v3207_v13, 16 }
 0x152   : > { %16339 = vmatprep.mubr.msk.bf16.mxu0 %vm587_vm0, %v2887_v42  ;;  %v925_v42 = vrot.slane %v923_v7, 7  ;;  %v905_v51 = vsel %vm785_vm2, %v897_v63, %v19668_v44  ;;  %v919_v26 = vshrl.u32 %v775_v49, 16  ;;  %v2923_v39 = vsel %vm1477_vm1, %v2918_v33, %v2922_v62  ;;  %v779_v7 = vld [vmem:[#allocation2 + $0x168] sm:$0x80]  ;;  %v18128_v33 = vld [vmem:[#allocation9 + $0xe8] sm:$0xff]  }
 0x153   : > { %v3242_v20 = vsel %vm785_vm2, %v3234_v50, %v19539_v5  ;;  %v3258_v41 = vrot.slane %v3256_v1, 7  ;;  %v943_v22 = vshrl.u32 %v779_v7, 16  ;;  %v941_v25 = vsel %vm785_vm2, %v933_v35, %v940_v10  ;;  %v3211_v49 = vld [vmem:[#allocation2 + $0xf0] sm:$0x80]  ;;  %v1450_v10 = vld [vmem:[#allocation2 + $0x70] sm:$0x1] }
 0x154   : > { %v921_v24 = vrot.slane %v919_v26, 7  ;;  %v928_v46 = vor.u32 %v926_v38, %v925_v42  ;;  %v19696_v38 = vld [vmem:[#allocation2 + $0xf8] sm:$0xff]  ;;  %v973_v62 = vrot.slane %v971_v0, 7  ;;  %v957_v50 = vrot.slane %v955_v27, 7  ;;  %v18130_v26 = vld [vmem:[#allocation9 + $0xf0] sm:$0xff]   ;;  %v18131_v32 = vld [vmem:[#allocation9 + $0xf8] sm:$0xff]  }
 0x155   : > { %v3308_v3 = vshrl.u32 %v19696_v38, 16  ;;  %v945_v23 = vrot.slane %v943_v22, 7  ;;  %v3282_v42 = vrot.slane %v3280_v30, 7  ;;  %v3304_v21 = vshrl.u32 %v3211_v49, 16 }
 0x156   : > { %v929_v6 = vsel %vm785_vm2, %v921_v24, %v928_v46  ;;  %v976_v1 = vor.u32 %v974_v11, %v973_v62  ;;  %v3213_v24 = vld [vmem:[#allocation2 + $0x108] sm:$0x80]  ;;  %v1505_v22 = vshll.u32 %v19725_v34, 16  ;;  %v1510_v27 = vshll.u32 %v1450_v10, 16  ;;  %v19758_v62 = vld [vmem:[#allocation9 + $0x100] sm:$0xff]  }
 0x157   : > { %v19730_v46 = vld [vmem:[#allocation2 + $0x128] sm:$0xff]  ;;  %v3306_v17 = vrot.slane %v3304_v21, 7 }
 0x158   : > { %16168 = vmatmul.mubr.msk.bf16.gmra.mrb[12].mxu1 %vm587_vm0, %v881_v55  ;;  %v1445_v55 = vld [vmem:[#allocation2 + $0x38] sm:$0xff]  ;;  %v3332_v30 = vshrl.u32 %v19730_v46, 16  ;;  %v1507_v49 = vrot.slane %v1505_v22, 1 }
 0x159   : > { %16340 = vmatmul.mubr.msk.bf16.gmra.mrb[24].mxu0 %vm587_vm0, %v2899_v56  ;;  %16171 = vmatprep.mubr.msk.bf16.mxu1 %vm587_vm0, %v893_v14  ;;  %v949_v56 = vrot.slane %v947_v43, 7  ;;  %v961_v14 = vrot.slane %v959_v54, 7  ;;  %v3266_v43 = vsel %vm785_vm2, %v3258_v41, %v19575_v47  ;;  %v1481_v63 = vshll.u32 %v1445_v55, 16  ;;  %v1446_v54 = vld [vmem:[#allocation2 + $0x40] sm:$0x1] }
 0x15a   : > { %16343 = vmatprep.mubr.msk.bf16.mxu0 %vm587_vm0, %v2911_v16  ;;  %v3209_v16 = vld [vmem:[#allocation2 + $0xd8] sm:$0x80]  ;;  %v3270_v47 = vrot.slane %v3268_v48, 7  ;;  %v1479_v58 = vshrl.u32 %v1445_v55, 16  ;;  %v19736_v41 = vld [vmem:[#allocation2 + $0x140] sm:$0xff] }
 0x15b   : > { %v952_v37 = vor.u32 %v950_v28, %v949_v56  ;;  %v964_v0 = vor.u32 %v962_v8, %v961_v14  ;;  %v3292_v9 = vshrl.u32 %v3209_v16, 16  ;;  %v1483_v61 = vrot.slane %v1481_v63, 1  ;;  %v19723_v8 = vld [vmem:[#allocation2 + $0x50] sm:$0xff]  ;;  %v3215_v56 = vld [vmem:[#allocation2 + $0x120] sm:$0x80]  ;;  %v19747_v48 = vld [vmem:[#allocation2 + $0x158] sm:$0xff] }
 0x15c   : > { %v3310_v28 = vrot.slane %v3308_v3, 7  ;;  %v3278_v31 = vsel %vm785_vm2, %v3270_v47, %v19608_v19  ;;  %v3290_v19 = vsel %vm785_vm2, %v3282_v42, %v19615_v57  ;;  %v1493_v13 = vshll.u32 %v19723_v8, 16 }
 0x15d   : > { %v965_v60 = vsel %vm785_vm2, %v957_v50, %v964_v0  ;;  %v3294_v7 = vrot.slane %v3292_v9, 7  ;;  %v1484_v18 = vor.u32 %v1483_v61, %v1479_v58  ;;  %v3316_v57 = vshrl.u32 %v3213_v24, 16  ;;  %v1454_v58 = vld [vmem:[#allocation2 + $0xa0] sm:$0x1] }
 0x15e   : > { %v1517_v63 = vshll.u32 %v19732_v2, 16  ;;  %v3328_v50 = vshrl.u32 %v3215_v56, 16  ;;  %v3335_v9 = vshll.u32 %v19730_v46, 16  ;;  %v1515_v42 = vshrl.u32 %v19732_v2, 16  ;;  %v19778_v2 = vld [vmem:[#allocation2 + $0x170] sm:$0xff] }
 0x15f   : > { %v3318_v47 = vrot.slane %v3316_v57, 7  ;;  %v3356_v61 = vshrl.u32 %v19747_v48, 16  ;;  %v1534_v24 = vshll.u32 %v1454_v58, 16  ;;  %v3359_v10 = vshll.u32 %v19747_v48, 16 }
 0x160   : > { %16172 = vmatmul.mubr.msk.bf16.gmra.mrb[16].mxu1 %vm587_vm0, %v905_v51  ;;  %v1486_v51 = vshll.u32 %v1446_v54, 16  ;;  %v1519_v21 = vrot.slane %v1517_v63, 1  ;;  %v3368_v22 = vshrl.u32 %v19778_v2, 16 }
 0x161   : > { %16344 = vmatmul.mubr.msk.bf16.gmra.mrb[28].mxu0 %vm587_vm0, %v2923_v39  ;;  %16175 = vmatprep.mubr.msk.bf16.mxu1 %vm587_vm0, %v917_v15  ;;  %v3311_v39 = vshll.u32 %v19696_v38, 16  ;;  %v953_v15 = vsel %vm785_vm2, %v945_v23, %v952_v37  ;;  %v3344_v37 = vshrl.u32 %v19736_v41, 16  ;;  %v3326_v56 = vsel %vm785_vm2, %v3318_v47, %v19668_v44  ;;  %v19800_v47 = vld [vmem:[#allocation2 + $0x188] sm:$0xff] }
 0x162   : > { %16355 = vmatprep.mubr.msk.bf16.mxu0 %vm587_vm0, %v3242_v20  ;;  %v969_v20 = vrot.slane %v967_v45, 7  ;;  %v1488_v35 = vrot.slane %v1486_v51, 1  ;;  %v1512_v45 = vrot.slane %v1510_v27, 1  ;;  %v19766_v51 = vld [vmem:[#allocation2 + $0xb0] sm:$0xff]  ;;  %v1536_v27 = vrot.slane %v1534_v24, 1 }
 0x163   : > { %v3313_v11 = vor.u32 %v3311_v39, %v3310_v28  ;;  %v1522_v28 = vshll.u32 %v1452_v12, 16  ;;  %v3370_v58 = vrot.slane %v3368_v22, 7 }
 0x164   : > { %v977_v14 = vsel %vm785_vm2, %v969_v20, %v976_v1  ;;  %v1489_v16 = vsel %vm1477_vm1, %v1484_v18, %v1488_v35  ;;  %v3358_v35 = vrot.slane %v3356_v61, 7 }
 0x165   : > { %v3314_v54 = vsel %vm785_vm2, %v3306_v17, %v3313_v11  ;;  %v1520_v17 = vor.u32 %v1519_v21, %v1515_v42  ;;  %v1524_v11 = vrot.slane %v1522_v28, 1  ;;  %v19805_v42 = vld [vmem:[#allocation2 + $0x180] sm:$0x80] }
 0x166   : > { %v3361_v44 = vor.u32 %v3359_v10, %v3358_v35  ;;  %v19813_v28 = vld [vmem:[#allocation2 + $0xe0] sm:$0xff] }
 0x167   : > { %v18129_v35 = vld [vmem:[#allocation9 + $0x70] sm:$0xff]  }
 0x168   : > { %16176 = vmatmul.mubr.msk.bf16.gmra.mrb[20].mxu1 %vm587_vm0, %v929_v6  ;;  %v19742_v6 = vld [vmem:[#allocation2 + $0x98] sm:$0xff] }
 0x169   : > { %16356 = vmatmul.mubr.msk.bf16.vlgmr.msra.gmra.mrb[0].mxu0 %vm587_vm0, %v3254_v52  ;;  %16179 = vmatprep.mubr.msk.bf16.mxu1 %vm587_vm0, %v941_v25  ;;  %v3302_v52 = vsel %vm785_vm2, %v3294_v7, %v19641_v59  ;;  %v1491_v25 = vshrl.u32 %v19723_v8, 16  ;;  %v1495_v59 = vrot.slane %v1493_v13, 1  ;;  %v1529_v0 = vshll.u32 %v19742_v6, 16 }
 0x16a   : > { %16359 = vmatprep.mubr.msk.bf16.mxu0 %vm587_vm0, %v3266_v43  ;;  %16388 = vmatpush3.bf16.msra.mxu0 %v19568_v40  ;;  %v1448_v40 = vld [vmem:[#allocation2 + $0x58] sm:$0x1]  ;;  %v1503_v43 = vshrl.u32 %v19725_v34, 16  ;;  %v3347_v34 = vshll.u32 %v19736_v41, 16  ;;  %v1527_v1 = vshrl.u32 %v19742_v6, 16  ;;  %v1541_v13 = vshll.u32 %v19766_v51, 16 }
 0x16b   : > { %16389 = vmatprep.subr.bf16.mxu0 %v18128_v33  ;;  %v1498_v55 = vshll.u32 %v1448_v40, 16  ;;  %v1496_v8 = vor.u32 %v1495_v59, %v1491_v25  ;;  %v3346_v40 = vrot.slane %v3344_v37, 7  ;;  %v1531_v7 = vrot.slane %v1529_v0, 1  ;;  %v1458_v59 = vld [vmem:[#allocation2 + $0xd0] sm:$0x1] }
 0x16c   : > { %v1508_v20 = vor.u32 %v1507_v49, %v1503_v43  ;;  %v1543_v0 = vrot.slane %v1541_v13, 1  ;;  %v1565_v13 = vshll.u32 %v19813_v28, 16 }
 0x16d   : > { %v1500_v23 = vrot.slane %v1498_v55, 1  ;;  %v3221_v55 = vld [vmem:[#allocation2 + $0x168] sm:$0x80]  ;;  %v3349_v57 = vor.u32 %v3347_v34, %v3346_v40  ;;  %v1532_v25 = vor.u32 %v1531_v7, %v1527_v1  ;;  %v19820_v1 = vld [vmem:[#allocation2 + $0x1a0] sm:$0xff] }
 0x16e   : > { %16390 = vmatpush3.bf16.msra.mxu0 %v18128_v33  ;;  %v3217_v33 = vld [vmem:[#allocation2 + $0x138] sm:$0x80]  ;;  %v1513_v43 = vsel %vm1477_vm1, %v1508_v20, %v1512_v45  ;;  %v1460_v20 = vld [vmem:[#allocation2 + $0xe8] sm:$0x1] }
 0x16f   : > { %16391 = vmatprep.subr.bf16.mxu0 %v18130_v26 }
 0x170   : > { %16180 = vmatmul.mubr.msk.bf16.gmra.mrb[24].mxu1 %vm587_vm0, %v953_v15  ;;  %v3340_v15 = vshrl.u32 %v3217_v33, 16  ;;  %v18126_v33 = vld [vmem:[#allocation9 + $0x68] sm:$0xff]  }
 0x171   : > { %16360 = vmatmul.mubr.msk.bf16.gmra.mrb[4].mxu0 %vm587_vm0, %v3278_v31  ;;  %16183 = vmatprep.mubr.msk.bf16.mxu1 %vm587_vm0, %v965_v60  ;;  %v3219_v31 = vld [vmem:[#allocation2 + $0x150] sm:$0x80]  ;;  %v1456_v60 = vld [vmem:[#allocation2 + $0xb8] sm:$0x1] }
 0x172   : > { %16363 = vmatprep.mubr.msk.bf16.mxu0 %vm587_vm0, %v3290_v19  ;;  %16392 = vmatpush3.bf16.msra.mxu0 %v18130_v26  ;;  %v3334_v26 = vrot.slane %v3332_v30, 7  ;;  %v3330_v19 = vrot.slane %v3328_v50, 7  ;;  %v3352_v18 = vshrl.u32 %v3219_v31, 16  ;;  %v3342_v6 = vrot.slane %v3340_v15, 7  ;;  %v8782_v15 = vpop.xlane.xlu1 %8781  ;;  %v8776_v31 = vpop.xlane.xlu0 %8775 }
 0x173   : > { %16393 = vmatprep.subr.bf16.mxu0 %v18131_v32  ;;  %v1546_v12 = vshll.u32 %v1456_v60, 16  ;;  %v1539_v50 = vshrl.u32 %v19766_v51, 16  ;;  %v1537_v51 = vsel %vm1477_vm1, %v1532_v25, %v1536_v27  ;;  %v3380_v60 = vshrl.u32 %v19800_v47, 16 }
 0x174   : > { %v3354_v63 = vrot.slane %v3352_v18, 7  ;;  %v3350_v45 = vsel %vm785_vm2, %v3342_v6, %v3349_v57  ;;  %v3225_v18 = vld [vmem:[#allocation2 + $0x198] sm:$0x80] }
 0x175   : > { %v3382_v27 = vrot.slane %v3380_v60, 7 }
 0x176   : > { %16394 = vmatpush3.bf16.msra.mxu0 %v18131_v32  ;;  %v3337_v32 = vor.u32 %v3335_v9, %v3334_v26  ;;  %v3371_v26 = vshll.u32 %v19778_v2, 16  ;;  %v8779_v25 = vpop.xlane.xlu0 %8778 }
 0x177   : > { %16427 = vmatprep.subr.bf16.mxu0 %v19758_v62 }
 0x178   : > { %16184 = vmatmul.mubr.msk.bf16.gmra.mrb[28].mxu1 %vm587_vm0, %v977_v14  ;;  %v19792_v14 = vld [vmem:[#allocation3] ss:$0 sm:$0xff]  ;;  %v3338_v49 = vsel %vm785_vm2, %v3330_v19, %v3337_v32  ;;  %v1544_v32 = vor.u32 %v1543_v0, %v1539_v50  ;;  %v3373_v6 = vor.u32 %v3371_v26, %v3370_v58  ;;  %v1567_v50 = vrot.slane %v1565_v13, 1 }
 0x179   : > { %16364 = vmatmul.mubr.msk.bf16.gmra.mrb[8].mxu0 %vm587_vm0, %v3302_v52  ;;  %16195 = vmatprep.mubr.msk.bf16.mxu1 %vm587_vm0, %v1489_v16  ;;  %v1501_v52 = vsel %vm1477_vm1, %v1496_v8, %v1500_v23  ;;  %v19795_v16 = vld [vmem:[#allocation2 + $0xc8] sm:$0xff]  ;;  %v1525_v23 = vsel %vm1477_vm1, %v1520_v17, %v1524_v11  ;;  %v1548_v8 = vrot.slane %v1546_v12, 1  ;;  %v8879_v7 = vadd.f32 %v19792_v14, %v8782_v15 }
 0x17a   : > { %16367 = vmatprep.mubr.msk.bf16.mxu0 %vm587_vm0, %v3314_v54  ;;  %v3364_v54 = vshrl.u32 %v3221_v55, 16  ;;  %v1553_v21 = vshll.u32 %v19795_v16, 16  ;;  %v1551_v40 = vshrl.u32 %v19795_v16, 16  ;;  %v8877_v24 = vadd.f32 %v19792_v14, %v8776_v31 }
 0x17b   : > { %v1558_v17 = vshll.u32 %v1458_v59, 16  ;;  %v3376_v11 = vshrl.u32 %v19805_v42, 16  ;;  %v15336_v55 = vmul.f32 -1.442695, %v8879_v7  ;;  %v3383_v12 = vshll.u32 %v19800_v47, 16 }
 0x17c   : > { %v3366_v19 = vrot.slane %v3364_v54, 7  ;;  %v1555_v57 = vrot.slane %v1553_v21, 1  ;;  %v1563_v16 = vshrl.u32 %v19813_v28, 16  ;;  %v8878_v54 = vadd.f32 %v19792_v14, %v8779_v25  ;;  %v3227_v42 = vld [vmem:[#allocation2 + $0x1b0] sm:$0x80] }
 0x17d   : > { %18209 = vpow2.f32 %v15336_v55  ;;  %v1570_v59 = vshll.u32 %v1460_v20, 16  ;;  %v3388_v0 = vshrl.u32 %v3225_v18, 16  ;;  %v1560_v21 = vrot.slane %v1558_v17, 1  ;;  %v8788_v55 = vpop.xlane.xlu0 %8787 }
 0x17e   : > { %v15335_v58 = vmul.f32 -1.442695, %v8878_v54  ;;  %v3395_v28 = vshll.u32 %v19820_v1, 16  ;;  %v1579_v15 = vrot.slane %v3311_v39, 1  ;;  %v1556_v18 = vor.u32 %v1555_v57, %v1551_v40  ;;  %v19872_v54 = vld [vmem:[#allocation9 + $0x80] sm:$0xff]  }
 0x17f   : > { %v19852_v39 = vor.u32 %v3383_v12, %v3382_v27  ;;  %v3390_v17 = vrot.slane %v3388_v0, 7  ;;  %v3406_v40 = vrot.slane %v2913_v36, 7 }
 0x180   : > { %16196 = vmatmul.mubr.msk.bf16.vlgmr.msra.gmra.mrb[0].mxu1 %vm587_vm0, %v1501_v52  ;;  %v8785_v52 = vpop.xlane.xlu1 %8784  ;;  %v1561_v27 = vsel %vm1477_vm1, %v1556_v18, %v1560_v21  ;;  %v3229_v21 = vld [vmem:[#allocation2 + $0x1c8] sm:$0x80]  ;;  %v1663_v47 = vrot.slane %v3395_v28, 1 }
 0x181   : > { %16368 = vmatmul.mubr.msk.bf16.gmra.mrb[12].mxu0 %vm587_vm0, %v3326_v56  ;;  %16228 = vmatpush3.bf16.msra.mxu1 %v19619_v29  ;;  %v3362_v29 = vsel %vm785_vm2, %v3354_v63, %v3361_v44  ;;  %v15334_v56 = vmul.f32 -1.442695, %v8877_v24  ;;  %v1462_v63 = vld [vmem:[#allocation2 + $0x100] sm:$0x1]  ;;  %v8880_v44 = vadd.f32 %v19792_v14, %v8785_v52  ;;  %v1464_v52 = vld [vmem:[#allocation2 + $0x118] sm:$0x1]  ;;  %v8794_v0 = vpop.xlane.xlu0 %8793 }
 0x182   : > { %16199 = vmatprep.mubr.msk.bf16.mxu1 %vm587_vm0, %v1513_v43  ;;  %16371 = vmatprep.mubr.msk.bf16.mxu0 %vm587_vm0, %v3338_v49  ;;  %v3392_v43 = vshrl.u32 %v19820_v1, 16  ;;  %v18132_v49 = vld [vmem:[#allocation9 + $0x78] sm:$0xff]   ;;  %v1582_v24 = vshll.u32 %v1462_v63, 16 }
 0x183   : > { %16229 = vmatprep.subr.bf16.mxu1 %v18126_v33  ;;  %18211 = vpow2.f32 %v15334_v56  ;;  %v15337_v31 = vmul.f32 -1.442695, %v8880_v44  ;;  %v1580_v56 = vor.u32 %v3308_v3, %v1579_v15  ;;  %v19867_v3 = vld [vmem:[#allocation2 + $0x1d0] sm:$0xff] }
 0x184   : > { %v8791_v7 = vpop.xlane.xlu1 %8790  ;;  %v3394_v20 = vrot.slane %v3392_v43, 7  ;;  %18213 = vpow2.f32 %v15335_v58  ;;  %v1584_v57 = vrot.slane %v1582_v24, 1  ;;  %v1594_v58 = vshll.u32 %v1464_v52, 16  ;;  %v1466_v24 = vld [vmem:[#allocation2 + $0x130] sm:$0x1] }
 0x185   : > { %16230 = vmatpush3.bf16.msra.mxu1 %v18126_v33  ;;  %v1549_v33 = vsel %vm1477_vm1, %v1544_v32, %v1548_v8  ;;  %v3374_v8 = vsel %vm785_vm2, %v3366_v19, %v3373_v6  ;;  %v3378_v32 = vrot.slane %v3376_v11, 7  ;;  %v19854_v19 = vld [vmem:[#allocation2 + $0x110] sm:$0xff]  ;;  %18215 = vpow2.f32 %v15337_v31  ;;  %v1468_v52 = vld [vmem:[#allocation2 + $0x148] sm:$0x1] }
 0x186   : > { %16231 = vmatprep.subr.bf16.mxu1 %v18129_v35  ;;  %v3397_v6 = vor.u32 %v3395_v28, %v3394_v20  ;;  %v1587_v63 = vshrl.u32 %v19854_v19, 16  ;;  %v1589_v44 = vshll.u32 %v19854_v19, 16  ;;  %v8800_v19 = vpop.xlane.xlu0 %8799 }
 0x187   : > { %v3386_v38 = vsel %vm785_vm2, %v3378_v32, %v19852_v39 }
 0x188   : > { %16200 = vmatmul.mubr.msk.bf16.gmra.mrb[4].mxu1 %vm587_vm0, %v1525_v23  ;;  %v8882_v23 = vadd.f32 %v19792_v14, %v8791_v7  ;;  %v8797_v11 = vpop.xlane.xlu1 %8796  ;;  %v8883_v7 = vadd.f32 %v19792_v14, %v8794_v0  ;;  %v3398_v20 = vsel %vm785_vm2, %v3390_v17, %v3397_v6 }
 0x189   : > { %16372 = vmatmul.mubr.msk.bf16.gmra.mrb[16].mxu0 %vm587_vm0, %v3350_v45  ;;  %16203 = vmatprep.mubr.msk.bf16.mxu1 %vm587_vm0, %v1537_v51  ;;  %v1568_v45 = vor.u32 %v1567_v50, %v1563_v16  ;;  %v1572_v51 = vrot.slane %v1570_v59, 1  ;;  %v8884_v25 = vadd.f32 %v19792_v14, %v8797_v11  ;;  %v18210_v59 = vpop.eup %18209  ;;  %v1606_v11 = vshll.u32 %v1466_v24, 16 }
 0x18a   : > { %16375 = vmatprep.mubr.msk.bf16.mxu0 %vm587_vm0, %v3362_v29  ;;  %16232 = vmatpush3.bf16.msra.mxu1 %v18129_v35  ;;  %v15339_v13 = vmul.f32 -1.442695, %v8882_v23  ;;  %v3400_v29 = vshrl.u32 %v3227_v42, 16  ;;  %v8881_v35 = vadd.f32 %v19792_v14, %v8788_v55  ;;  %v9007_v18 = vadd.f32 1.0, %v18210_v59 }
 0x18b   : > { %16233 = vmatprep.subr.bf16.mxu1 %v18132_v49  ;;  %v1573_v16 = vsel %vm1477_vm1, %v1568_v45, %v1572_v51  ;;  %v15341_v50 = vmul.f32 -1.442695, %v8884_v25  ;;  %v15340_v32 = vmul.f32 -1.442695, %v8883_v7  ;;  %v3412_v45 = vshrl.u32 %v3229_v21, 16 }
 0x18c   : > { %18217 = vpow2.f32 %v15339_v13  ;;  %v15338_v36 = vmul.f32 -1.442695, %v8881_v35  ;;  %v3402_v42 = vrot.slane %v3400_v29, 7  ;;  %v8803_v31 = vpop.xlane.xlu1 %8802  ;;  %v1603_v13 = vrot.slane %v3335_v9, 1  ;;  %v19892_v9 = vld [vmem:[#allocation2 + $0x160] sm:$0x1] }
 0x18d   : > { %v18212_v15 = vpop.eup %18211  ;;  %v8886_v53 = vadd.f32 %v19792_v14, %v8803_v31  ;;  %v8885_v29 = vadd.f32 %v19792_v14, %v8800_v19  ;;  %v1618_v7 = vshll.u32 %v1468_v52, 16 }
 0x18e   : > { %16234 = vmatpush3.bf16.msra.mxu1 %v18132_v49  ;;  %v3409_v49 = vor.u32 %v3406_v40, %v2915_v4  ;;  %18219 = vpow2.f32 %v15338_v36  ;;  %v9005_v23 = vadd.f32 1.0, %v18212_v15  ;;  %v3416_v4 = vshrl.u32 %v19867_v3, 16  ;;  %v18214_v55 = vpop.eup %18213 }
 0x18f   : > { %17218 = vmatprep.subr.bf16.mxu1 %v19872_v54  ;;  %18221 = vpow2.f32 %v15341_v50  ;;  %v15343_v51 = vmul.f32 -1.442695, %v8886_v53  ;;  %v3419_v40 = vshll.u32 %v19867_v3, 16  ;;  %v9006_v35 = vadd.f32 1.0, %v18214_v55  ;;  %v18216_v25 = vpop.eup %18215  ;;  %v8806_v3 = vpop.xlane.xlu0 %8805  ;;  %v1472_v55 = vld [vmem:[#allocation2 + $0x178] sm:$0x1] }
 0x190   : > { %16204 = vmatmul.mubr.msk.bf16.gmra.mrb[8].mxu1 %vm587_vm0, %v1549_v33  ;;  %v1585_v33 = vsel %vm1477_vm1, %v1580_v56, %v1584_v57  ;;  %18223 = vrcp.f32 %v9005_v23  ;;  %v3410_v17 = vsel %vm785_vm2, %v3402_v42, %v3409_v49  ;;  %v8809_v56 = vpop.xlane.xlu1 %8808  ;;  %v3418_v57 = vrot.slane %v3416_v4, 7 }
 0x191   : > { %16376 = vmatmul.mubr.msk.bf16.gmra.mrb[20].mxu0 %vm587_vm0, %v3374_v8  ;;  %16207 = vmatprep.mubr.msk.bf16.mxu1 %vm587_vm0, %v1561_v27  ;;  %v1591_v8 = vrot.slane %v1589_v44, 1  ;;  %18225 = vpow2.f32 %v15340_v32  ;;  %v8888_v6 = vadd.f32 %v19792_v14, %v8809_v56  ;;  %v15342_v27 = vmul.f32 -1.442695, %v8885_v29 }
 0x192   : > { %16379 = vmatprep.mubr.msk.bf16.mxu0 %vm587_vm0, %v3386_v38  ;;  %18227 = vpow2.f32 %v15343_v51  ;;  %v1596_v36 = vrot.slane %v1594_v58, 1  ;;  %v3414_v50 = vrot.slane %v3412_v45, 7  ;;  %v1604_v0 = vor.u32 %v3332_v30, %v1603_v13 }
 0x193   : > { %18229 = vrcp.f32 %v9007_v18  ;;  %v1592_v38 = vor.u32 %v1591_v8, %v1587_v63  ;;  %v15345_v59 = vmul.f32 -1.442695, %v8888_v6  ;;  %v8887_v63 = vadd.f32 %v19792_v14, %v8806_v3  ;;  %v8812_v23 = vpop.xlane.xlu0 %8811  ;;  %v1474_v6 = vld [vmem:[#allocation2 + $0x190] sm:$0x1] }
 0x194   : > { %18231 = vrcp.f32 %v9006_v35  ;;  %v8815_v49 = vpop.xlane.xlu1 %8814  ;;  %v1608_v58 = vrot.slane %v1606_v11, 1  ;;  %v9008_v21 = vadd.f32 1.0, %v18216_v25  ;;  %v1615_v30 = vrot.slane %v3347_v34, 1 }
 0x195   : > { %18233 = vpow2.f32 %v15342_v27  ;;  %v8890_v15 = vadd.f32 %v19792_v14, %v8815_v49  ;;  %v15344_v46 = vmul.f32 -1.442695, %v8887_v63  ;;  %v1627_v53 = vrot.slane %v3359_v10, 1 }
 0x196   : > { %v18218_v44 = vpop.eup %18217  ;;  %18235 = vpow2.f32 %v15345_v59  ;;  %v1630_v4 = vshll.u32 %v19892_v9, 16  ;;  %v8889_v8 = vadd.f32 %v19792_v14, %v8812_v23  ;;  %v1609_v45 = vsel %vm1477_vm1, %v1604_v0, %v1608_v58  ;;  %v18340_v9 = vld [vmem:[#allocation2 + $0x68] sm:$0xff] }
 0x197   : > { %v9010_v42 = vadd.f32 1.0, %v18218_v44  ;;  %v15347_v24 = vmul.f32 -1.442695, %v8890_v15  ;;  %v1616_v11 = vor.u32 %v3344_v37, %v1615_v30  ;;  %v1620_v35 = vrot.slane %v1618_v7, 1  ;;  %v19941_v7 = vld [vmem:[#allocation2 + $0x1a8] sm:$0x1] }
 0x198   : > { %16208 = vmatmul.mubr.msk.bf16.gmra.mrb[12].mxu1 %vm587_vm0, %v1573_v16  ;;  %v3421_v16 = vor.u32 %v3419_v40, %v3418_v57  ;;  %v18220_v31 = vpop.eup %18219  ;;  %v8821_v32 = vpop.xlane.xlu1 %8820  ;;  %v15346_v10 = vmul.f32 -1.442695, %v8889_v8  ;;  %v1632_v44 = vrot.slane %v1630_v4, 1  ;;  %v1642_v48 = vshll.u32 %v1472_v55, 16  ;;  %v19963_v55 = vld [vmem:[#allocation2 + $0x98] sm:$0xff] }
 0x199   : > { %16380 = vmatmul.mubr.msk.bf16.gmra.mrb[24].mxu0 %vm587_vm0, %v3398_v20  ;;  %16211 = vmatprep.mubr.msk.bf16.mxu1 %vm587_vm0, %v1585_v33  ;;  %18237 = vrcp.f32 %v9010_v42  ;;  %v18222_v20 = vpop.eup %18221  ;;  %v1597_v33 = vsel %vm1477_vm1, %v1592_v38, %v1596_v36  ;;  %v9009_v34 = vadd.f32 1.0, %v18220_v31  ;;  %v8892_v19 = vadd.f32 %v19792_v14, %v8821_v32  ;;  %v8818_v40 = vpop.xlane.xlu0 %8817  ;;  %v18134_v32 = vld [vmem:[#allocation9 + $0x108] sm:$0xff]  }
 0x19a   : > { %16383 = vmatprep.mubr.msk.bf16.mxu0 %vm587_vm0, %v3410_v17  ;;  %v9012_v18 = vadd.f32 1.0, %v18222_v20  ;;  %18239 = vpow2.f32 %v15344_v46  ;;  %v19910_v51 = vpop.eup %18223  ;;  %v3422_v17 = vsel %vm785_vm2, %v3414_v50, %v3421_v16  ;;  %v8891_v27 = vadd.f32 %v19792_v14, %v8818_v40 }
 0x19b   : > { %18241 = vrcp.f32 %v9008_v21  ;;  %v18226_v13 = vpop.eup %18225  ;;  %9103 = vperm.xlu0 %18097, %v19910_v51   ;;  %v15349_v29 = vmul.f32 -1.442695, %v8892_v19  ;;  %v1628_v38 = vor.u32 %v3356_v61, %v1627_v53  ;;  %v1639_v50 = vrot.slane %v3371_v26, 1 }
 0x19c   : > { %18243 = vrcp.f32 %v9012_v18  ;;  %v18228_v56 = vpop.eup %18227  ;;  %v8827_v25 = vpop.xlane.xlu1 %8826  ;;  %v9011_v41 = vadd.f32 1.0, %v18226_v13  ;;  %v15348_v3 = vmul.f32 -1.442695, %v8891_v27  ;;  %v1621_v49 = vsel %vm1477_vm1, %v1616_v11, %v1620_v35 }
 0x19d   : > { %18245 = vpow2.f32 %v15347_v24  ;;  %v19918_v57 = vpop.eup %18229  ;;  %v9014_v52 = vadd.f32 1.0, %v18228_v56  ;;  %v8894_v37 = vadd.f32 %v19792_v14, %v8827_v25  ;;  %v8824_v42 = vpop.xlane.xlu0 %8823  ;;  %v1651_v63 = vrot.slane %v3383_v12, 1  ;;  %v19944_v24 = vld [vmem:[#allocation2 + $0x48] sm:$0x80]  ;;  %v18343_v56 = vld [vmem:[#allocation2 + $0x50] sm:$0xff] }
 0x19e   : > { %18247 = vpow2.f32 %v15346_v10  ;;  %v19925_v36 = vpop.eup %18231  ;;  %v8893_v16 = vadd.f32 %v19792_v14, %v8824_v42  ;;  %v1654_v31 = vshll.u32 %v1474_v6, 16  ;;  %v1633_v30 = vsel %vm1477_vm1, %v1628_v38, %v1632_v44  ;;  %v19983_v42 = vld [vmem:[#allocation2 + $0x60] sm:$0x80] }
 0x19f   : > { %18249 = vrcp.f32 %v9009_v34  ;;  %v18234_v59 = vpop.eup %18233  ;;  %9108 = vperm.xlu1 %18098, %v19925_v36   ;;  %v15351_v0 = vmul.f32 -1.442695, %v8894_v37  ;;  %v1640_v4 = vor.u32 %v3368_v22, %v1639_v50  ;;  %v1644_v18 = vrot.slane %v1642_v48, 1  ;;  %v19953_v34 = vld [vmem:[#allocation2 + $0x80] sm:$0xff] }
 0x1a0   : > { %16212 = vmatmul.mubr.msk.bf16.gmra.mrb[16].mxu1 %vm587_vm0, %v1597_v33  ;;  %18251 = vrcp.f32 %v9014_v52  ;;  %v18236_v61 = vpop.eup %18235  ;;  %v8833_v15 = vpop.xlane.xlu1 %8832  ;;  %v9013_v26 = vadd.f32 1.0, %v18234_v59  ;;  %v15350_v12 = vmul.f32 -1.442695, %v8893_v16  ;;  %v1656_v2 = vrot.slane %v1654_v31, 1 }
 0x1a1   : > { %16384 = vmatmul.mubr.msk.bf16.gmra.mrb[28].mxu0 %vm587_vm0, %v3422_v17  ;;  %16215 = vmatprep.mubr.msk.bf16.mxu1 %vm587_vm0, %v1609_v45  ;;  %18253 = vpow2.f32 %v15349_v29  ;;  %v9016_v21 = vadd.f32 1.0, %v18236_v61  ;;  %v8896_v46 = vadd.f32 %v19792_v14, %v8833_v15  ;;  %v8830_v53 = vpop.xlane.xlu0 %8829  ;;  %v1652_v17 = vor.u32 %v3380_v60, %v1651_v63 }
 0x1a2   : > { %16395 = vmatprep.mubr.msk.bf16.mxu0 %vm587_vm0, %v18340_v9  ;;  %18255 = vpow2.f32 %v15348_v3  ;;  %v8895_v19 = vadd.f32 %v19792_v14, %v8830_v53  ;;  %v1981_v29 = vshrl.u32 %v18343_v56, 16  ;;  %v1666_v60 = vshll.u32 %v19941_v7, 16 }
 0x1a3   : > { %v19935_v58 = vpop.eup %18237  ;;  %18257 = vrcp.f32 %v9011_v41  ;;  %9113 = vperm.xlu1 %18098, %v19918_v57   ;;  %v15353_v33 = vmul.f32 -1.442695, %v8896_v46  ;;  %v1645_v27 = vsel %vm1477_vm1, %v1640_v4, %v1644_v18  ;;  %v1977_v38 = vshrl.u32 %v19944_v24, 16  ;;  %v18135_v41 = vld [vmem:[#allocation9 + $0x110] sm:$0xff]   ;;  %v1948_v4 = vld [vmem:[#allocation2 + $0x78] sm:$0x80] }
 0x1a4   : > { %9128 = vperm.xlu0 %18097, %v19935_v58   ;;  %v18240_v20 = vpop.eup %18239  ;;  %18259 = vrcp.f32 %v9016_v21  ;;  %v8839_v45 = vpop.xlane.xlu1 %8838  ;;  %v15352_v52 = vmul.f32 -1.442695, %v8895_v19  ;;  %v1657_v44 = vsel %vm1477_vm1, %v1652_v17, %v1656_v2  ;;  %v1983_v48 = vrot.slane %v1981_v29, 7  ;;  %v19999_v24 = vld [vmem:[#allocation2 + $0xc8] sm:$0xff] }
 0x1a5   : > { %v19946_v23 = vpop.eup %18241  ;;  %18261 = vpow2.f32 %v15351_v0  ;;  %v9015_v13 = vadd.f32 1.0, %v18240_v20  ;;  %v8898_v10 = vadd.f32 %v19792_v14, %v8839_v45  ;;  %v8836_v25 = vpop.xlane.xlu0 %8835  ;;  %v1668_v7 = vrot.slane %v1666_v60, 1 }
 0x1a6   : > { %v19951_v8 = vpop.eup %18243  ;;  %18263 = vpow2.f32 %v15350_v12  ;;  %v8897_v28 = vadd.f32 %v19792_v14, %v8836_v25  ;;  %v1989_v17 = vshrl.u32 %v19983_v42, 16  ;;  %v2020_v42 = vshll.u32 %v19963_v55, 16 }
 0x1a7   : > { %v18246_v22 = vpop.eup %18245  ;;  %18265 = vrcp.f32 %v9013_v26  ;;  %9118 = vperm.xlu1 %18098, %v19946_v23   ;;  %v15355_v6 = vmul.f32 -1.442695, %v8898_v10  ;;  %v19990_v26 = vld [vmem:[#allocation2 + $0xb0] sm:$0xff]  ;;  %v2001_v10 = vshrl.u32 %v1948_v4, 16  ;;  %v2041_v4 = vshrl.u32 %v19999_v24, 16 }
 0x1a8   : > { %16216 = vmatmul.mubr.msk.bf16.gmra.mrb[20].mxu1 %vm587_vm0, %v1621_v49  ;;  %9138 = vperm.xlu0 %18097, %v19951_v8   ;;  %v18248_v40 = vpop.eup %18247  ;;  %v9018_v11 = vadd.f32 1.0, %v18246_v22  ;;  %18267 = vpow2.f32 %v15353_v33  ;;  %v8845_v9 = vpop.xlane.xlu1 %8844  ;;  %v18136_v49 = vld [vmem:[#allocation9 + $0x118] sm:$0xff]   ;;  %v15354_v15 = vmul.f32 -1.442695, %v8897_v28  ;;  %v1979_v33 = vrot.slane %v1977_v38, 7  ;;  %v18347_v28 = vld [vmem:[#allocation2 + $0xf8] sm:$0xff] }
 0x1a9   : > { %16396 = vmatmul.mubr.msk.bf16.vlgmr.msra.gmra.mrb[0].mxu0 %vm587_vm0, %v19953_v34  ;;  %16219 = vmatprep.mubr.msk.bf16.mxu1 %vm587_vm0, %v1633_v30  ;;  %v19972_v35 = vpop.eup %18249  ;;  %v9017_v3 = vadd.f32 1.0, %v18248_v40  ;;  %v8900_v50 = vadd.f32 %v19792_v14, %v8845_v9  ;;  %v8842_v16 = vpop.xlane.xlu0 %8841  ;;  %v1664_v30 = vor.u32 %v3392_v43, %v1663_v47  ;;  %v2005_v43 = vshrl.u32 %v19953_v34, 16 }
 0x1aa   : > { %16399 = vmatprep.mubr.msk.bf16.mxu0 %vm587_vm0, %v19963_v55  ;;  %16428 = vmatpush3.bf16.msra.mxu0 %v19758_v62  ;;  %v19976_v37 = vpop.eup %18251  ;;  %18269 = vrcp.f32 %v9018_v11  ;;  %v1984_v62 = vshll.u32 %v18343_v56, 16  ;;  %v8899_v46 = vadd.f32 %v19792_v14, %v8842_v16  ;;  %v1991_v38 = vrot.slane %v1989_v17, 7 }
 0x1ab   : > { %16429 = vmatprep.subr.bf16.mxu0 %v18134_v32  ;;  %v18254_v59 = vpop.eup %18253  ;;  %18271 = vrcp.f32 %v9015_v13  ;;  %9123 = vperm.xlu1 %18098, %v19972_v35   ;;  %v15357_v21 = vmul.f32 -1.442695, %v8900_v50  ;;  %v1669_v13 = vsel %vm1477_vm1, %v1664_v30, %v1668_v7  ;;  %v2007_v60 = vrot.slane %v2005_v43, 7 }
 0x1ac   : > { %9148 = vperm.xlu0 %18097, %v19976_v37   ;;  %v18256_v61 = vpop.eup %18255  ;;  %v9020_v0 = vadd.f32 1.0, %v18254_v59  ;;  %18273 = vpow2.f32 %v15355_v6  ;;  %v1986_v53 = vor.u32 %v1984_v62, %v1983_v48  ;;  %v15356_v1 = vmul.f32 -1.442695, %v8899_v46  ;;  %v1954_v46 = vld [vmem:[#allocation2 + $0xc0] sm:$0x80] }
 0x1ad   : > { %v19985_v63 = vpop.eup %18257  ;;  %18275 = vpow2.f32 %v15352_v52  ;;  %v9019_v12 = vadd.f32 1.0, %v18256_v61  ;;  %v8848_v19 = vpop.xlane.xlu0 %8847  ;;  %v2008_v6 = vshll.u32 %v19953_v34, 16  ;;  %v2017_v34 = vshrl.u32 %v19963_v55, 16 }
 0x1ae   : > { %16430 = vmatpush3.bf16.msra.mxu0 %v18134_v32  ;;  %v19988_v31 = vpop.eup %18259  ;;  %18277 = vrcp.f32 %v9020_v0  ;;  %v8901_v22 = vadd.f32 %v19792_v14, %v8848_v19  ;;  %v1987_v40 = vsel %vm785_vm2, %v1979_v33, %v1986_v53  ;;  %v1950_v14 = vld [vmem:[#allocation2 + $0x90] sm:$0x80]  ;;  %v2029_v62 = vshrl.u32 %v19990_v26, 16 }
 0x1af   : > { %16431 = vmatprep.subr.bf16.mxu0 %v18135_v41  ;;  %v18262_v20 = vpop.eup %18261  ;;  %18279 = vrcp.f32 %v9017_v3  ;;  %9133 = vperm.xlu1 %18098, %v19985_v63   ;;  %v2003_v50 = vrot.slane %v2001_v10, 7  ;;  %v2010_v48 = vor.u32 %v2008_v6, %v2007_v60  ;;  %v2013_v0 = vshrl.u32 %v1950_v14, 16  ;;  %v18350_v60 = vld [vmem:[#allocation9 + $0x88] sm:$0xff]  }
 0x1b0   : > { %16220 = vmatmul.mubr.msk.bf16.gmra.mrb[24].mxu1 %vm587_vm0, %v1645_v27  ;;  %9158 = vperm.xlu0 %18097, %v19988_v31   ;;  %v18264_v18 = vpop.eup %18263  ;;  %v9022_v32 = vadd.f32 1.0, %v18262_v20  ;;  %18281 = vpow2.f32 %v15357_v21  ;;  %v15358_v47 = vmul.f32 -1.442695, %v8901_v22  ;;  %v20019_v27 = vld [vmem:[#allocation2 + $0xe0] sm:$0xff]  ;;  %v1999_v21 = vsel %vm785_vm2, %v1991_v38, %v19539_v5 }
 0x1b1   : > { %16400 = vmatmul.mubr.msk.bf16.gmra.mrb[4].mxu0 %vm587_vm0, %v19990_v26  ;;  %16223 = vmatprep.mubr.msk.bf16.mxu1 %vm587_vm0, %v1657_v44  ;;  %v20005_v45 = vpop.eup %18265  ;;  %18283 = vpow2.f32 %v15354_v15  ;;  %v9021_v29 = vadd.f32 1.0, %v18264_v18  ;;  %v1952_v44 = vld [vmem:[#allocation2 + $0xa8] sm:$0x80]  ;;  %v2019_v15 = vrot.slane %v2017_v34, 7  ;;  %v2031_v20 = vrot.slane %v2029_v62, 7 }
 0x1b2   : > { %16403 = vmatprep.mubr.msk.bf16.mxu0 %vm587_vm0, %v19999_v24  ;;  %16432 = vmatpush3.bf16.msra.mxu0 %v18135_v41  ;;  %v18268_v2 = vpop.eup %18267  ;;  %18285 = vrcp.f32 %v9022_v32  ;;  %v2025_v16 = vshrl.u32 %v1952_v44, 16  ;;  %v2011_v55 = vsel %vm785_vm2, %v2003_v50, %v2010_v48  ;;  %v1956_v18 = vld [vmem:[#allocation2 + $0xd8] sm:$0x80]  ;;  %v2015_v32 = vrot.slane %v2013_v0, 7  ;;  %v18351_v44 = vld [vmem:[#allocation9 + $0x90] sm:$0xff]  }
 0x1b3   : > { %16433 = vmatprep.subr.bf16.mxu0 %v18136_v49  ;;  %v9024_v56 = vadd.f32 1.0, %v18268_v2  ;;  %18287 = vrcp.f32 %v9019_v12  ;;  %9143 = vperm.xlu1 %18098, %v20005_v45   ;;  %v2032_v12 = vshll.u32 %v19990_v26, 16  ;;  %v20046_v26 = vld [vmem:[#allocation2 + $0x110] sm:$0xff]  ;;  %v2022_v43 = vor.u32 %v2020_v42, %v2019_v15  ;;  %v18352_v0 = vld [vmem:[#allocation2 + $0xf8] sm:$0xff] }
 0x1b4   : > { %v20011_v11 = vpop.eup %18269  ;;  %18289 = vpow2.f32 %v15356_v1  ;;  %v2027_v19 = vrot.slane %v2025_v16, 7  ;;  %v2053_v17 = vshrl.u32 %v20019_v27, 16  ;;  %v2049_v14 = vshrl.u32 %v1956_v18, 16 }
 0x1b5   : > { %v20015_v52 = vpop.eup %18271  ;;  %18291 = vrcp.f32 %v9024_v56  ;;  %9168 = vperm.xlu0 %18097, %v20011_v11   ;;  %v2034_v10 = vor.u32 %v2032_v12, %v2031_v20  ;;  %v2037_v56 = vshrl.u32 %v1954_v46, 16  ;;  %v2023_v34 = vsel %vm785_vm2, %v2015_v32, %v2022_v43  ;;  %v1964_v20 = vld [vmem:[#allocation2 + $0x138] sm:$0x80] }
 0x1b6   : > { %16434 = vmatpush3.bf16.msra.mxu0 %v18136_v49  ;;  %v18274_v25 = vpop.eup %18273  ;;  %18293 = vpow2.f32 %v15358_v47  ;;  %v2044_v47 = vshll.u32 %v19999_v24, 16  ;;  %v20068_v24 = vld [vmem:[#allocation2 + $0x108] sm:$0x80]  ;;  %v2051_v48 = vrot.slane %v2049_v14, 7  ;;  %v2065_v42 = vshrl.u32 %v18352_v0, 16 }
 0x1b7   : > { %v18276_v41 = vpop.eup %18275  ;;  %v9026_v9 = vadd.f32 1.0, %v18274_v25  ;;  %18295 = vrcp.f32 %v9021_v29  ;;  %9153 = vperm.xlu1 %18098, %v20015_v52   ;;  %v20056_v29 = vld [vmem:[#allocation2 + $0xf0] sm:$0x80]  ;;  %v2056_v25 = vshll.u32 %v20019_v27, 16  ;;  %v2039_v62 = vrot.slane %v2037_v56, 7 }
 0x1b8   : > { %16224 = vmatmul.mubr.msk.bf16.gmra.mrb[28].mxu1 %vm587_vm0, %v1669_v13  ;;  %v20027_v59 = vpop.eup %18277  ;;  %v9023_v3 = vadd.f32 1.0, %v18276_v41  ;;  %v18349_v13 = vld [vmem:[#allocation2 + $0x128] sm:$0xff]  ;;  %v2055_v41 = vrot.slane %v2053_v17, 7  ;;  %v2068_v15 = vshll.u32 %v18352_v0, 16  ;;  %v2077_v16 = vshrl.u32 %v20046_v26, 16 }
 0x1b9   : > { %16404 = vmatmul.mubr.msk.bf16.gmra.mrb[8].mxu0 %vm587_vm0, %v20019_v27  ;;  %16235 = vmatprep.mubr.msk.bf16.mxu1 %vm587_vm0, %v1987_v40  ;;  %v20030_v61 = vpop.eup %18279  ;;  %18297 = vrcp.f32 %v9026_v9  ;;  %v20072_v27 = vld [vmem:[#allocation2 + $0x120] sm:$0x80]  ;;  %v2073_v12 = vshrl.u32 %v20068_v24, 16  ;;  %v9298_v32 = vsub.f32 1.0, %v19935_v58  ;;  %v2080_v43 = vshll.u32 %v20046_v26, 16  ;;  %v20096_v17 = vld [vmem:[#allocation2 + $0x68] sm:$0xff] }
 0x1ba   : > { %16407 = vmatprep.mubr.msk.bf16.mxu0 %vm587_vm0, %v18347_v28  ;;  %9178 = vperm.xlu0 %18097, %v20027_v59   ;;  %v18282_v49 = vpop.eup %18281  ;;  %18299 = vrcp.f32 %v9023_v3  ;;  %v2035_v28 = vsel %vm785_vm2, %v2027_v19, %v2034_v10  ;;  %v2061_v3 = vshrl.u32 %v20056_v29, 16  ;;  %v2085_v19 = vshrl.u32 %v20072_v27, 16  ;;  %v18356_v10 = vld [vmem:[#allocation2 + $0x128] sm:$0xff]  ;;  %v3956_v14 = vld [vmem:[#allocation2 + $0x70] sm:$0x1] }
 0x1bb   : > { %v18284_v30 = vpop.eup %18283  ;;  %v9028_v7 = vadd.f32 1.0, %v18282_v49  ;;  %9163 = vperm.xlu1 %18098, %v20030_v61   ;;  %v18353_v49 = vld [vmem:[#allocation2 + $0x140] sm:$0xff]  ;;  %v2089_v56 = vshrl.u32 %v18356_v10, 16  ;;  %v3990_v24 = vshll.u32 %v20096_v17, 16  ;;  %v2075_v27 = vrot.slane %v2073_v12, 7 }
 0x1bc   : > { %v20037_v33 = vpop.eup %18285  ;;  %v9025_v53 = vadd.f32 1.0, %v18284_v30  ;;  %v18354_v30 = vld [vmem:[#allocation2 + $0x158] sm:$0xff]  ;;  %v2087_v0 = vrot.slane %v2085_v19, 7  ;;  %v3995_v12 = vshll.u32 %v3956_v14, 16  ;;  %v18360_v14 = vld [vmem:[#allocation2 + $0x1a0] sm:$0xff] }
 0x1bd   : > { %v20042_v5 = vpop.eup %18287  ;;  %18301 = vrcp.f32 %v9028_v7  ;;  %v2058_v7 = vor.u32 %v2056_v25, %v2055_v41  ;;  %v20107_v25 = vld [vmem:[#allocation2 + $0x158] sm:$0xff]  ;;  %v2091_v41 = vrot.slane %v2089_v56, 7  ;;  %v3992_v19 = vrot.slane %v3990_v24, 1  ;;  %v3958_v56 = vld [vmem:[#allocation2 + $0x88] sm:$0x1] }
 0x1be   : > { %9188 = vperm.xlu0 %18097, %v20037_v33   ;;  %v18290_v1 = vpop.eup %18289  ;;  %18303 = vrcp.f32 %v9025_v53  ;;  %v20086_v53 = vld [vmem:[#allocation2 + $0x140] sm:$0xff]  ;;  %v18361_v24 = vld [vmem:[#allocation2 + $0x1b8] sm:$0xff] }
 0x1bf   : > { %v20052_v2 = vpop.eup %18291  ;;  %v9027_v22 = vadd.f32 1.0, %v18290_v1  ;;  %9173 = vperm.xlu1 %18098, %v20042_v5   ;;  %v2067_v1 = vrot.slane %v2065_v42, 7  ;;  %v2059_v29 = vsel %vm785_vm2, %v2051_v48, %v2058_v7  ;;  %v9302_v7 = vsub.f32 1.0, %v19976_v37 }
 0x1c0   : > { %16236 = vmatmul.mubr.msk.bf16.vlgmr.msra.gmra.mrb[0].mxu1 %vm587_vm0, %v1999_v21  ;;  %v18294_v40 = vpop.eup %18293  ;;  %v9293_v37 = vsub.f32 1.0, %v19910_v51 }
 0x1c1   : > { %16408 = vmatmul.mubr.msk.bf16.gmra.mrb[12].mxu0 %vm587_vm0, %v20046_v26  ;;  %17222 = vmatpush3.bf16.msra.mxu1 %v19872_v54  ;;  %v2043_v54 = vrot.slane %v2041_v4, 7  ;;  %v20060_v6 = vpop.eup %18295  ;;  %v9029_v38 = vadd.f32 1.0, %v18294_v40  ;;  %18305 = vrcp.f32 %v9027_v22  ;;  %v20088_v4 = vld [vmem:[#allocation10 + $0x20] sm:$0xff]   ;;  %v8851_v40 = vpop.xlane.xlu1 %8850  ;;  %v9300_v26 = vsub.f32 1.0, %v19951_v8  ;;  %v20112_v8 = vld [vmem:[#allocation3] ss:$0 sm:$0xff] }
 0x1c2   : > { %16239 = vmatprep.mubr.msk.bf16.mxu1 %vm587_vm0, %v2011_v55  ;;  %16411 = vmatprep.mubr.msk.bf16.mxu0 %vm587_vm0, %v18349_v13  ;;  %v18355_v55 = vld [vmem:[#allocation9 + $0x98] sm:$0xff]   ;;  %v2079_v13 = vrot.slane %v2077_v16, 7  ;;  %v20125_v16 = vld [vmem:[#allocation2 + $0x80] sm:$0xff] }
 0x1c3   : > { %17219 = vmatprep.subr.bf16.mxu1 %v18350_v60  ;;  %9198 = vperm.xlu0 %18097, %v20052_v2   ;;  %v20065_v9 = vpop.eup %18297  ;;  %v2046_v21 = vor.u32 %v2044_v47, %v2043_v54  ;;  %18307 = vrcp.f32 %v9029_v38  ;;  %v2097_v54 = vshrl.u32 %v1964_v20, 16  ;;  %v2063_v47 = vrot.slane %v2061_v3, 7  ;;  %v18357_v38 = vld [vmem:[#allocation2 + $0x170] sm:$0xff]  ;;  %v20115_v3 = vld [vmem:[#allocation2 + $0x188] sm:$0xff] }
 0x1c4   : > { %9183 = vperm.xlu1 %18098, %v20060_v6   ;;  %v20074_v50 = vpop.eup %18299  ;;  %v2082_v48 = vor.u32 %v2080_v43, %v2079_v13 }
 0x1c5   : > { %17223 = vmatpush3.bf16.msra.mxu1 %v18350_v60  ;;  %v2047_v22 = vsel %vm785_vm2, %v2039_v62, %v2046_v21  ;;  %v2101_v60 = vshrl.u32 %v20086_v53, 16  ;;  %v8902_v62 = vadd.f32 %v20112_v8, %v8851_v40  ;;  %v20120_v42 = vrot.slane %v2097_v54, 7  ;;  %v8857_v40 = vpop.xlane.xlu1 %8856 }
 0x1c6   : > { %17220 = vmatprep.subr.bf16.mxu1 %v18351_v44  ;;  %v3988_v21 = vshrl.u32 %v20096_v17, 16 }
 0x1c7   : > { %9208 = vperm.xlu0 %18097, %v20065_v9   ;;  %v20081_v46 = vpop.eup %18301  ;;  %v2103_v20 = vrot.slane %v2101_v60, 7  ;;  %v15359_v13 = vmul.f32 -1.442695, %v8902_v62  ;;  %v4000_v62 = vshrl.u32 %v20125_v16, 16 }
 0x1c8   : > { %16240 = vmatmul.mubr.msk.bf16.gmra.mrb[4].mxu1 %vm587_vm0, %v2023_v34  ;;  %9193 = vperm.xlu1 %18098, %v20074_v50   ;;  %v20090_v18 = vpop.eup %18303  ;;  %v2070_v34 = vor.u32 %v2068_v15, %v2067_v1  ;;  %v22923_v15 = vshrl.u32 %v20107_v25, 16 }
 0x1c9   : > { %16412 = vmatmul.mubr.msk.bf16.gmra.mrb[16].mxu0 %vm587_vm0, %v18353_v49  ;;  %16243 = vmatprep.mubr.msk.bf16.mxu1 %vm587_vm0, %v2035_v28  ;;  %v2092_v28 = vshll.u32 %v18356_v10, 16  ;;  %v2104_v49 = vshll.u32 %v20086_v53, 16  ;;  %v2083_v10 = vsel %vm785_vm2, %v2075_v27, %v2082_v48  ;;  %18309 = vpow2.f32 %v15359_v13  ;;  %v3960_v27 = vld [vmem:[#allocation2 + $0xa0] sm:$0x1] }
 0x1ca   : > { %16415 = vmatprep.mubr.msk.bf16.mxu0 %vm587_vm0, %v18354_v30  ;;  %17224 = vmatpush3.bf16.msra.mxu1 %v18351_v44  ;;  %v1966_v44 = vld [vmem:[#allocation2 + $0x150] sm:$0x80]  ;;  %v2071_v1 = vsel %vm785_vm2, %v2063_v47, %v2070_v34  ;;  %v2115_v54 = vrot.slane %v22923_v15, 7  ;;  %v4002_v47 = vshll.u32 %v20125_v16, 16  ;;  %v3997_v34 = vrot.slane %v3995_v12, 1 }
 0x1cb   : > { %17221 = vmatprep.subr.bf16.mxu1 %v18355_v55  ;;  %9218 = vperm.xlu0 %18097, %v20081_v46   ;;  %v20102_v58 = vpop.eup %18305  ;;  %v2094_v43 = vor.u32 %v2092_v28, %v2091_v41  ;;  %v2106_v51 = vor.u32 %v2104_v49, %v2103_v20  ;;  %v1968_v41 = vld [vmem:[#allocation2 + $0x168] sm:$0x80]  ;;  %v9294_v48 = vsub.f32 1.0, %v19925_v36  ;;  %v20157_v12 = vld [vmem:[#allocation2 + $0xb0] sm:$0xff] }
 0x1cc   : > { %9203 = vperm.xlu1 %18098, %v20090_v18   ;;  %v4004_v13 = vrot.slane %v4002_v47, 1  ;;  %v8863_v47 = vpop.xlane.xlu1 %8862  ;;  %v4026_v15 = vshll.u32 %v20157_v12, 16 }
 0x1cd   : > { %v20127_v30 = vpop.eup %18307 }
 0x1ce   : > { %17225 = vmatpush3.bf16.msra.mxu1 %v18355_v55  ;;  %v2109_v55 = vshrl.u32 %v1966_v44, 16 }
 0x1cf   : > { %16467 = vmatprep.subr.bf16.mxu1 %v20088_v4  ;;  %9352 = vperm.xlu0 %18097, %v9298_v32   ;;  %v20132_v32 = vld [vmem:[#allocation2 + $0x170] sm:$0xff] }
 0x1d0   : > { %16244 = vmatmul.mubr.msk.bf16.gmra.mrb[8].mxu1 %vm587_vm0, %v2047_v22  ;;  %9213 = vperm.xlu1 %18098, %v20102_v58   ;;  %v2116_v22 = vshll.u32 %v20107_v25, 16  ;;  %v22922_v28 = vshrl.u32 %v20132_v32, 16  ;;  %v2111_v44 = vrot.slane %v2109_v55, 7  ;;  %v2121_v55 = vshrl.u32 %v1968_v41, 16 }
 0x1d1   : > { %16416 = vmatmul.mubr.msk.bf16.gmra.mrb[20].mxu0 %vm587_vm0, %v18357_v38  ;;  %16247 = vmatprep.mubr.msk.bf16.mxu1 %vm587_vm0, %v2059_v29  ;;  %v20137_v29 = vld [vmem:[#allocation2 + $0x98] sm:$0xff]  ;;  %v2095_v38 = vsel %vm785_vm2, %v2087_v0, %v2094_v43  ;;  %v3993_v0 = vor.u32 %v3992_v19, %v3988_v21  ;;  %v2128_v36 = vshll.u32 %v20132_v32, 16  ;;  %v4019_v19 = vshll.u32 %v3960_v27, 16 }
 0x1d2   : > { %16419 = vmatprep.mubr.msk.bf16.mxu0 %vm587_vm0, %v20115_v3  ;;  %v4014_v20 = vshll.u32 %v20137_v29, 16  ;;  %v2118_v43 = vor.u32 %v2116_v22, %v2115_v54  ;;  %v4012_v21 = vshrl.u32 %v20137_v29, 16  ;;  %v9295_v54 = vsub.f32 1.0, %v19918_v57 }
 0x1d3   : > { %9362 = vperm.xlu0 %18097, %v9300_v26   ;;  %v9304_v26 = vsub.f32 1.0, %v19988_v31  ;;  %v8904_v31 = vadd.f32 %v20112_v8, %v8857_v40  ;;  %v20168_v40 = vld [vmem:[#allocation2 + $0xc8] sm:$0xff]  ;;  %v4005_v27 = vor.u32 %v4004_v13, %v4000_v62  ;;  %v18310_v13 = vpop.eup %18309 }
 0x1d4   : > { %9223 = vperm.xlu1 %18098, %v20127_v30   ;;  %v4016_v41 = vrot.slane %v4014_v20, 1  ;;  %v2119_v57 = vsel %vm785_vm2, %v2111_v44, %v2118_v43  ;;  %v4021_v20 = vrot.slane %v4019_v19, 1  ;;  %v3964_v43 = vld [vmem:[#allocation2 + $0xd0] sm:$0x1]  ;;  %v4036_v19 = vshrl.u32 %v20168_v40, 16 }
 0x1d6   : > { %v4017_v44 = vor.u32 %v4016_v41, %v4012_v21  ;;  %v4043_v41 = vshll.u32 %v3964_v43, 16 }
 0x1d7   : > { %9372 = vperm.xlu0 %18097, %v9302_v7   ;;  %v4007_v7 = vshll.u32 %v3958_v56, 16  ;;  %v1970_v56 = vld [vmem:[#allocation2 + $0x180] sm:$0x80] }
 0x1d8   : > { %16248 = vmatmul.mubr.msk.bf16.gmra.mrb[12].mxu1 %vm587_vm0, %v2071_v1  ;;  %9327 = vperm.xlu1 %18098, %v9293_v37   ;;  %v9306_v1 = vsub.f32 1.0, %v20011_v11  ;;  %v2127_v37 = vrot.slane %v22922_v28, 7  ;;  %v2107_v11 = vsel %vm785_vm2, %v20120_v42, %v2106_v51  ;;  %v2123_v42 = vrot.slane %v2121_v55, 7 }
 0x1d9   : > { %16420 = vmatmul.mubr.msk.bf16.gmra.mrb[24].mxu0 %vm587_vm0, %v18360_v14  ;;  %16251 = vmatprep.mubr.msk.bf16.mxu1 %vm587_vm0, %v2083_v10  ;;  %v20162_v10 = vld [vmem:[#allocation2 + $0x1a0] sm:$0xff]  ;;  %v3998_v14 = vsel %vm1477_vm1, %v3993_v0, %v3997_v34  ;;  %v4009_v28 = vrot.slane %v4007_v7, 1  ;;  %v3962_v34 = vld [vmem:[#allocation2 + $0xb8] sm:$0x1]  ;;  %v2133_v62 = vshrl.u32 %v1970_v56, 16  ;;  %v4038_v0 = vshll.u32 %v20168_v40, 16 }
 0x1da   : > { %16423 = vmatprep.mubr.msk.bf16.mxu0 %vm587_vm0, %v18361_v24  ;;  %v9308_v24 = vsub.f32 1.0, %v20027_v59  ;;  %v2130_v51 = vor.u32 %v2128_v36, %v2127_v37  ;;  %v2149_v59 = vshrl.u32 %v20162_v10, 16  ;;  %v9296_v7 = vsub.f32 1.0, %v19946_v23 }
 0x1db   : > { %9382 = vperm.xlu0 %18097, %v9304_v26   ;;  %v15361_v26 = vmul.f32 -1.442695, %v8904_v31  ;;  %v18362_v31 = vld [vmem:[#allocation2 + $0x1d0] sm:$0xff]  ;;  %v9310_v55 = vsub.f32 1.0, %v20037_v33  ;;  %v4010_v37 = vsel %vm1477_vm1, %v4005_v27, %v4009_v28  ;;  %v2152_v23 = vshll.u32 %v20162_v10, 16  ;;  %v20199_v27 = vld [vmem:[#allocation2 + $0xe0] sm:$0xff] }
 0x1dc   : > { %9332 = vperm.xlu1 %18098, %v9294_v48   ;;  %v1972_v48 = vld [vmem:[#allocation2 + $0x198] sm:$0x80]  ;;  %v2131_v56 = vsel %vm785_vm2, %v2123_v42, %v2130_v51  ;;  %v9030_v33 = vadd.f32 1.0, %v18310_v13  ;;  %v4022_v28 = vsel %vm1477_vm1, %v4017_v44, %v4021_v20  ;;  %v2135_v42 = vrot.slane %v2133_v62, 7  ;;  %v3966_v20 = vld [vmem:[#allocation2 + $0xe8] sm:$0x1] }
 0x1dd   : > { %18311 = vpow2.f32 %v15361_v26  ;;  %v4028_v26 = vrot.slane %v4026_v15, 1  ;;  %v9297_v15 = vsub.f32 1.0, %v19972_v35  ;;  %v4050_v62 = vshll.u32 %v20199_v27, 16 }
 0x1de   : > { %v9299_v44 = vsub.f32 1.0, %v19985_v63  ;;  %v9314_v13 = vsub.f32 1.0, %v20065_v9 }
 0x1df   : > { %9392 = vperm.xlu0 %18097, %v9306_v1   ;;  %v4024_v1 = vshrl.u32 %v20157_v12, 16  ;;  %v4052_v9 = vrot.slane %v4050_v62, 1 }
 0x1e0   : > { %16252 = vmatmul.mubr.msk.bf16.gmra.mrb[16].mxu1 %vm587_vm0, %v2095_v38  ;;  %v8906_v38 = vadd.f32 %v20112_v8, %v8863_v47  ;;  %9337 = vperm.xlu1 %18098, %v9295_v54   ;;  %v2145_v47 = vshrl.u32 %v1972_v48, 16  ;;  %v2151_v54 = vrot.slane %v2149_v59, 7 }
 0x1e1   : > { %16424 = vmatmul.mubr.msk.bf16.gmra.mrb[28].mxu0 %vm587_vm0, %v18362_v31  ;;  %16255 = vmatprep.mubr.msk.bf16.mxu1 %vm587_vm0, %v2107_v11  ;;  %v4031_v11 = vshll.u32 %v3962_v34, 16  ;;  %v9312_v31 = vsub.f32 1.0, %v20052_v2  ;;  %v4029_v51 = vor.u32 %v4028_v26, %v4024_v1 }
 0x1e2   : > { %16435 = vmatprep.mubr.msk.bf16.mxu0 %vm587_vm0, %v3998_v14  ;;  %v15363_v21 = vmul.f32 -1.442695, %v8906_v38  ;;  %v4040_v14 = vrot.slane %v4038_v0, 1  ;;  %v20203_v38 = vld [vmem:[#allocation2 + $0xf8] sm:$0xff]  ;;  %v2147_v48 = vrot.slane %v2145_v47, 7  ;;  %v2154_v35 = vor.u32 %v2152_v23, %v2151_v54 }
 0x1e3   : > { %9402 = vperm.xlu0 %18097, %v9308_v24   ;;  %v20195_v24 = vld [vmem:[#allocation2 + $0x1b8] sm:$0xff]  ;;  %v4033_v34 = vrot.slane %v4031_v11, 1  ;;  %v1974_v0 = vld [vmem:[#allocation2 + $0x1b0] sm:$0x80]  ;;  %v4062_v1 = vshll.u32 %v20203_v38, 16  ;;  %v4048_v54 = vshrl.u32 %v20199_v27, 16 }
 0x1e4   : > { %9342 = vperm.xlu1 %18098, %v9296_v7   ;;  %v2161_v7 = vshrl.u32 %v20195_v24, 16  ;;  %18313 = vpow2.f32 %v15363_v21  ;;  %v4041_v2 = vor.u32 %v4040_v14, %v4036_v19  ;;  %v2157_v26 = vshrl.u32 %v1974_v0, 16  ;;  %v3968_v11 = vld [vmem:[#allocation2 + $0x100] sm:$0x1]  ;;  %v8854_v21 = vpop.xlane.xlu0 %8853 }
 0x1e5   : > { %18315 = vrcp.f32 %v9030_v33  ;;  %v2164_v63 = vshll.u32 %v20195_v24, 16  ;;  %v4055_v14 = vshll.u32 %v3966_v20, 16  ;;  %v9301_v33 = vsub.f32 1.0, %v20005_v45  ;;  %v20235_v45 = vld [vmem:[#allocation2 + $0x128] sm:$0xff] }
 0x1e6   : > { %v2163_v47 = vrot.slane %v2161_v7, 7 }
 0x1e7   : > { %9412 = vperm.xlu0 %18097, %v9310_v55   ;;  %v18312_v43 = vpop.eup %18311  ;;  %v2143_v55 = vsel %vm785_vm2, %v2135_v42, %v19852_v39  ;;  %v4060_v39 = vshrl.u32 %v20203_v38, 16  ;;  %v9316_v42 = vsub.f32 1.0, %v20081_v46  ;;  %v4057_v0 = vrot.slane %v4055_v14, 1 }
 0x1e8   : > { %16256 = vmatmul.mubr.msk.bf16.gmra.mrb[20].mxu1 %vm587_vm0, %v2119_v57  ;;  %v4045_v57 = vrot.slane %v4043_v41, 1  ;;  %9347 = vperm.xlu1 %18098, %v9297_v15   ;;  %v9032_v41 = vadd.f32 1.0, %v18312_v43  ;;  %v4064_v15 = vrot.slane %v4062_v1, 1  ;;  %v4086_v1 = vshll.u32 %v20235_v45, 16 }
 0x1e9   : > { %16436 = vmatmul.mubr.msk.bf16.vlgmr.msra.gmra.mrb[0].mxu0 %vm587_vm0, %v4010_v37  ;;  %16259 = vmatprep.mubr.msk.bf16.mxu1 %vm587_vm0, %v2131_v56  ;;  %v4034_v37 = vsel %vm1477_vm1, %v4029_v51, %v4033_v34  ;;  %v2155_v56 = vsel %vm785_vm2, %v2147_v48, %v2154_v35  ;;  %v8903_v51 = vadd.f32 %v20112_v8, %v8854_v21  ;;  %v2159_v34 = vrot.slane %v2157_v26, 7 }
 0x1ea   : > { %16439 = vmatprep.mubr.msk.bf16.mxu0 %vm587_vm0, %v4022_v28  ;;  %v4046_v19 = vsel %vm1477_vm1, %v4041_v2, %v4045_v57  ;;  %v4067_v28 = vshll.u32 %v3968_v11, 16  ;;  %v2166_v48 = vor.u32 %v2164_v63, %v2163_v47  ;;  %v4053_v35 = vor.u32 %v4052_v9, %v4048_v54  ;;  %v8860_v11 = vpop.xlane.xlu0 %8859 }
 0x1eb   : > { %9422 = vperm.xlu0 %18097, %v9312_v31   ;;  %v20226_v31 = vld [vmem:[#allocation2 + $0x110] sm:$0xff]  ;;  %18317 = vrcp.f32 %v9032_v41  ;;  %v9303_v2 = vsub.f32 1.0, %v20015_v52  ;;  %v4065_v57 = vor.u32 %v4064_v15, %v4060_v39  ;;  %v9305_v21 = vsub.f32 1.0, %v20030_v61 }
 0x1ec   : > { %9357 = vperm.xlu1 %18098, %v9299_v44   ;;  %v4074_v46 = vshll.u32 %v20226_v31, 16  ;;  %v4069_v62 = vrot.slane %v4067_v28, 1  ;;  %v3970_v44 = vld [vmem:[#allocation2 + $0x118] sm:$0x1]  ;;  %v4058_v26 = vsel %vm1477_vm1, %v4053_v35, %v4057_v0  ;;  %v4084_v14 = vshrl.u32 %v20235_v45, 16 }
 0x1ed   : > { %v4079_v54 = vshll.u32 %v3970_v44, 16  ;;  %v4088_v39 = vrot.slane %v4086_v1, 1  ;;  %v3974_v28 = vld [vmem:[#allocation2 + $0x148] sm:$0x1] }
 0x1ee   : > { %v18314_v20 = vpop.eup %18313  ;;  %v4076_v47 = vrot.slane %v4074_v46, 1  ;;  %v4103_v46 = vshll.u32 %v3974_v28, 16  ;;  %v18141_v28 = vld [vmem:[#allocation10] sm:$0xff]  }
 0x1ef   : > { %9432 = vperm.xlu0 %18097, %v9314_v13   ;;  %v18316_v43 = vpop.eup %18315  ;;  %v15360_v13 = vmul.f32 -1.442695, %v8903_v51  ;;  %v9034_v52 = vadd.f32 1.0, %v18314_v20  ;;  %v4081_v15 = vrot.slane %v4079_v54, 1  ;;  %v3976_v51 = vld [vmem:[#allocation2 + $0x160] sm:$0x1] }
 0x1f0   : > { %16260 = vmatmul.mubr.msk.bf16.gmra.mrb[24].mxu1 %vm587_vm0, %v2143_v55  ;;  %9367 = vperm.xlu1 %18098, %v9301_v33   ;;  %v2167_v55 = vsel %vm785_vm2, %v2159_v34, %v2166_v48  ;;  %v9318_v9 = vsub.f32 1.0, %v18316_v43  ;;  %v8905_v33 = vadd.f32 %v20112_v8, %v8860_v11  ;;  %v4089_v34 = vor.u32 %v4088_v39, %v4084_v14  ;;  %v18140_v14 = vld [vmem:[#allocation10 + $0x38] sm:$0xff]  }
 0x1f1   : > { %16440 = vmatmul.mubr.msk.bf16.gmra.mrb[4].mxu0 %vm587_vm0, %v4034_v37  ;;  %16263 = vmatprep.mubr.msk.bf16.mxu1 %vm587_vm0, %v2155_v56  ;;  %v3972_v37 = vld [vmem:[#allocation2 + $0x130] sm:$0x1]  ;;  %v4072_v56 = vshrl.u32 %v20226_v31, 16  ;;  %18319 = vpow2.f32 %v15360_v13  ;;  %v4100_v8 = vrot.slane %v2104_v49, 1  ;;  %v4115_v44 = vshll.u32 %v3976_v51, 16 }
 0x1f2   : > { %16443 = vmatprep.mubr.msk.bf16.mxu0 %vm587_vm0, %v4046_v19  ;;  %v4070_v19 = vsel %vm1477_vm1, %v4065_v57, %v4069_v62  ;;  %v4091_v41 = vshll.u32 %v3972_v37, 16  ;;  %18321 = vrcp.f32 %v9034_v52  ;;  %v15362_v0 = vmul.f32 -1.442695, %v8905_v33  ;;  %v18138_v57 = vld [vmem:[#allocation10 + $0x28] sm:$0xff]  }
 0x1f3   : > { %9442 = vperm.xlu0 %18097, %v9316_v42   ;;  %v4077_v61 = vor.u32 %v4076_v47, %v4072_v56  ;;  %v9307_v42 = vsub.f32 1.0, %v20042_v5  ;;  %v4112_v62 = vrot.slane %v2116_v22, 1  ;;  %v9309_v5 = vsub.f32 1.0, %v20060_v6  ;;  %v18139_v6 = vld [vmem:[#allocation10 + $0x30] sm:$0xff]  }
 0x1f4   : > { %9377 = vperm.xlu1 %18098, %v9303_v2   ;;  %v4093_v48 = vrot.slane %v4091_v41, 1  ;;  %18323 = vpow2.f32 %v15362_v0  ;;  %v4101_v49 = vor.u32 %v4100_v8, %v2101_v60  ;;  %v4105_v22 = vrot.slane %v4103_v46, 1  ;;  %v3980_v60 = vld [vmem:[#allocation2 + $0x190] sm:$0x1]  ;;  %v4804_v46 = vld [vmem:[#allocation2 + $0x8] sm:$0xff] }
 0x1f5   : > { %v18318_v35 = vpop.eup %18317  ;;  %v4082_v2 = vsel %vm1477_vm1, %v4077_v61, %v4081_v15  ;;  %v22991_v13 = vshrl.u32 %v20107_v25, 16  ;;  %v4117_v37 = vrot.slane %v4115_v44, 1  ;;  %v9311_v11 = vsub.f32 1.0, %v20074_v50 }
 0x1f6   : > { %v9320_v20 = vsub.f32 1.0, %v18318_v35  ;;  %v4094_v1 = vsel %vm1477_vm1, %v4089_v34, %v4093_v48  ;;  %v4106_v54 = vsel %vm1477_vm1, %v4101_v49, %v4105_v22  ;;  %v9313_v50 = vsub.f32 1.0, %v20090_v18  ;;  %v3982_v48 = vld [vmem:[#allocation2 + $0x1a8] sm:$0x1]  ;;  %v3986_v49 = vld [vmem:[#allocation2 + $0x1d8] sm:$0x1] }
 0x1f7   : > { %9228 = vperm.xlu0 %18097, %v18316_v43   ;;  %v3979_v43 = vld [vmem:[#allocation2 + $0x188] sm:$0xff]  ;;  %v4139_v33 = vshll.u32 %v3980_v60, 16  ;;  %v22992_v18 = vshrl.u32 %v20132_v32, 16  ;;  %v9315_v51 = vsub.f32 1.0, %v20102_v58  ;;  %v4160_v44 = vrot.slane %v2164_v63, 1 }
 0x1f8   : > { %16264 = vmatmul.mubr.msk.bf16.gmra.mrb[28].mxu1 %vm587_vm0, %v2167_v55  ;;  %9387 = vperm.xlu1 %18098, %v9305_v21   ;;  %v4113_v55 = vor.u32 %v4112_v62, %v22991_v13  ;;  %v4134_v56 = vshll.u32 %v3979_v43, 16  ;;  %v4132_v39 = vshrl.u32 %v3979_v43, 16  ;;  %v9317_v62 = vsub.f32 1.0, %v20127_v30 }
 0x1f9   : > { %16444 = vmatmul.mubr.msk.bf16.gmra.mrb[8].mxu0 %vm587_vm0, %v4058_v26  ;;  %16295 = vmatprep.mubr.msk.bf16.mxu1 %vm587_vm0, %v20086_v53  ;;  %v4141_v34 = vrot.slane %v4139_v33, 1  ;;  %v4161_v63 = vor.u32 %v4160_v44, %v2161_v7  ;;  %v4494_v44 = vld [vmem:[#allocation2 + $0x20] sm:$0x7f] }
 0x1fa   : > { %16447 = vmatprep.mubr.msk.bf16.mxu0 %vm587_vm0, %v4070_v19  ;;  %v4118_v21 = vsel %vm1477_vm1, %v4113_v55, %v4117_v37  ;;  %v4124_v19 = vrot.slane %v2128_v36, 1  ;;  %v4136_v41 = vrot.slane %v4134_v56, 1  ;;  %v18143_v56 = vld [vmem:[#allocation10 + $0x10] sm:$0xff]  }
 0x1fb   : > { %9452 = vperm.xlu0 %18097, %v9318_v9   ;;  %v18320_v26 = vpop.eup %18319 }
 0x1fc   : > { %9397 = vperm.xlu1 %18098, %v9307_v42   ;;  %v18322_v47 = vpop.eup %18321  ;;  %v9031_v52 = vadd.f32 1.0, %v18320_v26  ;;  %v4125_v36 = vor.u32 %v4124_v19, %v22992_v18  ;;  %v4175_v26 = vshll.u32 %v3986_v49, 16  ;;  %v18144_v19 = vld [vmem:[#allocation10 + $0x18] sm:$0xff]  }
 0x1fd   : > { %v9322_v61 = vsub.f32 1.0, %v18322_v47 }
 0x1fe   : > { %18325 = vrcp.f32 %v9031_v52  ;;  %v18324_v42 = vpop.eup %18323  ;;  %v4177_v7 = vrot.slane %v4175_v26, 1 }
 0x1ff   : > { %9238 = vperm.xlu0 %18097, %v18318_v35   ;;  %v3984_v35 = vld [vmem:[#allocation2 + $0x1c0] sm:$0x1]  ;;  %v9033_v0 = vadd.f32 1.0, %v18324_v42 }
 0x200   : > { %16296 = vmatmul.mubr.msk.bf16.vlgmr.msra.gmra.mrb[20].mxu1 %vm587_vm0, %v20107_v25  ;;  %9407 = vperm.xlu1 %18098, %v9309_v5   ;;  %v4163_v5 = vshll.u32 %v3984_v35, 16  ;;  %v18365_v35 = vld [vmem:[%s19048_s23 + $0xf0] sm:$0xff] }
 0x201   : > { %16448 = vmatmul.mubr.msk.bf16.gmra.mrb[12].mxu0 %vm587_vm0, %v4082_v2  ;;  %16468 = vmatpush3.bf16.msra.mxu1 %v20088_v4  ;;  %v3978_v4 = vld [vmem:[#allocation2 + $0x178] sm:$0x1]  ;;  %v4148_v2 = vrot.slane %v2152_v23, 1  ;;  %18327 = vrcp.f32 %v9033_v0 }
 0x202   : > { %16469 = vmatprep.subr.bf16.mxu1 %v18138_v57  ;;  %16299 = vmatprep.mubr.msk.bf16.mxu1 %vm587_vm0, %v20132_v32  ;;  %v4127_v9 = vshll.u32 %v3978_v4, 16  ;;  %v4165_v43 = vrot.slane %v4163_v5, 1  ;;  %v18142_v4 = vld [vmem:[#allocation10 + $0x8] sm:$0xff]  }
 0x203   : > { %16451 = vmatprep.mubr.msk.bf16.mxu0 %vm587_vm0, %v4094_v1  ;;  %9462 = vperm.xlu0 %18097, %v9320_v20   ;;  %v3985_v20 = vld [vmem:[#allocation2 + $0x1d0] sm:$0xff]  ;;  %v4149_v30 = vor.u32 %v4148_v2, %v2149_v59  ;;  %v4806_v59 = vld [vmem:[#allocation2 + $0x38] sm:$0xff] }
 0x204   : > { %9417 = vperm.xlu1 %18098, %v9311_v11   ;;  %v4129_v15 = vrot.slane %v4127_v9, 1  ;;  %v4170_v1 = vshll.u32 %v3985_v20, 16  ;;  %v4168_v55 = vshrl.u32 %v3985_v20, 16 }
 0x205   : > { %16470 = vmatpush3.bf16.msra.mxu1 %v18138_v57  ;;  %v4151_v57 = vshll.u32 %v3982_v48, 16  ;;  %v4492_v48 = vld [vmem:[#allocation2 + $0x8] sm:$0x7f] }
 0x206   : > { %16471 = vmatprep.subr.bf16.mxu1 %v18139_v6  ;;  %v4130_v8 = vsel %vm1477_vm1, %v4125_v36, %v4129_v15  ;;  %v4172_v37 = vrot.slane %v4170_v1, 1  ;;  %v4536_v2 = vshll.u32 %v4492_v48, 16 }
 0x207   : > { %9248 = vperm.xlu0 %18097, %v18322_v47   ;;  %v4153_v23 = vrot.slane %v4151_v57, 1  ;;  %v4807_v47 = vld [vmem:[#allocation2 + $0x50] sm:$0xff] }
 0x208   : > { %16300 = vmatmul.mubr.msk.bf16.gmra.mrb[24].mxu1 %vm587_vm0, %v20115_v3  ;;  %9427 = vperm.xlu1 %18098, %v9313_v50   ;;  %v4137_v3 = vor.u32 %v4136_v41, %v4132_v39  ;;  %v18326_v22 = vpop.eup %18325  ;;  %v20318_v50 = vld [vmem:[#allocation10 + $0x40] sm:$0xff]   ;;  %v18364_v39 = vld [vmem:[%s19048_s23 + $0xf8] sm:$0xff]  ;;  %s18599_s23 = sshll.u32 %s18694_s27, 4  ;;  %s18600_s23 = int_to_ptr.vmem [resolvable:$false] %s18599_s23 }
 0x209   : > { %16452 = vmatmul.mubr.msk.bf16.gmra.mrb[16].mxu0 %vm587_vm0, %v4106_v54  ;;  %16472 = vmatpush3.bf16.msra.mxu1 %v18139_v6  ;;  %v4805_v6 = vld [vmem:[#allocation2 + $0x20] sm:$0xff]  ;;  %v4154_v13 = vsel %vm1477_vm1, %v4149_v30, %v4153_v23  ;;  %v9319_v11 = vsub.f32 1.0, %v18326_v22  ;;  %v4538_v30 = vrot.slane %v4536_v2, 7  ;;  %v4495_v23 = vld [vmem:[#allocation2 + $0x30] sm:$0xc0]  ;;  %p18602_p10 = scmp.lt.s32.totalorder %s22851_s26, %s18600_s23 }
 0x20a   : > { %16303 = vmatprep.mubr.msk.bf16.mxu1 %vm587_vm0, %v20162_v10  ;;  %16455 = vmatprep.mubr.msk.bf16.mxu0 %vm587_vm0, %v4118_v21  ;;  %v4142_v58 = vsel %vm1477_vm1, %v4137_v3, %v4141_v34  ;;  %v4166_v10 = vsel %vm1477_vm1, %v4161_v63, %v4165_v43 }
 0x20b   : > { %16473 = vmatprep.subr.bf16.mxu1 %v18140_v14  ;;  %9472 = vperm.xlu0 %18097, %v9322_v61   ;;  %v18328_v60 = vpop.eup %18327 }
 0x20c   : > { %9437 = vperm.xlu1 %18098, %v9315_v51   ;;  %v9321_v52 = vsub.f32 1.0, %v18328_v60 }
 0x20d   : > { %16474 = vmatpush3.bf16.msra.mxu1 %v18140_v14  ;;  %v18363_v14 = vld [vmem:[%s22902_s5] ss:$0 sm:$0xff] }
 0x20e   : > { %16507 = vmatprep.subr.bf16.mxu1 %v18141_v28  ;;  %v8773_v41 = vmul.f32 %v18364_v39, %v18363_v14  ;;  %v8772_v0 = vmul.f32 %v18365_v35, %v18363_v14  ;;  %v4499_v39 = vld [vmem:[#allocation2 + $0x60] sm:$0xc0] }
 0x20f   : > { %v4596_v2 = vshll.u32 %v4499_v39, 16 }
 0x210   : > { %16304 = vmatmul.mubr.msk.bf16.gmra.mrb[28].mxu1 %vm587_vm0, %v20195_v24  ;;  %9447 = vperm.xlu1 %18098, %v9317_v62   ;;  %v4173_v24 = vor.u32 %v4172_v37, %v4168_v55  ;;  %v8864_v62 = vsel %vm587_vm0, %v8772_v0, 0.0  ;;  %v4562_v55 = vshll.u32 %v4495_v23, 16 }
 0x211   : > { %16456 = vmatmul.mubr.msk.bf16.gmra.mrb[20].mxu0 %vm587_vm0, %v4130_v8  ;;  %16475 = vmatprep.mubr.msk.bf16.mxu1 %vm587_vm0, %v4804_v46  ;;  %v4533_v46 = vshrl.u32 %v4492_v48, 16 }
 0x212   : > { %16459 = vmatprep.mubr.msk.bf16.mxu0 %vm587_vm0, %v4142_v58  ;;  %v4178_v54 = vsel %vm1477_vm1, %v4173_v24, %v4177_v7  ;;  %v4493_v58 = vld [vmem:[#allocation2 + $0x18] sm:$0xc0] }
 0x213   : > { %v4542_v43 = vshrl.u32 %v4493_v58, 16  ;;  %v4545_v49 = vshll.u32 %v4493_v58, 16 }
 0x214   : > { %9233 = vperm.xlu1 %18098, %v18326_v22   ;;  %v4550_v22 = vshrl.u32 %v4494_v44, 16 }
 0x215   : > { %v4547_v24 = vrot.slane %v4545_v49, 7 }
 0x216   : > { %v4552_v7 = vrot.slane %v4550_v22, 6 }
 0x218   : > { %16476 = vmatmul.mubr.msk.bf16.vlgmr.msra.gmra.mrb[32].mxu1 %vm587_vm0, %v4805_v6  ;;  %9457 = vperm.xlu1 %18098, %v9319_v11   ;;  %v4553_v6 = vshll.u32 %v4494_v44, 16 }
 0x219   : > { %16460 = vmatmul.mubr.msk.bf16.gmra.mrb[24].mxu0 %vm587_vm0, %v4154_v13  ;;  %16508 = vmatpush3.bf16.msra.mxu1 %v18141_v28  ;;  %v4559_v13 = vshrl.u32 %v4495_v23, 16 }
 0x21a   : > { %16463 = vmatprep.mubr.msk.bf16.mxu0 %vm587_vm0, %v4166_v10  ;;  %16479 = vmatprep.mubr.msk.bf16.mxu1 %vm587_vm0, %v4806_v59  ;;  %v20310_v21 = vpop.permute.xlu0 %9103 }
 0x21b   : > { %16509 = vmatprep.subr.bf16.mxu1 %v18142_v4 }
 0x21c   : > { %9243 = vperm.xlu1 %18098, %v18328_v60  }
 0x21d   : > { %16510 = vmatpush3.bf16.msra.mxu1 %v18142_v4  ;;  %v4544_v4 = vrot.slane %v4542_v43, 6  ;;  %v4502_v43 = vld [vmem:[#allocation2 + $0x80] sm:$0x7f] }
 0x21e   : > { %16511 = vmatprep.subr.bf16.mxu1 %v18143_v56  ;;  %v20316_v9 = vpop.permute.xlu1 %9108 }
 0x220   : > { %16480 = vmatmul.mubr.msk.bf16.gmra.mrb[36].mxu1 %vm587_vm0, %v4807_v47  ;;  %9467 = vperm.xlu1 %18098, %v9321_v52   ;;  %v4561_v47 = vrot.slane %v4559_v13, 6  ;;  %v4498_v52 = vld [vmem:[#allocation2 + $0x50] sm:$0x7f] }
 0x221   : > { %16464 = vmatmul.mubr.msk.bf16.gmra.mrb[28].mxu0 %vm587_vm0, %v4178_v54  ;;  %16483 = vmatprep.mubr.msk.bf16.mxu1 %vm587_vm0, %v20096_v17  ;;  %v8867_v17 = vsel %vm587_vm0, %v8773_v41, 0.0  ;;  %v4564_v54 = vrot.slane %v4562_v55, 7  ;;  %v4500_v41 = vld [vmem:[#allocation2 + $0x68] sm:$0x7f]  ;;  %v4584_v0 = vshrl.u32 %v4498_v52, 16 }
 0x222   : > { %16512 = vmatpush3.bf16.msra.mxu1 %v18143_v56  ;;  %v20326_v61 = vpop.permute.xlu1 %9113  ;;  %v4497_v56 = vld [vmem:[#allocation2 + $0x48] sm:$0xc0] }
 0x223   : > { %16513 = vmatprep.subr.bf16.mxu1 %v18144_v19  ;;  %v20324_v33 = vpop.permute.xlu0 %9128  ;;  %v4579_v35 = vshll.u32 %v4497_v56, 16  ;;  %v4565_v58 = vor.u32 %v4564_v54, %v4561_v47  ;;  %v4586_v23 = vrot.slane %v4584_v0, 6 }
 0x224   : > { %22993 = vst [vmem:[#allocation24_spill] sm:$0xff] %v20324_v33 }
 0x226   : > { %16514 = vmatpush3.bf16.msra.mxu1 %v18144_v19  ;;  %v20336_v36 = vpop.permute.xlu1 %9118 }
 0x227   : > { %16547 = vmatprep.subr.bf16.mxu1 %v20318_v50  ;;  %v20334_v18 = vpop.permute.xlu0 %9138 }
 0x228   : > { %16484 = vmatmul.mubr.msk.bf16.gmra.mrb[40].mxu1 %vm587_vm0, %v20125_v16  ;;  %22994 = vst [vmem:[#allocation25_spill] sm:$0xff] %v20334_v18 }
 0x229   : > { %16487 = vmatprep.mubr.msk.bf16.mxu1 %vm587_vm0, %v20137_v29 }
 0x22a   : > { %8868 = vadd.xlane.f32.xlu0 %v8867_v17  ;;  %v20340_v28 = vpop.permute.xlu1 %9123  ;;  %v4576_v17 = vshrl.u32 %v4497_v56, 16  ;;  %v4621_v56 = vshll.u32 %v4502_v43, 16 }
 0x22b   : > { %v20338_v15 = vpop.permute.xlu0 %9148  ;;  %22996 = vst [vmem:[#allocation27_spill] sm:$0xff] %v20340_v28 }
 0x22c   : > { %22995 = vst [vmem:[#allocation26_spill] sm:$0xff] %v20338_v15 }
 0x22e   : > { %v20348_v42 = vpop.permute.xlu1 %9133 }
 0x22f   : > { %v20346_v16 = vpop.permute.xlu0 %9158 }
 0x230   : > { %16488 = vmatmul.mubr.msk.bf16.gmra.mrb[44].mxu1 %vm587_vm0, %v20157_v12  ;;  %22997 = vst [vmem:[#allocation28_spill] sm:$0xff] %v20346_v16 }
 0x231   : > { %16491 = vmatprep.mubr.msk.bf16.mxu1 %vm587_vm0, %v20168_v40  ;;  %v4491_v40 = vld [vmem:[#allocation2] sm:$0xc0] }
 0x232   : > { %v20350_v29 = vpop.permute.xlu1 %9143 }
 0x233   : > { %22998 = vst [vmem:[#allocation29_spill] sm:$0xff] %v20350_v29 }
 0x234   : > { %v20352_v51 = vpop.permute.xlu0 %9168 }
 0x235   : > { %22999 = vst [vmem:[#allocation30_spill] sm:$0xff] %v20352_v51 }
 0x236   : > { %v20358_v3 = vpop.permute.xlu1 %9153 }
 0x237   : > { %23000 = vst [vmem:[#allocation31_spill] sm:$0xff] %v20358_v3 }
 0x238   : > { %16492 = vmatmul.mubr.msk.bf16.gmra.mrb[48].mxu1 %vm587_vm0, %v20199_v27  ;;  %v4525_v27 = vshrl.u32 %v4491_v40, 16 }
 0x239   : > { %16495 = vmatprep.mubr.msk.bf16.mxu1 %vm587_vm0, %v20203_v38  ;;  %v20360_v12 = vpop.permute.xlu0 %9178  ;;  %v4528_v38 = vshll.u32 %v4491_v40, 16  ;;  %v4548_v40 = vor.u32 %v4547_v24, %v4544_v4 }
 0x23a   : > { %23001 = vst [vmem:[#allocation32_spill] sm:$0xff] %v20360_v12  ;;  %v20362_v34 = vpop.permute.xlu1 %9163  ;;  %v4527_v5 = vrot.slane %v4525_v27, 6 }
 0x23b   : > { %23002 = vst [vmem:[#allocation33_spill] sm:$0xff] %v20362_v34  ;;  %v4530_v20 = vrot.slane %v4528_v38, 7  ;;  %v4587_v38 = vshll.u32 %v4498_v52, 16  ;;  %v20507_v34 = vld [vmem:[#allocation10 + $0x80] sm:$0xff]  }
 0x23d   : > { %v20367_v8 = vpop.permute.xlu0 %9188  ;;  %v4531_v37 = vor.u32 %v4530_v20, %v4527_v5  ;;  %v4604_v5 = vshll.u32 %v4500_v41, 16  ;;  %v4589_v49 = vrot.slane %v4587_v38, 7  ;;  %v4623_v38 = vrot.slane %v4621_v56, 7 }
 0x23e   : > { %23003 = vst [vmem:[#allocation34_spill] sm:$0xff] %v20367_v8  ;;  %v20371_v57 = vpop.permute.xlu1 %9173 }
 0x23f   : > { %23004 = vst [vmem:[#allocation35_spill] sm:$0xff] %v20371_v57  ;;  %v4590_v52 = vor.u32 %v4589_v49, %v4586_v23  ;;  %v4507_v23 = vld [vmem:[#allocation2 + $0xc0] sm:$0xc0] }
 0x240   : > { %16496 = vmatmul.mubr.msk.bf16.gmra.mrb[52].mxu1 %vm587_vm0, %v20226_v31  ;;  %v4535_v31 = vrot.slane %v4533_v46, 6  ;;  %v4593_v46 = vshrl.u32 %v4499_v39, 16 }
 0x241   : > { %16499 = vmatprep.mubr.msk.bf16.mxu1 %vm587_vm0, %v20235_v45  ;;  %v4496_v45 = vld [vmem:[#allocation2 + $0x38] sm:$0x7f] }
 0x242   : > { %v20374_v1 = vpop.permute.xlu0 %9198  ;;  %v4539_v26 = vor.u32 %v4538_v30, %v4535_v31  ;;  %v4567_v11 = vshrl.u32 %v4496_v45, 16  ;;  %v4570_v10 = vshll.u32 %v4496_v45, 16  ;;  %v4578_v31 = vrot.slane %v4576_v17, 6  ;;  %v4501_v45 = vld [vmem:[#allocation2 + $0x78] sm:$0xc0] }
 0x243   : > { %23005 = vst [vmem:[#allocation36_spill] sm:$0xff] %v20374_v1  ;;  %v20376_v63 = vpop.permute.xlu1 %9183  ;;  %v4581_v30 = vrot.slane %v4579_v35, 7  ;;  %v4595_v22 = vrot.slane %v4593_v46, 6  ;;  %v4610_v24 = vshrl.u32 %v4501_v45, 16  ;;  %v4505_v46 = vld [vmem:[#allocation2 + $0xa8] sm:$0xc0] }
 0x244   : > { %23006 = vst [vmem:[#allocation37_spill] sm:$0xff] %v20376_v63  ;;  %8865 = vadd.xlane.f32.xlu1 %v8864_v62  ;;  %v4569_v19 = vrot.slane %v4567_v11, 6  ;;  %v4572_v14 = vrot.slane %v4570_v10, 7  ;;  %v4601_v62 = vshrl.u32 %v4500_v41, 16  ;;  %v4503_v11 = vld [vmem:[#allocation2 + $0x90] sm:$0xc0] }
 0x245   : > { %v4504_v10 = vld [vmem:[#allocation2 + $0x98] sm:$0x7f]  ;;  %v4582_v47 = vor.u32 %v4581_v30, %v4578_v31 }
 0x246   : > { %v20384_v60 = vpop.permute.xlu0 %9208  ;;  %v4573_v44 = vor.u32 %v4572_v14, %v4569_v19  ;;  %v4603_v13 = vrot.slane %v4601_v62, 6  ;;  %v4630_v19 = vshll.u32 %v4503_v11, 16  ;;  %v4635_v14 = vshrl.u32 %v4504_v10, 16 }
 0x247   : > { %v20382_v59 = vpop.permute.xlu1 %9193  ;;  %23008 = vst [vmem:[#allocation39_spill] sm:$0xff] %v20384_v60  ;;  %v4638_v17 = vshll.u32 %v4504_v10, 16  ;;  %v4517_v60 = vld [vmem:[#allocation2 + $0x138] sm:$0xc0] }
 0x248   : > { %16500 = vmatmul.mubr.msk.bf16.gmra.mrb[56].mxu1 %vm587_vm0, %v20086_v53  ;;  %23007 = vst [vmem:[#allocation38_spill] sm:$0xff] %v20382_v59  ;;  %v4555_v53 = vrot.slane %v4553_v6, 7  ;;  %v4598_v6 = vrot.slane %v4596_v2, 7  ;;  %v4574_v55 = vsel %vm4523_vm3, %v4565_v58, %v4573_v44  ;;  %v4632_v58 = vrot.slane %v4630_v19, 7 }
 0x249   : > { %16503 = vmatprep.mubr.msk.bf16.mxu1 %vm587_vm0, %v20107_v25  ;;  %v4540_v25 = vsel %vm4523_vm3, %v4531_v37, %v4539_v26  ;;  %v4606_v37 = vrot.slane %v4604_v5, 7  ;;  %v18146_v26 = vld [vmem:[#allocation10 + $0x48] sm:$0xff]   ;;  %v4637_v44 = vrot.slane %v4635_v14, 6  ;;  %v4506_v5 = vld [vmem:[#allocation2 + $0xb0] sm:$0x7f] }
 0x24a   : > { %v4556_v48 = vor.u32 %v4555_v53, %v4552_v7  ;;  %v20392_v20 = vpop.permute.xlu0 %9218  ;;  %v4613_v7 = vshll.u32 %v4501_v45, 16  ;;  %v4618_v53 = vshrl.u32 %v4502_v43, 16  ;;  %v4599_v39 = vor.u32 %v4598_v6, %v4595_v22  ;;  %v4508_v45 = vld [vmem:[#allocation2 + $0xc8] sm:$0x7f] }
 0x24b   : > { %v20389_v27 = vpop.permute.xlu1 %9203  ;;  %23010 = vst [vmem:[#allocation41_spill] sm:$0xff] %v20392_v20  ;;  %v4607_v41 = vor.u32 %v4606_v37, %v4603_v13  ;;  %v18148_v43 = vld [vmem:[#allocation10 + $0x58] sm:$0xff]   ;;  %v4644_v6 = vshrl.u32 %v4505_v46, 16  ;;  %v4647_v13 = vshll.u32 %v4505_v46, 16  ;;  %v4655_v37 = vshll.u32 %v4506_v5, 16 }
 0x24c   : > { %23009 = vst [vmem:[#allocation40_spill] sm:$0xff] %v20389_v27  ;;  %v4615_v35 = vrot.slane %v4613_v7, 7  ;;  %v4620_v0 = vrot.slane %v4618_v53, 6  ;;  %v4669_v10 = vshrl.u32 %v4508_v45, 16  ;;  %v4510_v46 = vld [vmem:[#allocation2 + $0xe0] sm:$0x7f] }
 0x24d   : > { %v4608_v31 = vsel %vm4523_vm3, %v4599_v39, %v4607_v41  ;;  %v4649_v19 = vrot.slane %v4647_v13, 7  ;;  %v4657_v39 = vrot.slane %v4655_v37, 7  ;;  %v5299_v27 = vld [vmem:[#allocation2 + $0x38] sm:$0xfe] }
 0x24e   : > { %v20399_v54 = vpop.permute.xlu0 %9352  ;;  %v4624_v22 = vor.u32 %v4623_v38, %v4620_v0 }
 0x24f   : > { %v20396_v4 = vpop.permute.xlu1 %9213  ;;  %23012 = vst [vmem:[#allocation43_spill] sm:$0xff] %v20399_v54 }
 0x250   : > { %16504 = vmatmul.mubr.msk.bf16.gmra.mrb[60].mxu1 %vm587_vm0, %v20132_v32  ;;  %v4557_v32 = vsel %vm4523_vm3, %v4548_v40, %v4556_v48  ;;  %23011 = vst [vmem:[#allocation42_spill] sm:$0xff] %v20396_v4  ;;  %v18147_v40 = vld [vmem:[#allocation10 + $0x50] sm:$0xff]   ;;  %v4612_v48 = vrot.slane %v4610_v24, 6  ;;  %v4672_v24 = vshll.u32 %v4508_v45, 16 }
 0x251   : > { %16515 = vmatprep.mubr.msk.bf16.mxu1 %vm587_vm0, %v4540_v25  ;;  %v4627_v25 = vshrl.u32 %v4503_v11, 16  ;;  %v4664_v11 = vshll.u32 %v4507_v23, 16 }
 0x252   : > { %v20407_v30 = vpop.permute.xlu0 %9362  ;;  %v4616_v49 = vor.u32 %v4615_v35, %v4612_v48  ;;  %v4671_v35 = vrot.slane %v4669_v10, 6  ;;  %v4674_v0 = vrot.slane %v4672_v24, 7  ;;  %v4513_v10 = vld [vmem:[#allocation2 + $0x108] sm:$0xc0]  ;;  %v4514_v24 = vld [vmem:[#allocation2 + $0x110] sm:$0x7f] }
 0x253   : > { %v20403_v2 = vpop.permute.xlu1 %9223  ;;  %v4629_v62 = vrot.slane %v4627_v25, 6  ;;  %23014 = vst [vmem:[#allocation45_spill] sm:$0xff] %v20407_v30  ;;  %v4646_v25 = vrot.slane %v4644_v6, 6  ;;  %v4666_v48 = vrot.slane %v4664_v11, 7 }
 0x254   : > { %23013 = vst [vmem:[#allocation44_spill] sm:$0xff] %v20403_v2  ;;  %v4675_v45 = vor.u32 %v4674_v0, %v4671_v35  ;;  %v4712_v0 = vshrl.u32 %v4513_v10, 16 }
 0x255   : > { %v4633_v7 = vor.u32 %v4632_v58, %v4629_v62  ;;  %v4512_v62 = vld [vmem:[#allocation2 + $0xf8] sm:$0x7f]  ;;  %v4650_v58 = vor.u32 %v4649_v19, %v4646_v25 }
 0x256   : > { %v20416_v41 = vpop.permute.xlu0 %9372  ;;  %v4706_v37 = vshll.u32 %v4512_v62, 16 }
 0x257   : > { %v20411_v56 = vpop.permute.xlu1 %9327  ;;  %23015 = vst [vmem:[#allocation46_spill] sm:$0xff] %v20416_v41 }
 0x258   : > { %16516 = vmatmul.mubr.msk.bf16.vlgmr.msra.gmra.mrb[32].mxu1 %vm587_vm0, %v4557_v32  ;;  %v4640_v32 = vrot.slane %v4638_v17, 7 }
 0x259   : > { %16548 = vmatpush3.bf16.msra.mxu1 %v20318_v50  ;;  %16519 = vmatprep.mubr.msk.bf16.mxu1 %vm587_vm0, %v4574_v55  ;;  %v4591_v50 = vsel %vm4523_vm3, %v4582_v47, %v4590_v52  ;;  %v4652_v55 = vshrl.u32 %v4506_v5, 16  ;;  %v20413_v47 = vld [vmem:[#allocation10 + $0x60] sm:$0xff]   ;;  %v4625_v52 = vsel %vm4523_vm3, %v4616_v49, %v4624_v22  ;;  %v4689_v49 = vshll.u32 %v4510_v46, 16 }
 0x25a   : > { %16549 = vmatprep.subr.bf16.mxu1 %v18146_v26  ;;  %v4641_v53 = vor.u32 %v4640_v32, %v4637_v44  ;;  %v20424_v22 = vpop.permute.xlu0 %9382 }
 0x25b   : > { %v4654_v14 = vrot.slane %v4652_v55, 6  ;;  %v20421_v32 = vpop.permute.xlu1 %9332  ;;  %23016 = vst [vmem:[#allocation47_spill] sm:$0xff] %v20424_v22  ;;  %v4703_v55 = vshrl.u32 %v4512_v62, 16  ;;  %v4691_v25 = vrot.slane %v4689_v49, 7 }
 0x25c   : > { %v4642_v38 = vsel %vm4523_vm3, %v4633_v7, %v4641_v53 }
 0x25d   : > { %16550 = vmatpush3.bf16.msra.mxu1 %v18146_v26  ;;  %v4661_v26 = vshrl.u32 %v4507_v23, 16  ;;  %v4658_v44 = vor.u32 %v4657_v39, %v4654_v14  ;;  %v4705_v39 = vrot.slane %v4703_v55, 6 }
 0x25e   : > { %16551 = vmatprep.subr.bf16.mxu1 %v18147_v40  ;;  %v20431_v62 = vpop.permute.xlu0 %9392 }
 0x25f   : > { %v4663_v17 = vrot.slane %v4661_v26, 6  ;;  %v4659_v26 = vsel %vm4523_vm3, %v4650_v58, %v4658_v44  ;;  %v20428_v35 = vpop.permute.xlu1 %9337  ;;  %23017 = vst [vmem:[#allocation48_spill] sm:$0xff] %v20431_v62  ;;  %v18151_v62 = vld [vmem:[#allocation10 + $0x70] sm:$0xff]  }
 0x260   : > { %16520 = vmatmul.mubr.msk.bf16.gmra.mrb[36].mxu1 %vm587_vm0, %v4591_v50  ;;  %v4511_v50 = vld [vmem:[#allocation2 + $0xf0] sm:$0xc0] }
 0x261   : > { %16523 = vmatprep.mubr.msk.bf16.mxu1 %vm587_vm0, %v4608_v31  ;;  %16552 = vmatpush3.bf16.msra.mxu1 %v18147_v40  ;;  %v4509_v40 = vld [vmem:[#allocation2 + $0xd8] sm:$0xc0]  ;;  %v4667_v23 = vor.u32 %v4666_v48, %v4663_v17  ;;  %v4695_v6 = vshrl.u32 %v4511_v50, 16  ;;  %v4698_v13 = vshll.u32 %v4511_v50, 16  ;;  %v4708_v17 = vrot.slane %v4706_v37, 7 }
 0x262   : > { %16553 = vmatprep.subr.bf16.mxu1 %v18148_v43  ;;  %v4678_v5 = vshrl.u32 %v4509_v40, 16  ;;  %v4681_v31 = vshll.u32 %v4509_v40, 16  ;;  %v4515_v48 = vld [vmem:[#allocation2 + $0x120] sm:$0xc0]  ;;  %v4715_v40 = vshll.u32 %v4513_v10, 16 }
 0x263   : > { %v4676_v7 = vsel %vm4523_vm3, %v4667_v23, %v4675_v45  ;;  %v4697_v19 = vrot.slane %v4695_v6, 6  ;;  %v4700_v14 = vrot.slane %v4698_v13, 7  ;;  %v4516_v50 = vld [vmem:[#allocation2 + $0x128] sm:$0x7f]  ;;  %v4709_v45 = vor.u32 %v4708_v17, %v4705_v39  ;;  %v20434_v10 = vpop.permute.xlu1 %9342 }
 0x264   : > { %v4680_v11 = vrot.slane %v4678_v5, 6  ;;  %v4683_v53 = vrot.slane %v4681_v31, 7  ;;  %v4729_v5 = vshrl.u32 %v4515_v48, 16  ;;  %v4732_v31 = vshll.u32 %v4515_v48, 16 }
 0x265   : > { %16554 = vmatpush3.bf16.msra.mxu1 %v18148_v43  ;;  %v4686_v43 = vshrl.u32 %v4510_v46, 16  ;;  %v4723_v46 = vshll.u32 %v4514_v24, 16  ;;  %v4701_v23 = vor.u32 %v4700_v14, %v4697_v19  ;;  %v4740_v49 = vshll.u32 %v4516_v50, 16  ;;  %v4519_v19 = vld [vmem:[#allocation2 + $0x150] sm:$0xc0] }
 0x266   : > { %16587 = vmatprep.subr.bf16.mxu1 %v20413_v47  ;;  %v4684_v58 = vor.u32 %v4683_v53, %v4680_v11  ;;  %v4714_v6 = vrot.slane %v4712_v0, 6  ;;  %v4717_v13 = vrot.slane %v4715_v40, 7  ;;  %v4734_v2 = vrot.slane %v4732_v31, 7  ;;  %v20438_v53 = vpop.permute.xlu0 %9402  ;;  %v4520_v14 = vld [vmem:[#allocation2 + $0x158] sm:$0x7f] }
 0x267   : > { %v4725_v37 = vrot.slane %v4723_v46, 7  ;;  %v4710_v11 = vsel %vm4523_vm3, %v4701_v23, %v4709_v45  ;;  %23018 = vst [vmem:[#allocation49_spill] sm:$0xff] %v20438_v53  ;;  %v4746_v48 = vshrl.u32 %v4517_v60, 16  ;;  %v4749_v0 = vshll.u32 %v4517_v60, 16  ;;  %v20442_v23 = vpop.permute.xlu1 %9347 }
 0x268   : > { %16524 = vmatmul.mubr.msk.bf16.gmra.mrb[40].mxu1 %vm587_vm0, %v4625_v52  ;;  %v4688_v52 = vrot.slane %v4686_v43, 6  ;;  %v4737_v43 = vshrl.u32 %v4516_v50, 16  ;;  %v4718_v39 = vor.u32 %v4717_v13, %v4714_v6  ;;  %v4763_v46 = vshrl.u32 %v4519_v19, 16  ;;  %23019 = vst [vmem:[#allocation50_spill] sm:$0xff] %v20442_v23 }
 0x269   : > { %16527 = vmatprep.mubr.msk.bf16.mxu1 %vm587_vm0, %v4642_v38  ;;  %v4720_v38 = vshrl.u32 %v4514_v24, 16  ;;  %v4731_v24 = vrot.slane %v4729_v5, 6  ;;  %v4766_v50 = vshll.u32 %v4519_v19, 16 }
 0x26a   : > { %v4692_v44 = vor.u32 %v4691_v25, %v4688_v52  ;;  %v4739_v52 = vrot.slane %v4737_v43, 6  ;;  %v4742_v25 = vrot.slane %v4740_v49, 7  ;;  %v4748_v43 = vrot.slane %v4746_v48, 6 }
 0x26b   : > { %v4722_v55 = vrot.slane %v4720_v38, 6  ;;  %v4735_v5 = vor.u32 %v4734_v2, %v4731_v24  ;;  %v4751_v49 = vrot.slane %v4749_v0, 7  ;;  %v4765_v60 = vrot.slane %v4763_v46, 6  ;;  %v5295_v2 = vld [vmem:[#allocation2 + $0x8] sm:$0xfe]  ;;  %v20449_v48 = vpop.permute.xlu1 %9357 }
 0x26c   : > { %v4743_v31 = vor.u32 %v4742_v25, %v4739_v52  ;;  %v5296_v24 = vld [vmem:[#allocation2 + $0x10] sm:$0x3]  ;;  %23021 = vst [vmem:[#allocation52_spill] sm:$0xff] %v20449_v48 }
 0x26d   : > { %v4726_v17 = vor.u32 %v4725_v37, %v4722_v55  ;;  %v20445_v55 = vpop.permute.xlu0 %9412  ;;  %v4768_v37 = vrot.slane %v4766_v50, 7  ;;  %v4752_v52 = vor.u32 %v4751_v49, %v4748_v43  ;;  %v5297_v49 = vld [vmem:[#allocation2 + $0x20] sm:$0xfe] }
 0x26e   : > { %23020 = vst [vmem:[#allocation51_spill] sm:$0xff] %v20445_v55  ;;  %v4744_v19 = vsel %vm4523_vm3, %v4735_v5, %v4743_v31  ;;  %v5337_v5 = vshrl.u32 %v5296_v24, 16  ;;  %v5340_v31 = vshll.u32 %v5296_v24, 16  ;;  %v5349_v4 = vshll.u32 %v5297_v49, 16  ;;  %v5300_v24 = vld [vmem:[#allocation2 + $0x40] sm:$0x3] }
 0x26f   : > { %v4727_v45 = vsel %vm4523_vm3, %v4718_v39, %v4726_v17  ;;  %v4769_v0 = vor.u32 %v4768_v37, %v4765_v60 }
 0x270   : > { %16528 = vmatmul.mubr.msk.bf16.gmra.mrb[44].mxu1 %vm587_vm0, %v4659_v26  ;;  %v4693_v26 = vsel %vm4523_vm3, %v4684_v58, %v4692_v44  ;;  %v4771_v58 = vshrl.u32 %v4520_v14, 16  ;;  %v4774_v44 = vshll.u32 %v4520_v14, 16  ;;  %v4522_v14 = vld [vmem:[#allocation2 + $0x170] sm:$0x7f] }
 0x271   : > { %16531 = vmatprep.mubr.msk.bf16.mxu1 %vm587_vm0, %v4676_v7  ;;  %v4518_v7 = vld [vmem:[#allocation2 + $0x140] sm:$0x7f]  ;;  %v4791_v46 = vshll.u32 %v4522_v14, 16  ;;  %v20452_v50 = vpop.permute.xlu0 %9422 }
 0x272   : > { %v4754_v40 = vshrl.u32 %v4518_v7, 16  ;;  %v4757_v38 = vshll.u32 %v4518_v7, 16  ;;  %v4776_v7 = vrot.slane %v4774_v44, 7  ;;  %23022 = vst [vmem:[#allocation53_spill] sm:$0xff] %v20452_v50  ;;  %v5332_v44 = vshll.u32 %v5295_v2, 16 }
 0x273   : > { %v4793_v20 = vrot.slane %v4791_v46, 7  ;;  %v5302_v50 = vld [vmem:[#allocation2 + $0x58] sm:$0x3] }
 0x274   : > { %v4756_v6 = vrot.slane %v4754_v40, 6  ;;  %v4759_v13 = vrot.slane %v4757_v38, 7  ;;  %v4788_v38 = vshrl.u32 %v4522_v14, 16  ;;  %v5334_v37 = vrot.slane %v5332_v44, 2  ;;  %v20456_v14 = vpop.permute.xlu1 %9367 }
 0x275   : > { %23023 = vst [vmem:[#allocation54_spill] sm:$0xff] %v20456_v14  ;;  %v5371_v44 = vshrl.u32 %v5300_v24, 16 }
 0x276   : > { %v4760_v25 = vor.u32 %v4759_v13, %v4756_v6 }
 0x278   : > { %16532 = vmatmul.mubr.msk.bf16.gmra.mrb[48].mxu1 %vm587_vm0, %v4693_v26  ;;  %v4773_v26 = vrot.slane %v4771_v58, 6  ;;  %v5329_v58 = vshrl.u32 %v5295_v2, 16  ;;  %v5346_v2 = vshrl.u32 %v5297_v49, 16  ;;  %v5351_v49 = vrot.slane %v5349_v4, 2 }
 0x279   : > { %16535 = vmatprep.mubr.msk.bf16.mxu1 %vm587_vm0, %v4710_v11  ;;  %v4521_v11 = vld [vmem:[#allocation2 + $0x168] sm:$0xc0] }
 0x27a   : > { %v4780_v39 = vshrl.u32 %v4521_v11, 16  ;;  %v4783_v17 = vshll.u32 %v4521_v11, 16  ;;  %v4777_v40 = vor.u32 %v4776_v7, %v4773_v26  ;;  %v4790_v11 = vrot.slane %v4788_v38, 6 }
 0x27b   : > { %v5331_v60 = vrot.slane %v5329_v58, 1  ;;  %v5339_v26 = vrot.slane %v5337_v5, 1  ;;  %v5342_v7 = vrot.slane %v5340_v31, 2  ;;  %v5366_v38 = vshll.u32 %v5299_v27, 16 }
 0x27c   : > { %v4782_v43 = vrot.slane %v4780_v39, 6  ;;  %v4778_v6 = vsel %vm4523_vm3, %v4769_v0, %v4777_v40  ;;  %v4785_v13 = vrot.slane %v4783_v17, 7  ;;  %v4794_v0 = vor.u32 %v4793_v20, %v4790_v11 }
 0x27d   : > { %v5363_v40 = vshrl.u32 %v5299_v27, 16  ;;  %v5335_v46 = vor.u32 %v5334_v37, %v5331_v60  ;;  %v5343_v58 = vor.u32 %v5342_v7, %v5339_v26  ;;  %v5374_v5 = vshll.u32 %v5300_v24, 16  ;;  %v5303_v60 = vld [vmem:[#allocation2 + $0x68] sm:$0xfe]  ;;  %v5304_v37 = vld [vmem:[#allocation2 + $0x70] sm:$0x3] }
 0x27e   : > { %v4786_v17 = vor.u32 %v4785_v13, %v4782_v43  ;;  %v5348_v31 = vrot.slane %v5346_v2, 1  ;;  %v5368_v43 = vrot.slane %v5366_v38, 2  ;;  %v5373_v13 = vrot.slane %v5371_v44, 1 }
 0x27f   : > { %v5344_v27 = vsel %vm5327_vm4, %v5335_v46, %v5343_v58  ;;  %v5376_v11 = vrot.slane %v5374_v5, 2  ;;  %v5388_v7 = vshrl.u32 %v5302_v50, 16 }
 0x280   : > { %16536 = vmatmul.mubr.msk.bf16.gmra.mrb[52].mxu1 %vm587_vm0, %v4727_v45  ;;  %v4761_v45 = vsel %vm4523_vm3, %v4752_v52, %v4760_v25  ;;  %v20459_v52 = vpop.permute.xlu0 %9432  ;;  %v5352_v2 = vor.u32 %v5351_v49, %v5348_v31  ;;  %v5305_v31 = vld [vmem:[#allocation2 + $0x80] sm:$0xfe]  ;;  %v5306_v49 = vld [vmem:[#allocation2 + $0x88] sm:$0x3] }
 0x281   : > { %16539 = vmatprep.mubr.msk.bf16.mxu1 %vm587_vm0, %v4744_v19  ;;  %v5298_v19 = vld [vmem:[#allocation2 + $0x28] sm:$0x3]  ;;  %23024 = vst [vmem:[#allocation55_spill] sm:$0xff] %v20459_v52  ;;  %v5301_v52 = vld [vmem:[#allocation2 + $0x50] sm:$0xfe]  ;;  %v5377_v46 = vor.u32 %v5376_v11, %v5373_v13 }
 0x282   : > { %v5354_v25 = vshrl.u32 %v5298_v19, 16  ;;  %v5357_v39 = vshll.u32 %v5298_v19, 16  ;;  %v4795_v19 = vsel %vm4523_vm3, %v4786_v17, %v4794_v0  ;;  %v5380_v26 = vshrl.u32 %v5301_v52, 16 }
 0x283   : > { %v5383_v4 = vshll.u32 %v5301_v52, 16  ;;  %v5400_v17 = vshll.u32 %v5303_v60, 16  ;;  %v5405_v0 = vshrl.u32 %v5304_v37, 16 }
 0x284   : > { %v5356_v55 = vrot.slane %v5354_v25, 1  ;;  %v5359_v8 = vrot.slane %v5357_v39, 2  ;;  %v20465_v20 = vpop.permute.xlu0 %9442  ;;  %v5391_v25 = vshll.u32 %v5302_v50, 16  ;;  %v5397_v39 = vshrl.u32 %v5303_v60, 16 }
 0x285   : > { %23026 = vst [vmem:[#allocation57_spill] sm:$0xff] %v20465_v20  ;;  %v5382_v5 = vrot.slane %v5380_v26, 1  ;;  %v5385_v52 = vrot.slane %v5383_v4, 2  ;;  %v5390_v20 = vrot.slane %v5388_v7, 1  ;;  %v5307_v26 = vld [vmem:[#allocation2 + $0x98] sm:$0xfe] }
 0x286   : > { %v5360_v24 = vor.u32 %v5359_v8, %v5356_v55  ;;  %v5393_v50 = vrot.slane %v5391_v25, 2  ;;  %v5308_v4 = vld [vmem:[#allocation2 + $0xa0] sm:$0x3]  ;;  %v5414_v7 = vshrl.u32 %v5305_v31, 16 }
 0x287   : > { %v5386_v25 = vor.u32 %v5385_v52, %v5382_v5 }
 0x288   : > { %16540 = vmatmul.mubr.msk.bf16.gmra.mrb[56].mxu1 %vm587_vm0, %v4761_v45  ;;  %v20462_v45 = vpop.permute.xlu1 %9377  ;;  %v5361_v8 = vsel %vm5327_vm4, %v5352_v2, %v5360_v24  ;;  %v20477_v55 = vpop.permute.xlu0 %9228  ;;  %v5417_v2 = vshll.u32 %v5305_v31, 16  ;;  %v5422_v24 = vshrl.u32 %v5306_v49, 16 }
 0x289   : > { %16543 = vmatprep.mubr.msk.bf16.mxu1 %vm587_vm0, %v4778_v6  ;;  %23025 = vst [vmem:[#allocation56_spill] sm:$0xff] %v20462_v45  ;;  %v5365_v6 = vrot.slane %v5363_v40, 1  ;;  %v5408_v40 = vshll.u32 %v5304_v37, 16  ;;  %23028 = vst [vmem:[#allocation59_spill] sm:$0xff] %v20477_v55  ;;  %v18150_v37 = vld [vmem:[#allocation10 + $0x68] sm:$0xff]   ;;  %v5394_v55 = vor.u32 %v5393_v50, %v5390_v20  ;;  %v5416_v20 = vrot.slane %v5414_v7, 1 }
 0x28a   : > { %v5419_v5 = vrot.slane %v5417_v2, 2  ;;  %v5424_v52 = vrot.slane %v5422_v24, 1  ;;  %v5311_v24 = vld [vmem:[#allocation2 + $0xc8] sm:$0xfe] }
 0x28b   : > { %v5369_v38 = vor.u32 %v5368_v43, %v5365_v6  ;;  %v5399_v6 = vrot.slane %v5397_v39, 1  ;;  %v5402_v43 = vrot.slane %v5400_v17, 2  ;;  %v5410_v13 = vrot.slane %v5408_v40, 2 }
 0x28c   : > { %v20470_v58 = vpop.permute.xlu1 %9387  ;;  %v5425_v39 = vshll.u32 %v5306_v49, 16  ;;  %v5431_v17 = vshrl.u32 %v5307_v26, 16  ;;  %v5439_v40 = vshrl.u32 %v5308_v4, 16 }
 0x28d   : > { %23027 = vst [vmem:[#allocation58_spill] sm:$0xff] %v20470_v58  ;;  %v5378_v60 = vsel %vm5327_vm4, %v5369_v38, %v5377_v46  ;;  %v5442_v38 = vshll.u32 %v5308_v4, 16  ;;  %v20489_v46 = vpop.permute.xlu0 %9452  ;;  %v5403_v59 = vor.u32 %v5402_v43, %v5399_v6 }
 0x28e   : > { %23030 = vst [vmem:[#allocation61_spill] sm:$0xff] %v20489_v46  ;;  %v5427_v49 = vrot.slane %v5425_v39, 2  ;;  %v5433_v4 = vrot.slane %v5431_v17, 1  ;;  %v5441_v43 = vrot.slane %v5439_v40, 1  ;;  %v5312_v46 = vld [vmem:[#allocation2 + $0xd0] sm:$0x3]  ;;  %v5420_v17 = vor.u32 %v5419_v5, %v5416_v20 }
 0x290   : > { %16544 = vmatmul.mubr.msk.bf16.gmra.mrb[60].mxu1 %vm587_vm0, %v4795_v19  ;;  %v20485_v63 = vpop.permute.xlu1 %9397 }
 0x291   : > { %16555 = vmatprep.mubr.msk.bf16.mxu1 %vm587_vm0, %v5344_v27  ;;  %v5407_v27 = vrot.slane %v5405_v0, 1  ;;  %23029 = vst [vmem:[#allocation60_spill] sm:$0xff] %v20485_v63  ;;  %v5434_v0 = vshll.u32 %v5307_v26, 16  ;;  %v5310_v26 = vld [vmem:[#allocation2 + $0xb8] sm:$0x3] }
 0x292   : > { %v5456_v53 = vshrl.u32 %v5310_v26, 16  ;;  %v5459_v40 = vshll.u32 %v5310_v26, 16  ;;  %v5313_v26 = vld [vmem:[#allocation2 + $0xe0] sm:$0xfe] }
 0x293   : > { %v20472_v44 = vpop.f32.mrb[0].mxu1  ;;  %v5411_v31 = vor.u32 %v5410_v13, %v5407_v27  ;;  %v5436_v6 = vrot.slane %v5434_v0, 2  ;;  %v5444_v27 = vrot.slane %v5442_v38, 2  ;;  %v5428_v0 = vor.u32 %v5427_v49, %v5424_v52 }
 0x294   : > { %v20474_v1 = vpop.f32.mrb[1].mxu1  ;;  %v20501_v2 = vpop.permute.xlu1 %9407  ;;  %v5465_v38 = vshrl.u32 %v5311_v24, 16  ;;  %v5461_v49 = vrot.slane %v5459_v40, 2 }
 0x295   : > { %v20479_v19 = vpop.f32.mrb[2].mxu1  ;;  %v5412_v7 = vsel %vm5327_vm4, %v5403_v59, %v5411_v31  ;;  %23031 = vst [vmem:[#allocation62_spill] sm:$0xff] %v20501_v2  ;;  %v5468_v59 = vshll.u32 %v5311_v24, 16  ;;  %v5473_v31 = vshrl.u32 %v5312_v46, 16  ;;  %v5476_v2 = vshll.u32 %v5312_v46, 16 }
 0x296   : > { %v20481_v11 = vpop.f32.mrb[3].mxu1  ;;  %v5437_v12 = vor.u32 %v5436_v6, %v5433_v4  ;;  %v5445_v58 = vor.u32 %v5444_v27, %v5441_v43  ;;  %v5429_v5 = vsel %vm5327_vm4, %v5420_v17, %v5428_v0  ;;  %v5314_v46 = vld [vmem:[#allocation2 + $0xe8] sm:$0x3]  ;;  %v5467_v4 = vrot.slane %v5465_v38, 1  ;;  %v5315_v17 = vld [vmem:[#allocation2 + $0xf8] sm:$0xfe] }
 0x297   : > { %v5470_v6 = vrot.slane %v5468_v59, 2  ;;  %v5475_v43 = vrot.slane %v5473_v31, 1  ;;  %v5478_v27 = vrot.slane %v5476_v2, 2  ;;  %v5316_v0 = vld [vmem:[#allocation2 + $0x100] sm:$0x3]  ;;  %v5490_v40 = vshrl.u32 %v5314_v46, 16 }
 0x298   : > { %16556 = vmatmul.mubr.msk.bf16.vlgmr.msra.gmra.mrb[32].mxu1 %vm587_vm0, %v5361_v8  ;;  %v20514_v52 = vpop.permute.xlu1 %9417  ;;  %v5493_v38 = vshll.u32 %v5314_v46, 16  ;;  %v5507_v57 = vshrl.u32 %v5316_v0, 16  ;;  %v5510_v41 = vshll.u32 %v5316_v0, 16 }
 0x299   : > { %16588 = vmatpush3.bf16.msra.mxu1 %v20413_v47  ;;  %16559 = vmatprep.mubr.msk.bf16.mxu1 %vm587_vm0, %v5378_v60  ;;  %v5395_v47 = vsel %vm5327_vm4, %v5386_v25, %v5394_v55  ;;  %v5309_v60 = vld [vmem:[#allocation2 + $0xb0] sm:$0xfe]  ;;  %v18152_v55 = vld [vmem:[#allocation10 + $0x78] sm:$0xff]   ;;  %23033 = vst [vmem:[#allocation64_spill] sm:$0xff] %v20514_v52  ;;  %v5471_v59 = vor.u32 %v5470_v6, %v5467_v4 }
 0x29a   : > { %16589 = vmatprep.subr.bf16.mxu1 %v18150_v37  ;;  %v5448_v25 = vshrl.u32 %v5309_v60, 16  ;;  %v5451_v39 = vshll.u32 %v5309_v60, 16  ;;  %v5479_v31 = vor.u32 %v5478_v27, %v5475_v43  ;;  %v5317_v52 = vld [vmem:[#allocation2 + $0x110] sm:$0xfe]  ;;  %v5319_v27 = vld [vmem:[#allocation2 + $0x128] sm:$0xfe] }
 0x29b   : > { %v20491_v8 = vpop.f32.mrb[4].mxu1  ;;  %v5519_v43 = vshll.u32 %v5317_v52, 16  ;;  %v5533_v14 = vshrl.u32 %v5319_v27, 16  ;;  %v5536_v29 = vshll.u32 %v5319_v27, 16 }
 0x29c   : > { %v20493_v50 = vpop.f32.mrb[5].mxu1  ;;  %v5453_v63 = vrot.slane %v5451_v39, 2  ;;  %v5485_v39 = vshll.u32 %v5313_v26, 16  ;;  %v5480_v6 = vsel %vm5327_vm4, %v5471_v59, %v5479_v31  ;;  %v5321_v59 = vld [vmem:[#allocation2 + $0x140] sm:$0xfe] }
 0x29d   : > { %v20496_v51 = vpop.f32.mrb[6].mxu1  ;;  %16590 = vmatpush3.bf16.msra.mxu1 %v18150_v37  ;;  %v20504_v37 = vpop.permute.xlu0 %9238  ;;  %v5550_v54 = vshrl.u32 %v5321_v59, 16  ;;  %v5553_v27 = vshll.u32 %v5321_v59, 16  ;;  %v5538_v30 = vrot.slane %v5536_v29, 2 }
 0x29e   : > { %v20498_v13 = vpop.f32.mrb[7].mxu1  ;;  %16591 = vmatprep.subr.bf16.mxu1 %v18151_v62  ;;  %23032 = vst [vmem:[#allocation63_spill] sm:$0xff] %v20504_v37  ;;  %v5458_v37 = vrot.slane %v5456_v53, 1  ;;  %v5446_v53 = vsel %vm5327_vm4, %v5437_v12, %v5445_v58  ;;  %v5499_v12 = vshrl.u32 %v5315_v17, 16  ;;  %v5502_v58 = vshll.u32 %v5315_v17, 16 }
 0x29f   : > { %v5487_v22 = vrot.slane %v5485_v39, 2  ;;  %v5320_v17 = vld [vmem:[#allocation2 + $0x130] sm:$0x3]  ;;  %v5555_v59 = vrot.slane %v5553_v27, 2 }
 0x2a0   : > { %16560 = vmatmul.mubr.msk.bf16.gmra.mrb[36].mxu1 %vm587_vm0, %v5395_v47  ;;  %v5450_v47 = vrot.slane %v5448_v25, 1  ;;  %v5482_v25 = vshrl.u32 %v5313_v26, 16  ;;  %v5504_v39 = vrot.slane %v5502_v58, 2  ;;  %v5521_v58 = vrot.slane %v5519_v43, 2  ;;  %v5323_v43 = vld [vmem:[#allocation2 + $0x158] sm:$0xfe] }
 0x2a1   : > { %16563 = vmatprep.mubr.msk.bf16.mxu1 %vm587_vm0, %v5412_v7  ;;  %16592 = vmatpush3.bf16.msra.mxu1 %v18151_v62  ;;  %v20520_v24 = vpop.permute.xlu0 %9462 }
 0x2a2   : > { %16593 = vmatprep.subr.bf16.mxu1 %v18152_v55  ;;  %23034 = vst [vmem:[#allocation65_spill] sm:$0xff] %v20520_v24  ;;  %v5454_v2 = vor.u32 %v5453_v63, %v5450_v47  ;;  %v20526_v24 = vpop.permute.xlu1 %9427  ;;  %v5484_v15 = vrot.slane %v5482_v25, 1  ;;  %v5495_v63 = vrot.slane %v5493_v38, 2  ;;  %v5516_v47 = vshrl.u32 %v5317_v52, 16 }
 0x2a3   : > { %v20509_v60 = vpop.f32.mrb[8].mxu1  ;;  %23035 = vst [vmem:[#allocation66_spill] sm:$0xff] %v20526_v24  ;;  %v5501_v25 = vrot.slane %v5499_v12, 1  ;;  %v5512_v24 = vrot.slane %v5510_v41, 2 }
 0x2a4   : > { %v20511_v20 = vpop.f32.mrb[9].mxu1  ;;  %v5488_v52 = vor.u32 %v5487_v22, %v5484_v15  ;;  %v5518_v41 = vrot.slane %v5516_v47, 1 }
 0x2a5   : > { %v20516_v62 = vpop.f32.mrb[10].mxu1  ;;  %16594 = vmatpush3.bf16.msra.mxu1 %v18152_v55  ;;  %v5462_v55 = vor.u32 %v5461_v49, %v5458_v37  ;;  %v5318_v37 = vld [vmem:[#allocation2 + $0x118] sm:$0x3]  ;;  %v5505_v12 = vor.u32 %v5504_v39, %v5501_v25 }
 0x2a6   : > { %v20518_v7 = vpop.f32.mrb[11].mxu1  ;;  %16627 = vmatprep.subr.bf16.mxu1 %v20507_v34  ;;  %v5524_v16 = vshrl.u32 %v5318_v37, 16  ;;  %v20541_v38 = vpop.permute.xlu1 %9437  ;;  %v5522_v25 = vor.u32 %v5521_v58, %v5518_v41  ;;  %v5570_v41 = vshll.u32 %v5323_v43, 16 }
 0x2a7   : > { %v5463_v4 = vsel %vm5327_vm4, %v5454_v2, %v5462_v55  ;;  %23037 = vst [vmem:[#allocation68_spill] sm:$0xff] %v20541_v38  ;;  %v5541_v2 = vshrl.u32 %v5320_v17, 16  ;;  %v5544_v55 = vshll.u32 %v5320_v17, 16  ;;  %v5535_v17 = vrot.slane %v5533_v14, 1 }
 0x2a8   : > { %16564 = vmatmul.mubr.msk.bf16.gmra.mrb[40].mxu1 %vm587_vm0, %v5429_v5  ;;  %v20530_v5 = vpop.permute.xlu0 %9248 }
 0x2a9   : > { %16567 = vmatprep.mubr.msk.bf16.mxu1 %vm587_vm0, %v5446_v53  ;;  %23036 = vst [vmem:[#allocation67_spill] sm:$0xff] %v20530_v5  ;;  %v5492_v53 = vrot.slane %v5490_v40, 1  ;;  %v5509_v5 = vrot.slane %v5507_v57, 1  ;;  %v5527_v40 = vshll.u32 %v5318_v37, 16  ;;  %v5322_v37 = vld [vmem:[#allocation2 + $0x148] sm:$0x3]  ;;  %v5539_v29 = vor.u32 %v5538_v30, %v5535_v17 }
 0x2aa   : > { %v5546_v15 = vrot.slane %v5544_v55, 2  ;;  %v20555_v47 = vpop.permute.xlu1 %9447  ;;  %v5552_v55 = vrot.slane %v5550_v54, 1  ;;  %v5326_v17 = vld [vmem:[#allocation2 + $0x178] sm:$0x3] }
 0x2ab   : > { %v20528_v26 = vpop.f32.mrb[12].mxu1  ;;  %v5496_v31 = vor.u32 %v5495_v63, %v5492_v53  ;;  %v5513_v57 = vor.u32 %v5512_v24, %v5509_v5  ;;  %v5529_v38 = vrot.slane %v5527_v40, 2  ;;  %v5558_v24 = vshrl.u32 %v5322_v37, 16  ;;  %23039 = vst [vmem:[#allocation70_spill] sm:$0xff] %v20555_v47  ;;  %v5324_v40 = vld [vmem:[#allocation2 + $0x160] sm:$0x3] }
 0x2ac   : > { %v20532_v46 = vpop.f32.mrb[13].mxu1  ;;  %v20544_v45 = vpop.permute.xlu0 %9472  ;;  %v5561_v5 = vshll.u32 %v5322_v37, 16  ;;  %v5578_v58 = vshll.u32 %v5324_v40, 16  ;;  %v5556_v27 = vor.u32 %v5555_v59, %v5552_v55  ;;  %v5592_v59 = vshrl.u32 %v5326_v17, 16 }
 0x2ad   : > { %v20534_v49 = vpop.f32.mrb[14].mxu1  ;;  %23038 = vst [vmem:[#allocation69_spill] sm:$0xff] %v20544_v45  ;;  %v5497_v53 = vsel %vm5327_vm4, %v5488_v52, %v5496_v31  ;;  %v20559_v52 = vld [vmem:[#allocation3] ss:$0 sm:$0xff]  ;;  %v5560_v37 = vrot.slane %v5558_v24, 1 }
 0x2ae   : > { %v20538_v0 = vpop.f32.mrb[15].mxu1  ;;  %v5563_v45 = vrot.slane %v5561_v5, 2 }
 0x2b0   : > { %16568 = vmatmul.mubr.msk.bf16.gmra.mrb[44].mxu1 %vm587_vm0, %v5463_v4  ;;  %v5526_v4 = vrot.slane %v5524_v16, 1  ;;  %v5514_v16 = vsel %vm5327_vm4, %v5505_v12, %v5513_v57  ;;  %v5567_v12 = vshrl.u32 %v5323_v43, 16  ;;  %v5325_v57 = vld [vmem:[#allocation2 + $0x170] sm:$0xfe]  ;;  %v5564_v5 = vor.u32 %v5563_v45, %v5560_v37  ;;  %v5874_v43 = vld [vmem:[#allocation2 + $0x48] sm:$0xc0] }
 0x2b1   : > { %16571 = vmatprep.mubr.msk.bf16.mxu1 %vm587_vm0, %v5480_v6  ;;  %v5543_v6 = vrot.slane %v5541_v2, 1  ;;  %v5587_v55 = vshll.u32 %v5325_v57, 16  ;;  %v5907_v45 = vshrl.u32 %v5874_v43, 16  ;;  %v5910_v37 = vshll.u32 %v5874_v43, 16 }
 0x2b2   : > { %v5530_v39 = vor.u32 %v5529_v38, %v5526_v4  ;;  %v5575_v38 = vshrl.u32 %v5324_v40, 16  ;;  %v5875_v40 = vld [vmem:[#allocation2 + $0x50] sm:$0x7f] }
 0x2b3   : > { %v20546_v3 = vpop.f32.mrb[16].mxu1  ;;  %v5547_v2 = vor.u32 %v5546_v15, %v5543_v6  ;;  %v5584_v6 = vshrl.u32 %v5325_v57, 16  ;;  %v5909_v18 = vrot.slane %v5907_v45, 6  ;;  %v5912_v43 = vrot.slane %v5910_v37, 7  ;;  %v5879_v45 = vld [vmem:[#allocation2 + $0x80] sm:$0x7f] }
 0x2b4   : > { %v20548_v33 = vpop.f32.mrb[17].mxu1  ;;  %v5531_v54 = vsel %vm5327_vm4, %v5522_v25, %v5530_v39  ;;  %v5577_v25 = vrot.slane %v5575_v38, 1  ;;  %v5580_v39 = vrot.slane %v5578_v58, 2 }
 0x2b5   : > { %v20550_v22 = vpop.f32.mrb[18].mxu1  ;;  %v5548_v30 = vsel %vm5327_vm4, %v5539_v29, %v5547_v2 }
 0x2b6   : > { %v20553_v63 = vpop.f32.mrb[19].mxu1  ;;  %v5581_v57 = vor.u32 %v5580_v39, %v5577_v25 }
 0x2b7   : > { %v8869_v14 = vpop.xlane.xlu0 %8868 }
 0x2b8   : > { %16572 = vmatmul.mubr.msk.bf16.gmra.mrb[48].mxu1 %vm587_vm0, %v5497_v53  ;;  %v8908_v31 = vadd.f32 %v20559_v52, %v8869_v14  ;;  %v20563_v53 = vpop.permute.xlu1 %9233 }
 0x2b9   : > { %16575 = vmatprep.mubr.msk.bf16.mxu1 %vm587_vm0, %v5514_v16  ;;  %23040 = vst [vmem:[#allocation71_spill] sm:$0xff] %v20563_v53  ;;  %v5569_v16 = vrot.slane %v5567_v12, 1  ;;  %v5572_v53 = vrot.slane %v5570_v41, 2  ;;  %v5876_v12 = vld [vmem:[#allocation2 + $0x60] sm:$0xc0]  ;;  %v5918_v41 = vshll.u32 %v5875_v40, 16 }
 0x2ba   : > { %v15365_v4 = vmul.f32 -1.442695, %v8908_v31  ;;  %v5927_v28 = vshll.u32 %v5876_v12, 16 }
 0x2bb   : > { %v5573_v58 = vor.u32 %v5572_v53, %v5569_v16  ;;  %v5878_v16 = vld [vmem:[#allocation2 + $0x78] sm:$0xc0] }
 0x2bc   : > { %v16437_v47 = vpop.f32.mrb[0].mxu0  ;;  %18329 = vpow2.f32 %v15365_v4  ;;  %v20581_v38 = vpop.permute.xlu1 %9457  ;;  %v5586_v4 = vrot.slane %v5584_v6, 1 }
 0x2bd   : > { %v20568_v15 = vadd.f32 %v16437_v47, %v20472_v44  ;;  %v4294_v24 = vpop.f32.mrb[1].mxu0  ;;  %v5595_v44 = vshll.u32 %v5326_v17, 16  ;;  %23041 = vst [vmem:[#allocation72_spill] sm:$0xff] %v20581_v38  ;;  %v5877_v17 = vld [vmem:[#allocation2 + $0x68] sm:$0x7f]  ;;  %v5920_v38 = vrot.slane %v5918_v41, 7 }
 0x2be   : > { %v20571_v14 = vadd.f32 %v4294_v24, %v20474_v1  ;;  %v16438_v31 = vpop.f32.mrb[2].mxu0  ;;  %v5915_v1 = vshrl.u32 %v5875_v40, 16  ;;  %v5589_v24 = vrot.slane %v5587_v55, 2  ;;  %v5932_v48 = vshrl.u32 %v5877_v17, 16 }
 0x2bf   : > { %v20574_v29 = vadd.f32 %v16438_v31, %v20479_v19  ;;  %v4297_v2 = vpop.f32.mrb[3].mxu0  ;;  %v5565_v19 = vsel %vm5327_vm4, %v5556_v27, %v5564_v5  ;;  %v5597_v31 = vrot.slane %v5595_v44, 2  ;;  %v5935_v27 = vshll.u32 %v5877_v17, 16 }
 0x2c0   : > { %v20577_v47 = vadd.f32 %v4297_v2, %v20481_v11  ;;  %16576 = vmatmul.mubr.msk.bf16.gmra.mrb[52].mxu1 %vm587_vm0, %v5531_v54  ;;  %v5594_v11 = vrot.slane %v5592_v59, 1  ;;  %v5924_v2 = vshrl.u32 %v5876_v12, 16  ;;  %v5917_v23 = vrot.slane %v5915_v1, 6  ;;  %v20597_v12 = vpop.permute.xlu1 %9243 }
 0x2c1   : > { %16579 = vmatprep.mubr.msk.bf16.mxu1 %vm587_vm0, %v5548_v30  ;;  %v5582_v5 = vsel %vm5327_vm4, %v5573_v58, %v5581_v57  ;;  %v5590_v59 = vor.u32 %v5589_v24, %v5586_v4  ;;  %23042 = vst [vmem:[#allocation73_spill] sm:$0xff] %v20597_v12  ;;  %v5929_v41 = vrot.slane %v5927_v28, 7  ;;  %v5937_v57 = vrot.slane %v5935_v27, 7  ;;  %v5880_v4 = vld [vmem:[#allocation2 + $0x90] sm:$0xc0] }
 0x2c2   : > { %v5598_v44 = vor.u32 %v5597_v31, %v5594_v11  ;;  %v5921_v58 = vor.u32 %v5920_v38, %v5917_v23  ;;  %v5941_v17 = vshrl.u32 %v5878_v16, 16  ;;  %v5944_v24 = vshll.u32 %v5878_v16, 16 }
 0x2c3   : > { %v5949_v11 = vshrl.u32 %v5879_v45, 16  ;;  %v5952_v31 = vshll.u32 %v5879_v45, 16 }
 0x2c4   : > { %v16441_v54 = vpop.f32.mrb[4].mxu0  ;;  %v5943_v38 = vrot.slane %v5941_v17, 6  ;;  %v20606_v27 = vpop.permute.xlu1 %9467 }
 0x2c5   : > { %v20585_v30 = vadd.f32 %v16441_v54, %v20491_v8  ;;  %v4310_v40 = vpop.f32.mrb[5].mxu0  ;;  %v5926_v8 = vrot.slane %v5924_v2, 6  ;;  %23043 = vst [vmem:[#allocation74_spill] sm:$0xff] %v20606_v27 }
 0x2c6   : > { %v20588_v53 = vadd.f32 %v4310_v40, %v20493_v50  ;;  %v16442_v6 = vpop.f32.mrb[6].mxu0  ;;  %v18330_v25 = vpop.eup %18329  ;;  %v5913_v50 = vor.u32 %v5912_v43, %v5909_v18  ;;  %v5881_v40 = vld [vmem:[#allocation2 + $0x98] sm:$0x7f]  ;;  %v5883_v43 = vld [vmem:[#allocation2 + $0xb0] sm:$0x7f] }
 0x2c7   : > { %v20592_v39 = vadd.f32 %v16442_v6, %v20496_v51  ;;  %v4313_v55 = vpop.f32.mrb[7].mxu0  ;;  %v9036_v37 = vadd.f32 1.0, %v18330_v25  ;;  %v5934_v51 = vrot.slane %v5932_v48, 6  ;;  %v5930_v54 = vor.u32 %v5929_v41, %v5926_v8 }
 0x2c8   : > { %v20595_v1 = vadd.f32 %v4313_v55, %v20498_v13  ;;  %16580 = vmatmul.mubr.msk.bf16.gmra.mrb[56].mxu1 %vm587_vm0, %v5565_v19  ;;  %v5599_v13 = vsel %vm5327_vm4, %v5590_v59, %v5598_v44  ;;  %v5958_v6 = vshrl.u32 %v5880_v4, 16  ;;  %v5922_v23 = vsel %vm4523_vm3, %v5913_v50, %v5921_v58  ;;  %v5882_v19 = vld [vmem:[#allocation2 + $0xa8] sm:$0xc0] }
 0x2c9   : > { %16583 = vmatprep.mubr.msk.bf16.mxu1 %vm587_vm0, %v5582_v5  ;;  %18331 = vrcp.f32 %v9036_v37  ;;  %v5938_v48 = vor.u32 %v5937_v57, %v5934_v51  ;;  %v5946_v25 = vrot.slane %v5944_v24, 7  ;;  %v5951_v55 = vrot.slane %v5949_v11, 6  ;;  %v5884_v51 = vld [vmem:[#allocation2 + $0xc0] sm:$0xc0] }
 0x2ca   : > { %v5954_v59 = vrot.slane %v5952_v31, 7  ;;  %v5961_v8 = vshll.u32 %v5880_v4, 16  ;;  %v5966_v45 = vshrl.u32 %v5881_v40, 16  ;;  %v5969_v37 = vshll.u32 %v5881_v40, 16  ;;  %v5885_v4 = vld [vmem:[#allocation2 + $0xc8] sm:$0x7f] }
 0x2cb   : > { %v5975_v41 = vshrl.u32 %v5882_v19, 16  ;;  %v5978_v58 = vshll.u32 %v5882_v19, 16  ;;  %v5986_v57 = vshll.u32 %v5883_v43, 16  ;;  %v5939_v17 = vsel %vm4523_vm3, %v5930_v54, %v5938_v48 }
 0x2cc   : > { %v16445_v2 = vpop.f32.mrb[8].mxu0  ;;  %v5955_v24 = vor.u32 %v5954_v59, %v5951_v55  ;;  %v5960_v11 = vrot.slane %v5958_v6, 6  ;;  %v5971_v40 = vrot.slane %v5969_v37, 7  ;;  %v5995_v27 = vshll.u32 %v5884_v51, 16  ;;  %v5886_v59 = vld [vmem:[#allocation2 + $0xd8] sm:$0xc0] }
 0x2cd   : > { %v20603_v18 = vadd.f32 %v16445_v2, %v20509_v60  ;;  %v4326_v28 = vpop.f32.mrb[9].mxu0  ;;  %v5963_v2 = vrot.slane %v5961_v8, 7  ;;  %v6000_v55 = vshrl.u32 %v5885_v4, 16 }
 0x2ce   : > { %v20609_v5 = vadd.f32 %v4326_v28, %v20511_v20  ;;  %v16446_v16 = vpop.f32.mrb[10].mxu0  ;;  %v5983_v20 = vshrl.u32 %v5883_v43, 16  ;;  %v5992_v28 = vshrl.u32 %v5884_v51, 16 }
 0x2cf   : > { %v20612_v44 = vadd.f32 %v16446_v16, %v20516_v62  ;;  %v4329_v60 = vpop.f32.mrb[11].mxu0  ;;  %v5947_v62 = vor.u32 %v5946_v25, %v5943_v38  ;;  %v5988_v25 = vrot.slane %v5986_v57, 7 }
 0x2d0   : > { %v20615_v50 = vadd.f32 %v4329_v60, %v20518_v7  ;;  %16584 = vmatmul.mubr.msk.bf16.gmra.mrb[60].mxu1 %vm587_vm0, %v5599_v13  ;;  %v5968_v7 = vrot.slane %v5966_v45, 6  ;;  %v20624_v60 = vrot.slane %v5975_v41, 6  ;;  %v5985_v43 = vrot.slane %v5983_v20, 6  ;;  %v5887_v20 = vld [vmem:[#allocation2 + $0xe0] sm:$0x7f] }
 0x2d1   : > { %16595 = vmatprep.mubr.msk.bf16.mxu1 %vm587_vm0, %v5922_v23  ;;  %v8866_v19 = vpop.xlane.xlu1 %8865  ;;  %v5980_v23 = vrot.slane %v5978_v58, 7  ;;  %v5956_v41 = vsel %vm4523_vm3, %v5947_v62, %v5955_v24  ;;  %v18154_v58 = vld [vmem:[#allocation10 + $0x88] sm:$0xff]   ;;  %v5997_v62 = vrot.slane %v5995_v27, 7  ;;  %v6009_v24 = vshrl.u32 %v5886_v59, 16 }
 0x2d2   : > { %v8907_v54 = vadd.f32 %v20559_v52, %v8866_v19  ;;  %v6003_v52 = vshll.u32 %v5885_v4, 16  ;;  %v5972_v12 = vor.u32 %v5971_v40, %v5968_v7  ;;  %v6012_v4 = vshll.u32 %v5886_v59, 16 }
 0x2d3   : > { %v20620_v31 = vpop.f32.mrb[20].mxu1  ;;  %v20622_v13 = vpop.eup %18331  ;;  %v6002_v7 = vrot.slane %v6000_v55, 6  ;;  %v6020_v40 = vshll.u32 %v5887_v20, 16 }
 0x2d4   : > { %v16449_v16 = vpop.f32.mrb[12].mxu0  ;;  %9258 = vperm.xlu1 %18098, %v20622_v13   ;;  %v20631_v48 = vpop.f32.mrb[21].mxu1  ;;  %v15364_v51 = vmul.f32 -1.442695, %v8907_v54  ;;  %v6017_v54 = vshrl.u32 %v5887_v20, 16  ;;  %v6014_v59 = vrot.slane %v6012_v4, 7 }
 0x2d5   : > { %v20629_v6 = vadd.f32 %v16449_v16, %v20528_v26  ;;  %v4342_v38 = vpop.f32.mrb[13].mxu0  ;;  %v20636_v45 = vpop.f32.mrb[22].mxu1  ;;  %v5964_v16 = vor.u32 %v5963_v2, %v5960_v11  ;;  %v5888_v11 = vld [vmem:[#allocation2 + $0xf0] sm:$0xc0]  ;;  %v5989_v2 = vor.u32 %v5988_v25, %v5985_v43  ;;  %v5890_v20 = vld [vmem:[#allocation2 + $0x108] sm:$0xc0] }
 0x2d6   : > { %v20634_v8 = vadd.f32 %v4342_v38, %v20532_v46  ;;  %v16450_v37 = vpop.f32.mrb[14].mxu0  ;;  %v20642_v19 = vpop.f32.mrb[23].mxu1  ;;  %v20648_v38 = vrot.slane %v5992_v28, 6  ;;  %18333 = vpow2.f32 %v15364_v51  ;;  %v20658_v51 = vrot.slane %v6009_v24, 6 }
 0x2d7   : > { %v20640_v26 = vadd.f32 %v16450_v37, %v20534_v49  ;;  %v4345_v57 = vpop.f32.mrb[15].mxu0  ;;  %v5981_v49 = vor.u32 %v5980_v23, %v20624_v60  ;;  %v6026_v60 = vshrl.u32 %v5888_v11, 16 }
 0x2d8   : > { %23044 = vst [vmem:[#allocation75_spill] sm:$0xff] %v20634_v8  ;;  %v20645_v46 = vadd.f32 %v4345_v57, %v20538_v0  ;;  %16596 = vmatmul.mubr.msk.bf16.vlgmr.msra.gmra.mrb[32].mxu1 %vm587_vm0, %v5939_v17  ;;  %v6005_v0 = vrot.slane %v6003_v52, 7  ;;  %v18155_v17 = vld [vmem:[#allocation10 + $0x90] sm:$0xff]   ;;  %v5998_v55 = vor.u32 %v5997_v62, %v20648_v38  ;;  %v6019_v52 = vrot.slane %v6017_v54, 6 }
 0x2d9   : > { %23045 = vst [vmem:[#allocation76_spill] sm:$0xff] %v20640_v26  ;;  %16628 = vmatpush3.bf16.msra.mxu1 %v20507_v34  ;;  %16599 = vmatprep.mubr.msk.bf16.mxu1 %vm587_vm0, %v5956_v41  ;;  %v5973_v34 = vsel %vm4523_vm3, %v5964_v16, %v5972_v12  ;;  %v5889_v41 = vld [vmem:[#allocation2 + $0xf8] sm:$0x7f]  ;;  %v5990_v24 = vsel %vm4523_vm3, %v5981_v49, %v5989_v2  ;;  %v6029_v38 = vshll.u32 %v5888_v11, 16  ;;  %v6043_v54 = vshrl.u32 %v5890_v20, 16 }
 0x2da   : > { %23046 = vst [vmem:[#allocation77_spill] sm:$0xff] %v20645_v46  ;;  %16629 = vmatprep.subr.bf16.mxu1 %v18154_v58  ;;  %v6006_v46 = vor.u32 %v6005_v0, %v6002_v7  ;;  %v6034_v62 = vshrl.u32 %v5889_v41, 16  ;;  %v6037_v4 = vshll.u32 %v5889_v41, 16  ;;  %v6046_v49 = vshll.u32 %v5890_v20, 16  ;;  %v5892_v0 = vld [vmem:[#allocation2 + $0x120] sm:$0xc0] }
 0x2db   : > { %v20653_v28 = vpop.f32.mrb[24].mxu1  ;;  %v20681_v11 = vld [vmem:[#allocation10 + $0xa0] sm:$0xff]   ;;  %v5893_v20 = vld [vmem:[#allocation2 + $0x128] sm:$0x7f] }
 0x2dc   : > { %v16453_v27 = vpop.f32.mrb[16].mxu0  ;;  %v20655_v37 = vpop.f32.mrb[25].mxu1 }
 0x2dd   : > { %v20661_v23 = vadd.f32 %v16453_v27, %v20546_v3  ;;  %v4358_v43 = vpop.f32.mrb[17].mxu0  ;;  %v20663_v25 = vpop.f32.mrb[26].mxu1  ;;  %16630 = vmatpush3.bf16.msra.mxu1 %v18154_v58  ;;  %v6022_v3 = vrot.slane %v6020_v40, 7  ;;  %v5891_v27 = vld [vmem:[#allocation2 + $0x110] sm:$0x7f] }
 0x2de   : > { %v20667_v57 = vadd.f32 %v4358_v43, %v20548_v33  ;;  %v16454_v12 = vpop.f32.mrb[18].mxu0  ;;  %v20669_v16 = vpop.f32.mrb[27].mxu1  ;;  %16631 = vmatprep.subr.bf16.mxu1 %v18155_v17  ;;  %v6051_v2 = vshrl.u32 %v5891_v27, 16  ;;  %v6054_v7 = vshll.u32 %v5891_v27, 16  ;;  %v6028_v43 = vrot.slane %v6026_v60, 6 }
 0x2df   : > { %23047 = vst [vmem:[#allocation78_spill] sm:$0xff] %v20661_v23  ;;  %v18156_v23 = vld [vmem:[#allocation10 + $0x98] sm:$0xff]   ;;  %v20673_v26 = vadd.f32 %v16454_v12, %v20550_v22  ;;  %v4361_v58 = vpop.f32.mrb[19].mxu0  ;;  %v6015_v22 = vor.u32 %v6014_v59, %v20658_v51  ;;  %v6023_v40 = vor.u32 %v6022_v3, %v6019_v52  ;;  %v6031_v12 = vrot.slane %v6029_v38, 7 }
 0x2e0   : > { %23048 = vst [vmem:[#allocation79_spill] sm:$0xff] %v20667_v57  ;;  %v20676_v33 = vadd.f32 %v4361_v58, %v20553_v63  ;;  %16600 = vmatmul.mubr.msk.bf16.gmra.mrb[36].mxu1 %vm587_vm0, %v5973_v34  ;;  %v18334_v41 = vpop.eup %18333  ;;  %v6007_v34 = vsel %vm4523_vm3, %v5998_v55, %v6006_v46  ;;  %v6036_v58 = vrot.slane %v6034_v62, 6  ;;  %v6060_v51 = vshrl.u32 %v5892_v0, 16 }
 0x2e1   : > { %23049 = vst [vmem:[#allocation80_spill] sm:$0xff] %v20673_v26  ;;  %16603 = vmatprep.mubr.msk.bf16.mxu1 %vm587_vm0, %v5990_v24  ;;  %16632 = vmatpush3.bf16.msra.mxu1 %v18155_v17  ;;  %v6039_v24 = vrot.slane %v6037_v4, 7  ;;  %v6045_v17 = vrot.slane %v6043_v54, 6  ;;  %v6063_v59 = vshll.u32 %v5892_v0, 16  ;;  %v6048_v57 = vrot.slane %v6046_v49, 7 }
 0x2e2   : > { %23050 = vst [vmem:[#allocation81_spill] sm:$0xff] %v20676_v33  ;;  %16633 = vmatprep.subr.bf16.mxu1 %v18156_v23  ;;  %v9035_v33 = vadd.f32 1.0, %v18334_v41  ;;  %v6053_v8 = vrot.slane %v6051_v2, 6  ;;  %v6056_v46 = vrot.slane %v6054_v7, 7  ;;  %v6024_v4 = vsel %vm4523_vm3, %v6015_v22, %v6023_v40  ;;  %v5894_v54 = vld [vmem:[#allocation2 + $0x138] sm:$0xc0] }
 0x2e3   : > { %v20683_v63 = vpop.f32.mrb[28].mxu1  ;;  %v6068_v49 = vshrl.u32 %v5893_v20, 16  ;;  %v6071_v2 = vshll.u32 %v5893_v20, 16  ;;  %v5895_v7 = vld [vmem:[#allocation2 + $0x140] sm:$0x7f]  ;;  %v6062_v41 = vrot.slane %v6060_v51, 6  ;;  %v6049_v22 = vor.u32 %v6048_v57, %v6045_v17 }
 0x2e4   : > { %v16457_v27 = vpop.f32.mrb[20].mxu0  ;;  %v20686_v26 = vpop.f32.mrb[29].mxu1  ;;  %18335 = vrcp.f32 %v9035_v33  ;;  %v6040_v33 = vor.u32 %v6039_v24, %v6036_v58  ;;  %v6057_v40 = vor.u32 %v6056_v46, %v6053_v8  ;;  %v5897_v8 = vld [vmem:[#allocation2 + $0x158] sm:$0x7f]  ;;  %v5898_v24 = vld [vmem:[#allocation2 + $0x168] sm:$0xc0] }
 0x2e5   : > { %v20689_v60 = vadd.f32 %v16457_v27, %v20620_v31  ;;  %v4374_v52 = vpop.f32.mrb[21].mxu0  ;;  %v20691_v3 = vpop.f32.mrb[30].mxu1  ;;  %16634 = vmatpush3.bf16.msra.mxu1 %v18156_v23  ;;  %v6065_v27 = vrot.slane %v6063_v59, 7  ;;  %v6073_v20 = vrot.slane %v6071_v2, 7 }
 0x2e6   : > { %v20694_v55 = vadd.f32 %v4374_v52, %v20631_v48  ;;  %v16458_v38 = vpop.f32.mrb[22].mxu0  ;;  %v20696_v62 = vpop.f32.mrb[31].mxu1  ;;  %16667 = vmatprep.subr.bf16.mxu1 %v20681_v11  ;;  %v6032_v48 = vor.u32 %v6031_v12, %v6028_v43  ;;  %v6077_v52 = vshrl.u32 %v5894_v54, 16  ;;  %v6058_v12 = vsel %vm4523_vm3, %v6049_v22, %v6057_v40 }
 0x2e7   : > { %23051 = vst [vmem:[#allocation82_spill] sm:$0xff] %v20689_v60  ;;  %v20701_v31 = vadd.f32 %v16458_v38, %v20636_v45  ;;  %v4377_v0 = vpop.f32.mrb[23].mxu0  ;;  %v6080_v45 = vshll.u32 %v5894_v54, 16  ;;  %v6085_v38 = vshrl.u32 %v5895_v7, 16  ;;  %v6066_v58 = vor.u32 %v6065_v27, %v6062_v41  ;;  %v5899_v54 = vld [vmem:[#allocation2 + $0x170] sm:$0x7f] }
 0x2e8   : > { %23052 = vst [vmem:[#allocation83_spill] sm:$0xff] %v20694_v55  ;;  %v20704_v23 = vadd.f32 %v4377_v0, %v20642_v19  ;;  %16604 = vmatmul.mubr.msk.bf16.gmra.mrb[40].mxu1 %vm587_vm0, %v6007_v34  ;;  %v6070_v55 = vrot.slane %v6068_v49, 6  ;;  %v6041_v19 = vsel %vm4523_vm3, %v6032_v48, %v6040_v33  ;;  %v5896_v0 = vld [vmem:[#allocation2 + $0x150] sm:$0xc0]  ;;  %v6079_v57 = vrot.slane %v6077_v52, 6 }
 0x2e9   : > { %23053 = vst [vmem:[#allocation84_spill] sm:$0xff] %v20701_v31  ;;  %16607 = vmatprep.mubr.msk.bf16.mxu1 %vm587_vm0, %v6024_v4  ;;  %v6088_v31 = vshll.u32 %v5895_v7, 16  ;;  %v6082_v59 = vrot.slane %v6080_v45, 7  ;;  %v6087_v46 = vrot.slane %v6085_v38, 6  ;;  %v6094_v2 = vshrl.u32 %v5896_v0, 16 }
 0x2ea   : > { %v6097_v7 = vshll.u32 %v5896_v0, 16  ;;  %v6105_v41 = vshll.u32 %v5897_v8, 16  ;;  %v6111_v22 = vshrl.u32 %v5898_v24, 16  ;;  %v6122_v40 = vshll.u32 %v5899_v54, 16 }
 0x2eb   : > { %v6090_v4 = vrot.slane %v6088_v31, 7  ;;  %v6119_v31 = vshrl.u32 %v5899_v54, 16  ;;  %v6096_v52 = vrot.slane %v6094_v2, 6  ;;  %v5903_v2 = vld [vmem:[#allocation2 + $0x1a0] sm:$0x7f] }
 0x2ec   : > { %v16461_v60 = vpop.f32.mrb[24].mxu0  ;;  %v6099_v45 = vrot.slane %v6097_v7, 7  ;;  %v6107_v0 = vrot.slane %v6105_v41, 7 }
 0x2ed   : > { %v20710_v34 = vadd.f32 %v16461_v60, %v20653_v28  ;;  %v4390_v43 = vpop.f32.mrb[25].mxu0  ;;  %v6074_v60 = vor.u32 %v6073_v20, %v6070_v55  ;;  %v6083_v55 = vor.u32 %v6082_v59, %v6079_v57  ;;  %v6091_v27 = vor.u32 %v6090_v4, %v6087_v46 }
 0x2ee   : > { %v20714_v17 = vadd.f32 %v4390_v43, %v20655_v37  ;;  %v16462_v51 = vpop.f32.mrb[26].mxu0  ;;  %v20719_v48 = vpop.eup %18335  ;;  %v6102_v37 = vshrl.u32 %v5897_v8, 16  ;;  %v5900_v43 = vld [vmem:[#allocation2 + $0x180] sm:$0xc0] }
 0x2ef   : > { %v20717_v49 = vadd.f32 %v16462_v51, %v20663_v25  ;;  %v4393_v28 = vpop.f32.mrb[27].mxu0  ;;  %9253 = vperm.xlu0 %18097, %v20719_v48   ;;  %v6114_v25 = vshll.u32 %v5898_v24, 16  ;;  %v6124_v24 = vrot.slane %v6122_v40, 7  ;;  %v6092_v46 = vsel %vm4523_vm3, %v6083_v55, %v6091_v27 }
 0x2f0   : > { %v20722_v33 = vadd.f32 %v4393_v28, %v20669_v16  ;;  %16608 = vmatmul.mubr.msk.bf16.gmra.mrb[44].mxu1 %vm587_vm0, %v6041_v19  ;;  %v6075_v16 = vsel %vm4523_vm3, %v6066_v58, %v6074_v60  ;;  %v6104_v20 = vrot.slane %v6102_v37, 6  ;;  %v6113_v19 = vrot.slane %v6111_v22, 6  ;;  %v5902_v60 = vld [vmem:[#allocation2 + $0x198] sm:$0xc0] }
 0x2f1   : > { %16611 = vmatprep.mubr.msk.bf16.mxu1 %vm587_vm0, %v6058_v12  ;;  %v6116_v28 = vrot.slane %v6114_v25, 7  ;;  %v6121_v12 = vrot.slane %v6119_v31, 6  ;;  %v6128_v54 = vshrl.u32 %v5900_v43, 16  ;;  %v6131_v7 = vshll.u32 %v5900_v43, 16  ;;  %v5904_v43 = vld [vmem:[#allocation2 + $0x1b0] sm:$0xc0] }
 0x2f2   : > { %23054 = vst [vmem:[#allocation85_spill] sm:$0xff] %v20722_v33  ;;  %v5901_v33 = vld [vmem:[#allocation2 + $0x188] sm:$0x7f]  ;;  %v6108_v22 = vor.u32 %v6107_v0, %v6104_v20  ;;  %v6148_v40 = vshll.u32 %v5902_v60, 16  ;;  %v6153_v55 = vshrl.u32 %v5903_v2, 16  ;;  %v6156_v27 = vshll.u32 %v5903_v2, 16 }
 0x2f3   : > { %v6136_v37 = vshrl.u32 %v5901_v33, 16  ;;  %v6139_v41 = vshll.u32 %v5901_v33, 16  ;;  %v6117_v25 = vor.u32 %v6116_v28, %v6113_v19  ;;  %v6125_v31 = vor.u32 %v6124_v24, %v6121_v12 }
 0x2f4   : > { %v16465_v38 = vpop.f32.mrb[28].mxu0  ;;  %v6162_v19 = vshrl.u32 %v5904_v43, 16  ;;  %v6165_v28 = vshll.u32 %v5904_v43, 16  ;;  %v18374_v43 = vld [vmem:[#allocation2 + $0xf8] sm:$0xff] }
 0x2f5   : > { %v20729_v8 = vadd.f32 %v16465_v38, %v20683_v63  ;;  %v4406_v51 = vpop.f32.mrb[29].mxu0  ;;  %v6130_v38 = vrot.slane %v6128_v54, 6 }
 0x2f6   : > { %v20732_v57 = vadd.f32 %v4406_v51, %v20686_v26  ;;  %v16466_v59 = vpop.f32.mrb[30].mxu0  ;;  %v6100_v26 = vor.u32 %v6099_v45, %v6096_v52  ;;  %v6133_v51 = vrot.slane %v6131_v7, 7  ;;  %v6158_v52 = vrot.slane %v6156_v27, 7  ;;  %v5905_v45 = vld [vmem:[#allocation2 + $0x1b8] sm:$0x7f]  ;;  %v18369_v27 = vld [vmem:[#allocation2 + $0x80] sm:$0xff] }
 0x2f7   : > { %v20736_v58 = vadd.f32 %v16466_v59, %v20691_v3  ;;  %v4409_v4 = vpop.f32.mrb[31].mxu0  ;;  %v6145_v3 = vshrl.u32 %v5902_v60, 16  ;;  %v6138_v59 = vrot.slane %v6136_v37, 6  ;;  %v6170_v12 = vshrl.u32 %v5905_v45, 16 }
 0x2f8   : > { %v20739_v63 = vadd.f32 %v4409_v4, %v20696_v62  ;;  %16612 = vmatmul.mubr.msk.bf16.gmra.mrb[48].mxu1 %vm587_vm0, %v6075_v16  ;;  %v6141_v62 = vrot.slane %v6139_v41, 7  ;;  %v6109_v4 = vsel %vm4523_vm3, %v6100_v26, %v6108_v22  ;;  %v6126_v16 = vsel %vm4523_vm3, %v6117_v25, %v6125_v31 }
 0x2f9   : > { %23055 = vst [vmem:[#allocation86_spill] sm:$0xff] %v20736_v58  ;;  %16615 = vmatprep.mubr.msk.bf16.mxu1 %vm587_vm0, %v6092_v46  ;;  %v6147_v33 = vrot.slane %v6145_v3, 6  ;;  %v6155_v46 = vrot.slane %v6153_v55, 6  ;;  %v6134_v20 = vor.u32 %v6133_v51, %v6130_v38  ;;  %v6173_v24 = vshll.u32 %v5905_v45, 16  ;;  %v18368_v55 = vld [vmem:[#allocation2 + $0x68] sm:$0xff] }
 0x2fa   : > { %23056 = vst [vmem:[#allocation87_spill] sm:$0xff] %v20739_v63  ;;  %v6150_v63 = vrot.slane %v6148_v40, 7  ;;  %v6142_v0 = vor.u32 %v6141_v62, %v6138_v59  ;;  %v6164_v7 = vrot.slane %v6162_v19, 6  ;;  %v6167_v37 = vrot.slane %v6165_v28, 7  ;;  %v18158_v40 = vld [vmem:[#allocation10 + $0xa8] sm:$0xff]   ;;  %v18159_v38 = vld [vmem:[#allocation10 + $0xb0] sm:$0xff]  }
 0x2fb   : > { %v6159_v60 = vor.u32 %v6158_v52, %v6155_v46  ;;  %v6172_v41 = vrot.slane %v6170_v12, 6  ;;  %v6175_v26 = vrot.slane %v6173_v24, 7  ;;  %v18160_v51 = vld [vmem:[#allocation10 + $0xb8] sm:$0xff]   ;;  %v18370_v59 = vld [vmem:[#allocation2 + $0x98] sm:$0xff]  ;;  %v18377_v52 = vld [vmem:[#allocation2 + $0x140] sm:$0xff] }
 0x2fc   : > { %v6151_v54 = vor.u32 %v6150_v63, %v6147_v33  ;;  %v6143_v2 = vsel %vm4523_vm3, %v6134_v20, %v6142_v0  ;;  %v6168_v25 = vor.u32 %v6167_v37, %v6164_v7  ;;  %v18367_v63 = vld [vmem:[#allocation2 + $0x50] sm:$0xff]  ;;  %v18376_v46 = vld [vmem:[#allocation2 + $0x128] sm:$0xff]  ;;  %v6679_v20 = vld [vmem:[#allocation2 + $0x58] sm:$0x3] }
 0x2fd   : > { %v6176_v31 = vor.u32 %v6175_v26, %v6172_v41  ;;  %v18371_v62 = vld [vmem:[#allocation2 + $0xb0] sm:$0xff]  ;;  %v18378_v0 = vld [vmem:[#allocation2 + $0x158] sm:$0xff]  ;;  %v6719_v24 = vshrl.u32 %v6679_v20, 16  ;;  %v6680_v41 = vld [vmem:[#allocation2 + $0x68] sm:$0xfe] }
 0x2fe   : > { %v6160_v22 = vsel %vm4523_vm3, %v6151_v54, %v6159_v60  ;;  %v18375_v33 = vld [vmem:[#allocation2 + $0x110] sm:$0xff]  ;;  %v6722_v54 = vshll.u32 %v6679_v20, 16 }
 0x2ff   : > { %v6177_v3 = vsel %vm4523_vm3, %v6168_v25, %v6176_v31  ;;  %v6678_v45 = vld [vmem:[#allocation2 + $0x50] sm:$0xfe]  ;;  %v6721_v7 = vrot.slane %v6719_v24, 1  ;;  %v6683_v25 = vld [vmem:[#allocation2 + $0x88] sm:$0x3] }
 0x300   : > { %16616 = vmatmul.mubr.msk.bf16.gmra.mrb[52].mxu1 %vm587_vm0, %v6109_v4  ;;  %v20759_v4 = vld [vmem:[#allocation10 + $0xc0] sm:$0xff]   ;;  %v6711_v19 = vshrl.u32 %v6678_v45, 16  ;;  %v6714_v28 = vshll.u32 %v6678_v45, 16  ;;  %v6724_v37 = vrot.slane %v6722_v54, 2  ;;  %v18380_v31 = vld [vmem:[#allocation2 + $0x188] sm:$0xff] }
 0x301   : > { %16619 = vmatprep.mubr.msk.bf16.mxu1 %vm587_vm0, %v6126_v16  ;;  %v18373_v16 = vld [vmem:[#allocation2 + $0xe0] sm:$0xff]  ;;  %v18379_v12 = vld [vmem:[#allocation2 + $0x170] sm:$0xff] }
 0x302   : > { %v6713_v60 = vrot.slane %v6711_v19, 1  ;;  %v6681_v26 = vld [vmem:[#allocation2 + $0x70] sm:$0x3] }
 0x303   : > { %v6686_v19 = vld [vmem:[#allocation2 + $0xb0] sm:$0xfe] }
 0x308   : > { %16620 = vmatmul.mubr.msk.bf16.gmra.mrb[56].mxu1 %vm587_vm0, %v6143_v2  ;;  %v6716_v2 = vrot.slane %v6714_v28, 2 }
 0x309   : > { %16623 = vmatprep.mubr.msk.bf16.mxu1 %vm587_vm0, %v6160_v22  ;;  %v6682_v22 = vld [vmem:[#allocation2 + $0x80] sm:$0xfe] }
 0x310   : > { %16624 = vmatmul.mubr.msk.bf16.gmra.mrb[60].mxu1 %vm587_vm0, %v6177_v3  ;;  %v6717_v3 = vor.u32 %v6716_v2, %v6713_v60 }
 0x311   : > { %16635 = vmatprep.mubr.msk.bf16.mxu1 %vm587_vm0, %v18367_v63  ;;  %v6728_v63 = vshrl.u32 %v6680_v41, 16 }
 0x318   : > { %16636 = vmatmul.mubr.msk.bf16.vlgmr.msra.gmra.mrb[32].mxu1 %vm587_vm0, %v18368_v55  ;;  %v6725_v55 = vor.u32 %v6724_v37, %v6721_v7  ;;  %v6687_v7 = vld [vmem:[#allocation2 + $0xb8] sm:$0x3] }
 0x319   : > { %16668 = vmatpush3.bf16.msra.mxu1 %v20681_v11  ;;  %16639 = vmatprep.mubr.msk.bf16.mxu1 %vm587_vm0, %v18369_v27  ;;  %v18372_v11 = vld [vmem:[#allocation2 + $0xc8] sm:$0xff]  ;;  %v6731_v27 = vshll.u32 %v6680_v41, 16  ;;  %v18382_v37 = vld [vmem:[#allocation2 + $0x1b8] sm:$0xff] }
 0x31a   : > { %16669 = vmatprep.subr.bf16.mxu1 %v18158_v40 }
 0x31b   : > { %v6733_v45 = vrot.slane %v6731_v27, 2  ;;  %v6790_v27 = vshll.u32 %v6687_v7, 16 }
 0x31d   : > { %16670 = vmatpush3.bf16.msra.mxu1 %v18158_v40  ;;  %v18381_v40 = vld [vmem:[#allocation2 + $0x1a0] sm:$0xff] }
 0x31e   : > { %16671 = vmatprep.subr.bf16.mxu1 %v18159_v38 }
 0x320   : > { %16640 = vmatmul.mubr.msk.bf16.gmra.mrb[36].mxu1 %vm587_vm0, %v18370_v59  ;;  %v6745_v59 = vshrl.u32 %v6682_v22, 16 }
 0x321   : > { %16643 = vmatprep.mubr.msk.bf16.mxu1 %vm587_vm0, %v18371_v62  ;;  %16672 = vmatpush3.bf16.msra.mxu1 %v18159_v38  ;;  %v6736_v38 = vshrl.u32 %v6681_v26, 16  ;;  %v6748_v62 = vshll.u32 %v6682_v22, 16  ;;  %v6779_v22 = vshrl.u32 %v6686_v19, 16 }
 0x322   : > { %16673 = vmatprep.subr.bf16.mxu1 %v18160_v51  ;;  %v6747_v28 = vrot.slane %v6745_v59, 1 }
 0x323   : > { %v6738_v20 = vrot.slane %v6736_v38, 1 }
 0x325   : > { %16674 = vmatpush3.bf16.msra.mxu1 %v18160_v51  ;;  %v6739_v51 = vshll.u32 %v6681_v26, 16 }
 0x326   : > { %16707 = vmatprep.subr.bf16.mxu1 %v20759_v4 }
 0x328   : > { %16644 = vmatmul.mubr.msk.bf16.gmra.mrb[40].mxu1 %vm587_vm0, %v18372_v11  ;;  %v6753_v11 = vshrl.u32 %v6683_v25, 16 }
 0x329   : > { %16647 = vmatprep.mubr.msk.bf16.mxu1 %vm587_vm0, %v18373_v16  ;;  %v6756_v16 = vshll.u32 %v6683_v25, 16  ;;  %v6782_v25 = vshll.u32 %v6686_v19, 16 }
 0x32a   : > { %v6755_v24 = vrot.slane %v6753_v11, 1  ;;  %v6781_v11 = vrot.slane %v6779_v22, 1 }
 0x32b   : > { %v6758_v54 = vrot.slane %v6756_v16, 2  ;;  %v6784_v16 = vrot.slane %v6782_v25, 2 }
 0x330   : > { %16648 = vmatmul.mubr.msk.bf16.gmra.mrb[44].mxu1 %vm587_vm0, %v18374_v43  ;;  %v6730_v43 = vrot.slane %v6728_v63, 1 }
 0x331   : > { %16651 = vmatprep.mubr.msk.bf16.mxu1 %vm587_vm0, %v18375_v33  ;;  %v6684_v33 = vld [vmem:[#allocation2 + $0x98] sm:$0xfe] }
 0x332   : > { %v6762_v60 = vshrl.u32 %v6684_v33, 16  ;;  %v6765_v2 = vshll.u32 %v6684_v33, 16 }
 0x334   : > { %v6764_v38 = vrot.slane %v6762_v60, 1 }
 0x338   : > { %16652 = vmatmul.mubr.msk.bf16.gmra.mrb[48].mxu1 %vm587_vm0, %v18376_v46  ;;  %v6685_v46 = vld [vmem:[#allocation2 + $0xa0] sm:$0x3] }
 0x339   : > { %16655 = vmatprep.mubr.msk.bf16.mxu1 %vm587_vm0, %v18377_v52  ;;  %v6726_v52 = vsel %vm5327_vm4, %v6717_v3, %v6725_v55  ;;  %v6770_v41 = vshrl.u32 %v6685_v46, 16  ;;  %v6773_v26 = vshll.u32 %v6685_v46, 16  ;;  %v6787_v55 = vshrl.u32 %v6687_v7, 16  ;;  %v6689_v46 = vld [vmem:[#allocation2 + $0xd0] sm:$0x3] }
 0x33a   : > { %v6804_v60 = vshrl.u32 %v6689_v46, 16 }
 0x33b   : > { %v6772_v59 = vrot.slane %v6770_v41, 1  ;;  %v6789_v58 = vrot.slane %v6787_v55, 1 }
 0x340   : > { %16656 = vmatmul.mubr.msk.bf16.gmra.mrb[52].mxu1 %vm587_vm0, %v18378_v0  ;;  %v6741_v0 = vrot.slane %v6739_v51, 2  ;;  %v6767_v51 = vrot.slane %v6765_v2, 2  ;;  %v6807_v2 = vshll.u32 %v6689_v46, 16 }
 0x341   : > { %16659 = vmatprep.mubr.msk.bf16.mxu1 %vm587_vm0, %v18379_v12  ;;  %v6750_v12 = vrot.slane %v6748_v62, 2  ;;  %v6775_v62 = vrot.slane %v6773_v26, 2 }
 0x342   : > { %v6742_v3 = vor.u32 %v6741_v0, %v6738_v20  ;;  %v6691_v20 = vld [vmem:[#allocation2 + $0xe8] sm:$0x3]  ;;  %v6768_v0 = vor.u32 %v6767_v51, %v6764_v38  ;;  %v6809_v38 = vrot.slane %v6807_v2, 2  ;;  %v6693_v51 = vld [vmem:[#allocation2 + $0x100] sm:$0x3]  ;;  %v20784_v2 = vld [vmem:[#allocation10 + $0xe0] sm:$0xff]  }
 0x343   : > { %v6751_v63 = vor.u32 %v6750_v12, %v6747_v28  ;;  %v6776_v28 = vor.u32 %v6775_v62, %v6772_v59  ;;  %v6785_v12 = vor.u32 %v6784_v16, %v6781_v11  ;;  %v6821_v22 = vshrl.u32 %v6691_v20, 16  ;;  %v6694_v16 = vld [vmem:[#allocation2 + $0x110] sm:$0xfe] }
 0x344   : > { %v6824_v25 = vshll.u32 %v6691_v20, 16 }
 0x345   : > { %v6823_v11 = vrot.slane %v6821_v22, 1 }
 0x348   : > { %16660 = vmatmul.mubr.msk.bf16.gmra.mrb[56].mxu1 %vm587_vm0, %v18380_v31  ;;  %v6734_v31 = vor.u32 %v6733_v45, %v6730_v43  ;;  %v18162_v43 = vld [vmem:[#allocation10 + $0xc8] sm:$0xff]   ;;  %v6690_v45 = vld [vmem:[#allocation2 + $0xe0] sm:$0xfe] }
 0x349   : > { %16663 = vmatprep.mubr.msk.bf16.mxu1 %vm587_vm0, %v18381_v40  ;;  %v6759_v40 = vor.u32 %v6758_v54, %v6755_v24  ;;  %v6813_v7 = vshrl.u32 %v6690_v45, 16  ;;  %v6816_v26 = vshll.u32 %v6690_v45, 16  ;;  %v6841_v45 = vshll.u32 %v6693_v51, 16 }
 0x34a   : > { %v6743_v33 = vsel %vm5327_vm4, %v6734_v31, %v6742_v3  ;;  %v18163_v31 = vld [vmem:[#allocation10 + $0xd0] sm:$0xff]   ;;  %v6777_v3 = vsel %vm5327_vm4, %v6768_v0, %v6776_v28  ;;  %v6847_v0 = vshrl.u32 %v6694_v16, 16  ;;  %v6850_v28 = vshll.u32 %v6694_v16, 16 }
 0x34b   : > { %v6760_v19 = vsel %vm5327_vm4, %v6751_v63, %v6759_v40  ;;  %v6692_v40 = vld [vmem:[#allocation2 + $0xf8] sm:$0xfe]  ;;  %v6818_v62 = vrot.slane %v6816_v26, 2  ;;  %v6843_v22 = vrot.slane %v6841_v45, 2 }
 0x34c   : > { %v6830_v46 = vshrl.u32 %v6692_v40, 16 }
 0x350   : > { %16664 = vmatmul.mubr.msk.bf16.gmra.mrb[60].mxu1 %vm587_vm0, %v18382_v37  ;;  %v6688_v37 = vld [vmem:[#allocation2 + $0xc8] sm:$0xfe] }
 0x351   : > { %16675 = vmatprep.mubr.msk.bf16.mxu1 %vm587_vm0, %v6726_v52  ;;  %v6792_v52 = vrot.slane %v6790_v27, 2  ;;  %v6796_v24 = vshrl.u32 %v6688_v37, 16  ;;  %v6799_v54 = vshll.u32 %v6688_v37, 16  ;;  %v6806_v27 = vrot.slane %v6804_v60, 1  ;;  %v6695_v37 = vld [vmem:[#allocation2 + $0x118] sm:$0x3] }
 0x352   : > { %v6858_v60 = vshll.u32 %v6695_v37, 16 }
 0x353   : > { %v6793_v41 = vor.u32 %v6792_v52, %v6789_v58  ;;  %v6798_v63 = vrot.slane %v6796_v24, 1  ;;  %v6801_v55 = vrot.slane %v6799_v54, 2  ;;  %v6826_v58 = vrot.slane %v6824_v25, 2 }
 0x354   : > { %v6838_v52 = vshrl.u32 %v6693_v51, 16  ;;  %v6810_v20 = vor.u32 %v6809_v38, %v6806_v27  ;;  %v6855_v54 = vshrl.u32 %v6695_v37, 16  ;;  %v6860_v27 = vrot.slane %v6858_v60, 2  ;;  %v6697_v38 = vld [vmem:[#allocation2 + $0x130] sm:$0x3] }
 0x355   : > { %v6794_v59 = vsel %vm5327_vm4, %v6785_v12, %v6793_v41  ;;  %v6827_v24 = vor.u32 %v6826_v58, %v6823_v11  ;;  %v6699_v51 = vld [vmem:[#allocation2 + $0x148] sm:$0x3]  ;;  %v6872_v37 = vshrl.u32 %v6697_v38, 16 }
 0x356   : > { %v6840_v26 = vrot.slane %v6838_v52, 1  ;;  %v6889_v45 = vshrl.u32 %v6699_v51, 16 }
 0x358   : > { %16676 = vmatmul.mubr.msk.bf16.vlgmr.msra.gmra.mrb[32].mxu1 %vm587_vm0, %v6743_v33  ;;  %v18164_v33 = vld [vmem:[#allocation10 + $0xd8] sm:$0xff]  }
 0x359   : > { %16708 = vmatpush3.bf16.msra.mxu1 %v20759_v4  ;;  %16679 = vmatprep.mubr.msk.bf16.mxu1 %vm587_vm0, %v6760_v19  ;;  %v6815_v4 = vrot.slane %v6813_v7, 1  ;;  %v6833_v19 = vshll.u32 %v6692_v40, 16  ;;  %v6832_v7 = vrot.slane %v6830_v46, 1  ;;  %v6852_v40 = vrot.slane %v6850_v28, 2  ;;  %v6700_v28 = vld [vmem:[#allocation2 + $0x158] sm:$0xfe] }
 0x35a   : > { %16709 = vmatprep.subr.bf16.mxu1 %v18162_v43 }
 0x35b   : > { %v6819_v12 = vor.u32 %v6818_v62, %v6815_v4  ;;  %v6835_v41 = vrot.slane %v6833_v19, 2  ;;  %v6698_v4 = vld [vmem:[#allocation2 + $0x140] sm:$0xfe]  ;;  %v6844_v62 = vor.u32 %v6843_v22, %v6840_v26  ;;  %v6891_v22 = vrot.slane %v6889_v45, 1 }
 0x35c   : > { %v6881_v46 = vshrl.u32 %v6698_v4, 16  ;;  %v6884_v52 = vshll.u32 %v6698_v4, 16 }
 0x35d   : > { %16710 = vmatpush3.bf16.msra.mxu1 %v18162_v43  ;;  %v6802_v43 = vor.u32 %v6801_v55, %v6798_v63  ;;  %v6696_v63 = vld [vmem:[#allocation2 + $0x128] sm:$0xfe]  ;;  %v6828_v55 = vsel %vm5327_vm4, %v6819_v12, %v6827_v24  ;;  %v6874_v24 = vrot.slane %v6872_v37, 1 }
 0x35e   : > { %16711 = vmatprep.subr.bf16.mxu1 %v18163_v31  ;;  %v6864_v11 = vshrl.u32 %v6696_v63, 16  ;;  %v6867_v58 = vshll.u32 %v6696_v63, 16  ;;  %v6883_v60 = vrot.slane %v6881_v46, 1  ;;  %v6886_v26 = vrot.slane %v6884_v52, 2  ;;  %v6704_v52 = vld [vmem:[#allocation2 + $0x188] sm:$0xfe] }
 0x35f   : > { %v6811_v25 = vsel %vm5327_vm4, %v6802_v43, %v6810_v20  ;;  %v6892_v43 = vshll.u32 %v6699_v51, 16  ;;  %v6901_v63 = vshll.u32 %v6700_v28, 16 }
 0x360   : > { %16680 = vmatmul.mubr.msk.bf16.gmra.mrb[36].mxu1 %vm587_vm0, %v6777_v3  ;;  %v6849_v3 = vrot.slane %v6847_v0, 1  ;;  %v6866_v0 = vrot.slane %v6864_v11, 1  ;;  %v6869_v12 = vrot.slane %v6867_v58, 2 }
 0x361   : > { %16683 = vmatprep.mubr.msk.bf16.mxu1 %vm587_vm0, %v6794_v59  ;;  %16712 = vmatpush3.bf16.msra.mxu1 %v18163_v31  ;;  %v6857_v31 = vrot.slane %v6855_v54, 1  ;;  %v6836_v59 = vor.u32 %v6835_v41, %v6832_v7  ;;  %v6701_v7 = vld [vmem:[#allocation2 + $0x160] sm:$0x3] }
 0x362   : > { %16713 = vmatprep.subr.bf16.mxu1 %v18164_v33  ;;  %v6853_v16 = vor.u32 %v6852_v40, %v6849_v3  ;;  %v6702_v3 = vld [vmem:[#allocation2 + $0x170] sm:$0xfe]  ;;  %v6898_v40 = vshrl.u32 %v6700_v28, 16 }
 0x363   : > { %v6861_v19 = vor.u32 %v6860_v27, %v6857_v31  ;;  %v6845_v20 = vsel %vm5327_vm4, %v6836_v59, %v6844_v62  ;;  %v6906_v31 = vshrl.u32 %v6701_v7, 16  ;;  %v6909_v27 = vshll.u32 %v6701_v7, 16  ;;  %v6705_v28 = vld [vmem:[#allocation2 + $0x190] sm:$0x3] }
 0x364   : > { %v6915_v51 = vshrl.u32 %v6702_v3, 16  ;;  %v6918_v59 = vshll.u32 %v6702_v3, 16  ;;  %v6887_v62 = vor.u32 %v6886_v26, %v6883_v60  ;;  %v6900_v37 = vrot.slane %v6898_v40, 1 }
 0x365   : > { %16714 = vmatpush3.bf16.msra.mxu1 %v18164_v33  ;;  %v6875_v33 = vshll.u32 %v6697_v38, 16  ;;  %v6862_v41 = vsel %vm5327_vm4, %v6853_v16, %v6861_v19  ;;  %v6870_v38 = vor.u32 %v6869_v12, %v6866_v0  ;;  %v6908_v46 = vrot.slane %v6906_v31, 1 }
 0x366   : > { %16747 = vmatprep.subr.bf16.mxu1 %v20784_v2  ;;  %v6911_v19 = vrot.slane %v6909_v27, 2  ;;  %v6943_v3 = vshll.u32 %v6705_v28, 16 }
 0x367   : > { %v6877_v54 = vrot.slane %v6875_v33, 2  ;;  %v6903_v33 = vrot.slane %v6901_v63, 2 }
 0x368   : > { %16684 = vmatmul.mubr.msk.bf16.gmra.mrb[40].mxu1 %vm587_vm0, %v6811_v25  ;;  %v6894_v25 = vrot.slane %v6892_v43, 2  ;;  %v6917_v43 = vrot.slane %v6915_v51, 1  ;;  %v6912_v26 = vor.u32 %v6911_v19, %v6908_v46  ;;  %v6709_v19 = vld [vmem:[#allocation2 + $0x1c0] sm:$0x3] }
 0x369   : > { %16687 = vmatprep.mubr.msk.bf16.mxu1 %vm587_vm0, %v6828_v55  ;;  %v6703_v55 = vld [vmem:[#allocation2 + $0x178] sm:$0x3]  ;;  %v6878_v4 = vor.u32 %v6877_v54, %v6874_v24  ;;  %v6706_v24 = vld [vmem:[#allocation2 + $0x1a0] sm:$0xfe]  ;;  %v6707_v54 = vld [vmem:[#allocation2 + $0x1a8] sm:$0x3]  ;;  %v6904_v60 = vor.u32 %v6903_v33, %v6900_v37 }
 0x36a   : > { %v6895_v11 = vor.u32 %v6894_v25, %v6891_v22  ;;  %v6923_v58 = vshrl.u32 %v6703_v55, 16  ;;  %v6926_v16 = vshll.u32 %v6703_v55, 16  ;;  %v6935_v22 = vshll.u32 %v6704_v52, 16 }
 0x36b   : > { %v6879_v45 = vsel %vm5327_vm4, %v6870_v38, %v6878_v4  ;;  %v6940_v25 = vshrl.u32 %v6705_v28, 16  ;;  %v6949_v40 = vshrl.u32 %v6706_v24, 16  ;;  %v6952_v63 = vshll.u32 %v6706_v24, 16  ;;  %v7258_v28 = vld [vmem:[#allocation2 + $0x98] sm:$0x7f] }
 0x36c   : > { %v6896_v7 = vsel %vm5327_vm4, %v6887_v62, %v6895_v11  ;;  %v6925_v0 = vrot.slane %v6923_v58, 1  ;;  %v6928_v12 = vrot.slane %v6926_v16, 2  ;;  %v6957_v55 = vshrl.u32 %v6707_v54, 16  ;;  %v6708_v58 = vld [vmem:[#allocation2 + $0x1b8] sm:$0xfe] }
 0x36d   : > { %v6960_v31 = vshll.u32 %v6707_v54, 16  ;;  %v6913_v51 = vsel %vm5327_vm4, %v6904_v60, %v6912_v26  ;;  %v6942_v62 = vrot.slane %v6940_v25, 1  ;;  %v6945_v11 = vrot.slane %v6943_v3, 2 }
 0x36e   : > { %v6929_v38 = vor.u32 %v6928_v12, %v6925_v0  ;;  %v6951_v16 = vrot.slane %v6949_v40, 1  ;;  %v6954_v37 = vrot.slane %v6952_v63, 2  ;;  %v6959_v33 = vrot.slane %v6957_v55, 1 }
 0x36f   : > { %v6962_v46 = vrot.slane %v6960_v31, 2  ;;  %v6977_v0 = vshll.u32 %v6709_v19, 16  ;;  %v6946_v24 = vor.u32 %v6945_v11, %v6942_v62  ;;  %v7301_v25 = vshll.u32 %v7258_v28, 16  ;;  %v7261_v62 = vld [vmem:[#allocation2 + $0xc0] sm:$0xc0] }
 0x370   : > { %16688 = vmatmul.mubr.msk.bf16.gmra.mrb[44].mxu1 %vm587_vm0, %v6845_v20  ;;  %v6920_v20 = vrot.slane %v6918_v59, 2  ;;  %v6937_v59 = vrot.slane %v6935_v22, 2  ;;  %v6955_v54 = vor.u32 %v6954_v37, %v6951_v16  ;;  %v7298_v22 = vshrl.u32 %v7258_v28, 16  ;;  %v7262_v11 = vld [vmem:[#allocation2 + $0xc8] sm:$0x7f] }
 0x371   : > { %16691 = vmatprep.mubr.msk.bf16.mxu1 %vm587_vm0, %v6862_v41  ;;  %v6932_v41 = vshrl.u32 %v6704_v52, 16  ;;  %v6963_v60 = vor.u32 %v6962_v46, %v6959_v33  ;;  %v6979_v55 = vrot.slane %v6977_v0, 2  ;;  %v7324_v28 = vshrl.u32 %v7261_v62, 16 }
 0x372   : > { %v6921_v27 = vor.u32 %v6920_v20, %v6917_v43  ;;  %v6966_v43 = vshrl.u32 %v6708_v58, 16  ;;  %v6969_v20 = vshll.u32 %v6708_v58, 16  ;;  %v7332_v0 = vshrl.u32 %v7262_v11, 16 }
 0x373   : > { %v6934_v4 = vrot.slane %v6932_v41, 1 }
 0x374   : > { %v6930_v52 = vsel %vm5327_vm4, %v6921_v27, %v6929_v38  ;;  %v6968_v3 = vrot.slane %v6966_v43, 1  ;;  %v6971_v40 = vrot.slane %v6969_v20, 2  ;;  %v6964_v27 = vsel %vm5327_vm4, %v6955_v54, %v6963_v60  ;;  %v7259_v38 = vld [vmem:[#allocation2 + $0xa8] sm:$0xc0] }
 0x375   : > { %v6938_v12 = vor.u32 %v6937_v59, %v6934_v4  ;;  %v7300_v4 = vrot.slane %v7298_v22, 6  ;;  %v7303_v59 = vrot.slane %v7301_v25, 7  ;;  %v7307_v33 = vshrl.u32 %v7259_v38, 16 }
 0x376   : > { %v6972_v16 = vor.u32 %v6971_v40, %v6968_v3  ;;  %v7310_v46 = vshll.u32 %v7259_v38, 16  ;;  %v7327_v43 = vshll.u32 %v7261_v62, 16  ;;  %v7326_v3 = vrot.slane %v7324_v28, 6  ;;  %v7266_v38 = vld [vmem:[#allocation2 + $0xf8] sm:$0x7f] }
 0x377   : > { %v6947_v31 = vsel %vm5327_vm4, %v6938_v12, %v6946_v24  ;;  %v7335_v12 = vshll.u32 %v7262_v11, 16  ;;  %v7309_v54 = vrot.slane %v7307_v33, 6  ;;  %v9323_v62 = vsub.f32 1.0, %v20719_v48 }
 0x378   : > { %16692 = vmatmul.mubr.msk.bf16.gmra.mrb[48].mxu1 %vm587_vm0, %v6879_v45  ;;  %v7257_v45 = vld [vmem:[#allocation2 + $0x90] sm:$0xc0]  ;;  %v7312_v60 = vrot.slane %v7310_v46, 7  ;;  %v7329_v40 = vrot.slane %v7327_v43, 7  ;;  %v7366_v33 = vshrl.u32 %v7266_v38, 16 }
 0x379   : > { %16695 = vmatprep.mubr.msk.bf16.mxu1 %vm587_vm0, %v6896_v7  ;;  %v6974_v7 = vshrl.u32 %v6709_v19, 16  ;;  %v7290_v41 = vshrl.u32 %v7257_v45, 16  ;;  %v7293_v26 = vshll.u32 %v7257_v45, 16  ;;  %9477 = vperm.xlu1 %18098, %v9323_v62  }
 0x37a   : > { %v7330_v46 = vor.u32 %v7329_v40, %v7326_v3  ;;  %v7368_v48 = vrot.slane %v7366_v33, 6  ;;  %v7270_v3 = vld [vmem:[#allocation2 + $0x128] sm:$0x7f] }
 0x37b   : > { %v6976_v63 = vrot.slane %v6974_v7, 1  ;;  %v7292_v58 = vrot.slane %v7290_v41, 6  ;;  %v7295_v19 = vrot.slane %v7293_v26, 7  ;;  %v7304_v7 = vor.u32 %v7303_v59, %v7300_v4  ;;  %v7263_v41 = vld [vmem:[#allocation2 + $0xd8] sm:$0xc0] }
 0x37c   : > { %v7264_v26 = vld [vmem:[#allocation2 + $0xe0] sm:$0x7f]  ;;  %v7313_v59 = vor.u32 %v7312_v60, %v7309_v54  ;;  %v7268_v60 = vld [vmem:[#allocation2 + $0x110] sm:$0x7f] }
 0x37d   : > { %v6980_v37 = vor.u32 %v6979_v55, %v6976_v63  ;;  %v7296_v20 = vor.u32 %v7295_v19, %v7292_v58  ;;  %v7334_v55 = vrot.slane %v7332_v0, 6  ;;  %v7344_v58 = vshll.u32 %v7263_v41, 16  ;;  %v7267_v0 = vld [vmem:[#allocation2 + $0x108] sm:$0xc0] }
 0x37e   : > { %v7349_v19 = vshrl.u32 %v7264_v26, 16  ;;  %v7352_v4 = vshll.u32 %v7264_v26, 16 }
 0x37f   : > { %v6981_v24 = vsel %vm5327_vm4, %v6972_v16, %v6980_v37  ;;  %v7305_v63 = vsel %vm4523_vm3, %v7296_v20, %v7304_v7  ;;  %v7346_v43 = vrot.slane %v7344_v58, 7 }
 0x380   : > { %16696 = vmatmul.mubr.msk.bf16.gmra.mrb[52].mxu1 %vm587_vm0, %v6913_v51  ;;  %v7260_v51 = vld [vmem:[#allocation2 + $0xb0] sm:$0x7f]  ;;  %v7351_v20 = vrot.slane %v7349_v19, 6  ;;  %v7354_v7 = vrot.slane %v7352_v4, 7  ;;  %v7400_v19 = vshrl.u32 %v7270_v3, 16  ;;  %v7403_v4 = vshll.u32 %v7270_v3, 16 }
 0x381   : > { %16699 = vmatprep.mubr.msk.bf16.mxu1 %vm587_vm0, %v6930_v52  ;;  %v7315_v52 = vshrl.u32 %v7260_v51, 16  ;;  %v7318_v45 = vshll.u32 %v7260_v51, 16  ;;  %v7341_v51 = vshrl.u32 %v7263_v41, 16 }
 0x383   : > { %v7317_v22 = vrot.slane %v7315_v52, 6  ;;  %v7320_v25 = vrot.slane %v7318_v45, 7  ;;  %v7369_v45 = vshll.u32 %v7266_v38, 16  ;;  %v7343_v28 = vrot.slane %v7341_v51, 6 }
 0x384   : > { %v7386_v38 = vshll.u32 %v7268_v60, 16 }
 0x385   : > { %v7321_v11 = vor.u32 %v7320_v25, %v7317_v22  ;;  %v7371_v26 = vrot.slane %v7369_v45, 7  ;;  %v18166_v22 = vld [vmem:[#allocation10 + $0xe8] sm:$0xff]   ;;  %v7269_v25 = vld [vmem:[#allocation2 + $0x120] sm:$0xc0]  ;;  %v7347_v40 = vor.u32 %v7346_v43, %v7343_v28  ;;  %v7405_v43 = vrot.slane %v7403_v4, 7 }
 0x386   : > { %v7392_v51 = vshrl.u32 %v7269_v25, 16  ;;  %v7395_v58 = vshll.u32 %v7269_v25, 16  ;;  %v7276_v4 = vld [vmem:[#allocation2 + $0x170] sm:$0x7f] }
 0x387   : > { %v7372_v62 = vor.u32 %v7371_v26, %v7368_v48 }
 0x388   : > { %16700 = vmatmul.mubr.msk.bf16.gmra.mrb[56].mxu1 %vm587_vm0, %v6947_v31  ;;  %v7337_v31 = vrot.slane %v7335_v12, 7  ;;  %v7322_v12 = vsel %vm4523_vm3, %v7313_v59, %v7321_v11  ;;  %v18167_v11 = vld [vmem:[#allocation10 + $0xf0] sm:$0xff]   ;;  %v7394_v45 = vrot.slane %v7392_v51, 6  ;;  %v7397_v28 = vrot.slane %v7395_v58, 7 }
 0x389   : > { %16703 = vmatprep.mubr.msk.bf16.mxu1 %vm587_vm0, %v6964_v27  ;;  %v7265_v27 = vld [vmem:[#allocation2 + $0xf0] sm:$0xc0] }
 0x38a   : > { %v7358_v16 = vshrl.u32 %v7265_v27, 16  ;;  %v7361_v37 = vshll.u32 %v7265_v27, 16  ;;  %v7338_v52 = vor.u32 %v7337_v31, %v7334_v55  ;;  %v7375_v55 = vshrl.u32 %v7267_v0, 16 }
 0x38b   : > { %v7378_v31 = vshll.u32 %v7267_v0, 16  ;;  %v7383_v27 = vshrl.u32 %v7268_v60, 16  ;;  %v7272_v0 = vld [vmem:[#allocation2 + $0x140] sm:$0x7f] }
 0x38c   : > { %v7363_v54 = vrot.slane %v7361_v37, 7  ;;  %v7339_v41 = vsel %vm4523_vm3, %v7330_v46, %v7338_v52  ;;  %v7377_v37 = vrot.slane %v7375_v55, 6  ;;  %v7388_v52 = vrot.slane %v7386_v38, 7  ;;  %v20821_v38 = vld [vmem:[#allocation10 + $0x100] sm:$0xff]  }
 0x38d   : > { %v7380_v33 = vrot.slane %v7378_v31, 7  ;;  %v7385_v46 = vrot.slane %v7383_v27, 6  ;;  %v7417_v3 = vshrl.u32 %v7272_v0, 16 }
 0x38f   : > { %v7381_v48 = vor.u32 %v7380_v33, %v7377_v37  ;;  %v7389_v60 = vor.u32 %v7388_v52, %v7385_v46 }
 0x390   : > { %16704 = vmatmul.mubr.msk.bf16.gmra.mrb[60].mxu1 %vm587_vm0, %v6981_v24  ;;  %v7360_v24 = vrot.slane %v7358_v16, 6 }
 0x391   : > { %16715 = vmatprep.mubr.msk.bf16.mxu1 %vm587_vm0, %v7305_v63  ;;  %v7355_v63 = vor.u32 %v7354_v7, %v7351_v20  ;;  %v7271_v20 = vld [vmem:[#allocation2 + $0x138] sm:$0xc0]  ;;  %v7390_v51 = vsel %vm4523_vm3, %v7381_v48, %v7389_v60 }
 0x392   : > { %v7364_v59 = vor.u32 %v7363_v54, %v7360_v24  ;;  %v7273_v24 = vld [vmem:[#allocation2 + $0x150] sm:$0xc0]  ;;  %v7274_v54 = vld [vmem:[#allocation2 + $0x158] sm:$0x7f]  ;;  %v7412_v26 = vshll.u32 %v7271_v20, 16 }
 0x393   : > { %v7356_v16 = vsel %vm4523_vm3, %v7347_v40, %v7355_v63  ;;  %v7420_v40 = vshll.u32 %v7272_v0, 16  ;;  %v7426_v63 = vshrl.u32 %v7273_v24, 16  ;;  %v7429_v55 = vshll.u32 %v7273_v24, 16 }
 0x394   : > { %v7373_v7 = vsel %vm4523_vm3, %v7364_v59, %v7372_v62  ;;  %v7434_v31 = vshrl.u32 %v7274_v54, 16  ;;  %v7437_v27 = vshll.u32 %v7274_v54, 16  ;;  %v7414_v62 = vrot.slane %v7412_v26, 7 }
 0x395   : > { %v7422_v37 = vrot.slane %v7420_v40, 7  ;;  %v7428_v33 = vrot.slane %v7426_v63, 6  ;;  %v9324_v0 = vsub.f32 1.0, %v20622_v13  ;;  %v7279_v13 = vld [vmem:[#allocation2 + $0x198] sm:$0xc0] }
 0x396   : > { %v7436_v46 = vrot.slane %v7434_v31, 6  ;;  %v7439_v52 = vrot.slane %v7437_v27, 7 }
 0x397   : > { %9482 = vperm.xlu0 %18097, %v9324_v0  }
 0x398   : > { %16716 = vmatmul.mubr.msk.bf16.vlgmr.msra.gmra.mrb[32].mxu1 %vm587_vm0, %v7322_v12  ;;  %v18168_v12 = vld [vmem:[#allocation10 + $0xf8] sm:$0xff]  }
 0x399   : > { %16748 = vmatpush3.bf16.msra.mxu1 %v20784_v2  ;;  %16719 = vmatprep.mubr.msk.bf16.mxu1 %vm587_vm0, %v7339_v41  ;;  %v7402_v2 = vrot.slane %v7400_v19, 6  ;;  %v7409_v41 = vshrl.u32 %v7271_v20, 16  ;;  %v7275_v19 = vld [vmem:[#allocation2 + $0x168] sm:$0xc0]  ;;  %v7454_v20 = vshll.u32 %v7276_v4, 16 }
 0x39a   : > { %16749 = vmatprep.subr.bf16.mxu1 %v18166_v22 }
 0x39b   : > { %v7406_v25 = vor.u32 %v7405_v43, %v7402_v2  ;;  %v7411_v58 = vrot.slane %v7409_v41, 6  ;;  %v7446_v2 = vshll.u32 %v7275_v19, 16  ;;  %v7451_v43 = vshrl.u32 %v7276_v4, 16 }
 0x39c   : > { %v7440_v41 = vor.u32 %v7439_v52, %v7436_v46  ;;  %v7456_v63 = vrot.slane %v7454_v20, 7 }
 0x39d   : > { %16750 = vmatpush3.bf16.msra.mxu1 %v18166_v22  ;;  %v7398_v22 = vor.u32 %v7397_v28, %v7394_v45  ;;  %v7277_v45 = vld [vmem:[#allocation2 + $0x180] sm:$0xc0]  ;;  %v7443_v28 = vshrl.u32 %v7275_v19, 16  ;;  %v7415_v24 = vor.u32 %v7414_v62, %v7411_v58  ;;  %v7453_v40 = vrot.slane %v7451_v43, 6  ;;  %v7282_v62 = vld [vmem:[#allocation2 + $0x1b8] sm:$0x7f] }
 0x39e   : > { %16751 = vmatprep.subr.bf16.mxu1 %v18167_v11  ;;  %v7460_v54 = vshrl.u32 %v7277_v45, 16  ;;  %v7463_v48 = vshll.u32 %v7277_v45, 16  ;;  %v7505_v43 = vshll.u32 %v7282_v62, 16 }
 0x39f   : > { %v7407_v59 = vsel %vm4523_vm3, %v7398_v22, %v7406_v25  ;;  %v7445_v25 = vrot.slane %v7443_v28, 6 }
 0x3a0   : > { %16720 = vmatmul.mubr.msk.bf16.gmra.mrb[36].mxu1 %vm587_vm0, %v7356_v16  ;;  %v7419_v16 = vrot.slane %v7417_v3, 6  ;;  %v7448_v3 = vrot.slane %v7446_v2, 7  ;;  %v7462_v31 = vrot.slane %v7460_v54, 6  ;;  %v7465_v27 = vrot.slane %v7463_v48, 7 }
 0x3a1   : > { %16723 = vmatprep.mubr.msk.bf16.mxu1 %vm587_vm0, %v7373_v7  ;;  %16752 = vmatpush3.bf16.msra.mxu1 %v18167_v11  ;;  %v7431_v11 = vrot.slane %v7429_v55, 7  ;;  %v7278_v7 = vld [vmem:[#allocation2 + $0x188] sm:$0x7f]  ;;  %v7502_v2 = vshrl.u32 %v7282_v62, 16 }
 0x3a2   : > { %16753 = vmatprep.subr.bf16.mxu1 %v18168_v12  ;;  %v7468_v26 = vshrl.u32 %v7278_v7, 16  ;;  %v7471_v22 = vshll.u32 %v7278_v7, 16  ;;  %v7466_v20 = vor.u32 %v7465_v27, %v7462_v31 }
 0x3a3   : > { %v7432_v60 = vor.u32 %v7431_v11, %v7428_v33  ;;  %v7477_v33 = vshrl.u32 %v7279_v13, 16  ;;  %v7480_v11 = vshll.u32 %v7279_v13, 16 }
 0x3a4   : > { %v7470_v19 = vrot.slane %v7468_v26, 6  ;;  %v7473_v4 = vrot.slane %v7471_v22, 7  ;;  %v7504_v22 = vrot.slane %v7502_v2, 6 }
 0x3a5   : > { %16754 = vmatpush3.bf16.msra.mxu1 %v18168_v12  ;;  %v7423_v12 = vor.u32 %v7422_v37, %v7419_v16  ;;  %v7441_v58 = vsel %vm4523_vm3, %v7432_v60, %v7440_v41  ;;  %v7449_v16 = vor.u32 %v7448_v3, %v7445_v25  ;;  %v7457_v37 = vor.u32 %v7456_v63, %v7453_v40  ;;  %v7283_v60 = vld [vmem:[#allocation2 + $0x1c8] sm:$0xc0]  ;;  %v7284_v3 = vld [vmem:[#allocation2 + $0x1d0] sm:$0x7f]  ;;  %v7285_v63 = vld [vmem:[#allocation2 + $0x1e0] sm:$0xc0] }
 0x3a6   : > { %16787 = vmatprep.subr.bf16.mxu1 %v20821_v38  ;;  %v7474_v7 = vor.u32 %v7473_v4, %v7470_v19  ;;  %v7507_v25 = vrot.slane %v7505_v43, 7  ;;  %v7511_v31 = vshrl.u32 %v7283_v60, 16  ;;  %v7514_v27 = vshll.u32 %v7283_v60, 16  ;;  %v7287_v43 = vld [vmem:[#allocation2 + $0x1f8] sm:$0xc0] }
 0x3a7   : > { %v7424_v55 = vsel %vm4523_vm3, %v7415_v24, %v7423_v12  ;;  %v7458_v0 = vsel %vm4523_vm3, %v7449_v16, %v7457_v37  ;;  %v7479_v24 = vrot.slane %v7477_v33, 6  ;;  %v7482_v12 = vrot.slane %v7480_v11, 7 }
 0x3a8   : > { %16724 = vmatmul.mubr.msk.bf16.gmra.mrb[40].mxu1 %vm587_vm0, %v7390_v51  ;;  %v7280_v51 = vld [vmem:[#allocation2 + $0x1a0] sm:$0x7f]  ;;  %v7475_v40 = vsel %vm4523_vm3, %v7466_v20, %v7474_v7  ;;  %v7519_v13 = vshrl.u32 %v7284_v3, 16  ;;  %v7528_v62 = vshrl.u32 %v7285_v63, 16  ;;  %v7531_v16 = vshll.u32 %v7285_v63, 16 }
 0x3a9   : > { %16727 = vmatprep.mubr.msk.bf16.mxu1 %vm587_vm0, %v7407_v59  ;;  %v7281_v59 = vld [vmem:[#allocation2 + $0x1b0] sm:$0xc0]  ;;  %v7485_v46 = vshrl.u32 %v7280_v51, 16  ;;  %v7488_v52 = vshll.u32 %v7280_v51, 16  ;;  %v7522_v51 = vshll.u32 %v7284_v3, 16  ;;  %v7513_v11 = vrot.slane %v7511_v31, 6 }
 0x3aa   : > { %v7494_v45 = vshrl.u32 %v7281_v59, 16  ;;  %v7497_v28 = vshll.u32 %v7281_v59, 16  ;;  %v7508_v59 = vor.u32 %v7507_v25, %v7504_v22  ;;  %v7530_v20 = vrot.slane %v7528_v62, 6  ;;  %v18174_v62 = vld [vmem:[#allocation12 + $0x28] sm:$0xff]  }
 0x3ab   : > { %v7487_v54 = vrot.slane %v7485_v46, 6  ;;  %v7490_v48 = vrot.slane %v7488_v52, 7  ;;  %v7516_v46 = vrot.slane %v7514_v27, 7  ;;  %v7521_v52 = vrot.slane %v7519_v13, 6 }
 0x3ac   : > { %v7496_v41 = vrot.slane %v7494_v45, 6  ;;  %v7499_v26 = vrot.slane %v7497_v28, 7  ;;  %v7524_v45 = vrot.slane %v7522_v51, 7  ;;  %v7533_v7 = vrot.slane %v7531_v16, 7  ;;  %v18175_v16 = vld [vmem:[#allocation12 + $0x30] sm:$0xff]  }
 0x3ad   : > { %v7491_v19 = vor.u32 %v7490_v48, %v7487_v54  ;;  %v7517_v54 = vor.u32 %v7516_v46, %v7513_v11  ;;  %v7545_v60 = vshrl.u32 %v7287_v43, 16  ;;  %v18170_v11 = vld [vmem:[#allocation10 + $0x108] sm:$0xff]   ;;  %v18171_v46 = vld [vmem:[#allocation10 + $0x110] sm:$0xff]  }
 0x3ae   : > { %v7500_v4 = vor.u32 %v7499_v26, %v7496_v41  ;;  %v7525_v48 = vor.u32 %v7524_v45, %v7521_v52  ;;  %v7548_v41 = vshll.u32 %v7287_v43, 16  ;;  %v7534_v25 = vor.u32 %v7533_v7, %v7530_v20  ;;  %v7838_v52 = vld [vmem:[#allocation2 + $0xe0] sm:$0xff]  ;;  %v7839_v45 = vld [vmem:[#allocation2 + $0xf8] sm:$0xff]  ;;  %v7841_v43 = vld [vmem:[#allocation2 + $0x128] sm:$0xff] }
 0x3af   : > { %v7547_v63 = vrot.slane %v7545_v60, 6  ;;  %v7843_v20 = vld [vmem:[#allocation2 + $0x158] sm:$0xff]  ;;  %v7844_v7 = vld [vmem:[#allocation2 + $0x170] sm:$0xff] }
 0x3b0   : > { %16728 = vmatmul.mubr.msk.bf16.gmra.mrb[44].mxu1 %vm587_vm0, %v7424_v55  ;;  %v7286_v55 = vld [vmem:[#allocation2 + $0x1e8] sm:$0x7f]  ;;  %v7509_v2 = vsel %vm4523_vm3, %v7500_v4, %v7508_v59  ;;  %v7835_v4 = vld [vmem:[#allocation2 + $0x98] sm:$0xff] }
 0x3b1   : > { %16731 = vmatprep.mubr.msk.bf16.mxu1 %vm587_vm0, %v7441_v58  ;;  %v7483_v58 = vor.u32 %v7482_v12, %v7479_v24  ;;  %v7536_v37 = vshrl.u32 %v7286_v55, 16  ;;  %v7539_v33 = vshll.u32 %v7286_v55, 16  ;;  %v7288_v12 = vld [vmem:[#allocation2 + $0x200] sm:$0x7f]  ;;  %v7550_v55 = vrot.slane %v7548_v41, 7  ;;  %v18173_v59 = vld [vmem:[#allocation12 + $0x20] sm:$0xff]  }
 0x3b2   : > { %v7553_v26 = vshrl.u32 %v7288_v12, 16  ;;  %v7556_v22 = vshll.u32 %v7288_v12, 16  ;;  %16827 = vmatprep.subr.bf16.mxu0 %v18173_v59  ;;  %v7847_v12 = vld [vmem:[#allocation2 + $0x1b8] sm:$0xff] }
 0x3b3   : > { %v7492_v28 = vsel %vm4523_vm3, %v7483_v58, %v7491_v19  ;;  %v7541_v24 = vrot.slane %v7539_v33, 7  ;;  %v7551_v51 = vor.u32 %v7550_v55, %v7547_v63  ;;  %16828 = vmatpush3.bf16.msra.mxu0 %v18173_v59  ;;  %v7837_v33 = vld [vmem:[#allocation2 + $0xc8] sm:$0xff] }
 0x3b4   : > { %v7555_v31 = vrot.slane %v7553_v26, 6  ;;  %v7558_v27 = vrot.slane %v7556_v22, 7  ;;  %16829 = vmatprep.subr.bf16.mxu0 %v18174_v62 }
 0x3b6   : > { %v7559_v58 = vor.u32 %v7558_v27, %v7555_v31  ;;  %v8127_v31 = vld [vmem:[#allocation2 + $0xb0] sm:$0xfe]  ;;  %v7849_v27 = vld [vmem:[#allocation2 + $0x1e8] sm:$0xff] }
 0x3b7   : > { %16830 = vmatpush3.bf16.msra.mxu0 %v18174_v62 }
 0x3b8   : > { %16732 = vmatmul.mubr.msk.bf16.gmra.mrb[48].mxu1 %vm587_vm0, %v7458_v0  ;;  %v7538_v0 = vrot.slane %v7536_v37, 6  ;;  %v7560_v19 = vsel %vm4523_vm3, %v7551_v51, %v7559_v58  ;;  %v7836_v37 = vld [vmem:[#allocation2 + $0xb0] sm:$0xff]  ;;  %16831 = vmatprep.subr.bf16.mxu0 %v18175_v16  ;;  %v8129_v51 = vld [vmem:[#allocation2 + $0xc8] sm:$0xfe] }
 0x3b9   : > { %16735 = vmatprep.mubr.msk.bf16.mxu1 %vm587_vm0, %v7475_v40  ;;  %v7526_v40 = vsel %vm4523_vm3, %v7517_v54, %v7525_v48  ;;  %v8125_v54 = vld [vmem:[#allocation2 + $0x98] sm:$0xfe]  ;;  %v8126_v48 = vld [vmem:[#allocation2 + $0xa0] sm:$0x3]  ;;  %v8130_v58 = vld [vmem:[#allocation2 + $0xd0] sm:$0x3] }
 0x3ba   : > { %v7542_v3 = vor.u32 %v7541_v24, %v7538_v0  ;;  %v7845_v0 = vld [vmem:[#allocation2 + $0x188] sm:$0xff]  ;;  %v7846_v24 = vld [vmem:[#allocation2 + $0x1a0] sm:$0xff]  ;;  %v8158_v60 = vshrl.u32 %v8125_v54, 16  ;;  %v8161_v41 = vshll.u32 %v8125_v54, 16  ;;  %v8166_v26 = vshrl.u32 %v8126_v48, 16 }
 0x3bb   : > { %16832 = vmatpush3.bf16.msra.mxu0 %v18175_v16  ;;  %v8169_v22 = vshll.u32 %v8126_v48, 16 }
 0x3bc   : > { %v7543_v13 = vsel %vm4523_vm3, %v7534_v25, %v7542_v3  ;;  %v7848_v25 = vld [vmem:[#allocation2 + $0x1d0] sm:$0xff]  ;;  %v8160_v3 = vrot.slane %v8158_v60, 1  ;;  %v8168_v63 = vrot.slane %v8166_v26, 1  ;;  %v8133_v60 = vld [vmem:[#allocation2 + $0xf8] sm:$0xfe] }
 0x3bd   : > { %v8171_v55 = vrot.slane %v8169_v22, 2 }
 0x3bf   : > { %v8172_v62 = vor.u32 %v8171_v55, %v8168_v63  ;;  %v8226_v55 = vshrl.u32 %v8133_v60, 16 }
 0x3c0   : > { %16736 = vmatmul.mubr.msk.bf16.gmra.mrb[52].mxu1 %vm587_vm0, %v7492_v28  ;;  %v18172_v28 = vld [vmem:[#allocation10 + $0x118] sm:$0xff]  }
 0x3c1   : > { %16739 = vmatprep.mubr.msk.bf16.mxu1 %vm587_vm0, %v7509_v2  ;;  %v7840_v2 = vld [vmem:[#allocation2 + $0x110] sm:$0xff] }
 0x3c8   : > { %16740 = vmatmul.mubr.msk.bf16.gmra.mrb[56].mxu1 %vm587_vm0, %v7526_v40  ;;  %v8163_v40 = vrot.slane %v8161_v41, 2 }
 0x3c9   : > { %16743 = vmatprep.mubr.msk.bf16.mxu1 %vm587_vm0, %v7543_v13  ;;  %v8128_v13 = vld [vmem:[#allocation2 + $0xb8] sm:$0x3] }
 0x3ca   : > { %v8164_v59 = vor.u32 %v8163_v40, %v8160_v3  ;;  %v8183_v16 = vshrl.u32 %v8128_v13, 16  ;;  %v8134_v3 = vld [vmem:[#allocation2 + $0x100] sm:$0x3] }
 0x3d0   : > { %16744 = vmatmul.mubr.msk.bf16.gmra.mrb[60].mxu1 %vm587_vm0, %v7560_v19  ;;  %v8175_v19 = vshrl.u32 %v8127_v31, 16 }
 0x3d1   : > { %16755 = vmatprep.mubr.msk.bf16.mxu1 %vm587_vm0, %v7835_v4  ;;  %v8178_v4 = vshll.u32 %v8127_v31, 16  ;;  %v8229_v31 = vshll.u32 %v8133_v60, 16 }
 0x3d8   : > { %16756 = vmatmul.mubr.msk.bf16.vlgmr.msra.gmra.mrb[32].mxu1 %vm587_vm0, %v7836_v37  ;;  %v8186_v37 = vshll.u32 %v8128_v13, 16 }
 0x3d9   : > { %16788 = vmatpush3.bf16.msra.mxu1 %v20821_v38  ;;  %16759 = vmatprep.mubr.msk.bf16.mxu1 %vm587_vm0, %v7837_v33  ;;  %v7842_v38 = vld [vmem:[#allocation2 + $0x140] sm:$0xff]  ;;  %v8192_v33 = vshrl.u32 %v8129_v51, 16 }
 0x3da   : > { %16789 = vmatprep.subr.bf16.mxu1 %v18170_v11 }
 0x3dd   : > { %16790 = vmatpush3.bf16.msra.mxu1 %v18170_v11  ;;  %v8195_v11 = vshll.u32 %v8129_v51, 16  ;;  %v8234_v51 = vshrl.u32 %v8134_v3, 16 }
 0x3de   : > { %16791 = vmatprep.subr.bf16.mxu1 %v18171_v46 }
 0x3e0   : > { %16760 = vmatmul.mubr.msk.bf16.gmra.mrb[36].mxu1 %vm587_vm0, %v7838_v52  ;;  %v8203_v52 = vshll.u32 %v8130_v58, 16 }
 0x3e1   : > { %16763 = vmatprep.mubr.msk.bf16.mxu1 %vm587_vm0, %v7839_v45  ;;  %16792 = vmatpush3.bf16.msra.mxu1 %v18171_v46  ;;  %v8200_v46 = vshrl.u32 %v8130_v58, 16  ;;  %v8177_v45 = vrot.slane %v8175_v19, 1  ;;  %v8237_v58 = vshll.u32 %v8134_v3, 16 }
 0x3e2   : > { %16793 = vmatprep.subr.bf16.mxu1 %v18172_v28  ;;  %v8205_v48 = vrot.slane %v8203_v52, 2 }
 0x3e3   : > { %v8202_v54 = vrot.slane %v8200_v46, 1  ;;  %v8136_v46 = vld [vmem:[#allocation2 + $0x118] sm:$0x3] }
 0x3e5   : > { %16794 = vmatpush3.bf16.msra.mxu1 %v18172_v28  ;;  %v8131_v28 = vld [vmem:[#allocation2 + $0xe0] sm:$0xfe]  ;;  %v8206_v13 = vor.u32 %v8205_v48, %v8202_v54 }
 0x3e6   : > { %v8209_v41 = vshrl.u32 %v8131_v28, 16  ;;  %v8212_v26 = vshll.u32 %v8131_v28, 16  ;;  %v8239_v28 = vrot.slane %v8237_v58, 2  ;;  %v8139_v58 = vld [vmem:[#allocation2 + $0x140] sm:$0xfe] }
 0x3e8   : > { %16764 = vmatmul.mubr.msk.bf16.gmra.mrb[40].mxu1 %vm587_vm0, %v7840_v2  ;;  %v8132_v2 = vld [vmem:[#allocation2 + $0xe8] sm:$0x3]  ;;  %v8211_v19 = vrot.slane %v8209_v41, 1 }
 0x3e9   : > { %16767 = vmatprep.mubr.msk.bf16.mxu1 %vm587_vm0, %v7841_v43  ;;  %v7850_v43 = vld [vmem:[#allocation2 + $0x200] sm:$0xff]  ;;  %v8217_v22 = vshrl.u32 %v8132_v2, 16 }
 0x3f0   : > { %16768 = vmatmul.mubr.msk.bf16.gmra.mrb[44].mxu1 %vm587_vm0, %v7842_v38  ;;  %v8173_v38 = vsel %vm5327_vm4, %v8164_v59, %v8172_v62  ;;  %v8219_v59 = vrot.slane %v8217_v22, 1 }
 0x3f1   : > { %16771 = vmatprep.mubr.msk.bf16.mxu1 %vm587_vm0, %v7843_v20  ;;  %v8180_v20 = vrot.slane %v8178_v4, 2  ;;  %v8214_v4 = vrot.slane %v8212_v26, 2 }
 0x3f3   : > { %v8181_v40 = vor.u32 %v8180_v20, %v8177_v45  ;;  %v8236_v45 = vrot.slane %v8234_v51, 1 }
 0x3f5   : > { %v8240_v22 = vor.u32 %v8239_v28, %v8236_v45 }
 0x3f8   : > { %16772 = vmatmul.mubr.msk.bf16.gmra.mrb[48].mxu1 %vm587_vm0, %v7844_v7  ;;  %v8185_v7 = vrot.slane %v8183_v16, 1 }
 0x3f9   : > { %16775 = vmatprep.mubr.msk.bf16.mxu1 %vm587_vm0, %v7845_v0  ;;  %v8188_v0 = vrot.slane %v8186_v37, 2  ;;  %v8228_v37 = vrot.slane %v8226_v55, 1 }
 0x3fb   : > { %v8189_v63 = vor.u32 %v8188_v0, %v8185_v7 }
 0x3fd   : > { %v8190_v16 = vsel %vm5327_vm4, %v8181_v40, %v8189_v63 }
 0x400   : > { %16776 = vmatmul.mubr.msk.bf16.gmra.mrb[52].mxu1 %vm587_vm0, %v7846_v24  ;;  %v8194_v24 = vrot.slane %v8192_v33, 1  ;;  %v8231_v33 = vrot.slane %v8229_v31, 2 }
 0x401   : > { %16779 = vmatprep.mubr.msk.bf16.mxu1 %vm587_vm0, %v7847_v12  ;;  %v8197_v12 = vrot.slane %v8195_v11, 2  ;;  %v8135_v11 = vld [vmem:[#allocation2 + $0x110] sm:$0xfe] }
 0x402   : > { %v8243_v7 = vshrl.u32 %v8135_v11, 16  ;;  %v8246_v0 = vshll.u32 %v8135_v11, 16  ;;  %v8232_v26 = vor.u32 %v8231_v33, %v8228_v37  ;;  %v8277_v33 = vshrl.u32 %v8139_v58, 16 }
 0x403   : > { %v8280_v11 = vshll.u32 %v8139_v58, 16 }
 0x404   : > { %v8245_v3 = vrot.slane %v8243_v7, 1  ;;  %v8248_v40 = vrot.slane %v8246_v0, 2  ;;  %v8279_v0 = vrot.slane %v8277_v33, 1 }
 0x408   : > { %16780 = vmatmul.mubr.msk.bf16.gmra.mrb[56].mxu1 %vm587_vm0, %v7848_v25  ;;  %v8220_v25 = vshll.u32 %v8132_v2, 16  ;;  %v8137_v2 = vld [vmem:[#allocation2 + $0x128] sm:$0xfe] }
 0x409   : > { %16783 = vmatprep.mubr.msk.bf16.mxu1 %vm587_vm0, %v7849_v27  ;;  %v8198_v27 = vor.u32 %v8197_v12, %v8194_v24  ;;  %v8251_v24 = vshrl.u32 %v8136_v46, 16  ;;  %v8254_v12 = vshll.u32 %v8136_v46, 16  ;;  %v8260_v54 = vshrl.u32 %v8137_v2, 16 }
 0x40a   : > { %v8222_v62 = vrot.slane %v8220_v25, 2  ;;  %v8263_v48 = vshll.u32 %v8137_v2, 16 }
 0x40b   : > { %v8207_v52 = vsel %vm5327_vm4, %v8198_v27, %v8206_v13  ;;  %v8253_v63 = vrot.slane %v8251_v24, 1  ;;  %v8256_v55 = vrot.slane %v8254_v12, 2  ;;  %v8262_v31 = vrot.slane %v8260_v54, 1  ;;  %v8143_v24 = vld [vmem:[#allocation2 + $0x170] sm:$0xfe] }
 0x40c   : > { %v8223_v20 = vor.u32 %v8222_v62, %v8219_v59  ;;  %v8265_v27 = vrot.slane %v8263_v48, 2  ;;  %v8141_v59 = vld [vmem:[#allocation2 + $0x158] sm:$0xfe]  ;;  %v8142_v62 = vld [vmem:[#allocation2 + $0x160] sm:$0x3]  ;;  %v8282_v48 = vrot.slane %v8280_v11, 2 }
 0x40d   : > { %v8257_v37 = vor.u32 %v8256_v55, %v8253_v63  ;;  %v8294_v2 = vshrl.u32 %v8141_v59, 16  ;;  %v8144_v12 = vld [vmem:[#allocation2 + $0x178] sm:$0x3]  ;;  %v8311_v63 = vshrl.u32 %v8143_v24, 16  ;;  %v8314_v55 = vshll.u32 %v8143_v24, 16 }
 0x40e   : > { %v8266_v46 = vor.u32 %v8265_v27, %v8262_v31  ;;  %v8319_v31 = vshrl.u32 %v8144_v12, 16  ;;  %v8322_v27 = vshll.u32 %v8144_v12, 16  ;;  %v8149_v24 = vld [vmem:[#allocation2 + $0x1b8] sm:$0xfe]  ;;  %v8150_v12 = vld [vmem:[#allocation2 + $0x1c0] sm:$0x3] }
 0x40f   : > { %v8313_v33 = vrot.slane %v8311_v63, 1  ;;  %v8316_v11 = vrot.slane %v8314_v55, 2  ;;  %v8373_v63 = vshll.u32 %v8150_v12, 16 }
 0x410   : > { %16784 = vmatmul.mubr.msk.bf16.gmra.mrb[60].mxu1 %vm587_vm0, %v7850_v43  ;;  %v8138_v43 = vld [vmem:[#allocation2 + $0x130] sm:$0x3] }
 0x411   : > { %16795 = vmatprep.mubr.msk.bf16.mxu1 %vm587_vm0, %v8173_v38  ;;  %v8215_v38 = vor.u32 %v8214_v4, %v8211_v19  ;;  %v8268_v60 = vshrl.u32 %v8138_v43, 16  ;;  %v8271_v41 = vshll.u32 %v8138_v43, 16  ;;  %v8241_v19 = vsel %vm5327_vm4, %v8232_v26, %v8240_v22  ;;  %v8140_v4 = vld [vmem:[#allocation2 + $0x148] sm:$0x3] }
 0x412   : > { %v8285_v45 = vshrl.u32 %v8140_v4, 16  ;;  %v8288_v28 = vshll.u32 %v8140_v4, 16  ;;  %v8297_v43 = vshll.u32 %v8141_v59, 16  ;;  %v8296_v26 = vrot.slane %v8294_v2, 1 }
 0x413   : > { %v8224_v25 = vsel %vm5327_vm4, %v8215_v38, %v8223_v20  ;;  %v8270_v13 = vrot.slane %v8268_v60, 1  ;;  %v8273_v51 = vrot.slane %v8271_v41, 2  ;;  %v8302_v38 = vshrl.u32 %v8142_v62, 16 }
 0x414   : > { %v8305_v20 = vshll.u32 %v8142_v62, 16  ;;  %v8287_v60 = vrot.slane %v8285_v45, 1  ;;  %v8290_v41 = vrot.slane %v8288_v28, 2  ;;  %v8299_v22 = vrot.slane %v8297_v43, 2  ;;  %v8147_v43 = vld [vmem:[#allocation2 + $0x1a0] sm:$0xfe] }
 0x416   : > { %v8291_v58 = vor.u32 %v8290_v41, %v8287_v60  ;;  %v8300_v59 = vor.u32 %v8299_v22, %v8296_v26  ;;  %v8345_v60 = vshrl.u32 %v8147_v43, 16  ;;  %v8348_v41 = vshll.u32 %v8147_v43, 16 }
 0x418   : > { %16796 = vmatmul.mubr.msk.bf16.vlgmr.msra.gmra.mrb[32].mxu1 %vm587_vm0, %v8190_v16  ;;  %v8249_v16 = vor.u32 %v8248_v40, %v8245_v3  ;;  %v8307_v3 = vrot.slane %v8305_v20, 2  ;;  %v8145_v40 = vld [vmem:[#allocation2 + $0x188] sm:$0xfe] }
 0x419   : > { %16799 = vmatprep.mubr.msk.bf16.mxu1 %vm587_vm0, %v8207_v52  ;;  %v8274_v52 = vor.u32 %v8273_v51, %v8270_v13  ;;  %v8146_v13 = vld [vmem:[#allocation2 + $0x190] sm:$0x3]  ;;  %v8283_v51 = vor.u32 %v8282_v48, %v8279_v0  ;;  %v8331_v4 = vshll.u32 %v8145_v40, 16 }
 0x41a   : > { %v8258_v7 = vsel %vm5327_vm4, %v8249_v16, %v8257_v37  ;;  %v8336_v16 = vshrl.u32 %v8146_v13, 16  ;;  %v8339_v37 = vshll.u32 %v8146_v13, 16  ;;  %v8347_v13 = vrot.slane %v8345_v60, 1 }
 0x41b   : > { %v8275_v54 = vsel %vm5327_vm4, %v8266_v46, %v8274_v52  ;;  %v8321_v46 = vrot.slane %v8319_v31, 1  ;;  %v8324_v52 = vrot.slane %v8322_v27, 2  ;;  %v8292_v45 = vsel %vm5327_vm4, %v8283_v51, %v8291_v58 }
 0x41c   : > { %v8333_v2 = vrot.slane %v8331_v4, 2  ;;  %v8341_v0 = vrot.slane %v8339_v37, 2  ;;  %v8350_v51 = vrot.slane %v8348_v41, 2  ;;  %v8151_v4 = vld [vmem:[#allocation2 + $0x1d0] sm:$0xfe]  ;;  %v8375_v37 = vrot.slane %v8373_v63, 2 }
 0x41d   : > { %v8325_v48 = vor.u32 %v8324_v52, %v8321_v46  ;;  %v8153_v46 = vld [vmem:[#allocation2 + $0x1e8] sm:$0xfe]  ;;  %v8154_v52 = vld [vmem:[#allocation2 + $0x1f0] sm:$0x3] }
 0x420   : > { %16800 = vmatmul.mubr.msk.bf16.gmra.mrb[36].mxu1 %vm587_vm0, %v8224_v25  ;;  %v8304_v25 = vrot.slane %v8302_v38, 1  ;;  %v8148_v38 = vld [vmem:[#allocation2 + $0x1a8] sm:$0x3] }
 0x421   : > { %16803 = vmatprep.mubr.msk.bf16.mxu1 %vm587_vm0, %v8241_v19  ;;  %v8328_v19 = vshrl.u32 %v8145_v40, 16  ;;  %v8353_v26 = vshrl.u32 %v8148_v38, 16  ;;  %v8356_v22 = vshll.u32 %v8148_v38, 16  ;;  %v8370_v40 = vshrl.u32 %v8150_v12, 16 }
 0x422   : > { %v8308_v62 = vor.u32 %v8307_v3, %v8304_v25  ;;  %v8362_v25 = vshrl.u32 %v8149_v24, 16  ;;  %v8365_v3 = vshll.u32 %v8149_v24, 16  ;;  %v8351_v38 = vor.u32 %v8350_v51, %v8347_v13  ;;  %v8156_v13 = vld [vmem:[#allocation2 + $0x208] sm:$0x3] }
 0x423   : > { %v8330_v28 = vrot.slane %v8328_v19, 1  ;;  %v8355_v58 = vrot.slane %v8353_v26, 1  ;;  %v8358_v19 = vrot.slane %v8356_v22, 2  ;;  %v8396_v24 = vshrl.u32 %v8153_v46, 16 }
 0x424   : > { %v8309_v20 = vsel %vm5327_vm4, %v8300_v59, %v8308_v62  ;;  %v8364_v59 = vrot.slane %v8362_v25, 1  ;;  %v8367_v62 = vrot.slane %v8365_v3, 2  ;;  %v8399_v12 = vshll.u32 %v8153_v46, 16 }
 0x425   : > { %v8334_v55 = vor.u32 %v8333_v2, %v8330_v28  ;;  %v8382_v28 = vshll.u32 %v8151_v4, 16  ;;  %v8398_v63 = vrot.slane %v8396_v24, 1  ;;  %v20906_v24 = vld [vmem:[%s22901_s4] ss:$0 sm:$0xff] }
 0x427   : > { %v8384_v41 = vrot.slane %v8382_v28, 2 }
 0x428   : > { %16804 = vmatmul.mubr.msk.bf16.gmra.mrb[40].mxu1 %vm587_vm0, %v8258_v7  ;;  %v8338_v7 = vrot.slane %v8336_v16, 1  ;;  %v8372_v16 = vrot.slane %v8370_v40, 1  ;;  %v8155_v40 = vld [vmem:[#allocation2 + $0x200] sm:$0xfe] }
 0x429   : > { %16807 = vmatprep.mubr.msk.bf16.mxu1 %vm587_vm0, %v8275_v54  ;;  %v8317_v54 = vor.u32 %v8316_v11, %v8313_v33  ;;  %v8152_v33 = vld [vmem:[#allocation2 + $0x1d8] sm:$0x3] }
 0x42a   : > { %v8342_v31 = vor.u32 %v8341_v0, %v8338_v7  ;;  %v8387_v2 = vshrl.u32 %v8152_v33, 16  ;;  %v8390_v43 = vshll.u32 %v8152_v33, 16  ;;  %v8368_v7 = vor.u32 %v8367_v62, %v8364_v59 }
 0x42b   : > { %v8326_v27 = vsel %vm5327_vm4, %v8317_v54, %v8325_v48  ;;  %v8376_v0 = vor.u32 %v8375_v37, %v8372_v16  ;;  %v8404_v54 = vshrl.u32 %v8154_v52, 16  ;;  %v8407_v48 = vshll.u32 %v8154_v52, 16 }
 0x42c   : > { %v8343_v11 = vsel %vm5327_vm4, %v8334_v55, %v8342_v31  ;;  %v8389_v26 = vrot.slane %v8387_v2, 1  ;;  %v8392_v22 = vrot.slane %v8390_v43, 2  ;;  %v8401_v55 = vrot.slane %v8399_v12, 2 }
 0x42d   : > { %v8377_v3 = vsel %vm5327_vm4, %v8368_v7, %v8376_v0  ;;  %v8406_v31 = vrot.slane %v8404_v54, 1  ;;  %v8421_v59 = vshrl.u32 %v8156_v13, 16  ;;  %v8424_v62 = vshll.u32 %v8156_v13, 16  ;;  %v20896_v7 = vld [vmem:[#allocation2 + $0x38] sm:$0xff] }
 0x42e   : > { %v8402_v16 = vor.u32 %v8401_v55, %v8398_v63  ;;  %16835 = vmatprep.mubr.msk.bf16.mxu0 %vm587_vm0, %v20896_v7  ;;  %v20900_v0 = vld [vmem:[#allocation12] sm:$0xff]   ;;  %v4461_v12 = vadd.f32 %v20568_v15, %v20906_v24  ;;  %v4459_v54 = vadd.f32 %v20571_v14, %v20906_v24 }
 0x42f   : > { %v8423_v52 = vrot.slane %v8421_v59, 1 }
 0x430   : > { %16808 = vmatmul.mubr.msk.bf16.gmra.mrb[44].mxu1 %vm587_vm0, %v8292_v45  ;;  %v8379_v45 = vshrl.u32 %v8151_v4, 16  ;;  %v8416_v4 = vshll.u32 %v8155_v40, 16  ;;  %v9263_v15 = vmul.f32 %v20326_v61, %v4461_v12  ;;  %v9261_v63 = vmul.f32 %v20310_v21, %v4459_v54  ;;  %v686_v21 = vld [vmem:[%s19056_s28] sm:$0xff] }
 0x431   : > { %16811 = vmatprep.mubr.msk.bf16.mxu1 %vm587_vm0, %v8309_v20  ;;  %v8359_v20 = vor.u32 %v8358_v19, %v8355_v58  ;;  %v8393_v58 = vor.u32 %v8392_v22, %v8389_v26  ;;  %v8413_v19 = vshrl.u32 %v8155_v40, 16  ;;  %v4460_v22 = vadd.f32 %v20577_v47, %v20906_v24 }
 0x432   : > { %v8381_v60 = vrot.slane %v8379_v45, 1  ;;  %v8418_v46 = vrot.slane %v8416_v4, 2  ;;  %v8426_v45 = vrot.slane %v8424_v62, 2  ;;  %v4465_v4 = vadd.f32 %v20585_v30, %v20906_v24 }
 0x433   : > { %v8360_v25 = vsel %vm5327_vm4, %v8351_v38, %v8359_v20  ;;  %v18176_v20 = vld [vmem:[#allocation12 + $0x38] sm:$0xff]   ;;  %v9262_v61 = vmul.f32 %v20316_v9, %v4460_v22  ;;  %v4463_v62 = vadd.f32 %v20588_v53, %v20906_v24  ;;  %v23061_v22 = vld [vmem:[#allocation45_spill] sm:$0xff] }
 0x434   : > { %v8385_v51 = vor.u32 %v8384_v41, %v8381_v60  ;;  %v8427_v43 = vor.u32 %v8426_v45, %v8423_v52  ;;  %16833 = vmatprep.subr.bf16.mxu0 %v18176_v20  ;;  %v4462_v60 = vadd.f32 %v20574_v29, %v20906_v24  ;;  %v9267_v53 = vmul.f32 %v20348_v42, %v4465_v4 }
 0x435   : > { %16834 = vmatpush3.bf16.msra.mxu0 %v18176_v20  ;;  %v23058_v20 = vld [vmem:[#allocation27_spill] sm:$0xff] }
 0x436   : > { %v8394_v33 = vsel %vm5327_vm4, %v8385_v51, %v8393_v58  ;;  %16867 = vmatprep.subr.bf16.mxu0 %v20900_v0  ;;  %v9264_v47 = vmul.f32 %v20336_v36, %v4462_v60  ;;  %v688_v51 = vld [vmem:[%s19056_s28 + $0x10] sm:$0xff]  ;;  %v9265_v12 = vmul.f32 %v23058_v20, %v4463_v62 }
 0x438   : > { %16812 = vmatmul.mubr.msk.bf16.gmra.mrb[48].mxu1 %vm587_vm0, %v8326_v27  ;;  %v8409_v27 = vrot.slane %v8407_v48, 2 }
 0x439   : > { %16815 = vmatprep.mubr.msk.bf16.mxu1 %vm587_vm0, %v8343_v11  ;;  %v8415_v11 = vrot.slane %v8413_v19, 1 }
 0x43a   : > { %v8410_v37 = vor.u32 %v8409_v27, %v8406_v31 }
 0x43b   : > { %v8419_v2 = vor.u32 %v8418_v46, %v8415_v11 }
 0x43c   : > { %v8411_v28 = vsel %vm5327_vm4, %v8402_v16, %v8410_v37 }
 0x43d   : > { %v8428_v38 = vsel %vm5327_vm4, %v8419_v2, %v8427_v43  ;;  %v23057_v2 = vld [vmem:[#allocation52_spill] sm:$0xff] }
 0x440   : > { %16816 = vmatmul.mubr.msk.bf16.gmra.mrb[52].mxu1 %vm587_vm0, %v8360_v25 }
 0x441   : > { %16819 = vmatprep.mubr.msk.bf16.mxu1 %vm587_vm0, %v8377_v3 }
 0x448   : > { %16820 = vmatmul.mubr.msk.bf16.gmra.mrb[56].mxu1 %vm587_vm0, %v8394_v33 }
 0x449   : > { %16823 = vmatprep.mubr.msk.bf16.mxu1 %vm587_vm0, %v8411_v28 }
 0x450   : > { %16824 = vmatmul.mubr.msk.bf16.gmra.mrb[60].mxu1 %vm587_vm0, %v8428_v38 }
 0x4eb   : > { %v16797_v48 = vpop.f32.mrb[32].mxu1 }
 0x4ec   : > { %v8705_v41 = vadd.f32 %v16797_v48, %v20906_v24  ;;  %v8544_v26 = vpop.f32.mrb[33].mxu1 }
 0x4ed   : > { %v8703_v25 = vadd.f32 %v20906_v24, %v8544_v26  ;;  %v16798_v3 = vpop.f32.mrb[34].mxu1 }
 0x4ee   : > { %v9487_v14 = vmul.f32 %v20428_v35, %v8705_v41  ;;  %v8706_v40 = vadd.f32 %v16798_v3, %v20906_v24  ;;  %v8547_v29 = vpop.f32.mrb[35].mxu1  ;;  %v689_v35 = vld [vmem:[%s19056_s28 + $0x18] sm:$0xff]  ;;  %v23060_v41 = vld [vmem:[#allocation25_spill] sm:$0xff]  ;;  %v23062_v3 = vld [vmem:[#allocation24_spill] sm:$0xff] }
 0x4ef   : > { %v9485_v55 = vmul.f32 %v20411_v56, %v8703_v25  ;;  %v8704_v31 = vadd.f32 %v20906_v24, %v8547_v29  ;;  %v687_v56 = vld [vmem:[%s19056_s28 + $0x8] sm:$0xff]  ;;  %v693_v29 = vld [vmem:[%s19056_s28 + $0x38] sm:$0xff] }
 0x4f0   : > { %v9519_v27 = vadd.f32 %v9487_v14, %v9263_v15  ;;  %v9488_v13 = vmul.f32 %v20434_v10, %v8706_v40  ;;  %v4466_v10 = vadd.f32 %v20592_v39, %v20906_v24  ;;  %v692_v14 = vld [vmem:[%s19056_s28 + $0x30] sm:$0xff] }
 0x4f1   : > { %v9517_v58 = vadd.f32 %v9485_v55, %v9261_v63  ;;  %v9486_v19 = vmul.f32 %v20421_v32, %v8704_v31  ;;  %v4464_v32 = vadd.f32 %v20595_v1, %v20906_v24  ;;  %v23059_v1 = vld [vmem:[#allocation50_spill] sm:$0xff]  ;;  %v23063_v63 = vld [vmem:[#allocation43_spill] sm:$0xff]  ;;  %v4469_v31 = vadd.f32 %v20603_v18, %v20906_v24 }
 0x4f2   : > { %v9520_v59 = vadd.f32 %v9488_v13, %v9264_v47  ;;  %v9551_v9 = vadd.f32 %v9519_v27, %v688_v51  ;;  %v9268_v26 = vmul.f32 %v23060_v41, %v4466_v10  ;;  %v690_v47 = vld [vmem:[%s19056_s28 + $0x20] sm:$0xff]  ;;  %v691_v13 = vld [vmem:[%s19056_s28 + $0x28] sm:$0xff]  ;;  %v23064_v10 = vld [vmem:[#allocation31_spill] sm:$0xff] }
 0x4f3   : > { %v9518_v36 = vadd.f32 %v9486_v19, %v9262_v61  ;;  %v16801_v16 = vpop.f32.mrb[36].mxu1  ;;  %v9549_v30 = vadd.f32 %v9517_v58, %v686_v21  ;;  %v9266_v15 = vmul.f32 %v23062_v3, %v4464_v32  ;;  %v4467_v61 = vadd.f32 %v20609_v5, %v20906_v24  ;;  %v23066_v32 = vld [vmem:[#allocation29_spill] sm:$0xff]  ;;  %v23071_v41 = vld [vmem:[#allocation46_spill] sm:$0xff] }
 0x4f4   : > { %v9552_v37 = vadd.f32 %v9520_v59, %v689_v35  ;;  %v8709_v33 = vadd.f32 %v16801_v16, %v20906_v24  ;;  %v8560_v11 = vpop.f32.mrb[37].mxu1  ;;  %v4470_v35 = vadd.f32 %v20612_v44, %v20906_v24  ;;  %v9271_v5 = vmul.f32 %v23064_v10, %v4469_v31  ;;  %v23073_v31 = vld [vmem:[#allocation76_spill] sm:$0xff]  ;;  %v23077_v10 = vld [vmem:[#allocation33_spill] sm:$0xff] }
 0x4f5   : > { %v9550_v46 = vadd.f32 %v9518_v36, %v687_v56  ;;  %v8707_v52 = vadd.f32 %v20906_v24, %v8560_v11  ;;  %v16802_v45 = vpop.f32.mrb[38].mxu1  ;;  %v4468_v56 = vadd.f32 %v20615_v50, %v20906_v24 }
 0x4f6   : > { %v9590_v28 = vpack.c.bf16 %v9552_v37, %v9551_v9  ;;  %v9491_v39 = vmul.f32 %v23057_v2, %v8709_v33  ;;  %v8710_v43 = vadd.f32 %v16802_v45, %v20906_v24  ;;  %v8563_v38 = vpop.f32.mrb[39].mxu1  ;;  %v23065_v37 = vld [vmem:[#allocation56_spill] sm:$0xff] }
 0x4f7   : > { %v9589_v54 = vpack.c.bf16 %v9550_v46, %v9549_v30  ;;  %v9489_v48 = vmul.f32 %v23059_v1, %v8707_v52  ;;  %v8708_v60 = vadd.f32 %v20906_v24, %v8563_v38  ;;  %v9269_v30 = vmul.f32 %v23066_v32, %v4467_v61  ;;  %v23067_v52 = vld [vmem:[#allocation54_spill] sm:$0xff]  ;;  %v23079_v32 = vld [vmem:[#allocation32_spill] sm:$0xff] }
 0x4f8   : > { %9606 = vst.msk [vmem:[#allocation2 + $0x68] sm:$0xff] %vm587_vm0, %v9590_v28  ;;  %v9523_v42 = vadd.f32 %v9491_v39, %v9267_v53  ;;  %v9492_v25 = vmul.f32 %v23061_v22, %v8710_v43  ;;  %v18178_v53 = vld [vmem:[#allocation12 + $0x8] sm:$0xff]   ;;  %v23068_v28 = vld [vmem:[#allocation28_spill] sm:$0xff]  ;;  %v23069_v43 = vld [vmem:[#allocation47_spill] sm:$0xff]  ;;  %v4473_v22 = vadd.f32 %v20629_v6, %v20906_v24 }
 0x4f9   : > { %9605 = vst.msk [vmem:[#allocation2 + $0x50] sm:$0xff] %vm587_vm0, %v9589_v54  ;;  %v9521_v40 = vadd.f32 %v9489_v48, %v9265_v12  ;;  %v9490_v55 = vmul.f32 %v23063_v63, %v8708_v60  ;;  %v9272_v2 = vmul.f32 %v23068_v28, %v4470_v35  ;;  %v23070_v12 = vld [vmem:[#allocation26_spill] sm:$0xff]  ;;  %v697_v60 = vld [vmem:[%s19056_s28 + $0x58] sm:$0xff] }
 0x4fa   : > { %v9524_v27 = vadd.f32 %v9492_v25, %v9268_v26  ;;  %v9555_v19 = vadd.f32 %v9523_v42, %v692_v14  ;;  %v9270_v54 = vmul.f32 %v23070_v12, %v4468_v56  ;;  %v696_v1 = vld [vmem:[%s19056_s28 + $0x50] sm:$0xff]  ;;  %v694_v25 = vld [vmem:[%s19056_s28 + $0x40] sm:$0xff]  ;;  %v23072_v14 = vld [vmem:[#allocation75_spill] sm:$0xff] }
 0x4fb   : > { %v9522_v51 = vadd.f32 %v9490_v55, %v9266_v15  ;;  %v16805_v58 = vpop.f32.mrb[40].mxu1  ;;  %v9553_v18 = vadd.f32 %v9521_v40, %v690_v47  ;;  %v695_v15 = vld [vmem:[%s19056_s28 + $0x48] sm:$0xff]  ;;  %v4471_v40 = vadd.f32 %v23072_v14, %v20906_v24  ;;  %v18179_v55 = vld [vmem:[#allocation12 + $0x10] sm:$0xff]   ;;  %v4474_v47 = vadd.f32 %v23073_v31, %v20906_v24  ;;  %v21031_v14 = vld [vmem:[#allocation12 + $0x40] sm:$0xff]  }
 0x4fc   : > { %v9556_v4 = vadd.f32 %v9524_v27, %v693_v29  ;;  %v8713_v21 = vadd.f32 %v16805_v58, %v20906_v24  ;;  %v8576_v59 = vpop.f32.mrb[41].mxu1 }
 0x4fd   : > { %v9554_v62 = vadd.f32 %v9522_v51, %v691_v13  ;;  %v8711_v36 = vadd.f32 %v20906_v24, %v8576_v59  ;;  %v16806_v16 = vpop.f32.mrb[42].mxu1  ;;  %v23074_v51 = vld [vmem:[#allocation77_spill] sm:$0xff] }
 0x4fe   : > { %v9592_v9 = vpack.c.bf16 %v9556_v4, %v9555_v19  ;;  %v9495_v33 = vmul.f32 %v23065_v37, %v8713_v21  ;;  %v8714_v44 = vadd.f32 %v16806_v16, %v20906_v24  ;;  %v8579_v11 = vpop.f32.mrb[43].mxu1  ;;  %v4472_v58 = vadd.f32 %v23074_v51, %v20906_v24  ;;  %v23075_v21 = vld [vmem:[#allocation35_spill] sm:$0xff]  ;;  %v23078_v37 = vld [vmem:[#allocation58_spill] sm:$0xff] }
 0x4ff   : > { %v9591_v46 = vpack.c.bf16 %v9554_v62, %v9553_v18  ;;  %v9493_v50 = vmul.f32 %v23067_v52, %v8711_v36  ;;  %v8712_v45 = vadd.f32 %v20906_v24, %v8579_v11  ;;  %v20986_v42 = vld [vmem:[#allocation2 + $0x68] sm:$0xff]  ;;  %v9275_v59 = vmul.f32 %v23075_v21, %v4473_v22  ;;  %v23076_v18 = vld [vmem:[#allocation60_spill] sm:$0xff]  ;;  %v23080_v52 = vld [vmem:[#allocation49_spill] sm:$0xff] }
 0x500   : > { %9608 = vst.msk [vmem:[#allocation2 + $0x98] sm:$0xff] %vm587_vm0, %v9592_v9  ;;  %v9527_v39 = vadd.f32 %v9495_v33, %v9271_v5  ;;  %v9496_v38 = vmul.f32 %v23069_v43, %v8714_v44  ;;  %v20977_v20 = vld [vmem:[#allocation2 + $0x50] sm:$0xff]  ;;  %v9273_v5 = vmul.f32 %v23077_v10, %v4471_v40 }
 0x501   : > { %9607 = vst.msk [vmem:[#allocation2 + $0x80] sm:$0xff] %vm587_vm0, %v9591_v46  ;;  %v9525_v48 = vadd.f32 %v9493_v50, %v9269_v30  ;;  %v9494_v26 = vmul.f32 %v23071_v41, %v8712_v45  ;;  %16836 = vmatmul.mubr.msk.bf16.vlgmr.msra.gmra.mrb[32].mxu0 %vm587_vm0, %v20977_v20  ;;  %v18180_v11 = vld [vmem:[#allocation12 + $0x18] sm:$0xff]   ;;  %v9276_v30 = vmul.f32 %v23079_v32, %v4474_v47  ;;  %v23085_v40 = vld [vmem:[#allocation80_spill] sm:$0xff] }
 0x502   : > { %v9528_v3 = vadd.f32 %v9496_v38, %v9272_v2  ;;  %16839 = vmatprep.mubr.msk.bf16.mxu0 %vm587_vm0, %v20986_v42  ;;  %16868 = vmatpush3.bf16.msra.mxu0 %v20900_v0  ;;  %v9559_v27 = vadd.f32 %v9527_v39, %v696_v1  ;;  %v700_v2 = vld [vmem:[%s19056_s28 + $0x70] sm:$0xff]  ;;  %v701_v43 = vld [vmem:[%s19056_s28 + $0x78] sm:$0xff]  ;;  %v23082_v38 = vld [vmem:[#allocation48_spill] sm:$0xff] }
 0x503   : > { %v9526_v29 = vadd.f32 %v9494_v26, %v9270_v54  ;;  %v16809_v63 = vpop.f32.mrb[44].mxu1  ;;  %16869 = vmatprep.subr.bf16.mxu0 %v18178_v53  ;;  %v9557_v35 = vadd.f32 %v9525_v48, %v694_v25  ;;  %v23083_v1 = vld [vmem:[#allocation78_spill] sm:$0xff]  ;;  %v699_v26 = vld [vmem:[%s19056_s28 + $0x68] sm:$0xff]  ;;  %v23084_v22 = vld [vmem:[#allocation79_spill] sm:$0xff] }
 0x504   : > { %v9560_v6 = vadd.f32 %v9528_v3, %v697_v60  ;;  %v8717_v13 = vadd.f32 %v16809_v63, %v20906_v24  ;;  %v8592_v61 = vpop.f32.mrb[45].mxu1  ;;  %v4477_v48 = vadd.f32 %v23083_v1, %v20906_v24  ;;  %v698_v60 = vld [vmem:[%s19056_s28 + $0x60] sm:$0xff]  ;;  %v4475_v25 = vadd.f32 %v23084_v22, %v20906_v24 }
 0x505   : > { %v9558_v0 = vadd.f32 %v9526_v29, %v695_v15  ;;  %v8715_v19 = vadd.f32 %v20906_v24, %v8592_v61  ;;  %v16810_v4 = vpop.f32.mrb[46].mxu1  ;;  %v4478_v29 = vadd.f32 %v23085_v40, %v20906_v24 }
 0x506   : > { %v9594_v56 = vpack.c.bf16 %v9560_v6, %v9559_v27  ;;  %v9499_v62 = vmul.f32 %v23076_v18, %v8717_v13  ;;  %v8718_v36 = vadd.f32 %v16810_v4, %v20906_v24  ;;  %v8595_v16 = vpop.f32.mrb[47].mxu1  ;;  %16870 = vmatpush3.bf16.msra.mxu0 %v18178_v53  ;;  %v23081_v53 = vld [vmem:[#allocation30_spill] sm:$0xff]  ;;  %v23086_v6 = vld [vmem:[#allocation81_spill] sm:$0xff]  ;;  %v23088_v4 = vld [vmem:[#allocation64_spill] sm:$0xff] }
 0x507   : > { %v9593_v9 = vpack.c.bf16 %v9558_v0, %v9557_v35  ;;  %v9497_v33 = vmul.f32 %v23078_v37, %v8715_v19  ;;  %v8716_v44 = vadd.f32 %v20906_v24, %v8595_v16  ;;  %16871 = vmatprep.subr.bf16.mxu0 %v18179_v55  ;;  %v9274_v28 = vmul.f32 %v23081_v53, %v4472_v58  ;;  %v21021_v54 = vld [vmem:[#allocation2 + $0x98] sm:$0xff]  ;;  %v23087_v35 = vld [vmem:[#allocation38_spill] sm:$0xff]  ;;  %v705_v53 = vld [vmem:[%s19056_s28 + $0x98] sm:$0xff] }
 0x508   : > { %9610 = vst.msk [vmem:[#allocation2 + $0xc8] sm:$0xff] %vm587_vm0, %v9594_v56  ;;  %v9531_v46 = vadd.f32 %v9499_v62, %v9275_v59  ;;  %v9500_v50 = vmul.f32 %v23080_v52, %v8718_v36  ;;  %v21012_v45 = vld [vmem:[#allocation2 + $0x80] sm:$0xff]  ;;  %v4476_v13 = vadd.f32 %v23086_v6, %v20906_v24  ;;  %v9279_v0 = vmul.f32 %v23087_v35, %v4477_v48 }
 0x509   : > { %9609 = vst.msk [vmem:[#allocation2 + $0xb0] sm:$0xff] %vm587_vm0, %v9593_v9  ;;  %v9529_v39 = vadd.f32 %v9497_v33, %v9273_v5  ;;  %v9498_v12 = vmul.f32 %v23082_v38, %v8716_v44  ;;  %16840 = vmatmul.mubr.msk.bf16.gmra.mrb[36].mxu0 %vm587_vm0, %v21012_v45  ;;  %v23089_v18 = vld [vmem:[#allocation37_spill] sm:$0xff]  ;;  %v23090_v16 = vld [vmem:[#allocation62_spill] sm:$0xff]  ;;  %v23091_v9 = vld [vmem:[#allocation36_spill] sm:$0xff] }
 0x50a   : > { %v9532_v41 = vadd.f32 %v9500_v50, %v9276_v30  ;;  %16843 = vmatprep.mubr.msk.bf16.mxu0 %vm587_vm0, %v21021_v54  ;;  %16872 = vmatpush3.bf16.msra.mxu0 %v18179_v55  ;;  %v9563_v63 = vadd.f32 %v9531_v46, %v700_v2  ;;  %v9277_v62 = vmul.f32 %v23089_v18, %v4475_v25  ;;  %v23092_v44 = vld [vmem:[#allocation53_spill] sm:$0xff]  ;;  %v704_v52 = vld [vmem:[%s19056_s28 + $0x90] sm:$0xff]  ;;  %v23097_v25 = vld [vmem:[#allocation84_spill] sm:$0xff] }
 0x50b   : > { %v9530_v3 = vadd.f32 %v9498_v12, %v9274_v28  ;;  %v16813_v15 = vpop.f32.mrb[48].mxu1  ;;  %16873 = vmatprep.subr.bf16.mxu0 %v18180_v11  ;;  %v9561_v55 = vadd.f32 %v9529_v39, %v698_v60  ;;  %v9280_v37 = vmul.f32 %v23091_v9, %v4478_v29  ;;  %v23094_v28 = vld [vmem:[#allocation51_spill] sm:$0xff]  ;;  %v702_v12 = vld [vmem:[%s19056_s28 + $0x80] sm:$0xff]  ;;  %v703_v48 = vld [vmem:[%s19056_s28 + $0x88] sm:$0xff] }
 0x50c   : > { %v9564_v31 = vadd.f32 %v9532_v41, %v701_v43  ;;  %v8721_v47 = vadd.f32 %v16813_v15, %v20906_v24  ;;  %v8608_v27 = vpop.f32.mrb[49].mxu1  ;;  %v23095_v43 = vld [vmem:[#allocation82_spill] sm:$0xff]  ;;  %v23096_v60 = vld [vmem:[#allocation83_spill] sm:$0xff] }
 0x50d   : > { %v9562_v61 = vadd.f32 %v9530_v3, %v699_v26  ;;  %v8719_v51 = vadd.f32 %v20906_v24, %v8608_v27  ;;  %v16814_v58 = vpop.f32.mrb[50].mxu1  ;;  %v4481_v38 = vadd.f32 %v23095_v43, %v20906_v24  ;;  %v4479_v41 = vadd.f32 %v23096_v60, %v20906_v24  ;;  %v707_v43 = vld [vmem:[%s19056_s28 + $0xa8] sm:$0xff] }
 0x50e   : > { %v9596_v19 = vpack.c.bf16 %v9564_v31, %v9563_v63  ;;  %v9503_v21 = vmul.f32 %v23088_v4, %v8721_v47  ;;  %v8722_v59 = vadd.f32 %v16814_v58, %v20906_v24  ;;  %v8611_v56 = vpop.f32.mrb[51].mxu1  ;;  %16874 = vmatpush3.bf16.msra.mxu0 %v18180_v11  ;;  %v23093_v11 = vld [vmem:[#allocation34_spill] sm:$0xff]  ;;  %v4482_v3 = vadd.f32 %v23097_v25, %v20906_v24  ;;  %v23099_v58 = vld [vmem:[#allocation68_spill] sm:$0xff] }
 0x50f   : > { %v9595_v36 = vpack.c.bf16 %v9562_v61, %v9561_v55  ;;  %v9501_v10 = vmul.f32 %v23090_v16, %v8719_v51  ;;  %v8720_v5 = vadd.f32 %v20906_v24, %v8611_v56  ;;  %16907 = vmatprep.subr.bf16.mxu0 %v21031_v14  ;;  %v9278_v46 = vmul.f32 %v23093_v11, %v4476_v13  ;;  %v21058_v39 = vld [vmem:[#allocation2 + $0xc8] sm:$0xff]  ;;  %v23100_v4 = vld [vmem:[#allocation40_spill] sm:$0xff] }
 0x510   : > { %9612 = vst.msk [vmem:[#allocation2 + $0xf8] sm:$0xff] %vm587_vm0, %v9596_v19  ;;  %v9535_v33 = vadd.f32 %v9503_v21, %v9279_v0  ;;  %v9504_v32 = vmul.f32 %v23092_v44, %v8722_v59  ;;  %v21049_v30 = vld [vmem:[#allocation2 + $0xb0] sm:$0xff]  ;;  %v4480_v31 = vadd.f32 %v20704_v23, %v20906_v24  ;;  %v23098_v55 = vld [vmem:[#allocation42_spill] sm:$0xff]  ;;  %v9281_v21 = vmul.f32 %v23100_v4, %v4479_v41 }
 0x511   : > { %9611 = vst.msk [vmem:[#allocation2 + $0xe0] sm:$0xff] %vm587_vm0, %v9595_v36  ;;  %v9533_v50 = vadd.f32 %v9501_v10, %v9277_v62  ;;  %v9502_v2 = vmul.f32 %v23094_v28, %v8720_v5  ;;  %16844 = vmatmul.mubr.msk.bf16.gmra.mrb[40].mxu0 %vm587_vm0, %v21049_v30  ;;  %v9283_v61 = vmul.f32 %v23098_v55, %v4481_v38  ;;  %v23101_v56 = vld [vmem:[#allocation66_spill] sm:$0xff]  ;;  %v23102_v62 = vld [vmem:[#allocation41_spill] sm:$0xff]  ;;  %v709_v11 = vld [vmem:[%s19056_s28 + $0xb8] sm:$0xff] }
 0x512   : > { %v9536_v1 = vadd.f32 %v9504_v32, %v9280_v37  ;;  %16847 = vmatprep.mubr.msk.bf16.mxu0 %vm587_vm0, %v21058_v39  ;;  %v9567_v15 = vadd.f32 %v9535_v33, %v704_v52  ;;  %v9284_v36 = vmul.f32 %v23102_v62, %v4482_v3  ;;  %v23103_v10 = vld [vmem:[#allocation57_spill] sm:$0xff]  ;;  %v23104_v37 = vld [vmem:[#allocation39_spill] sm:$0xff]  ;;  %v708_v44 = vld [vmem:[%s19056_s28 + $0xb0] sm:$0xff]  ;;  %v4483_v38 = vadd.f32 %v20714_v17, %v20906_v24  ;;  %v9259_v62 = vpop.permute.xlu1 %9258 }
 0x513   : > { %v9534_v26 = vadd.f32 %v9502_v2, %v9278_v46  ;;  %v16817_v22 = vpop.f32.mrb[52].mxu1  ;;  %v9565_v47 = vadd.f32 %v9533_v50, %v702_v12  ;;  %v9282_v33 = vmul.f32 %v23104_v37, %v4480_v31  ;;  %v23105_v46 = vld [vmem:[#allocation55_spill] sm:$0xff]  ;;  %v706_v28 = vld [vmem:[%s19056_s28 + $0xa0] sm:$0xff] }
 0x514   : > { %v9568_v40 = vadd.f32 %v9536_v1, %v705_v53  ;;  %v8725_v29 = vadd.f32 %v16817_v22, %v20906_v24  ;;  %v8624_v63 = vpop.f32.mrb[53].mxu1  ;;  %v4485_v53 = vadd.f32 %v20710_v34, %v20906_v24  ;;  %v23106_v34 = vld [vmem:[#allocation85_spill] sm:$0xff] }
 0x515   : > { %v9566_v27 = vadd.f32 %v9534_v26, %v703_v48  ;;  %v8723_v6 = vadd.f32 %v20906_v24, %v8624_v63  ;;  %v16818_v13 = vpop.f32.mrb[54].mxu1  ;;  %v4486_v48 = vadd.f32 %v20717_v49, %v20906_v24  ;;  %v4484_v25 = vadd.f32 %v23106_v34, %v20906_v24  ;;  %v23107_v63 = vld [vmem:[#allocation71_spill] sm:$0xff] }
 0x516   : > { %v9598_v51 = vpack.c.bf16 %v9568_v40, %v9567_v15  ;;  %v9507_v35 = vmul.f32 %v23099_v58, %v8725_v29  ;;  %v8726_v0 = vadd.f32 %v16818_v13, %v20906_v24  ;;  %v8627_v19 = vpop.f32.mrb[55].mxu1  ;;  %v9287_v17 = vmul.f32 %v23107_v63, %v4485_v53  ;;  %v23109_v13 = vld [vmem:[#allocation44_spill] sm:$0xff]  ;;  %v9254_v53 = vpop.permute.xlu0 %9253 }
 0x517   : > { %v9597_v59 = vpack.c.bf16 %v9566_v27, %v9565_v47  ;;  %v9505_v23 = vmul.f32 %v23101_v56, %v8723_v6  ;;  %v8724_v18 = vadd.f32 %v20906_v24, %v8627_v19  ;;  %v21092_v50 = vld [vmem:[#allocation2 + $0xf8] sm:$0xff]  ;;  %v9285_v55 = vmul.f32 %v23109_v13, %v4483_v38 }
 0x518   : > { %9614 = vst.msk [vmem:[#allocation2 + $0x128] sm:$0xff] %vm587_vm0, %v9598_v51  ;;  %v9539_v16 = vadd.f32 %v9507_v35, %v9283_v61  ;;  %v9508_v5 = vmul.f32 %v23103_v10, %v8726_v0  ;;  %v21083_v9 = vld [vmem:[#allocation2 + $0xe0] sm:$0xff]  ;;  %v23108_v47 = vld [vmem:[#allocation72_spill] sm:$0xff]  ;;  %v23111_v0 = vld [vmem:[#allocation63_spill] sm:$0xff] }
 0x519   : > { %9613 = vst.msk [vmem:[#allocation2 + $0x110] sm:$0xff] %vm587_vm0, %v9597_v59  ;;  %v9537_v32 = vadd.f32 %v9505_v23, %v9281_v21  ;;  %v9506_v52 = vmul.f32 %v23105_v46, %v8724_v18  ;;  %16848 = vmatmul.mubr.msk.bf16.gmra.mrb[44].mxu0 %vm587_vm0, %v21083_v9  ;;  %v23110_v51 = vld [vmem:[#allocation70_spill] sm:$0xff]  ;;  %v9288_v19 = vmul.f32 %v23111_v0, %v4486_v48  ;;  %v23112_v21 = vld [vmem:[#allocation65_spill] sm:$0xff]  ;;  %v23113_v23 = vld [vmem:[#allocation59_spill] sm:$0xff] }
 0x51a   : > { %v9540_v2 = vadd.f32 %v9508_v5, %v9284_v36  ;;  %16851 = vmatprep.mubr.msk.bf16.mxu0 %vm587_vm0, %v21092_v50  ;;  %v9571_v60 = vadd.f32 %v9539_v16, %v708_v44  ;;  %v9286_v18 = vmul.f32 %v23113_v23, %v4484_v25  ;;  %v712_v36 = vld [vmem:[%s19056_s28 + $0xd0] sm:$0xff]  ;;  %v713_v10 = vld [vmem:[%s19056_s28 + $0xd8] sm:$0xff]  ;;  %v23114_v5 = vld [vmem:[#allocation61_spill] sm:$0xff]  ;;  %v4489_v46 = vadd.f32 %v20729_v8, %v20906_v24 }
 0x51b   : > { %v9538_v12 = vadd.f32 %v9506_v52, %v9282_v33  ;;  %v16821_v1 = vpop.f32.mrb[56].mxu1  ;;  %v9569_v3 = vadd.f32 %v9537_v32, %v706_v28  ;;  %v710_v44 = vld [vmem:[%s19056_s28 + $0xc0] sm:$0xff]  ;;  %v4487_v52 = vadd.f32 %v20732_v57, %v20906_v24 }
 0x51c   : > { %v9572_v41 = vadd.f32 %v9540_v2, %v709_v11  ;;  %v8729_v26 = vadd.f32 %v16821_v1, %v20906_v24  ;;  %v8640_v22 = vpop.f32.mrb[57].mxu1  ;;  %v711_v11 = vld [vmem:[%s19056_s28 + $0xc8] sm:$0xff] }
 0x51d   : > { %v9570_v15 = vadd.f32 %v9538_v12, %v707_v43  ;;  %v8727_v40 = vadd.f32 %v20906_v24, %v8640_v22  ;;  %v16822_v29 = vpop.f32.mrb[58].mxu1  ;;  %v23115_v43 = vld [vmem:[#allocation86_spill] sm:$0xff]  ;;  %v9478_v22 = vpop.permute.xlu1 %9477 }
 0x51e   : > { %v9600_v31 = vpack.c.bf16 %v9572_v41, %v9571_v60  ;;  %v9511_v27 = vmul.f32 %v23108_v47, %v8729_v26  ;;  %v8730_v49 = vadd.f32 %v16822_v29, %v20906_v24  ;;  %v8643_v6 = vpop.f32.mrb[59].mxu1  ;;  %v4490_v38 = vadd.f32 %v23115_v43, %v20906_v24  ;;  %v23116_v41 = vld [vmem:[#allocation87_spill] sm:$0xff]  ;;  %v9483_v47 = vpop.permute.xlu0 %9482 }
 0x51f   : > { %v9599_v61 = vpack.c.bf16 %v9570_v15, %v9569_v3  ;;  %v9509_v58 = vmul.f32 %v23110_v51, %v8727_v40  ;;  %v8728_v35 = vadd.f32 %v20906_v24, %v8643_v6  ;;  %v21126_v33 = vld [vmem:[#allocation2 + $0x128] sm:$0xff]  ;;  %v4488_v26 = vadd.f32 %v23116_v41, %v20906_v24 }
 0x520   : > { %9616 = vst.msk [vmem:[#allocation2 + $0x158] sm:$0xff] %vm587_vm0, %v9600_v31  ;;  %v9543_v4 = vadd.f32 %v9511_v27, %v9287_v17  ;;  %v9512_v59 = vmul.f32 %v23112_v21, %v8730_v49  ;;  %v21117_v56 = vld [vmem:[#allocation2 + $0x110] sm:$0xff]  ;;  %v9291_v3 = vmul.f32 %v9254_v53, %v4489_v46  ;;  %v23117_v17 = vld [vmem:[#allocation73_spill] sm:$0xff]  ;;  %v23118_v49 = vld [vmem:[#allocation74_spill] sm:$0xff]  ;;  %v9661_v53 = vshll.u32 %v20896_v7, 16 }
 0x521   : > { %9615 = vst.msk [vmem:[#allocation2 + $0x140] sm:$0xff] %vm587_vm0, %v9599_v61  ;;  %v9541_v16 = vadd.f32 %v9509_v58, %v9285_v55  ;;  %v9510_v37 = vmul.f32 %v23114_v5, %v8728_v35  ;;  %16852 = vmatmul.mubr.msk.bf16.gmra.mrb[48].mxu0 %vm587_vm0, %v21117_v56  ;;  %v9289_v31 = vmul.f32 %v23117_v17, %v4487_v52  ;;  %v23119_v35 = vld [vmem:[#allocation67_spill] sm:$0xff]  ;;  %v9682_v41 = vshrl.u32 %v20986_v42, 16 }
 0x522   : > { %v9544_v32 = vadd.f32 %v9512_v59, %v9288_v19  ;;  %16855 = vmatprep.mubr.msk.bf16.mxu0 %vm587_vm0, %v21126_v33  ;;  %v9575_v12 = vadd.f32 %v9543_v4, %v712_v36  ;;  %v9292_v55 = vmul.f32 %v9259_v62, %v4490_v38  ;;  %v9290_v0 = vmul.f32 %v23119_v35, %v4488_v26  ;;  %v716_v19 = vld [vmem:[%s19056_s28 + $0xf0] sm:$0xff]  ;;  %v717_v21 = vld [vmem:[%s19056_s28 + $0xf8] sm:$0xff]  ;;  %v23120_v59 = vld [vmem:[#allocation69_spill] sm:$0xff] }
 0x523   : > { %v9542_v28 = vadd.f32 %v9510_v37, %v9286_v18  ;;  %v16825_v2 = vpop.f32.mrb[60].mxu1  ;;  %v9573_v34 = vadd.f32 %v9541_v16, %v710_v44  ;;  %v714_v18 = vld [vmem:[%s19056_s28 + $0xe0] sm:$0xff]  ;;  %v715_v36 = vld [vmem:[%s19056_s28 + $0xe8] sm:$0xff]  ;;  %v9658_v16 = vshrl.u32 %v20896_v7, 16  ;;  %v9625_v26 = vld [vmem:[#allocation2 + $0x60] sm:$0x80] }
 0x524   : > { %v9576_v1 = vadd.f32 %v9544_v32, %v713_v10  ;;  %v8733_v48 = vadd.f32 %v16825_v2, %v20906_v24  ;;  %v8656_v60 = vpop.f32.mrb[61].mxu1  ;;  %v9621_v44 = vld [vmem:[#allocation2 + $0x30] sm:$0x80] }
 0x525   : > { %v9574_v8 = vadd.f32 %v9542_v28, %v711_v11  ;;  %v8731_v25 = vadd.f32 %v20906_v24, %v8656_v60  ;;  %v16826_v57 = vpop.f32.mrb[62].mxu1  ;;  %v9660_v52 = vrot.slane %v9658_v16, 7  ;;  %v9654_v2 = vshrl.u32 %v9621_v44, 16  ;;  %v9623_v60 = vld [vmem:[#allocation2 + $0x48] sm:$0x80] }
 0x526   : > { %v9602_v15 = vpack.c.bf16 %v9576_v1, %v9575_v12  ;;  %v9515_v40 = vmul.f32 %v9478_v22, %v8733_v48  ;;  %v8734_v29 = vadd.f32 %v16826_v57, %v20906_v24  ;;  %v8659_v63 = vpop.f32.mrb[63].mxu1  ;;  %v9670_v1 = vshrl.u32 %v20977_v20, 16  ;;  %v21185_v57 = vld [vmem:[#allocation2 + $0x68] sm:$0xff] }
 0x527   : > { %v9601_v27 = vpack.c.bf16 %v9574_v8, %v9573_v34  ;;  %v9513_v6 = vmul.f32 %v23118_v49, %v8731_v25  ;;  %v8732_v13 = vadd.f32 %v20906_v24, %v8659_v63  ;;  %v21156_v24 = vld [vmem:[#allocation2 + $0x158] sm:$0xff]  ;;  %v9663_v12 = vor.u32 %v9661_v53, %v9660_v52  ;;  %v21183_v25 = vld [vmem:[#allocation2 + $0x50] sm:$0xff] }
 0x528   : > { %9618 = vst.msk [vmem:[#allocation2 + $0x188] sm:$0xff] %vm587_vm0, %v9602_v15  ;;  %v9547_v61 = vadd.f32 %v9515_v40, %v9291_v3  ;;  %v9516_v51 = vmul.f32 %v9483_v47, %v8734_v29  ;;  %v21147_v58 = vld [vmem:[#allocation2 + $0x140] sm:$0xff]  ;;  %v9656_v48 = vrot.slane %v9654_v2, 7  ;;  %v9672_v22 = vrot.slane %v9670_v1, 7  ;;  %v21194_v63 = vld [vmem:[#allocation2 + $0x98] sm:$0xff] }
 0x529   : > { %9617 = vst.msk [vmem:[#allocation2 + $0x170] sm:$0xff] %vm587_vm0, %v9601_v27  ;;  %v9545_v4 = vadd.f32 %v9513_v6, %v9289_v31  ;;  %v9514_v23 = vmul.f32 %v23120_v59, %v8732_v13  ;;  %16856 = vmatmul.mubr.msk.bf16.gmra.mrb[52].mxu0 %vm587_vm0, %v21147_v58  ;;  %v9666_v8 = vshrl.u32 %v9623_v60, 16  ;;  %v9673_v15 = vshll.u32 %v20977_v20, 16  ;;  %v9627_v13 = vld [vmem:[#allocation2 + $0x78] sm:$0x80]  ;;  %v18183_v2 = vld [vmem:[#allocation12 + $0x50] sm:$0xff]  }
 0x52a   : > { %v9548_v62 = vadd.f32 %v9516_v51, %v9292_v55  ;;  %16859 = vmatprep.mubr.msk.bf16.mxu0 %vm587_vm0, %v21156_v24  ;;  %v9579_v5 = vadd.f32 %v9547_v61, %v716_v19  ;;  %v9664_v34 = vsel %vm785_vm2, %v9656_v48, %v9663_v12  ;;  %v9684_v40 = vrot.slane %v9682_v41, 7 }
 0x52b   : > { %v9546_v10 = vadd.f32 %v9514_v23, %v9290_v0  ;;  %v9577_v32 = vadd.f32 %v9545_v4, %v714_v18  ;;  %v9678_v29 = vshrl.u32 %v9625_v26, 16  ;;  %v22930_v17 = vshll.u32 %v21183_v25, 16  ;;  %v9629_v0 = vld [vmem:[#allocation2 + $0x90] sm:$0x80] }
 0x52c   : > { %v9580_v37 = vadd.f32 %v9548_v62, %v717_v21  ;;  %v22928_v31 = vshll.u32 %v21185_v57, 16  ;;  %v9675_v47 = vor.u32 %v9673_v15, %v9672_v22  ;;  %v9685_v27 = vshll.u32 %v20986_v42, 16  ;;  %v18182_v62 = vld [vmem:[#allocation12 + $0x48] sm:$0xff]   ;;  %v18187_v42 = vld [vmem:[#allocation12 + $0x70] sm:$0xff]  }
 0x52d   : > { %v9578_v11 = vadd.f32 %v9546_v10, %v715_v36  ;;  %v9668_v49 = vrot.slane %v9666_v8, 7  ;;  %v9694_v6 = vshrl.u32 %v21012_v45, 16  ;;  %v22926_v55 = vshll.u32 %v21194_v63, 16  ;;  %v9631_v8 = vld [vmem:[#allocation2 + $0xa8] sm:$0x80] }
 0x52e   : > { %v9604_v46 = vpack.c.bf16 %v9580_v37, %v9579_v5  ;;  %v9687_v61 = vor.u32 %v9685_v27, %v9684_v40  ;;  %v9706_v51 = vshrl.u32 %v21021_v54, 16  ;;  %v9680_v35 = vrot.slane %v9678_v29, 7  ;;  %v9633_v40 = vld [vmem:[#allocation2 + $0xc0] sm:$0x80]  ;;  %v18184_v29 = vld [vmem:[#allocation12 + $0x58] sm:$0xff]  }
 0x52f   : > { %v9603_v28 = vpack.c.bf16 %v9578_v11, %v9577_v32  ;;  %v21172_v38 = vld [vmem:[#allocation2 + $0x188] sm:$0xff]  ;;  %v22931_v19 = vshrl.u32 %v21183_v25, 16  ;;  %v22929_v4 = vshrl.u32 %v21185_v57, 16  ;;  %v11603_v21 = vrot.slane %v22930_v17, 1 }
 0x530   : > { %9620 = vst.msk [vmem:[#allocation2 + $0x1b8] sm:$0xff] %vm587_vm0, %v9604_v46  ;;  %v21167_v43 = vld [vmem:[#allocation2 + $0x170] sm:$0xff]  ;;  %v11615_v59 = vrot.slane %v22928_v31, 1  ;;  %v9676_v23 = vsel %vm785_vm2, %v9668_v49, %v9675_v47  ;;  %v9690_v18 = vshrl.u32 %v9627_v13, 16  ;;  %v9696_v36 = vrot.slane %v9694_v6, 7 }
 0x531   : > { %9619 = vst.msk [vmem:[#allocation2 + $0x1a0] sm:$0xff] %vm587_vm0, %v9603_v28  ;;  %16860 = vmatmul.mubr.msk.bf16.gmra.mrb[56].mxu0 %vm587_vm0, %v21167_v43  ;;  %v21218_v10 = vor.u32 %v11603_v21, %v22931_v19  ;;  %v11639_v37 = vrot.slane %v22926_v55, 1  ;;  %v9708_v44 = vrot.slane %v9706_v51, 7  ;;  %v9688_v32 = vsel %vm785_vm2, %v9680_v35, %v9687_v61  ;;  %v9641_v55 = vld [vmem:[#allocation2 + $0x120] sm:$0x80] }
 0x532   : > { %16863 = vmatprep.mubr.msk.bf16.mxu0 %vm587_vm0, %v21172_v38  ;;  %v21222_v5 = vor.u32 %v11615_v59, %v22929_v4  ;;  %v9702_v11 = vshrl.u32 %v9629_v0, 16  ;;  %v22927_v46 = vshrl.u32 %v21194_v63, 16  ;;  %v9697_v52 = vshll.u32 %v21012_v45, 16  ;;  %v9643_v19 = vld [vmem:[#allocation2 + $0x138] sm:$0x80] }
 0x533   : > { %v9709_v28 = vshll.u32 %v21021_v54, 16  ;;  %v9718_v60 = vshrl.u32 %v21049_v30, 16  ;;  %v9692_v26 = vrot.slane %v9690_v18, 7  ;;  %v9714_v61 = vshrl.u32 %v9631_v8, 16 }
 0x534   : > { %v21237_v12 = vor.u32 %v11639_v37, %v22927_v46  ;;  %v21241_v48 = vor.u32 %v9697_v52, %v9696_v36  ;;  %v9726_v21 = vshrl.u32 %v9633_v40, 16  ;;  %v9721_v59 = vshll.u32 %v21049_v30, 16 }
 0x535   : > { %v9711_v22 = vor.u32 %v9709_v28, %v9708_v44  ;;  %v9720_v49 = vrot.slane %v9718_v60, 7  ;;  %v9733_v18 = vshll.u32 %v21058_v39, 16  ;;  %v22939_v37 = vshrl.u32 %v21083_v9, 16 }
 0x536   : > { %v9700_v13 = vsel %vm785_vm2, %v9692_v26, %v21241_v48  ;;  %v9716_v44 = vrot.slane %v9714_v61, 7  ;;  %v9635_v26 = vld [vmem:[#allocation2 + $0xd8] sm:$0x80]  ;;  %v22935_v4 = vshll.u32 %v21126_v33, 16  ;;  %v10373_v7 = vrot.slane %v9685_v27, 1 }
 0x537   : > { %v21247_v47 = vld [vmem:[#allocation2 + $0x1b8] sm:$0xff]  ;;  %v21265_v36 = vor.u32 %v9721_v59, %v9720_v49  ;;  %v9744_v40 = vrot.slane %v22939_v37, 7  ;;  %v10397_v20 = vrot.slane %v9709_v28, 1  ;;  %v18188_v28 = vld [vmem:[#allocation12 + $0x78] sm:$0xff]   ;;  %v10421_v54 = vrot.slane %v9733_v18, 1 }
 0x538   : > { %v21187_v3 = vld [vmem:[#allocation2 + $0x1a0] sm:$0xff] }
 0x539   : > { %16864 = vmatmul.mubr.msk.bf16.gmra.mrb[60].mxu0 %vm587_vm0, %v21187_v3  ;;  %v9724_v49 = vsel %vm785_vm2, %v9716_v44, %v21265_v36  ;;  %v22944_v44 = vshll.u32 %v21092_v50, 16 }
 0x53a   : > { %16875 = vmatprep.mubr.msk.bf16.mxu0 %vm587_vm0, %v9664_v34  ;;  %v9704_v34 = vrot.slane %v9702_v11, 7  ;;  %v22938_v11 = vshrl.u32 %v21092_v50, 16 }
 0x53c   : > { %v9712_v0 = vsel %vm785_vm2, %v9704_v34, %v9711_v22  ;;  %v9637_v22 = vld [vmem:[#allocation2 + $0xf0] sm:$0x80]  ;;  %v22925_v34 = vshrl.u32 %v21247_v47, 16 }
 0x541   : > { %16876 = vmatmul.mubr.msk.bf16.vlgmr.msra.gmra.mrb[32].mxu0 %vm587_vm0, %v9676_v23  ;;  %v22924_v23 = vshll.u32 %v21247_v47, 16 }
 0x542   : > { %16879 = vmatprep.mubr.msk.bf16.mxu0 %vm587_vm0, %v9688_v32  ;;  %16908 = vmatpush3.bf16.msra.mxu0 %v21031_v14  ;;  %v9730_v14 = vshrl.u32 %v21058_v39, 16 }
 0x543   : > { %16909 = vmatprep.subr.bf16.mxu0 %v18182_v62  ;;  %v11783_v8 = vrot.slane %v22924_v23, 1 }
 0x544   : > { %v9732_v35 = vrot.slane %v9730_v14, 7 }
 0x545   : > { %v21283_v61 = vor.u32 %v11783_v8, %v22925_v34  ;;  %v22933_v8 = vshrl.u32 %v21117_v56, 16  ;;  %v9639_v34 = vld [vmem:[#allocation2 + $0x108] sm:$0x80] }
 0x546   : > { %16910 = vmatpush3.bf16.msra.mxu0 %v18182_v62  ;;  %v21261_v62 = vld [vmem:[#allocation12 + $0x60] sm:$0xff]   ;;  %v21270_v32 = vor.u32 %v9733_v18, %v9732_v35 }
 0x547   : > { %16911 = vmatprep.subr.bf16.mxu0 %v18183_v2 }
 0x549   : > { %16880 = vmatmul.mubr.msk.bf16.gmra.mrb[36].mxu0 %vm587_vm0, %v9700_v13  ;;  %v9738_v13 = vshrl.u32 %v9635_v26, 16 }
 0x54a   : > { %16883 = vmatprep.mubr.msk.bf16.mxu0 %vm587_vm0, %v9712_v0  ;;  %16912 = vmatpush3.bf16.msra.mxu0 %v18183_v2  ;;  %v9728_v2 = vrot.slane %v9726_v21, 7  ;;  %v9750_v0 = vshrl.u32 %v9637_v22, 16  ;;  %v22945_v21 = vshll.u32 %v21083_v9, 16 }
 0x54b   : > { %16913 = vmatprep.subr.bf16.mxu0 %v18184_v29  ;;  %v9740_v23 = vrot.slane %v9738_v13, 7 }
 0x54c   : > { %v9736_v35 = vsel %vm785_vm2, %v9728_v2, %v21270_v32  ;;  %v21295_v26 = vor.u32 %v22945_v21, %v9744_v40  ;;  %v22932_v2 = vshrl.u32 %v21126_v33, 16  ;;  %v9752_v22 = vrot.slane %v9750_v0, 7 }
 0x54d   : > { %v9762_v40 = vshrl.u32 %v9639_v34, 16  ;;  %v22934_v0 = vshll.u32 %v21117_v56, 16 }
 0x54e   : > { %16914 = vmatpush3.bf16.msra.mxu0 %v18184_v29  ;;  %v9756_v29 = vrot.slane %v22938_v11, 7  ;;  %v9748_v46 = vsel %vm785_vm2, %v9740_v23, %v21295_v26  ;;  %v9780_v31 = vrot.slane %v22932_v2, 7  ;;  %v22936_v23 = vshrl.u32 %v21147_v58, 16  ;;  %v9645_v2 = vld [vmem:[#allocation2 + $0x150] sm:$0x80] }
 0x54f   : > { %16947 = vmatprep.subr.bf16.mxu0 %v21261_v62  ;;  %v9764_v34 = vrot.slane %v9762_v40, 7  ;;  %v9798_v40 = vshrl.u32 %v9645_v2, 16  ;;  %v9649_v11 = vld [vmem:[#allocation2 + $0x180] sm:$0x80] }
 0x551   : > { %16884 = vmatmul.mubr.msk.bf16.gmra.mrb[40].mxu0 %vm587_vm0, %v9724_v49  ;;  %v21300_v49 = vor.u32 %v22944_v44, %v9756_v29  ;;  %v9774_v29 = vshrl.u32 %v9641_v55, 16  ;;  %v9800_v2 = vrot.slane %v9798_v40, 7  ;;  %v22946_v40 = vshll.u32 %v21167_v43, 16 }
 0x552   : > { %16887 = vmatprep.mubr.msk.bf16.mxu0 %vm587_vm0, %v9736_v35  ;;  %v9768_v35 = vrot.slane %v22933_v8, 7  ;;  %v10349_v44 = vrot.slane %v9661_v53, 1 }
 0x553   : > { %v9760_v13 = vsel %vm785_vm2, %v9752_v22, %v21300_v49  ;;  %v22937_v22 = vshrl.u32 %v21156_v24, 16  ;;  %v9776_v55 = vrot.slane %v9774_v29, 7  ;;  %v22940_v29 = vshll.u32 %v21147_v58, 16 }
 0x554   : > { %v21317_v17 = vor.u32 %v22934_v0, %v9768_v35  ;;  %v9786_v35 = vshrl.u32 %v9643_v19, 16  ;;  %v22942_v19 = vshrl.u32 %v21167_v43, 16  ;;  %v10350_v53 = vor.u32 %v10349_v44, %v9658_v16 }
 0x555   : > { %v9804_v0 = vrot.slane %v22937_v22, 7  ;;  %v9647_v22 = vld [vmem:[#allocation2 + $0x168] sm:$0x80] }
 0x556   : > { %v9772_v8 = vsel %vm785_vm2, %v9764_v34, %v21317_v17  ;;  %v9788_v34 = vrot.slane %v9786_v35, 7  ;;  %v9822_v35 = vshrl.u32 %v9649_v11, 16  ;;  %v9651_v11 = vld [vmem:[#allocation2 + $0x198] sm:$0x80] }
 0x559   : > { %16888 = vmatmul.mubr.msk.bf16.gmra.mrb[44].mxu0 %vm587_vm0, %v9748_v46  ;;  %v21322_v46 = vor.u32 %v22935_v4, %v9780_v31  ;;  %v22941_v4 = vshll.u32 %v21156_v24, 16 }
 0x55a   : > { %16891 = vmatprep.mubr.msk.bf16.mxu0 %vm587_vm0, %v9760_v13  ;;  %v9792_v13 = vrot.slane %v22936_v23, 7 }
 0x55b   : > { %v9784_v31 = vsel %vm785_vm2, %v9776_v55, %v21322_v46  ;;  %v22943_v55 = vshrl.u32 %v21172_v38, 16 }
 0x55c   : > { %v21339_v23 = vor.u32 %v22940_v29, %v9792_v13  ;;  %v9810_v13 = vshrl.u32 %v9647_v22, 16  ;;  %v22947_v22 = vshrl.u32 %v21187_v3, 16 }
 0x55d   : > { %v9828_v29 = vrot.slane %v22943_v55, 7  ;;  %v10313_v55 = vld [vmem:[#allocation2 + $0x40] sm:$0x1] }
 0x55e   : > { %v9796_v37 = vsel %vm785_vm2, %v9788_v34, %v21339_v23  ;;  %v9812_v34 = vrot.slane %v9810_v13, 7  ;;  %v9840_v21 = vrot.slane %v22947_v22, 7 }
 0x561   : > { %16892 = vmatmul.mubr.msk.bf16.gmra.mrb[48].mxu0 %vm587_vm0, %v9772_v8  ;;  %v21344_v8 = vor.u32 %v22941_v4, %v9804_v0  ;;  %v22948_v4 = vshll.u32 %v21172_v38, 16 }
 0x562   : > { %16895 = vmatprep.mubr.msk.bf16.mxu0 %vm587_vm0, %v9784_v31  ;;  %v9816_v31 = vrot.slane %v22942_v19, 7 }
 0x563   : > { %v9808_v0 = vsel %vm785_vm2, %v9800_v2, %v21344_v8  ;;  %v9824_v2 = vrot.slane %v9822_v35, 7 }
 0x564   : > { %v21361_v19 = vor.u32 %v22946_v40, %v9816_v31  ;;  %v9834_v40 = vshrl.u32 %v9651_v11, 16  ;;  %v10317_v11 = vld [vmem:[#allocation2 + $0x70] sm:$0x1] }
 0x565   : > { %v10376_v16 = vshll.u32 %v10317_v11, 16 }
 0x566   : > { %v9820_v31 = vsel %vm785_vm2, %v9812_v34, %v21361_v19  ;;  %v9836_v22 = vrot.slane %v9834_v40, 7  ;;  %v10315_v34 = vld [vmem:[#allocation2 + $0x58] sm:$0x1]  ;;  %v10374_v40 = vor.u32 %v10373_v7, %v9682_v41 }
 0x569   : > { %16896 = vmatmul.mubr.msk.bf16.gmra.mrb[52].mxu0 %vm587_vm0, %v9796_v37  ;;  %v21366_v37 = vor.u32 %v22948_v4, %v9828_v29  ;;  %v9841_v29 = vshll.u32 %v21187_v3, 16  ;;  %v10361_v4 = vrot.slane %v9673_v15, 1  ;;  %v18186_v15 = vld [vmem:[#allocation12 + $0x68] sm:$0xff]  }
 0x56a   : > { %16899 = vmatprep.mubr.msk.bf16.mxu0 %vm587_vm0, %v9808_v0  ;;  %v10352_v0 = vshll.u32 %v10313_v55, 16 }
 0x56b   : > { %v9832_v13 = vsel %vm785_vm2, %v9824_v2, %v21366_v37  ;;  %v21383_v35 = vor.u32 %v9841_v29, %v9840_v21  ;;  %v10362_v21 = vor.u32 %v10361_v4, %v9670_v1 }
 0x56c   : > { %v10354_v55 = vrot.slane %v10352_v0, 1  ;;  %v10319_v0 = vld [vmem:[#allocation2 + $0x88] sm:$0x1] }
 0x56d   : > { %v9844_v2 = vsel %vm785_vm2, %v9836_v22, %v21383_v35  ;;  %v10378_v22 = vrot.slane %v10376_v16, 1  ;;  %v10388_v27 = vshll.u32 %v10319_v0, 16  ;;  %v10329_v0 = vld [vmem:[#allocation2 + $0x100] sm:$0x1] }
 0x56f   : > { %v10379_v11 = vsel %vm1477_vm1, %v10374_v40, %v10378_v22  ;;  %v10390_v4 = vrot.slane %v10388_v27, 1  ;;  %v10327_v22 = vld [vmem:[#allocation2 + $0xe8] sm:$0x1] }
 0x571   : > { %16900 = vmatmul.mubr.msk.bf16.gmra.mrb[56].mxu0 %vm587_vm0, %v9820_v31  ;;  %v10355_v31 = vsel %vm1477_vm1, %v10350_v53, %v10354_v55  ;;  %v10321_v53 = vld [vmem:[#allocation2 + $0xa0] sm:$0x1] }
 0x572   : > { %16903 = vmatprep.mubr.msk.bf16.mxu0 %vm587_vm0, %v9832_v13  ;;  %v10364_v13 = vshll.u32 %v10315_v34, 16  ;;  %v10385_v34 = vrot.slane %v9697_v52, 1  ;;  %v10400_v1 = vshll.u32 %v10321_v53, 16  ;;  %v10398_v52 = vor.u32 %v10397_v20, %v9706_v51  ;;  %v21419_v51 = vld [vmem:[#allocation12 + $0x80] sm:$0xff]  }
 0x573   : > { %v23121_v53 = vshll.u32 %v21083_v9, 16  ;;  %v23124_v20 = vshrl.u32 %v21092_v50, 16 }
 0x574   : > { %v10366_v44 = vrot.slane %v10364_v13, 1  ;;  %v10386_v41 = vor.u32 %v10385_v34, %v9694_v6  ;;  %v10325_v13 = vld [vmem:[#allocation2 + $0xd0] sm:$0x1]  ;;  %v23123_v34 = vshrl.u32 %v21083_v9, 16  ;;  %v23126_v9 = vshll.u32 %v21126_v33, 16 }
 0x575   : > { %v10424_v6 = vshll.u32 %v10325_v13, 16 }
 0x576   : > { %v10367_v55 = vsel %vm1477_vm1, %v10362_v21, %v10366_v44  ;;  %v10391_v7 = vsel %vm1477_vm1, %v10386_v41, %v10390_v4  ;;  %v10331_v41 = vld [vmem:[#allocation2 + $0x118] sm:$0x1]  ;;  %v10333_v4 = vld [vmem:[#allocation2 + $0x130] sm:$0x1] }
 0x577   : > { %v10426_v40 = vrot.slane %v10424_v6, 1  ;;  %v10460_v13 = vshll.u32 %v10331_v41, 16  ;;  %v23133_v41 = vshll.u32 %v21167_v43, 16 }
 0x579   : > { %16904 = vmatmul.mubr.msk.bf16.gmra.mrb[60].mxu0 %vm587_vm0, %v9844_v2  ;;  %v10323_v2 = vld [vmem:[#allocation2 + $0xb8] sm:$0x1] }
 0x57a   : > { %16915 = vmatprep.mubr.msk.bf16.mxu0 %vm587_vm0, %v10355_v31  ;;  %v10402_v31 = vrot.slane %v10400_v1, 1  ;;  %v10412_v16 = vshll.u32 %v10323_v2, 16 }
 0x57c   : > { %v10403_v45 = vsel %vm1477_vm1, %v10398_v52, %v10402_v31  ;;  %v10414_v44 = vrot.slane %v10412_v16, 1  ;;  %v23125_v31 = vshll.u32 %v21117_v56, 16 }
 0x57e   : > { %v10457_v2 = vrot.slane %v23125_v31, 1 }
 0x581   : > { %16916 = vmatmul.mubr.msk.bf16.vlgmr.msra.gmra.mrb[32].mxu0 %vm587_vm0, %v10367_v55  ;;  %v10436_v55 = vshll.u32 %v10327_v22, 16  ;;  %v23129_v22 = vshll.u32 %v21147_v58, 16 }
 0x582   : > { %16919 = vmatprep.mubr.msk.bf16.mxu0 %vm587_vm0, %v10379_v11  ;;  %16948 = vmatpush3.bf16.msra.mxu0 %v21261_v62  ;;  %v10409_v62 = vrot.slane %v9721_v59, 1  ;;  %v10422_v59 = vor.u32 %v10421_v54, %v9730_v14  ;;  %v10448_v14 = vshll.u32 %v10329_v0, 16  ;;  %v23128_v54 = vshrl.u32 %v21126_v33, 16 }
 0x583   : > { %16949 = vmatprep.subr.bf16.mxu0 %v18186_v15  ;;  %v10438_v11 = vrot.slane %v10436_v55, 1  ;;  %v10481_v0 = vrot.slane %v23129_v22, 1 }
 0x584   : > { %v10410_v21 = vor.u32 %v10409_v62, %v9718_v60  ;;  %v10427_v30 = vsel %vm1477_vm1, %v10422_v59, %v10426_v40  ;;  %v23122_v60 = vshll.u32 %v21092_v50, 16  ;;  %v10472_v62 = vshll.u32 %v10333_v4, 16  ;;  %v10337_v59 = vld [vmem:[#allocation2 + $0x160] sm:$0x1] }
 0x585   : > { %v23127_v50 = vshrl.u32 %v21117_v56, 16  ;;  %v10505_v4 = vrot.slane %v23133_v41, 1 }
 0x586   : > { %16950 = vmatpush3.bf16.msra.mxu0 %v18186_v15  ;;  %v10415_v18 = vsel %vm1477_vm1, %v10410_v21, %v10414_v44  ;;  %v10433_v15 = vrot.slane %v23121_v53, 1  ;;  %v10445_v39 = vrot.slane %v23122_v60, 1  ;;  %v10474_v21 = vrot.slane %v10472_v62, 1  ;;  %v10335_v44 = vld [vmem:[#allocation2 + $0x148] sm:$0x1] }
 0x587   : > { %16951 = vmatprep.subr.bf16.mxu0 %v18187_v42  ;;  %v10458_v16 = vor.u32 %v10457_v2, %v23127_v50  ;;  %v23131_v60 = vshrl.u32 %v21147_v58, 16  ;;  %v23134_v2 = vshll.u32 %v21172_v38, 16  ;;  %v23136_v50 = vshrl.u32 %v21172_v38, 16 }
 0x588   : > { %v10434_v27 = vor.u32 %v10433_v15, %v23123_v34  ;;  %v10446_v1 = vor.u32 %v10445_v39, %v23124_v20  ;;  %v23130_v15 = vshll.u32 %v21156_v24, 16  ;;  %v23132_v34 = vshrl.u32 %v21156_v24, 16  ;;  %v10339_v20 = vld [vmem:[#allocation2 + $0x178] sm:$0x1] }
 0x589   : > { %16920 = vmatmul.mubr.msk.bf16.gmra.mrb[36].mxu0 %vm587_vm0, %v10391_v7  ;;  %v10469_v7 = vrot.slane %v23126_v9, 1  ;;  %v10482_v39 = vor.u32 %v10481_v0, %v23131_v60  ;;  %v23135_v9 = vshrl.u32 %v21167_v43, 16  ;;  %v23137_v0 = vshrl.u32 %v21183_v25, 16 }
 0x58a   : > { %16923 = vmatprep.mubr.msk.bf16.mxu0 %vm587_vm0, %v10403_v45  ;;  %16952 = vmatpush3.bf16.msra.mxu0 %v18187_v42  ;;  %v10450_v42 = vrot.slane %v10448_v14, 1  ;;  %v10439_v52 = vsel %vm1477_vm1, %v10434_v27, %v10438_v11  ;;  %v10462_v45 = vrot.slane %v10460_v13, 1  ;;  %v10493_v55 = vrot.slane %v23130_v15, 1 }
 0x58b   : > { %16953 = vmatprep.subr.bf16.mxu0 %v18188_v28  ;;  %v10470_v6 = vor.u32 %v10469_v7, %v23128_v54  ;;  %v10517_v13 = vrot.slane %v23134_v2, 1  ;;  %v10506_v7 = vor.u32 %v10505_v4, %v23135_v9  ;;  %v10343_v54 = vld [vmem:[#allocation2 + $0x1a8] sm:$0x1]  ;;  %v23139_v60 = vshll.u32 %v21183_v25, 16  ;;  %v10816_v2 = vld [vmem:[#allocation2 + $0x90] sm:$0x80] }
 0x58c   : > { %v10463_v40 = vsel %vm1477_vm1, %v10458_v16, %v10462_v45  ;;  %v10494_v27 = vor.u32 %v10493_v55, %v23132_v34  ;;  %v23141_v4 = vshll.u32 %v21185_v57, 16 }
 0x58d   : > { %v10475_v53 = vsel %vm1477_vm1, %v10470_v6, %v10474_v21  ;;  %v10518_v16 = vor.u32 %v10517_v13, %v23136_v50  ;;  %v10810_v6 = vld [vmem:[#allocation2 + $0x48] sm:$0x80] }
 0x58e   : > { %16954 = vmatpush3.bf16.msra.mxu0 %v18188_v28  ;;  %v10451_v28 = vsel %vm1477_vm1, %v10446_v1, %v10450_v42  ;;  %v10341_v1 = vld [vmem:[#allocation2 + $0x190] sm:$0x1]  ;;  %v10843_v22 = vshrl.u32 %v10810_v6, 16  ;;  %v10818_v13 = vld [vmem:[#allocation2 + $0xa8] sm:$0x80] }
 0x58f   : > { %16987 = vmatprep.subr.bf16.mxu0 %v21419_v51 }
 0x591   : > { %16924 = vmatmul.mubr.msk.bf16.gmra.mrb[40].mxu0 %vm587_vm0, %v10415_v18  ;;  %v10484_v18 = vshll.u32 %v10335_v44, 16  ;;  %v10529_v44 = vrot.slane %v9841_v29, 1  ;;  %v10812_v29 = vld [vmem:[#allocation2 + $0x60] sm:$0x80] }
 0x592   : > { %16927 = vmatprep.mubr.msk.bf16.mxu0 %vm587_vm0, %v10427_v30  ;;  %v10496_v30 = vshll.u32 %v10337_v59, 16  ;;  %v10532_v59 = vshll.u32 %v10343_v54, 16  ;;  %v18191_v54 = vld [vmem:[#allocation12 + $0x90] sm:$0xff]  }
 0x593   : > { %v10486_v14 = vrot.slane %v10484_v18, 1  ;;  %v10849_v18 = vrot.slane %v23137_v0, 7  ;;  %v18192_v0 = vld [vmem:[#allocation12 + $0x98] sm:$0xff]  }
 0x594   : > { %v10498_v11 = vrot.slane %v10496_v30, 1  ;;  %v10534_v55 = vrot.slane %v10532_v59, 1  ;;  %v10845_v30 = vrot.slane %v10843_v22, 7  ;;  %v10822_v22 = vld [vmem:[#allocation2 + $0xd8] sm:$0x80] }
 0x595   : > { %v10487_v42 = vsel %vm1477_vm1, %v10482_v39, %v10486_v14  ;;  %v10852_v39 = vor.u32 %v23139_v60, %v10849_v18  ;;  %v10814_v14 = vld [vmem:[#allocation2 + $0x78] sm:$0x80]  ;;  %v10824_v60 = vld [vmem:[#allocation2 + $0xf0] sm:$0x80] }
 0x596   : > { %v10499_v31 = vsel %vm1477_vm1, %v10494_v27, %v10498_v11  ;;  %v10855_v27 = vshrl.u32 %v10812_v29, 16  ;;  %v23140_v11 = vshrl.u32 %v21185_v57, 16 }
 0x598   : > { %v10857_v41 = vrot.slane %v10855_v27, 7 }
 0x599   : > { %16928 = vmatmul.mubr.msk.bf16.gmra.mrb[44].mxu0 %vm587_vm0, %v10439_v52  ;;  %v10508_v52 = vshll.u32 %v10339_v20, 16  ;;  %v10861_v20 = vrot.slane %v23140_v11, 7 }
 0x59a   : > { %16931 = vmatprep.mubr.msk.bf16.mxu0 %vm587_vm0, %v10451_v28  ;;  %v10520_v28 = vshll.u32 %v10341_v1, 16  ;;  %v10853_v1 = vsel %vm785_vm2, %v10845_v30, %v10852_v39  ;;  %v10826_v39 = vld [vmem:[#allocation2 + $0x108] sm:$0x80] }
 0x59b   : > { %v10510_v62 = vrot.slane %v10508_v52, 1  ;;  %v21494_v52 = vor.u32 %v23141_v4, %v10861_v20  ;;  %v10828_v20 = vld [vmem:[#allocation2 + $0x120] sm:$0x80] }
 0x59c   : > { %v10522_v45 = vrot.slane %v10520_v28, 1  ;;  %v18190_v28 = vld [vmem:[#allocation12 + $0x88] sm:$0xff]  }
 0x59d   : > { %v10511_v21 = vsel %vm1477_vm1, %v10506_v7, %v10510_v62  ;;  %v10865_v9 = vsel %vm785_vm2, %v10857_v41, %v21494_v52  ;;  %v10879_v7 = vshrl.u32 %v10816_v2, 16  ;;  %v23142_v62 = vshrl.u32 %v21194_v63, 16  ;;  %v10832_v2 = vld [vmem:[#allocation2 + $0x150] sm:$0x80] }
 0x59e   : > { %v10951_v41 = vshrl.u32 %v10828_v20, 16 }
 0x59f   : > { %v10885_v50 = vrot.slane %v23142_v62, 7  ;;  %v10881_v6 = vrot.slane %v10879_v7, 7 }
 0x5a1   : > { %16932 = vmatmul.mubr.msk.bf16.gmra.mrb[48].mxu0 %vm587_vm0, %v10463_v40  ;;  %v10523_v40 = vsel %vm1477_vm1, %v10518_v16, %v10522_v45  ;;  %v10891_v45 = vshrl.u32 %v10818_v13, 16  ;;  %v10834_v13 = vld [vmem:[#allocation2 + $0x168] sm:$0x80] }
 0x5a2   : > { %16935 = vmatprep.mubr.msk.bf16.mxu0 %vm587_vm0, %v10475_v53  ;;  %v23138_v53 = vshrl.u32 %v21187_v3, 16  ;;  %v10987_v7 = vshrl.u32 %v10834_v13, 16  ;;  %v21604_v13 = vld [vmem:[#allocation2 + $0xc8] sm:$0xff] }
 0x5a3   : > { %v10893_v59 = vrot.slane %v10891_v45, 7 }
 0x5a4   : > { %v10530_v15 = vor.u32 %v10529_v44, %v23138_v53  ;;  %v10915_v53 = vshrl.u32 %v10822_v22, 16  ;;  %v10989_v62 = vrot.slane %v10987_v7, 7  ;;  %v11661_v7 = vshll.u32 %v21604_v13, 16 }
 0x5a6   : > { %v10535_v34 = vsel %vm1477_vm1, %v10530_v15, %v10534_v55  ;;  %v18193_v15 = vld [vmem:[#allocation12 + $0xa0] sm:$0xff]   ;;  %v10917_v30 = vrot.slane %v10915_v53, 7 }
 0x5a9   : > { %16936 = vmatmul.mubr.msk.bf16.gmra.mrb[52].mxu0 %vm587_vm0, %v10487_v42  ;;  %v10867_v42 = vshrl.u32 %v10814_v14, 16  ;;  %v10927_v14 = vshrl.u32 %v10824_v60, 16  ;;  %v18384_v60 = vld [vmem:[#allocation2 + $0xb0] sm:$0xff] }
 0x5aa   : > { %16939 = vmatprep.mubr.msk.bf16.mxu0 %vm587_vm0, %v10499_v31 }
 0x5ab   : > { %v10869_v31 = vrot.slane %v10867_v42, 7  ;;  %v10929_v27 = vrot.slane %v10927_v14, 7  ;;  %v11569_v14 = vld [vmem:[#allocation2 + $0x70] sm:$0x1] }
 0x5ad   : > { %v10877_v16 = vsel %vm785_vm2, %v10869_v31, %v21241_v48  ;;  %v10937_v42 = vsel %vm785_vm2, %v10929_v27, %v21300_v49 }
 0x5b1   : > { %16940 = vmatmul.mubr.msk.bf16.gmra.mrb[56].mxu0 %vm587_vm0, %v10511_v21  ;;  %v23143_v21 = vshll.u32 %v21194_v63, 16 }
 0x5b2   : > { %16943 = vmatprep.mubr.msk.bf16.mxu0 %vm587_vm0, %v10523_v40  ;;  %v10820_v40 = vld [vmem:[#allocation2 + $0xc0] sm:$0x80] }
 0x5b3   : > { %v21507_v44 = vor.u32 %v23143_v21, %v10885_v50  ;;  %v10903_v18 = vshrl.u32 %v10820_v40, 16  ;;  %v10836_v50 = vld [vmem:[#allocation2 + $0x180] sm:$0x80] }
 0x5b5   : > { %v10889_v48 = vsel %vm785_vm2, %v10881_v6, %v21507_v44  ;;  %v10905_v55 = vrot.slane %v10903_v18, 7  ;;  %v23145_v18 = vshll.u32 %v21247_v47, 16 }
 0x5b7   : > { %v10913_v29 = vsel %vm785_vm2, %v10905_v55, %v21270_v32  ;;  %v18195_v55 = vld [vmem:[#allocation12 + $0xb0] sm:$0xff]  }
 0x5b9   : > { %16944 = vmatmul.mubr.msk.bf16.gmra.mrb[60].mxu0 %vm587_vm0, %v10535_v34  ;;  %v10939_v34 = vshrl.u32 %v10826_v39, 16  ;;  %v18387_v39 = vld [vmem:[#allocation2 + $0xf8] sm:$0xff] }
 0x5ba   : > { %16955 = vmatprep.mubr.msk.bf16.mxu0 %vm587_vm0, %v10853_v1  ;;  %v10830_v1 = vld [vmem:[#allocation2 + $0x138] sm:$0x80] }
 0x5bb   : > { %v10941_v11 = vrot.slane %v10939_v34, 7  ;;  %v10963_v4 = vshrl.u32 %v10830_v1, 16  ;;  %v11618_v34 = vshll.u32 %v11569_v14, 16 }
 0x5bd   : > { %v10949_v32 = vsel %vm785_vm2, %v10941_v11, %v21317_v17  ;;  %v10965_v31 = vrot.slane %v10963_v4, 7  ;;  %v11620_v11 = vrot.slane %v11618_v34, 1 }
 0x5bf   : > { %v10973_v49 = vsel %vm785_vm2, %v10965_v31, %v21339_v23 }
 0x5c1   : > { %16956 = vmatmul.mubr.msk.bf16.vlgmr.msra.gmra.mrb[32].mxu0 %vm587_vm0, %v10865_v9  ;;  %v10975_v9 = vshrl.u32 %v10832_v2, 16 }
 0x5c2   : > { %16959 = vmatprep.mubr.msk.bf16.mxu0 %vm587_vm0, %v10877_v16  ;;  %16988 = vmatpush3.bf16.msra.mxu0 %v21419_v51  ;;  %v10901_v51 = vsel %vm785_vm2, %v10893_v59, %v21265_v36  ;;  %v10925_v36 = vsel %vm785_vm2, %v10917_v30, %v21295_v26  ;;  %v10953_v26 = vrot.slane %v10951_v41, 7  ;;  %v10838_v16 = vld [vmem:[#allocation2 + $0x198] sm:$0x80]  ;;  %v10840_v59 = vld [vmem:[#allocation2 + $0x1b0] sm:$0x80]  ;;  %v18196_v30 = vld [vmem:[#allocation12 + $0xb8] sm:$0xff]  }
 0x5c3   : > { %16989 = vmatprep.subr.bf16.mxu0 %v18190_v28  ;;  %v10977_v17 = vrot.slane %v10975_v9, 7  ;;  %v11011_v6 = vshrl.u32 %v10838_v16, 16  ;;  %v11023_v22 = vshrl.u32 %v10840_v59, 16  ;;  %v18198_v41 = vld [vmem:[#allocation12 + $0xc8] sm:$0xff]  }
 0x5c5   : > { %v10985_v45 = vsel %vm785_vm2, %v10977_v17, %v21344_v8  ;;  %v11013_v21 = vrot.slane %v11011_v6, 7  ;;  %v11663_v6 = vrot.slane %v11661_v7, 1 }
 0x5c6   : > { %16990 = vmatpush3.bf16.msra.mxu0 %v18190_v28  ;;  %v10961_v28 = vsel %vm785_vm2, %v10953_v26, %v21322_v46  ;;  %v10997_v46 = vsel %vm785_vm2, %v10989_v62, %v21361_v19  ;;  %v11025_v19 = vrot.slane %v11023_v22, 7  ;;  %v21625_v22 = vld [vmem:[#allocation2 + $0xf8] sm:$0xff] }
 0x5c7   : > { %16991 = vmatprep.subr.bf16.mxu0 %v18191_v54  ;;  %v11021_v8 = vsel %vm785_vm2, %v11013_v21, %v21383_v35  ;;  %v18383_v35 = vld [vmem:[#allocation2 + $0x80] sm:$0xff]  ;;  %v11683_v14 = vshrl.u32 %v21625_v22, 16 }
 0x5c9   : > { %16960 = vmatmul.mubr.msk.bf16.gmra.mrb[36].mxu0 %vm587_vm0, %v10889_v48 }
 0x5ca   : > { %16963 = vmatprep.mubr.msk.bf16.mxu0 %vm587_vm0, %v10901_v51  ;;  %16992 = vmatpush3.bf16.msra.mxu0 %v18191_v54  ;;  %v10999_v54 = vshrl.u32 %v10836_v50, 16  ;;  %v11577_v50 = vld [vmem:[#allocation2 + $0xd0] sm:$0x1] }
 0x5cb   : > { %16993 = vmatprep.subr.bf16.mxu0 %v18192_v0 }
 0x5cc   : > { %v11001_v23 = vrot.slane %v10999_v54, 7  ;;  %v18200_v54 = vld [vmem:[#allocation12 + $0xd8] sm:$0xff]  }
 0x5ce   : > { %16994 = vmatpush3.bf16.msra.mxu0 %v18192_v0  ;;  %v11009_v40 = vsel %vm785_vm2, %v11001_v23, %v21366_v37  ;;  %v23144_v0 = vshrl.u32 %v21247_v47, 16  ;;  %v18194_v37 = vld [vmem:[#allocation12 + $0xa8] sm:$0xff]   ;;  %v11666_v23 = vshll.u32 %v11577_v50, 16  ;;  %v21684_v50 = vld [vmem:[#allocation2 + $0x170] sm:$0xff] }
 0x5cf   : > { %17027 = vmatprep.subr.bf16.mxu0 %v18193_v15 }
 0x5d0   : > { %v11029_v48 = vrot.slane %v23144_v0, 7  ;;  %v11659_v0 = vshrl.u32 %v21604_v13, 16 }
 0x5d1   : > { %16964 = vmatmul.mubr.msk.bf16.gmra.mrb[40].mxu0 %vm587_vm0, %v10913_v29 }
 0x5d2   : > { %16967 = vmatprep.mubr.msk.bf16.mxu0 %vm587_vm0, %v10925_v36  ;;  %v21549_v51 = vor.u32 %v23145_v18, %v11029_v48  ;;  %v11571_v36 = vld [vmem:[#allocation2 + $0x88] sm:$0x1]  ;;  %v11668_v18 = vrot.slane %v11666_v23, 1 }
 0x5d4   : > { %v11033_v53 = vsel %vm785_vm2, %v11025_v19, %v21549_v51  ;;  %v21636_v19 = vor.u32 %v11663_v6, %v11659_v0 }
 0x5d9   : > { %16968 = vmatmul.mubr.msk.bf16.gmra.mrb[44].mxu0 %vm587_vm0, %v10937_v42 }
 0x5da   : > { %16971 = vmatprep.mubr.msk.bf16.mxu0 %vm587_vm0, %v10949_v32  ;;  %v11621_v32 = vsel %vm1477_vm1, %v21222_v5, %v11620_v11  ;;  %v18199_v5 = vld [vmem:[#allocation12 + $0xd0] sm:$0xff]  }
 0x5e1   : > { %16972 = vmatmul.mubr.msk.bf16.gmra.mrb[48].mxu0 %vm587_vm0, %v10961_v28  ;;  %v21607_v28 = vld [vmem:[#allocation2 + $0xe0] sm:$0xff] }
 0x5e2   : > { %16975 = vmatprep.mubr.msk.bf16.mxu0 %vm587_vm0, %v10973_v49  ;;  %v11673_v16 = vshll.u32 %v21607_v28, 16  ;;  %v11671_v48 = vshrl.u32 %v21607_v28, 16 }
 0x5e4   : > { %v11675_v59 = vrot.slane %v11673_v16, 1 }
 0x5e9   : > { %16976 = vmatmul.mubr.msk.bf16.gmra.mrb[52].mxu0 %vm587_vm0, %v10985_v45  ;;  %v11579_v45 = vld [vmem:[#allocation2 + $0xe8] sm:$0x1] }
 0x5ea   : > { %16979 = vmatprep.mubr.msk.bf16.mxu0 %vm587_vm0, %v10997_v46 }
 0x5f1   : > { %16980 = vmatmul.mubr.msk.bf16.gmra.mrb[56].mxu0 %vm587_vm0, %v11009_v40  ;;  %v11678_v40 = vshll.u32 %v11579_v45, 16 }
 0x5f2   : > { %16983 = vmatprep.mubr.msk.bf16.mxu0 %vm587_vm0, %v11021_v8  ;;  %v21632_v8 = vld [vmem:[#allocation12 + $0xe0] sm:$0xff]  }
 0x5f9   : > { %16984 = vmatmul.mubr.msk.bf16.gmra.mrb[60].mxu0 %vm587_vm0, %v11033_v53  ;;  %v11685_v53 = vshll.u32 %v21625_v22, 16 }
 0x5fa   : > { %16995 = vmatprep.mubr.msk.bf16.mxu0 %vm587_vm0, %v21183_v25  ;;  %v18197_v25 = vld [vmem:[#allocation12 + $0xc0] sm:$0xff]  }
 0x601   : > { %16996 = vmatmul.mubr.msk.bf16.vlgmr.msra.gmra.mrb[32].mxu0 %vm587_vm0, %v21185_v57  ;;  %v18385_v57 = vld [vmem:[#allocation2 + $0xc8] sm:$0xff] }
 0x602   : > { %16999 = vmatprep.mubr.msk.bf16.mxu0 %vm587_vm0, %v18383_v35  ;;  %17028 = vmatpush3.bf16.msra.mxu0 %v18193_v15  ;;  %v18386_v15 = vld [vmem:[#allocation2 + $0xe0] sm:$0xff]  ;;  %v11680_v35 = vrot.slane %v11678_v40, 1  ;;  %v11745_v40 = vshll.u32 %v21684_v50, 16 }
 0x603   : > { %17029 = vmatprep.subr.bf16.mxu0 %v18194_v37 }
 0x606   : > { %17030 = vmatpush3.bf16.msra.mxu0 %v18194_v37  ;;  %v21641_v37 = vor.u32 %v11675_v59, %v11671_v48  ;;  %v11589_v59 = vld [vmem:[#allocation2 + $0x160] sm:$0x1] }
 0x607   : > { %17031 = vmatprep.subr.bf16.mxu0 %v18195_v55 }
 0x609   : > { %17000 = vmatmul.mubr.msk.bf16.gmra.mrb[36].mxu0 %vm587_vm0, %v21194_v63  ;;  %v11567_v63 = vld [vmem:[#allocation2 + $0x58] sm:$0x1] }
 0x60a   : > { %17003 = vmatprep.mubr.msk.bf16.mxu0 %vm587_vm0, %v18384_v60  ;;  %17032 = vmatpush3.bf16.msra.mxu0 %v18195_v55  ;;  %v11606_v29 = vshll.u32 %v11567_v63, 16  ;;  %v11581_v55 = vld [vmem:[#allocation2 + $0x100] sm:$0x1]  ;;  %v11583_v60 = vld [vmem:[#allocation2 + $0x118] sm:$0x1] }
 0x60b   : > { %17033 = vmatprep.subr.bf16.mxu0 %v18196_v30 }
 0x60e   : > { %17034 = vmatpush3.bf16.msra.mxu0 %v18196_v30 }
 0x60f   : > { %17067 = vmatprep.subr.bf16.mxu0 %v18197_v25 }
 0x611   : > { %17004 = vmatmul.mubr.msk.bf16.gmra.mrb[40].mxu0 %vm587_vm0, %v18385_v57  ;;  %v11687_v57 = vrot.slane %v11685_v53, 1 }
 0x612   : > { %17007 = vmatprep.mubr.msk.bf16.mxu0 %vm587_vm0, %v18386_v15  ;;  %v11690_v15 = vshll.u32 %v11581_v55, 16 }
 0x619   : > { %17008 = vmatmul.mubr.msk.bf16.gmra.mrb[44].mxu0 %vm587_vm0, %v18387_v39  ;;  %v11681_v39 = vsel %vm1477_vm1, %v21641_v37, %v11680_v35 }
 0x61a   : > { %17011 = vmatprep.mubr.msk.bf16.mxu0 %vm587_vm0, %v21117_v56  ;;  %v21579_v56 = vld [vmem:[#allocation2 + $0x80] sm:$0xff] }
 0x61b   : > { %v11623_v27 = vshrl.u32 %v21579_v56, 16 }
 0x621   : > { %17012 = vmatmul.mubr.msk.bf16.gmra.mrb[48].mxu0 %vm587_vm0, %v21126_v33  ;;  %v11608_v33 = vrot.slane %v11606_v29, 1  ;;  %v11702_v29 = vshll.u32 %v11583_v60, 16  ;;  %v11738_v60 = vshll.u32 %v11589_v59, 16 }
 0x622   : > { %17015 = vmatprep.mubr.msk.bf16.mxu0 %vm587_vm0, %v21147_v58  ;;  %v11625_v58 = vshll.u32 %v21579_v56, 16 }
 0x629   : > { %17016 = vmatmul.mubr.msk.bf16.gmra.mrb[52].mxu0 %vm587_vm0, %v21156_v24  ;;  %v11609_v24 = vsel %vm1477_vm1, %v21218_v10, %v11608_v33  ;;  %v11575_v10 = vld [vmem:[#allocation2 + $0xb8] sm:$0x1]  ;;  %v21654_v33 = vld [vmem:[#allocation2 + $0x128] sm:$0xff] }
 0x62a   : > { %17019 = vmatprep.mubr.msk.bf16.mxu0 %vm587_vm0, %v21167_v43  ;;  %v11627_v43 = vrot.slane %v11625_v58, 1  ;;  %v11654_v2 = vshll.u32 %v11575_v10, 16 }
 0x62c   : > { %v21594_v20 = vor.u32 %v11627_v43, %v11623_v27  ;;  %v11656_v62 = vrot.slane %v11654_v2, 1  ;;  %v11692_v43 = vrot.slane %v11690_v15, 1 }
 0x631   : > { %17020 = vmatmul.mubr.msk.bf16.gmra.mrb[56].mxu0 %vm587_vm0, %v21172_v38  ;;  %v11630_v38 = vshll.u32 %v11571_v36, 16  ;;  %v21658_v36 = vld [vmem:[#allocation2 + $0x140] sm:$0xff] }
 0x632   : > { %17023 = vmatprep.mubr.msk.bf16.mxu0 %vm587_vm0, %v21187_v3  ;;  %v21589_v3 = vld [vmem:[#allocation2 + $0xb0] sm:$0xff]  ;;  %v11721_v10 = vshll.u32 %v21658_v36, 16  ;;  %v11719_v45 = vshrl.u32 %v21658_v36, 16 }
 0x633   : > { %v11632_v1 = vrot.slane %v11630_v38, 1  ;;  %v11649_v42 = vshll.u32 %v21589_v3, 16  ;;  %v11647_v9 = vshrl.u32 %v21589_v3, 16  ;;  %v11709_v38 = vshll.u32 %v21654_v33, 16 }
 0x634   : > { %v11723_v2 = vrot.slane %v11721_v10, 1 }
 0x635   : > { %v11633_v26 = vsel %vm1477_vm1, %v21594_v20, %v11632_v1  ;;  %v11651_v31 = vrot.slane %v11649_v42, 1  ;;  %v11704_v1 = vrot.slane %v11702_v29, 1  ;;  %v21710_v29 = vld [vmem:[#allocation2 + $0x1a0] sm:$0xff] }
 0x636   : > { %v21694_v23 = vor.u32 %v11723_v2, %v11719_v45  ;;  %v11595_v2 = vld [vmem:[#allocation2 + $0x1a8] sm:$0x1] }
 0x637   : > { %v21613_v17 = vor.u32 %v11651_v31, %v11647_v9 }
 0x639   : > { %17024 = vmatmul.mubr.msk.bf16.gmra.mrb[60].mxu0 %vm587_vm0, %v21247_v47  ;;  %v11573_v47 = vld [vmem:[#allocation2 + $0xa0] sm:$0x1]  ;;  %v11657_v21 = vsel %vm1477_vm1, %v21613_v17, %v11656_v62  ;;  %v11707_v62 = vshrl.u32 %v21654_v33, 16 }
 0x63a   : > { %17035 = vmatprep.mubr.msk.bf16.mxu0 %vm587_vm0, %v11609_v24  ;;  %v11642_v4 = vshll.u32 %v11573_v47, 16  ;;  %v21663_v24 = vor.u32 %v11687_v57, %v11683_v14  ;;  %v11585_v47 = vld [vmem:[#allocation2 + $0x130] sm:$0x1]  ;;  %v11747_v57 = vrot.slane %v11745_v40, 1 }
 0x63c   : > { %v11644_v49 = vrot.slane %v11642_v4, 1  ;;  %v11711_v4 = vrot.slane %v11709_v38, 1 }
 0x63e   : > { %v11645_v46 = vsel %vm1477_vm1, %v21237_v12, %v11644_v49  ;;  %v21629_v12 = vld [vmem:[#allocation2 + $0x110] sm:$0xff]  ;;  %v21680_v49 = vld [vmem:[#allocation2 + $0x158] sm:$0xff] }
 0x63f   : > { %v11697_v30 = vshll.u32 %v21629_v12, 16  ;;  %v11695_v34 = vshrl.u32 %v21629_v12, 16  ;;  %v11733_v6 = vshll.u32 %v21680_v49, 16 }
 0x641   : > { %17036 = vmatmul.mubr.msk.bf16.vlgmr.msra.gmra.mrb[32].mxu0 %vm587_vm0, %v11621_v32  ;;  %v11699_v63 = vrot.slane %v11697_v30, 1  ;;  %v11693_v32 = vsel %vm1477_vm1, %v21663_v24, %v11692_v43  ;;  %v11735_v55 = vrot.slane %v11733_v6, 1  ;;  %v11743_v43 = vshrl.u32 %v21684_v50, 16 }
 0x642   : > { %17039 = vmatprep.mubr.msk.bf16.mxu0 %vm587_vm0, %v11633_v26  ;;  %17068 = vmatpush3.bf16.msra.mxu0 %v18197_v25  ;;  %v11669_v25 = vsel %vm1477_vm1, %v21636_v19, %v11668_v18  ;;  %v11714_v26 = vshll.u32 %v11585_v47, 16  ;;  %v11591_v18 = vld [vmem:[#allocation2 + $0x178] sm:$0x1]  ;;  %v11740_v47 = vrot.slane %v11738_v60, 1  ;;  %v22951_v60 = vshrl.u32 %v21710_v29, 16 }
 0x643   : > { %17069 = vmatprep.subr.bf16.mxu0 %v18198_v41  ;;  %v21668_v11 = vor.u32 %v11699_v63, %v11695_v34  ;;  %v11750_v15 = vshll.u32 %v11591_v18, 16  ;;  %v11731_v63 = vshrl.u32 %v21680_v49, 16 }
 0x645   : > { %v11705_v31 = vsel %vm1477_vm1, %v21668_v11, %v11704_v1  ;;  %v21715_v1 = vor.u32 %v11735_v55, %v11731_v63 }
 0x646   : > { %17070 = vmatpush3.bf16.msra.mxu0 %v18198_v41  ;;  %v11587_v41 = vld [vmem:[#allocation2 + $0x148] sm:$0x1] }
 0x647   : > { %17071 = vmatprep.subr.bf16.mxu0 %v18199_v5 }
 0x649   : > { %17040 = vmatmul.mubr.msk.bf16.gmra.mrb[36].mxu0 %vm587_vm0, %v11645_v46  ;;  %v11716_v46 = vrot.slane %v11714_v26, 1  ;;  %v11593_v26 = vld [vmem:[#allocation2 + $0x190] sm:$0x1] }
 0x64a   : > { %17043 = vmatprep.mubr.msk.bf16.mxu0 %vm587_vm0, %v11657_v21  ;;  %17072 = vmatpush3.bf16.msra.mxu0 %v18199_v5  ;;  %v11726_v5 = vshll.u32 %v11587_v41, 16 }
 0x64b   : > { %17073 = vmatprep.subr.bf16.mxu0 %v18200_v54 }
 0x64c   : > { %v11728_v21 = vrot.slane %v11726_v5, 1  ;;  %v11741_v5 = vsel %vm1477_vm1, %v21715_v1, %v11740_v47 }
 0x64e   : > { %17074 = vmatpush3.bf16.msra.mxu0 %v18200_v54  ;;  %v21689_v54 = vor.u32 %v11711_v4, %v11707_v62  ;;  %v11752_v4 = vrot.slane %v11750_v15, 1 }
 0x64f   : > { %17107 = vmatprep.subr.bf16.mxu0 %v21632_v8 }
 0x650   : > { %v11717_v35 = vsel %vm1477_vm1, %v21689_v54, %v11716_v46 }
 0x651   : > { %17044 = vmatmul.mubr.msk.bf16.gmra.mrb[40].mxu0 %vm587_vm0, %v11669_v25  ;;  %v11729_v25 = vsel %vm1477_vm1, %v21694_v23, %v11728_v21  ;;  %v11762_v21 = vshll.u32 %v11593_v26, 16  ;;  %v12064_v26 = vld [vmem:[#allocation2 + $0x60] sm:$0x80] }
 0x652   : > { %17047 = vmatprep.mubr.msk.bf16.mxu0 %vm587_vm0, %v11681_v39  ;;  %v21706_v39 = vld [vmem:[#allocation2 + $0x188] sm:$0xff] }
 0x653   : > { %v22950_v41 = vshll.u32 %v21706_v39, 16  ;;  %v11755_v55 = vshrl.u32 %v21706_v39, 16 }
 0x655   : > { %v11759_v46 = vrot.slane %v22950_v41, 1  ;;  %v12066_v41 = vld [vmem:[#allocation2 + $0x78] sm:$0x80] }
 0x659   : > { %17048 = vmatmul.mubr.msk.bf16.gmra.mrb[44].mxu0 %vm587_vm0, %v11693_v32  ;;  %v21720_v32 = vor.u32 %v11747_v57, %v11743_v43  ;;  %v11764_v57 = vrot.slane %v11762_v21, 1 }
 0x65a   : > { %17051 = vmatprep.mubr.msk.bf16.mxu0 %vm587_vm0, %v11705_v31  ;;  %v22949_v31 = vshll.u32 %v21710_v29, 16 }
 0x65b   : > { %v11753_v59 = vsel %vm1477_vm1, %v21720_v32, %v11752_v4  ;;  %v11597_v4 = vld [vmem:[#allocation2 + $0x1c0] sm:$0x1] }
 0x65c   : > { %v11771_v18 = vrot.slane %v22949_v31, 1  ;;  %v12097_v31 = vshrl.u32 %v12064_v26, 16 }
 0x65e   : > { %v21741_v15 = vor.u32 %v11771_v18, %v22951_v60  ;;  %v12099_v21 = vrot.slane %v12097_v31, 7  ;;  %v12068_v18 = vld [vmem:[#allocation2 + $0x90] sm:$0x80]  ;;  %v12109_v60 = vshrl.u32 %v12066_v41, 16 }
 0x660   : > { %v12111_v26 = vrot.slane %v12109_v60, 7  ;;  %v12151_v60 = vrot.slane %v11659_v0, 7 }
 0x661   : > { %17052 = vmatmul.mubr.msk.bf16.gmra.mrb[48].mxu0 %vm587_vm0, %v11717_v35  ;;  %v11774_v35 = vshll.u32 %v11595_v2, 16 }
 0x662   : > { %17055 = vmatprep.mubr.msk.bf16.mxu0 %vm587_vm0, %v11729_v25  ;;  %v21737_v25 = vor.u32 %v11759_v46, %v11755_v55 }
 0x663   : > { %v11776_v47 = vrot.slane %v11774_v35, 1 }
 0x664   : > { %v11765_v2 = vsel %vm1477_vm1, %v21737_v25, %v11764_v57  ;;  %v12115_v57 = vrot.slane %v11623_v27, 7  ;;  %v12139_v27 = vrot.slane %v11647_v9, 7 }
 0x666   : > { %v12118_v31 = vor.u32 %v12115_v57, %v11625_v58  ;;  %v18203_v58 = vld [vmem:[#allocation12 + $0xf0] sm:$0xff]   ;;  %v12154_v57 = vor.u32 %v12151_v60, %v11661_v7  ;;  %v21781_v7 = vld [vmem:[#allocation12 + $0x100] sm:$0xff]   ;;  %v12199_v60 = vrot.slane %v11707_v62, 7 }
 0x668   : > { %v12119_v41 = vsel %vm785_vm2, %v12111_v26, %v12118_v31 }
 0x669   : > { %17056 = vmatmul.mubr.msk.bf16.gmra.mrb[52].mxu0 %vm587_vm0, %v11741_v5  ;;  %v11786_v5 = vshll.u32 %v11597_v4, 16  ;;  %v12107_v4 = vsel %vm785_vm2, %v12099_v21, %v21494_v52 }
 0x66a   : > { %17059 = vmatprep.mubr.msk.bf16.mxu0 %vm587_vm0, %v11753_v59  ;;  %v11777_v59 = vsel %vm1477_vm1, %v21741_v15, %v11776_v47  ;;  %v12121_v47 = vshrl.u32 %v12068_v18, 16 }
 0x66b   : > { %v11788_v46 = vrot.slane %v11786_v5, 1  ;;  %v12070_v5 = vld [vmem:[#allocation2 + $0xa8] sm:$0x80] }
 0x66d   : > { %v11789_v35 = vsel %vm1477_vm1, %v21283_v61, %v11788_v46  ;;  %v18202_v61 = vld [vmem:[#allocation12 + $0xe8] sm:$0xff]   ;;  %v12133_v46 = vshrl.u32 %v12070_v5, 16 }
 0x66f   : > { %v12135_v18 = vrot.slane %v12133_v46, 7  ;;  %v12080_v46 = vld [vmem:[#allocation2 + $0x120] sm:$0x80] }
 0x671   : > { %17060 = vmatmul.mubr.msk.bf16.gmra.mrb[56].mxu0 %vm587_vm0, %v11765_v2  ;;  %v12123_v2 = vrot.slane %v12121_v47, 7  ;;  %v18204_v47 = vld [vmem:[#allocation12 + $0xf8] sm:$0xff]  }
 0x672   : > { %17063 = vmatprep.mubr.msk.bf16.mxu0 %vm587_vm0, %v11777_v59  ;;  %v12072_v59 = vld [vmem:[#allocation2 + $0xc0] sm:$0x80] }
 0x673   : > { %v12131_v52 = vsel %vm785_vm2, %v12123_v2, %v21507_v44  ;;  %v12145_v21 = vshrl.u32 %v12072_v59, 16  ;;  %v12076_v44 = vld [vmem:[#allocation2 + $0xf0] sm:$0x80]  ;;  %v12175_v2 = vrot.slane %v11683_v14, 7 }
 0x675   : > { %v12147_v9 = vrot.slane %v12145_v21, 7 }
 0x677   : > { %v12155_v31 = vsel %vm785_vm2, %v12147_v9, %v12154_v57  ;;  %v12082_v9 = vld [vmem:[#allocation2 + $0x138] sm:$0x80] }
 0x679   : > { %17064 = vmatmul.mubr.msk.bf16.gmra.mrb[60].mxu0 %vm587_vm0, %v11789_v35  ;;  %v12142_v35 = vor.u32 %v12139_v27, %v11649_v42  ;;  %v12169_v42 = vshrl.u32 %v12076_v44, 16  ;;  %v12211_v44 = vrot.slane %v11719_v45, 7  ;;  %v12088_v45 = vld [vmem:[#allocation2 + $0x180] sm:$0x80] }
 0x67a   : > { %17075 = vmatprep.mubr.msk.bf16.mxu0 %vm587_vm0, %v12107_v4  ;;  %v12074_v4 = vld [vmem:[#allocation2 + $0xd8] sm:$0x80] }
 0x67b   : > { %v12143_v0 = vsel %vm785_vm2, %v12135_v18, %v12142_v35  ;;  %v12157_v26 = vshrl.u32 %v12074_v4, 16  ;;  %v12202_v35 = vor.u32 %v12199_v60, %v11709_v38  ;;  %v12205_v4 = vshrl.u32 %v12082_v9, 16 }
 0x67c   : > { %v12214_v38 = vor.u32 %v12211_v44, %v11721_v10  ;;  %v12247_v10 = vrot.slane %v11755_v55, 7 }
 0x67d   : > { %v12159_v5 = vrot.slane %v12157_v26, 7 }
 0x681   : > { %17076 = vmatmul.mubr.msk.bf16.vlgmr.msra.gmra.mrb[32].mxu0 %vm587_vm0, %v12119_v41  ;;  %v12078_v41 = vld [vmem:[#allocation2 + $0x108] sm:$0x80] }
 0x682   : > { %17079 = vmatprep.mubr.msk.bf16.mxu0 %vm587_vm0, %v12131_v52  ;;  %17108 = vmatpush3.bf16.msra.mxu0 %v21632_v8  ;;  %v12163_v8 = vrot.slane %v11671_v48, 7  ;;  %v12178_v48 = vor.u32 %v12175_v2, %v11685_v53  ;;  %v12181_v27 = vshrl.u32 %v12078_v41, 16  ;;  %v12187_v52 = vrot.slane %v11695_v34, 7  ;;  %v12084_v34 = vld [vmem:[#allocation2 + $0x150] sm:$0x80] }
 0x683   : > { %17109 = vmatprep.subr.bf16.mxu0 %v18202_v61  ;;  %v23146_v41 = vshll.u32 %v21706_v39, 16 }
 0x684   : > { %v12166_v59 = vor.u32 %v12163_v8, %v11673_v16  ;;  %v12193_v16 = vshrl.u32 %v12080_v46, 16  ;;  %v12183_v53 = vrot.slane %v12181_v27, 7  ;;  %v21824_v27 = vld [vmem:[#allocation2 + $0x1d0] sm:$0xff] }
 0x685   : > { %v12250_v46 = vor.u32 %v12247_v10, %v23146_v41  ;;  %v12284_v44 = vshll.u32 %v21824_v27, 16  ;;  %v12829_v41 = vld [vmem:[#allocation2 + $0xd0] sm:$0x1] }
 0x686   : > { %17110 = vmatpush3.bf16.msra.mxu0 %v18202_v61  ;;  %v12171_v61 = vrot.slane %v12169_v42, 7  ;;  %v12167_v14 = vsel %vm785_vm2, %v12159_v5, %v12166_v59  ;;  %v12195_v18 = vrot.slane %v12193_v16, 7  ;;  %v12235_v5 = vrot.slane %v11743_v43, 7  ;;  %v12092_v43 = vld [vmem:[#allocation2 + $0x1b0] sm:$0x80] }
 0x687   : > { %17111 = vmatprep.subr.bf16.mxu0 %v18203_v58  ;;  %v12241_v59 = vshrl.u32 %v12088_v45, 16  ;;  %v23147_v16 = vshrl.u32 %v21710_v29, 16  ;;  %v18208_v45 = vld [vmem:[#allocation12 + $0x118] sm:$0xff]  }
 0x688   : > { %v12179_v21 = vsel %vm785_vm2, %v12171_v61, %v12178_v48  ;;  %v12203_v62 = vsel %vm785_vm2, %v12195_v18, %v12202_v35  ;;  %v23148_v35 = vshll.u32 %v21710_v29, 16 }
 0x689   : > { %17080 = vmatmul.mubr.msk.bf16.gmra.mrb[36].mxu0 %vm587_vm0, %v12143_v0  ;;  %v12207_v0 = vrot.slane %v12205_v4, 7  ;;  %v12243_v48 = vrot.slane %v12241_v59, 7  ;;  %v12259_v55 = vrot.slane %v23147_v16, 7 }
 0x68a   : > { %17083 = vmatprep.mubr.msk.bf16.mxu0 %vm587_vm0, %v12155_v31  ;;  %17112 = vmatpush3.bf16.msra.mxu0 %v18203_v58  ;;  %v12190_v58 = vor.u32 %v12187_v52, %v11697_v30  ;;  %v12223_v30 = vrot.slane %v11731_v63, 7  ;;  %v12086_v31 = vld [vmem:[#allocation2 + $0x168] sm:$0x80] }
 0x68b   : > { %17113 = vmatprep.subr.bf16.mxu0 %v18204_v47  ;;  %v12215_v42 = vsel %vm785_vm2, %v12207_v0, %v12214_v38  ;;  %v12229_v2 = vshrl.u32 %v12086_v31, 16  ;;  %v12251_v60 = vsel %vm785_vm2, %v12243_v48, %v12250_v46  ;;  %v12262_v9 = vor.u32 %v12259_v55, %v23148_v35  ;;  %v18389_v31 = vld [vmem:[#allocation2 + $0x98] sm:$0xff]  ;;  %v12831_v55 = vld [vmem:[#allocation2 + $0xe8] sm:$0x1] }
 0x68c   : > { %v12191_v57 = vsel %vm785_vm2, %v12183_v53, %v12190_v58  ;;  %v12226_v8 = vor.u32 %v12223_v30, %v11733_v6  ;;  %v12238_v6 = vor.u32 %v12235_v5, %v11745_v40  ;;  %v12265_v53 = vshrl.u32 %v12092_v43, 16  ;;  %v12094_v58 = vld [vmem:[#allocation2 + $0x1c8] sm:$0x80]  ;;  %v12827_v48 = vld [vmem:[#allocation2 + $0xb8] sm:$0x1] }
 0x68d   : > { %v12231_v61 = vrot.slane %v12229_v2, 7  ;;  %v12281_v40 = vshrl.u32 %v21824_v27, 16  ;;  %v12825_v2 = vld [vmem:[#allocation2 + $0xa0] sm:$0x1] }
 0x68e   : > { %17114 = vmatpush3.bf16.msra.mxu0 %v18204_v47  ;;  %v12217_v47 = vshrl.u32 %v12084_v34, 16  ;;  %v12267_v34 = vrot.slane %v12265_v53, 7 }
 0x68f   : > { %17147 = vmatprep.subr.bf16.mxu0 %v21781_v7  ;;  %v12239_v52 = vsel %vm785_vm2, %v12231_v61, %v12238_v6  ;;  %v12283_v4 = vrot.slane %v12281_v40, 7 }
 0x690   : > { %v12219_v26 = vrot.slane %v12217_v47, 7  ;;  %v12275_v47 = vsel %vm785_vm2, %v12267_v34, %v21549_v51  ;;  %v18207_v51 = vld [vmem:[#allocation12 + $0x110] sm:$0xff]   ;;  %v12835_v34 = vld [vmem:[#allocation2 + $0x118] sm:$0x1] }
 0x691   : > { %17084 = vmatmul.mubr.msk.bf16.gmra.mrb[40].mxu0 %vm587_vm0, %v12167_v14  ;;  %v12090_v14 = vld [vmem:[#allocation2 + $0x198] sm:$0x80]  ;;  %v12286_v0 = vor.u32 %v12284_v44, %v12283_v4 }
 0x692   : > { %17087 = vmatprep.mubr.msk.bf16.mxu0 %vm587_vm0, %v12179_v21  ;;  %v12227_v63 = vsel %vm785_vm2, %v12219_v26, %v12226_v8  ;;  %v12253_v21 = vshrl.u32 %v12090_v14, 16  ;;  %v18388_v26 = vld [vmem:[#allocation2 + $0x68] sm:$0xff]  ;;  %v18206_v8 = vld [vmem:[#allocation12 + $0x108] sm:$0xff]   ;;  %v12896_v14 = vshll.u32 %v12827_v48, 16 }
 0x694   : > { %v12255_v18 = vrot.slane %v12253_v21, 7  ;;  %v12898_v21 = vrot.slane %v12896_v14, 1 }
 0x696   : > { %v12899_v53 = vsel %vm1477_vm1, %v21613_v17, %v12898_v21  ;;  %v9585_v21 = vld [vmem:[#allocation13 + $0x20] sm:$0xff] }
 0x699   : > { %17088 = vmatmul.mubr.msk.bf16.gmra.mrb[44].mxu0 %vm587_vm0, %v12191_v57  ;;  %v12277_v57 = vshrl.u32 %v12094_v58, 16  ;;  %v12920_v58 = vshll.u32 %v12831_v55, 16  ;;  %v9588_v55 = vld [vmem:[#allocation13 + $0x38] sm:$0xff] }
 0x69a   : > { %17091 = vmatprep.mubr.msk.bf16.mxu0 %vm587_vm0, %v12203_v62  ;;  %v12263_v62 = vsel %vm785_vm2, %v12255_v18, %v12262_v9 }
 0x69b   : > { %v12279_v30 = vrot.slane %v12277_v57, 7  ;;  %v12922_v35 = vrot.slane %v12920_v58, 1  ;;  %v12837_v57 = vld [vmem:[#allocation2 + $0x130] sm:$0x1]  ;;  %v21928_v58 = vld [vmem:[%s22905_s8] ss:$0 sm:$0xff] }
 0x69d   : > { %v12287_v38 = vsel %vm785_vm2, %v12279_v30, %v12286_v0  ;;  %v12923_v4 = vsel %vm1477_vm1, %v21641_v37, %v12922_v35  ;;  %v12839_v0 = vld [vmem:[#allocation2 + $0x148] sm:$0x1] }
 0x6a1   : > { %17092 = vmatmul.mubr.msk.bf16.gmra.mrb[48].mxu0 %vm587_vm0, %v12215_v42  ;;  %v12823_v42 = vld [vmem:[#allocation2 + $0x88] sm:$0x1] }
 0x6a2   : > { %17095 = vmatprep.mubr.msk.bf16.mxu0 %vm587_vm0, %v12227_v63  ;;  %v12872_v5 = vshll.u32 %v12823_v42, 16 }
 0x6a4   : > { %v12874_v10 = vrot.slane %v12872_v5, 1  ;;  %v12851_v5 = vld [vmem:[#allocation2 + $0x1d8] sm:$0x1] }
 0x6a6   : > { %v12875_v46 = vsel %vm1477_vm1, %v21594_v20, %v12874_v10  ;;  %v13040_v10 = vshll.u32 %v12851_v5, 16 }
 0x6a9   : > { %17096 = vmatmul.mubr.msk.bf16.gmra.mrb[52].mxu0 %vm587_vm0, %v12239_v52  ;;  %v12908_v52 = vshll.u32 %v12829_v41, 16  ;;  %v9581_v41 = vld [vmem:[#allocation13] sm:$0xff] }
 0x6aa   : > { %17099 = vmatprep.mubr.msk.bf16.mxu0 %vm587_vm0, %v12251_v60  ;;  %v12833_v60 = vld [vmem:[#allocation2 + $0x100] sm:$0x1] }
 0x6ab   : > { %v12910_v16 = vrot.slane %v12908_v52, 1  ;;  %v12932_v18 = vshll.u32 %v12833_v60, 16 }
 0x6ad   : > { %v12911_v20 = vsel %vm1477_vm1, %v21636_v19, %v12910_v16  ;;  %v12934_v9 = vrot.slane %v12932_v18, 1  ;;  %v9587_v16 = vld [vmem:[#allocation13 + $0x30] sm:$0xff] }
 0x6ae   : > { %v17216_v60 = vpack.c.bf16 %v9588_v55, %v9587_v16 }
 0x6af   : > { %v12935_v17 = vsel %vm1477_vm1, %v21663_v24, %v12934_v9 }
 0x6b1   : > { %17100 = vmatmul.mubr.msk.bf16.gmra.mrb[56].mxu0 %vm587_vm0, %v12263_v62  ;;  %v12944_v62 = vshll.u32 %v12835_v34, 16 }
 0x6b2   : > { %17103 = vmatprep.mubr.msk.bf16.mxu0 %vm587_vm0, %v12275_v47  ;;  %v12956_v47 = vshll.u32 %v12837_v57, 16 }
 0x6b3   : > { %v12946_v19 = vrot.slane %v12944_v62, 1 }
 0x6b4   : > { %v12958_v30 = vrot.slane %v12956_v47, 1 }
 0x6b6   : > { %v12959_v37 = vsel %vm1477_vm1, %v21689_v54, %v12958_v30  ;;  %v12848_v54 = vld [vmem:[#allocation2 + $0x1b8] sm:$0xff] }
 0x6b9   : > { %17104 = vmatmul.mubr.msk.bf16.gmra.mrb[60].mxu0 %vm587_vm0, %v12287_v38  ;;  %v12841_v38 = vld [vmem:[#allocation2 + $0x160] sm:$0x1] }
 0x6ba   : > { %17115 = vmatprep.mubr.msk.bf16.mxu0 %vm587_vm0, %v18388_v26  ;;  %v12947_v26 = vsel %vm1477_vm1, %v21668_v11, %v12946_v19 }
 0x6c1   : > { %17116 = vmatmul.mubr.msk.bf16.vlgmr.msra.gmra.mrb[32].mxu0 %vm587_vm0, %v21579_v56  ;;  %v12820_v56 = vld [vmem:[#allocation2 + $0x68] sm:$0xff] }
 0x6c2   : > { %17119 = vmatprep.mubr.msk.bf16.mxu0 %vm587_vm0, %v18389_v31  ;;  %17148 = vmatpush3.bf16.msra.mxu0 %v21781_v7  ;;  %v12980_v31 = vshll.u32 %v12841_v38, 16 }
 0x6c3   : > { %17149 = vmatprep.subr.bf16.mxu0 %v18206_v8 }
 0x6c6   : > { %17150 = vmatpush3.bf16.msra.mxu0 %v18206_v8  ;;  %v12968_v8 = vshll.u32 %v12839_v0, 16 }
 0x6c7   : > { %17151 = vmatprep.subr.bf16.mxu0 %v18207_v51 }
 0x6c8   : > { %v12970_v24 = vrot.slane %v12968_v8, 1 }
 0x6c9   : > { %17120 = vmatmul.mubr.msk.bf16.gmra.mrb[36].mxu0 %vm587_vm0, %v21589_v3  ;;  %v12855_v3 = vshll.u32 %v12820_v56, 16 }
 0x6ca   : > { %17123 = vmatprep.mubr.msk.bf16.mxu0 %vm587_vm0, %v21604_v13  ;;  %17152 = vmatpush3.bf16.msra.mxu0 %v18207_v51  ;;  %v12821_v13 = vld [vmem:[#allocation2 + $0x70] sm:$0x1]  ;;  %v12982_v51 = vrot.slane %v12980_v31, 1 }
 0x6cb   : > { %17153 = vmatprep.subr.bf16.mxu0 %v18208_v45 }
 0x6cc   : > { %v12983_v11 = vsel %vm1477_vm1, %v21715_v1, %v12982_v51 }
 0x6ce   : > { %17154 = vmatpush3.bf16.msra.mxu0 %v18208_v45  ;;  %v12843_v45 = vld [vmem:[#allocation2 + $0x178] sm:$0x1] }
 0x6d1   : > { %17124 = vmatmul.mubr.msk.bf16.gmra.mrb[40].mxu0 %vm587_vm0, %v21607_v28  ;;  %v12857_v28 = vrot.slane %v12855_v3, 1  ;;  %v12971_v3 = vsel %vm1477_vm1, %v21694_v23, %v12970_v24 }
 0x6d2   : > { %17127 = vmatprep.mubr.msk.bf16.mxu0 %vm587_vm0, %v21625_v22  ;;  %v12860_v22 = vshll.u32 %v12821_v13, 16  ;;  %v12992_v13 = vshll.u32 %v12843_v45, 16 }
 0x6d4   : > { %v12862_v7 = vrot.slane %v12860_v22, 1  ;;  %v12994_v22 = vrot.slane %v12992_v13, 1 }
 0x6d9   : > { %17128 = vmatmul.mubr.msk.bf16.gmra.mrb[44].mxu0 %vm587_vm0, %v21629_v12  ;;  %v18390_v12 = vld [vmem:[#allocation2 + $0x1b8] sm:$0xff] }
 0x6da   : > { %17131 = vmatprep.mubr.msk.bf16.mxu0 %vm587_vm0, %v21654_v33  ;;  %v12824_v33 = vld [vmem:[#allocation2 + $0x98] sm:$0xff] }
 0x6db   : > { %v12877_v59 = vshrl.u32 %v12824_v33, 16 }
 0x6e1   : > { %17132 = vmatmul.mubr.msk.bf16.gmra.mrb[48].mxu0 %vm587_vm0, %v21658_v36  ;;  %v12853_v36 = vshrl.u32 %v12820_v56, 16  ;;  %v12845_v56 = vld [vmem:[#allocation2 + $0x190] sm:$0x1] }
 0x6e2   : > { %17135 = vmatprep.mubr.msk.bf16.mxu0 %vm587_vm0, %v21680_v49 }
 0x6e3   : > { %v12858_v49 = vor.u32 %v12857_v28, %v12853_v36  ;;  %v13004_v28 = vshll.u32 %v12845_v56, 16  ;;  %v13023_v36 = vshll.u32 %v12848_v54, 16 }
 0x6e9   : > { %17136 = vmatmul.mubr.msk.bf16.gmra.mrb[52].mxu0 %vm587_vm0, %v21684_v50  ;;  %v12879_v50 = vshll.u32 %v12824_v33, 16  ;;  %v12847_v33 = vld [vmem:[#allocation2 + $0x1a8] sm:$0x1] }
 0x6ea   : > { %17139 = vmatprep.mubr.msk.bf16.mxu0 %vm587_vm0, %v21706_v39  ;;  %v12863_v39 = vsel %vm1477_vm1, %v12858_v49, %v12862_v7  ;;  %v12849_v49 = vld [vmem:[#allocation2 + $0x1c0] sm:$0x1]  ;;  %v12995_v7 = vsel %vm1477_vm1, %v21720_v32, %v12994_v22  ;;  %v13016_v42 = vshll.u32 %v12847_v33, 16 }
 0x6eb   : > { %v12881_v63 = vrot.slane %v12879_v50, 1  ;;  %v13025_v50 = vrot.slane %v13023_v36, 1  ;;  %v13028_v1 = vshll.u32 %v12849_v49, 16 }
 0x6ed   : > { %v12882_v61 = vor.u32 %v12881_v63, %v12877_v59  ;;  %v13037_v59 = vrot.slane %v12284_v44, 1  ;;  %v9582_v44 = vld [vmem:[#allocation13 + $0x8] sm:$0xff] }
 0x6ee   : > { %v17207_v14 = vpack.c.bf16 %v9582_v44, %v9581_v41 }
 0x6f1   : > { %17140 = vmatmul.mubr.msk.bf16.gmra.mrb[56].mxu0 %vm587_vm0, %v21710_v29  ;;  %v12884_v29 = vshll.u32 %v12825_v2, 16  ;;  %v13021_v2 = vshrl.u32 %v12848_v54, 16 }
 0x6f2   : > { %17143 = vmatprep.mubr.msk.bf16.mxu0 %vm587_vm0, %v18390_v12  ;;  %v13006_v12 = vrot.slane %v13004_v28, 1 }
 0x6f3   : > { %v12886_v6 = vrot.slane %v12884_v29, 1  ;;  %v13026_v63 = vor.u32 %v13025_v50, %v13021_v2  ;;  %v13030_v29 = vrot.slane %v13028_v1, 1 }
 0x6f4   : > { %v13007_v23 = vsel %vm1477_vm1, %v21737_v25, %v13006_v12 }
 0x6f5   : > { %v12887_v43 = vsel %vm1477_vm1, %v12882_v61, %v12886_v6  ;;  %v13031_v25 = vsel %vm1477_vm1, %v13026_v63, %v13030_v29  ;;  %v13038_v61 = vor.u32 %v13037_v59, %v12281_v40  ;;  %v13042_v6 = vrot.slane %v13040_v10, 1 }
 0x6f7   : > { %v13043_v48 = vsel %vm1477_vm1, %v13038_v61, %v13042_v6 }
 0x6f9   : > { %17144 = vmatmul.mubr.msk.bf16.gmra.mrb[60].mxu0 %vm587_vm0, %v21824_v27  ;;  %v9586_v27 = vld [vmem:[#allocation13 + $0x28] sm:$0xff] }
 0x6fa   : > { %17155 = vmatprep.mubr.msk.bf16.mxu0 %vm587_vm0, %v12863_v39  ;;  %v13018_v39 = vrot.slane %v13016_v42, 1  ;;  %v17213_v40 = vpack.c.bf16 %v9586_v27, %v9585_v21 }
 0x6fc   : > { %v13019_v32 = vsel %vm1477_vm1, %v21741_v15, %v13018_v39  ;;  %v9583_v15 = vld [vmem:[#allocation13 + $0x10] sm:$0xff] }
 0x701   : > { %17156 = vmatmul.mubr.msk.bf16.vlgmr.msra.gmra.mrb[32].mxu0 %vm587_vm0, %v12875_v46  ;;  %v18690_v46 = vmov 0.0|0.0  }
 0x702   : > { %17159 = vmatprep.mubr.msk.bf16.mxu0 %vm587_vm0, %v12887_v43  ;;  %17206 = vmatprep.subr.bf16.mxu1 %v18690_v46  ;;  %v9584_v43 = vld [vmem:[#allocation13 + $0x18] sm:$0xff] }
 0x703   : > { %17208 = vmatpush3.bf16.msra.mxu1 %v17207_v14  ;;  %v17210_v52 = vpack.c.bf16 %v9584_v43, %v9583_v15 }
 0x704   : > { %17209 = vmatprep.subr.bf16.mxu1 %v18690_v46 }
 0x707   : > { %17211 = vmatpush3.bf16.msra.mxu1 %v17210_v52 }
 0x708   : > { %17212 = vmatprep.subr.bf16.mxu1 %v18690_v46 }
 0x709   : > { %17160 = vmatmul.mubr.msk.bf16.gmra.mrb[36].mxu0 %vm587_vm0, %v12899_v53  ;;  %v18692_v53 = vmov 0.0  }
 0x70a   : > { %17163 = vmatprep.mubr.msk.bf16.mxu0 %vm587_vm0, %v12911_v20  ;;  %17203 = vmatprep.mubr.msk.f32.mxu1 %vm18691_vm5, %v18692_v53 }
 0x70b   : > { %17214 = vmatpush3.bf16.msra.mxu1 %v17213_v40 }
 0x70c   : > { %17215 = vmatprep.subr.bf16.mxu1 %v18690_v46 }
 0x70f   : > { %17217 = vmatpush3.bf16.msra.mxu1 %v17216_v60 }
 0x711   : > { %17164 = vmatmul.mubr.msk.bf16.gmra.mrb[40].mxu0 %vm587_vm0, %v12923_v4 }
 0x712   : > { %17167 = vmatprep.mubr.msk.bf16.mxu0 %vm587_vm0, %v12935_v17 }
 0x719   : > { %17168 = vmatmul.mubr.msk.bf16.gmra.mrb[44].mxu0 %vm587_vm0, %v12947_v26 }
 0x71a   : > { %17171 = vmatprep.mubr.msk.bf16.mxu0 %vm587_vm0, %v12959_v37 }
 0x721   : > { %17172 = vmatmul.mubr.msk.bf16.gmra.mrb[48].mxu0 %vm587_vm0, %v12971_v3 }
 0x722   : > { %17175 = vmatprep.mubr.msk.bf16.mxu0 %vm587_vm0, %v12983_v11 }
 0x729   : > { %17176 = vmatmul.mubr.msk.bf16.gmra.mrb[52].mxu0 %vm587_vm0, %v12995_v7 }
 0x72a   : > { %17179 = vmatprep.mubr.msk.bf16.mxu0 %vm587_vm0, %v13007_v23 }
 0x731   : > { %17180 = vmatmul.mubr.msk.bf16.gmra.mrb[56].mxu0 %vm587_vm0, %v13019_v32 }
 0x732   : > { %17183 = vmatprep.mubr.msk.bf16.mxu0 %vm587_vm0, %v13031_v25 }
 0x739   : > { %17184 = vmatmul.mubr.msk.bf16.gmra.mrb[60].mxu0 %vm587_vm0, %v13043_v48 }
 0x7d4   : > { %v17157_v20 = vpop.f32.mrb[32].mxu0 }
 0x7d5   : > { %v13159_v18 = vpop.f32.mrb[33].mxu0  ;;  %v21931_v35 = vadd.f32 %v17157_v20, %v21928_v58 }
 0x7d6   : > { %v21934_v9 = vadd.f32 %v21928_v58, %v13159_v18  ;;  %v17158_v34 = vpop.f32.mrb[34].mxu0 }
 0x7d7   : > { %v13162_v57 = vpop.f32.mrb[35].mxu0  ;;  %v21939_v62 = vadd.f32 %v17158_v34, %v21928_v58  ;;  %v13428_v47 = vmul.f32 %v21931_v35, %v21931_v35  ;;  %v13360_v26 = vsel %vm587_vm0, %v21931_v35, 0.0 }
 0x7d8   : > { %v13426_v4 = vmul.f32 %v21934_v9, %v21934_v9  ;;  %v21942_v17 = vadd.f32 %v21928_v58, %v13162_v57  ;;  %v13357_v19 = vsel %vm587_vm0, %v21934_v9, 0.0 }
 0x7d9   : > { %v13429_v37 = vmul.f32 %v21939_v62, %v21939_v62  ;;  %v13461_v3 = vsel %vm587_vm0, %v13428_v47, 0.0  ;;  %v13362_v13 = vsel %vm587_vm0, %v21939_v62, 0.0 }
 0x7da   : > { %v13358_v30 = vsel %vm587_vm0, %v21942_v17, 0.0  ;;  %v13427_v0 = vmul.f32 %v21942_v17, %v21942_v17  ;;  %v13458_v8 = vsel %vm587_vm0, %v13426_v4, 0.0 }
 0x7db   : > { %v13359_v38 = vadd.f32 %v13358_v30, %v13357_v19  ;;  %v13463_v36 = vsel %vm587_vm0, %v13429_v37, 0.0 }
 0x7dc   : > { %v13459_v31 = vsel %vm587_vm0, %v13427_v0, 0.0  ;;  %v17161_v24 = vpop.f32.mrb[36].mxu0 }
 0x7dd   : > { %v13361_v51 = vadd.f32 %v13360_v26, %v13359_v38  ;;  %v13460_v45 = vadd.f32 %v13459_v31, %v13458_v8  ;;  %v13175_v56 = vpop.f32.mrb[37].mxu0  ;;  %v21965_v22 = vadd.f32 %v17161_v24, %v21928_v58 }
 0x7de   : > { %v21962_v11 = vadd.f32 %v21928_v58, %v13175_v56  ;;  %v17162_v28 = vpop.f32.mrb[38].mxu0 }
 0x7df   : > { %v13462_v54 = vadd.f32 %v13461_v3, %v13460_v45  ;;  %v13363_v12 = vadd.f32 %v13362_v13, %v13361_v51  ;;  %v13178_v33 = vpop.f32.mrb[39].mxu0  ;;  %v21976_v1 = vadd.f32 %v17162_v28, %v21928_v58  ;;  %v13432_v39 = vmul.f32 %v21965_v22, %v21965_v22 }
 0x7e0   : > { %v13364_v49 = vsel %vm587_vm0, %v21962_v11, 0.0  ;;  %v13430_v7 = vmul.f32 %v21962_v11, %v21962_v11  ;;  %v21973_v42 = vadd.f32 %v21928_v58, %v13178_v33  ;;  %v13368_v10 = vsel %vm587_vm0, %v21965_v22, 0.0 }
 0x7e1   : > { %v13365_v23 = vadd.f32 %v13364_v49, %v13363_v12  ;;  %v13464_v50 = vadd.f32 %v13463_v36, %v13462_v54  ;;  %v13433_v25 = vmul.f32 %v21976_v1, %v21976_v1  ;;  %v13370_v41 = vsel %vm587_vm0, %v21976_v1, 0.0 }
 0x7e2   : > { %v13465_v2 = vsel %vm587_vm0, %v13430_v7, 0.0  ;;  %v13366_v5 = vsel %vm587_vm0, %v21973_v42, 0.0  ;;  %v13431_v59 = vmul.f32 %v21973_v42, %v21973_v42  ;;  %v13469_v15 = vsel %vm587_vm0, %v13432_v39, 0.0 }
 0x7e3   : > { %v13466_v63 = vadd.f32 %v13465_v2, %v13464_v50  ;;  %v13367_v29 = vadd.f32 %v13366_v5, %v13365_v23  ;;  %v13471_v60 = vsel %vm587_vm0, %v13433_v25, 0.0 }
 0x7e4   : > { %v17165_v32 = vpop.f32.mrb[40].mxu0  ;;  %v13467_v6 = vsel %vm587_vm0, %v13431_v59, 0.0 }
 0x7e5   : > { %v13369_v61 = vadd.f32 %v13368_v10, %v13367_v29  ;;  %v13191_v48 = vpop.f32.mrb[41].mxu0  ;;  %v13468_v44 = vadd.f32 %v13467_v6, %v13466_v63  ;;  %v21997_v43 = vadd.f32 %v17165_v32, %v21928_v58 }
 0x7e6   : > { %v21993_v46 = vadd.f32 %v21928_v58, %v13191_v48  ;;  %v17166_v14 = vpop.f32.mrb[42].mxu0 }
 0x7e7   : > { %v13371_v52 = vadd.f32 %v13370_v41, %v13369_v61  ;;  %v13194_v21 = vpop.f32.mrb[43].mxu0  ;;  %v13470_v27 = vadd.f32 %v13469_v15, %v13468_v44  ;;  %v22008_v20 = vadd.f32 %v17166_v14, %v21928_v58  ;;  %v13436_v47 = vmul.f32 %v21997_v43, %v21997_v43 }
 0x7e8   : > { %v13372_v40 = vsel %vm587_vm0, %v21993_v46, 0.0  ;;  %v13434_v16 = vmul.f32 %v21993_v46, %v21993_v46  ;;  %v22004_v55 = vadd.f32 %v21928_v58, %v13194_v21  ;;  %v13376_v30 = vsel %vm587_vm0, %v21997_v43, 0.0 }
 0x7e9   : > { %v13373_v53 = vadd.f32 %v13372_v40, %v13371_v52  ;;  %v13472_v18 = vadd.f32 %v13471_v60, %v13470_v27  ;;  %v13437_v8 = vmul.f32 %v22008_v20, %v22008_v20  ;;  %v13378_v24 = vsel %vm587_vm0, %v22008_v20, 0.0 }
 0x7ea   : > { %v13473_v34 = vsel %vm587_vm0, %v13434_v16, 0.0  ;;  %v13374_v57 = vsel %vm587_vm0, %v22004_v55, 0.0  ;;  %v13435_v4 = vmul.f32 %v22004_v55, %v22004_v55  ;;  %v13477_v3 = vsel %vm587_vm0, %v13436_v47, 0.0 }
 0x7eb   : > { %v13375_v19 = vadd.f32 %v13374_v57, %v13373_v53  ;;  %v13474_v0 = vadd.f32 %v13473_v34, %v13472_v18  ;;  %v13479_v7 = vsel %vm587_vm0, %v13437_v8, 0.0 }
 0x7ec   : > { %v13475_v38 = vsel %vm587_vm0, %v13435_v4, 0.0  ;;  %v17169_v26 = vpop.f32.mrb[44].mxu0 }
 0x7ed   : > { %v13377_v37 = vadd.f32 %v13376_v30, %v13375_v19  ;;  %v13207_v31 = vpop.f32.mrb[45].mxu0  ;;  %v13476_v51 = vadd.f32 %v13475_v38, %v13474_v0  ;;  %v22029_v13 = vadd.f32 %v17169_v26, %v21928_v58 }
 0x7ee   : > { %v22025_v45 = vadd.f32 %v21928_v58, %v13207_v31  ;;  %v17170_v56 = vpop.f32.mrb[46].mxu0 }
 0x7ef   : > { %v13379_v28 = vadd.f32 %v13378_v24, %v13377_v37  ;;  %v13210_v54 = vpop.f32.mrb[47].mxu0  ;;  %v13478_v12 = vadd.f32 %v13477_v3, %v13476_v51  ;;  %v22040_v50 = vadd.f32 %v17170_v56, %v21928_v58  ;;  %v13440_v29 = vmul.f32 %v22029_v13, %v22029_v13 }
 0x7f0   : > { %v13380_v33 = vsel %vm587_vm0, %v22025_v45, 0.0  ;;  %v13438_v36 = vmul.f32 %v22025_v45, %v22025_v45  ;;  %v22036_v49 = vadd.f32 %v21928_v58, %v13210_v54  ;;  %v13384_v10 = vsel %vm587_vm0, %v22029_v13, 0.0 }
 0x7f1   : > { %v13381_v23 = vadd.f32 %v13380_v33, %v13379_v28  ;;  %v13480_v2 = vadd.f32 %v13479_v7, %v13478_v12  ;;  %v13441_v6 = vmul.f32 %v22040_v50, %v22040_v50  ;;  %v13386_v44 = vsel %vm587_vm0, %v22040_v50, 0.0 }
 0x7f2   : > { %v13481_v5 = vsel %vm587_vm0, %v13438_v36, 0.0  ;;  %v13382_v39 = vsel %vm587_vm0, %v22036_v49, 0.0  ;;  %v13439_v63 = vmul.f32 %v22036_v49, %v22036_v49  ;;  %v13485_v21 = vsel %vm587_vm0, %v13440_v29, 0.0 }
 0x7f3   : > { %v13383_v59 = vadd.f32 %v13382_v39, %v13381_v23  ;;  %v13482_v32 = vadd.f32 %v13481_v5, %v13480_v2  ;;  %v13487_v57 = vsel %vm587_vm0, %v13441_v6, 0.0 }
 0x7f4   : > { %v13483_v25 = vsel %vm587_vm0, %v13439_v63, 0.0  ;;  %v17173_v61 = vpop.f32.mrb[48].mxu0 }
 0x7f5   : > { %v13385_v48 = vadd.f32 %v13384_v10, %v13383_v59  ;;  %v13223_v41 = vpop.f32.mrb[49].mxu0  ;;  %v13484_v14 = vadd.f32 %v13483_v25, %v13482_v32  ;;  %v22061_v27 = vadd.f32 %v17173_v61, %v21928_v58 }
 0x7f6   : > { %v22057_v15 = vadd.f32 %v21928_v58, %v13223_v41  ;;  %v17174_v52 = vpop.f32.mrb[50].mxu0 }
 0x7f7   : > { %v13387_v40 = vadd.f32 %v13386_v44, %v13385_v48  ;;  %v13226_v16 = vpop.f32.mrb[51].mxu0  ;;  %v13486_v60 = vadd.f32 %v13485_v21, %v13484_v14  ;;  %v22072_v47 = vadd.f32 %v17174_v52, %v21928_v58  ;;  %v13444_v26 = vmul.f32 %v22061_v27, %v22061_v27 }
 0x7f8   : > { %v13388_v53 = vsel %vm587_vm0, %v22057_v15, 0.0  ;;  %v13442_v18 = vmul.f32 %v22057_v15, %v22057_v15  ;;  %v22068_v34 = vadd.f32 %v21928_v58, %v13226_v16  ;;  %v13392_v37 = vsel %vm587_vm0, %v22061_v27, 0.0 }
 0x7f9   : > { %v13389_v4 = vadd.f32 %v13388_v53, %v13387_v40  ;;  %v13488_v19 = vadd.f32 %v13487_v57, %v13486_v60  ;;  %v13445_v56 = vmul.f32 %v22072_v47, %v22072_v47  ;;  %v13394_v54 = vsel %vm587_vm0, %v22072_v47, 0.0 }
 0x7fa   : > { %v13489_v30 = vsel %vm587_vm0, %v13442_v18, 0.0  ;;  %v13390_v0 = vsel %vm587_vm0, %v22068_v34, 0.0  ;;  %v13443_v38 = vmul.f32 %v22068_v34, %v22068_v34  ;;  %v13493_v7 = vsel %vm587_vm0, %v13444_v26, 0.0 }
 0x7fb   : > { %v13391_v8 = vadd.f32 %v13390_v0, %v13389_v4  ;;  %v13490_v31 = vadd.f32 %v13489_v30, %v13488_v19  ;;  %v13495_v10 = vsel %vm587_vm0, %v13445_v56, 0.0 }
 0x7fc   : > { %v13491_v24 = vsel %vm587_vm0, %v13443_v38, 0.0  ;;  %v17177_v51 = vpop.f32.mrb[52].mxu0 }
 0x7fd   : > { %v13393_v3 = vadd.f32 %v13392_v37, %v13391_v8  ;;  %v13239_v28 = vpop.f32.mrb[53].mxu0  ;;  %v13492_v12 = vadd.f32 %v13491_v24, %v13490_v31  ;;  %v22093_v23 = vadd.f32 %v17177_v51, %v21928_v58 }
 0x7fe   : > { %v22089_v33 = vadd.f32 %v21928_v58, %v13239_v28  ;;  %v17178_v36 = vpop.f32.mrb[54].mxu0 }
 0x7ff   : > { %v13395_v2 = vadd.f32 %v13394_v54, %v13393_v3  ;;  %v13242_v5 = vpop.f32.mrb[55].mxu0  ;;  %v13494_v39 = vadd.f32 %v13493_v7, %v13492_v12  ;;  %v22104_v25 = vadd.f32 %v17178_v36, %v21928_v58  ;;  %v13448_v44 = vmul.f32 %v22093_v23, %v22093_v23 }
 0x800   : > { %v13396_v63 = vsel %vm587_vm0, %v22089_v33, 0.0  ;;  %v13446_v29 = vmul.f32 %v22089_v33, %v22089_v33  ;;  %v22100_v59 = vadd.f32 %v21928_v58, %v13242_v5  ;;  %v13400_v52 = vsel %vm587_vm0, %v22093_v23, 0.0 }
 0x801   : > { %v13397_v32 = vadd.f32 %v13396_v63, %v13395_v2  ;;  %v13496_v61 = vadd.f32 %v13495_v10, %v13494_v39  ;;  %v13449_v60 = vmul.f32 %v22104_v25, %v22104_v25  ;;  %v13402_v57 = vsel %vm587_vm0, %v22104_v25, 0.0 }
 0x802   : > { %v13497_v6 = vsel %vm587_vm0, %v13446_v29, 0.0  ;;  %v13398_v48 = vsel %vm587_vm0, %v22100_v59, 0.0  ;;  %v13447_v41 = vmul.f32 %v22100_v59, %v22100_v59  ;;  %v13501_v0 = vsel %vm587_vm0, %v13448_v44, 0.0 }
 0x803   : > { %v13399_v14 = vadd.f32 %v13398_v48, %v13397_v32  ;;  %v13498_v21 = vadd.f32 %v13497_v6, %v13496_v61  ;;  %v13503_v56 = vsel %vm587_vm0, %v13449_v60, 0.0 }
 0x804   : > { %v13499_v40 = vsel %vm587_vm0, %v13447_v41, 0.0  ;;  %v17181_v16 = vpop.f32.mrb[56].mxu0 }
 0x805   : > { %v13401_v53 = vadd.f32 %v13400_v52, %v13399_v14  ;;  %v13255_v18 = vpop.f32.mrb[57].mxu0  ;;  %v13500_v4 = vadd.f32 %v13499_v40, %v13498_v21  ;;  %v22125_v38 = vadd.f32 %v17181_v16, %v21928_v58 }
 0x806   : > { %v22121_v19 = vadd.f32 %v21928_v58, %v13255_v18  ;;  %v17182_v30 = vpop.f32.mrb[58].mxu0 }
 0x807   : > { %v13403_v26 = vadd.f32 %v13402_v57, %v13401_v53  ;;  %v13258_v8 = vpop.f32.mrb[59].mxu0  ;;  %v13502_v37 = vadd.f32 %v13501_v0, %v13500_v4  ;;  %v22136_v28 = vadd.f32 %v17182_v30, %v21928_v58  ;;  %v13452_v2 = vmul.f32 %v22125_v38, %v22125_v38 }
 0x808   : > { %v13404_v31 = vsel %vm587_vm0, %v22121_v19, 0.0  ;;  %v13450_v24 = vmul.f32 %v22121_v19, %v22121_v19  ;;  %v22132_v51 = vadd.f32 %v21928_v58, %v13258_v8  ;;  %v13408_v39 = vsel %vm587_vm0, %v22125_v38, 0.0 }
 0x809   : > { %v13405_v3 = vadd.f32 %v13404_v31, %v13403_v26  ;;  %v13504_v54 = vadd.f32 %v13503_v56, %v13502_v37  ;;  %v13453_v32 = vmul.f32 %v22136_v28, %v22136_v28  ;;  %v13410_v48 = vsel %vm587_vm0, %v22136_v28, 0.0 }
 0x80a   : > { %v13505_v12 = vsel %vm587_vm0, %v13450_v24, 0.0  ;;  %v13406_v36 = vsel %vm587_vm0, %v22132_v51, 0.0  ;;  %v13451_v7 = vmul.f32 %v22132_v51, %v22132_v51  ;;  %v13509_v52 = vsel %vm587_vm0, %v13452_v2, 0.0 }
 0x80b   : > { %v13407_v5 = vadd.f32 %v13406_v36, %v13405_v3  ;;  %v13506_v63 = vadd.f32 %v13505_v12, %v13504_v54  ;;  %v13511_v4 = vsel %vm587_vm0, %v13453_v32, 0.0 }
 0x80c   : > { %v13507_v29 = vsel %vm587_vm0, %v13451_v7, 0.0  ;;  %v17185_v10 = vpop.f32.mrb[60].mxu0 }
 0x80d   : > { %v13409_v61 = vadd.f32 %v13408_v39, %v13407_v5  ;;  %v13271_v6 = vpop.f32.mrb[61].mxu0  ;;  %v13508_v41 = vadd.f32 %v13507_v29, %v13506_v63  ;;  %v22157_v21 = vadd.f32 %v17185_v10, %v21928_v58 }
 0x80e   : > { %v22153_v44 = vadd.f32 %v21928_v58, %v13271_v6  ;;  %v17186_v14 = vpop.f32.mrb[62].mxu0 }
 0x80f   : > { %v13411_v40 = vadd.f32 %v13410_v48, %v13409_v61  ;;  %v13274_v16 = vpop.f32.mrb[63].mxu0  ;;  %v13510_v60 = vadd.f32 %v13509_v52, %v13508_v41  ;;  %v13356_v0 = vadd.f32 %v17186_v14, %v21928_v58  ;;  %v13456_v24 = vmul.f32 %v22157_v21, %v22157_v21 }
 0x810   : > { %v13412_v53 = vsel %vm587_vm0, %v22153_v44, 0.0  ;;  %v13454_v18 = vmul.f32 %v22153_v44, %v22153_v44  ;;  %v22164_v57 = vadd.f32 %v21928_v58, %v13274_v16  ;;  %v13416_v3 = vsel %vm587_vm0, %v22157_v21, 0.0 }
 0x811   : > { %v13413_v30 = vadd.f32 %v13412_v53, %v13411_v40  ;;  %v13512_v26 = vadd.f32 %v13511_v4, %v13510_v60  ;;  %v13457_v58 = vmul.f32 %v13356_v0, %v13356_v0  ;;  %v13418_v7 = vsel %vm587_vm0, %v13356_v0, 0.0 }
 0x812   : > { %v13513_v8 = vsel %vm587_vm0, %v13454_v18, 0.0  ;;  %v13414_v37 = vsel %vm587_vm0, %v22164_v57, 0.0  ;;  %v13455_v31 = vmul.f32 %v22164_v57, %v22164_v57  ;;  %v13517_v5 = vsel %vm587_vm0, %v13456_v24, 0.0 }
 0x813   : > { %v13415_v56 = vadd.f32 %v13414_v37, %v13413_v30  ;;  %v13514_v54 = vadd.f32 %v13513_v8, %v13512_v26  ;;  %v13519_v29 = vsel %vm587_vm0, %v13457_v58, 0.0 }
 0x814   : > { %v13515_v12 = vsel %vm587_vm0, %v13455_v31, 0.0 }
 0x815   : > { %v13417_v36 = vadd.f32 %v13416_v3, %v13415_v56  ;;  %v13516_v2 = vadd.f32 %v13515_v12, %v13514_v54  ;;  %v15548_v3 = vld [vmem:[%s23149_s0] ss:$0 sm:$0xff]  ;;  %v13624_v54 = vlaneseq  ;;  %s22849_s0 = scalar_lea.hbm %s23185_s30, %s15557_s12 }
 0x817   : > { %v13419_v39 = vadd.f32 %v13418_v7, %v13417_v36  ;;  %v13518_v63 = vadd.f32 %v13517_v5, %v13516_v2  ;;  %v22185_v7 = vshrl.u32 %v13624_v54, 7  ;;  %v13618_v5 = vld [vmem:[%s23150_s22] sm:$0x1]  ;;  %s18601_s22 = scalar_lea.vmem %s18600_s23, 8192 }
 0x819   : > { %v13420_v10 = vrot.slane %v13419_v39, 4  ;;  %v13520_v32 = vadd.f32 %v13519_v29, %v13518_v63  ;;  %v13663_v29 = vsub.s32 0, %v22185_v7 }
 0x81b   : > { %v13421_v61 = vadd.f32 %v13420_v10, %v13419_v39  ;;  %v13521_v6 = vrot.slane %v13520_v32, 4  ;;  %v13626_v39 = vsub.s32 1, %v22185_v7 }
 0x81d   : > { %v13422_v48 = vrot.slane %v13421_v61, 2  ;;  %v13522_v41 = vadd.f32 %v13521_v6, %v13520_v32  ;;  %v22203_v6 = vld [vmem:[%s23151_s15] sm:$0x3] }
 0x81f   : > { %v13423_v14 = vadd.f32 %v13422_v48, %v13421_v61  ;;  %v13523_v52 = vrot.slane %v13522_v41, 2 }
 0x821   : > { %v13424_v40 = vrot.slane %v13423_v14, 1  ;;  %v13524_v16 = vadd.f32 %v13523_v52, %v13522_v41 }
 0x823   : > { %v13525_v60 = vrot.slane %v13524_v16, 1  ;;  %v13425_v53 = vadd.f32 %v13424_v40, %v13423_v14  ;;  %v22212_v40 = vrot.slane %v22203_v6, %v13663_v29 }
 0x825   : > { %v13526_v18 = vadd.f32 %v13525_v60, %v13524_v16 }
 0x827   : > { %v13528_v4 = vsel %vm13527_vm6, %v13425_v53, %v13526_v18 }
 0x828   : > { %17204 = vmatmul.mubr.msk.f32.vlgmr.msra.gmra.mrb[64].mxu1 %vm587_vm0, %v13528_v4 }
 0x8fb   : > { %v13598_v30 = vpop.f32.mrb[64].mxu1 }
 0x8fc   : > { %v13602_v26 = vmul.f32 0.001953125, %v13598_v30  ;;  %v17205_v8 = vpop.f32.mrb[65].mxu1 }
 0x8fe   : > { %v13603_v37 = vmul.f32 %v13602_v26, %v13602_v26 }
 0x900   : > { %v13605_v31 = vrot.slane %v13603_v37, 7 }
 0x902   : > { %v13607_v24 = vsub.f32 %v13602_v26, %v13605_v31 }
 0x904   : > { %v13608_v56 = vadd.f32 1e-05, %v13607_v24 }
 0x906   : > { %18337 = vrsqrt.f32 %v13608_v56 }
 0x910   : > { %v18338_v12 = vpop.eup %18337 }
 0x911   : > { %v13617_v58 = vmul.f32 %v18338_v12, %v15548_v3 }
 0x913   : > { %v13620_v36 = vrot.slane %v13617_v58, 1  ;;  %v22194_v10 = vrot.slane %v13617_v58, %v13626_v39 }
 0x915   : > { %v13622_v2 = vmul.f32 %v13620_v36, %v13602_v26  ;;  %v13629_v61 = vmul.f32 %v22194_v10, %v21942_v17  ;;  %v13628_v41 = vmul.f32 %v22194_v10, %v21934_v9  ;;  %v13658_v14 = vmul.f32 %v22194_v10, %v22157_v21 }
 0x916   : > { %v13659_v52 = vmul.f32 %v22194_v10, %v13356_v0  ;;  %v13631_v17 = vmul.f32 %v22194_v10, %v21939_v62  ;;  %v13630_v21 = vmul.f32 %v22194_v10, %v21931_v35  ;;  %v13632_v62 = vmul.f32 %v22194_v10, %v21962_v11 }
 0x917   : > { %v13623_v63 = vsub.f32 %v13618_v5, %v13622_v2  ;;  %v13633_v4 = vmul.f32 %v22194_v10, %v21973_v42  ;;  %v13634_v35 = vmul.f32 %v22194_v10, %v21965_v22  ;;  %v13635_v11 = vmul.f32 %v22194_v10, %v21976_v1 }
 0x918   : > { %v13636_v54 = vmul.f32 %v22194_v10, %v21993_v46  ;;  %v13637_v5 = vmul.f32 %v22194_v10, %v22004_v55 }
 0x919   : > { %v22196_v32 = vrot.slane %v13623_v63, %v13663_v29 }
 0x91b   : > { %v13667_v48 = vadd.f32 %v22196_v32, %v13629_v61  ;;  %v13666_v16 = vadd.f32 %v22196_v32, %v13628_v41  ;;  %v22218_v60 = vadd.f32 %v22196_v32, %v13658_v14  ;;  %v22221_v53 = vadd.f32 %v22196_v32, %v13659_v52 }
 0x91c   : > { %v13669_v0 = vadd.f32 %v22196_v32, %v13631_v17  ;;  %v13668_v30 = vadd.f32 %v22196_v32, %v13630_v21  ;;  %v13670_v37 = vadd.f32 %v22196_v32, %v13632_v62  ;;  %v13671_v31 = vadd.f32 %v22196_v32, %v13633_v4 }
 0x91d   : > { %v22223_v9 = vmax.f32 %v13667_v48, 0.0  ;;  %v22236_v8 = vmax.f32 %v13666_v16, 0.0  ;;  %v13672_v42 = vadd.f32 %v22196_v32, %v13634_v35  ;;  %v13673_v12 = vadd.f32 %v22196_v32, %v13635_v11 }
 0x91e   : > { %v22242_v24 = vmax.f32 %v13669_v0, 0.0  ;;  %v22249_v3 = vmax.f32 %v13668_v30, 0.0  ;;  %v22254_v22 = vmax.f32 %v13670_v37, 0.0  ;;  %v22256_v58 = vmax.f32 %v13671_v31, 0.0 }
 0x91f   : > { %v13737_v18 = vmul.f32 %v22212_v40, %v22223_v9  ;;  %v13736_v56 = vmul.f32 %v22212_v40, %v22236_v8  ;;  %v13674_v46 = vadd.f32 %v22196_v32, %v13636_v54  ;;  %v22269_v61 = vmax.f32 %v13672_v42, 0.0 }
 0x920   : > { %v13738_v1 = vmul.f32 %v22212_v40, %v22249_v3  ;;  %v13739_v2 = vmul.f32 %v22212_v40, %v22242_v24  ;;  %v13740_v29 = vmul.f32 %v22212_v40, %v22254_v22  ;;  %v13638_v48 = vmul.f32 %v22194_v10, %v21997_v43 }
 0x921   : > { %v13771_v26 = vsel %vm587_vm0, %v13737_v18, 0.0  ;;  %v13768_v36 = vsel %vm587_vm0, %v13736_v56, 0.0  ;;  %v13675_v41 = vadd.f32 %v22196_v32, %v13637_v5  ;;  %v22274_v14 = vmax.f32 %v13673_v12, 0.0 }
 0x922   : > { %13772 = vadd.xlane.f32.xlu0 %v13771_v26  ;;  %13769 = vadd.xlane.f32.xlu1 %v13768_v36  ;;  %v13774_v63 = vsel %vm587_vm0, %v13738_v1, 0.0  ;;  %v13777_v55 = vsel %vm587_vm0, %v13739_v2, 0.0  ;;  %v13741_v52 = vmul.f32 %v22212_v40, %v22256_v58  ;;  %v13639_v17 = vmul.f32 %v22194_v10, %v22008_v20 }
 0x923   : > { %v13676_v16 = vadd.f32 %v22196_v32, %v13638_v48  ;;  %v22282_v21 = vmax.f32 %v13674_v46, 0.0  ;;  %v13780_v43 = vsel %vm587_vm0, %v13740_v29, 0.0  ;;  %v13742_v0 = vmul.f32 %v22212_v40, %v22269_v61 }
 0x924   : > { %v13640_v18 = vmul.f32 %v22194_v10, %v22025_v45  ;;  %v13677_v62 = vadd.f32 %v22196_v32, %v13639_v17  ;;  %v22290_v4 = vmax.f32 %v13675_v41, 0.0  ;;  %v13783_v20 = vsel %vm587_vm0, %v13741_v52, 0.0 }
 0x925   : > { %v13743_v30 = vmul.f32 %v22212_v40, %v22274_v14  ;;  %v13641_v26 = vmul.f32 %v22194_v10, %v22036_v49  ;;  %v22298_v35 = vmax.f32 %v13676_v16, 0.0  ;;  %v13786_v45 = vsel %vm587_vm0, %v13742_v0, 0.0 }
 0x926   : > { %13775 = vadd.xlane.f32.xlu0 %v13774_v63  ;;  %13778 = vadd.xlane.f32.xlu1 %v13777_v55  ;;  %v13678_v37 = vadd.f32 %v22196_v32, %v13640_v18  ;;  %v13744_v31 = vmul.f32 %v22212_v40, %v22282_v21  ;;  %v13642_v11 = vmul.f32 %v22194_v10, %v22029_v13  ;;  %v22306_v56 = vmax.f32 %v13677_v62, 0.0 }
 0x927   : > { %v13679_v42 = vadd.f32 %v22196_v32, %v13641_v26  ;;  %v13789_v49 = vsel %vm587_vm0, %v13743_v30, 0.0  ;;  %v13745_v54 = vmul.f32 %v22212_v40, %v22290_v4  ;;  %v13643_v12 = vmul.f32 %v22194_v10, %v22040_v50 }
 0x928   : > { %v13680_v36 = vadd.f32 %v22196_v32, %v13642_v11  ;;  %v22314_v1 = vmax.f32 %v13678_v37, 0.0  ;;  %v13792_v13 = vsel %vm587_vm0, %v13744_v31, 0.0  ;;  %v13746_v2 = vmul.f32 %v22212_v40, %v22298_v35 }
 0x929   : > { %v13644_v5 = vmul.f32 %v22194_v10, %v22057_v15  ;;  %v13681_v46 = vadd.f32 %v22196_v32, %v13643_v12  ;;  %v22322_v63 = vmax.f32 %v13679_v42, 0.0  ;;  %v13795_v50 = vsel %vm587_vm0, %v13745_v54, 0.0 }
 0x92a   : > { %13781 = vadd.xlane.f32.xlu0 %v13780_v43  ;;  %13784 = vadd.xlane.f32.xlu1 %v13783_v20  ;;  %v13747_v29 = vmul.f32 %v22212_v40, %v22306_v56  ;;  %v13645_v48 = vmul.f32 %v22194_v10, %v22068_v34  ;;  %v22330_v55 = vmax.f32 %v13680_v36, 0.0  ;;  %v13798_v15 = vsel %vm587_vm0, %v13746_v2, 0.0 }
 0x92b   : > { %v13682_v41 = vadd.f32 %v22196_v32, %v13644_v5  ;;  %v13748_v52 = vmul.f32 %v22212_v40, %v22314_v1  ;;  %v13646_v17 = vmul.f32 %v22194_v10, %v22061_v27  ;;  %v22338_v43 = vmax.f32 %v13681_v46, 0.0 }
 0x92c   : > { %v13683_v16 = vadd.f32 %v22196_v32, %v13645_v48  ;;  %v13801_v34 = vsel %vm587_vm0, %v13747_v29, 0.0  ;;  %v13749_v0 = vmul.f32 %v22212_v40, %v22322_v63  ;;  %v13647_v18 = vmul.f32 %v22194_v10, %v22072_v47 }
 0x92d   : > { %v13684_v62 = vadd.f32 %v22196_v32, %v13646_v17  ;;  %v22346_v20 = vmax.f32 %v13682_v41, 0.0  ;;  %v13804_v27 = vsel %vm587_vm0, %v13748_v52, 0.0  ;;  %v13750_v30 = vmul.f32 %v22212_v40, %v22330_v55 }
 0x92e   : > { %13787 = vadd.xlane.f32.xlu0 %v13786_v45  ;;  %13790 = vadd.xlane.f32.xlu1 %v13789_v49  ;;  %v13648_v26 = vmul.f32 %v22194_v10, %v22089_v33  ;;  %v13685_v37 = vadd.f32 %v22196_v32, %v13647_v18  ;;  %v22354_v45 = vmax.f32 %v13683_v16, 0.0  ;;  %v13807_v47 = vsel %vm587_vm0, %v13749_v0, 0.0 }
 0x92f   : > { %v13751_v31 = vmul.f32 %v22212_v40, %v22338_v43  ;;  %v13649_v11 = vmul.f32 %v22194_v10, %v22100_v59  ;;  %v22362_v49 = vmax.f32 %v13684_v62, 0.0  ;;  %v13810_v33 = vsel %vm587_vm0, %v13750_v30, 0.0 }
 0x930   : > { %v13686_v42 = vadd.f32 %v22196_v32, %v13648_v26  ;;  %v13752_v54 = vmul.f32 %v22212_v40, %v22346_v20  ;;  %v13650_v12 = vmul.f32 %v22194_v10, %v22093_v23  ;;  %v13753_v2 = vmul.f32 %v22212_v40, %v22354_v45 }
 0x931   : > { %v13687_v36 = vadd.f32 %v22196_v32, %v13649_v11  ;;  %v13813_v59 = vsel %vm587_vm0, %v13751_v31, 0.0  ;;  %v13651_v5 = vmul.f32 %v22194_v10, %v22104_v25  ;;  %v13754_v29 = vmul.f32 %v22212_v40, %v22362_v49 }
 0x932   : > { %13793 = vadd.xlane.f32.xlu0 %v13792_v13  ;;  %13796 = vadd.xlane.f32.xlu1 %v13795_v50  ;;  %v22370_v13 = vmax.f32 %v13685_v37, 0.0  ;;  %v13688_v46 = vadd.f32 %v22196_v32, %v13650_v12  ;;  %v22378_v50 = vmax.f32 %v13686_v42, 0.0  ;;  %v13816_v23 = vsel %vm587_vm0, %v13752_v54, 0.0 }
 0x933   : > { %v13652_v48 = vmul.f32 %v22194_v10, %v22121_v19  ;;  %v13689_v41 = vadd.f32 %v22196_v32, %v13651_v5  ;;  %v13819_v25 = vsel %vm587_vm0, %v13753_v2, 0.0  ;;  %v13653_v17 = vmul.f32 %v22194_v10, %v22132_v51 }
 0x934   : > { %v13755_v52 = vmul.f32 %v22212_v40, %v22370_v13  ;;  %v13822_v19 = vsel %vm587_vm0, %v13754_v29, 0.0  ;;  %v13756_v0 = vmul.f32 %v22212_v40, %v22378_v50  ;;  %v13654_v18 = vmul.f32 %v22194_v10, %v22125_v38 }
 0x935   : > { %v13690_v16 = vadd.f32 %v22196_v32, %v13652_v48  ;;  %v13691_v62 = vadd.f32 %v22196_v32, %v13653_v17  ;;  %v13655_v26 = vmul.f32 %v22194_v10, %v22136_v28  ;;  %v13656_v11 = vmul.f32 %v22194_v10, %v22153_v44 }
 0x936   : > { %13799 = vadd.xlane.f32.xlu0 %v13798_v15  ;;  %13802 = vadd.xlane.f32.xlu1 %v13801_v34  ;;  %v22386_v15 = vmax.f32 %v13687_v36, 0.0  ;;  %v22394_v34 = vmax.f32 %v13688_v46, 0.0  ;;  %v13825_v51 = vsel %vm587_vm0, %v13755_v52, 0.0  ;;  %v13692_v37 = vadd.f32 %v22196_v32, %v13654_v18 }
 0x937   : > { %v13828_v38 = vsel %vm587_vm0, %v13756_v0, 0.0  ;;  %v13693_v42 = vadd.f32 %v22196_v32, %v13655_v26  ;;  %v13657_v12 = vmul.f32 %v22194_v10, %v22164_v57  ;;  %v13694_v36 = vadd.f32 %v22196_v32, %v13656_v11 }
 0x938   : > { %v13757_v30 = vmul.f32 %v22212_v40, %v22386_v15  ;;  %v13758_v31 = vmul.f32 %v22212_v40, %v22394_v34  ;;  %v22448_v52 = vmax.f32 %v22218_v60, 0.0 }
 0x939   : > { %v13695_v5 = vadd.f32 %v22196_v32, %v13657_v12  ;;  %v22432_v46 = vmax.f32 %v13693_v42, 0.0  ;;  %v22437_v10 = vmax.f32 %v13694_v36, 0.0 }
 0x93a   : > { %13805 = vadd.xlane.f32.xlu0 %v13804_v27  ;;  %13808 = vadd.xlane.f32.xlu1 %v13807_v47  ;;  %v22402_v27 = vmax.f32 %v13689_v41, 0.0  ;;  %v22410_v47 = vmax.f32 %v13690_v16, 0.0  ;;  %v13831_v28 = vsel %vm587_vm0, %v13757_v30, 0.0  ;;  %v13834_v44 = vsel %vm587_vm0, %v13758_v31, 0.0  ;;  %23158 = vst [vmem:[#allocation43_spill] sm:$0xff] %v22448_v52 }
 0x93b   : > { %23155 = vst [vmem:[#allocation25_spill] sm:$0xff] %v22432_v46  ;;  %23156 = vst [vmem:[#allocation45_spill] sm:$0xff] %v22437_v10  ;;  %v22442_v41 = vmax.f32 %v13695_v5, 0.0  ;;  %v13764_v16 = vmul.f32 %v22212_v40, %v22437_v10  ;;  %v13766_v60 = vmul.f32 %v22212_v40, %v22448_v52 }
 0x93c   : > { %23152 = vst [vmem:[#allocation52_spill] sm:$0xff] %v22402_v27  ;;  %v13759_v54 = vmul.f32 %v22212_v40, %v22402_v27  ;;  %v13760_v2 = vmul.f32 %v22212_v40, %v22410_v47 }
 0x93d   : > { %23157 = vst [vmem:[#allocation24_spill] sm:$0xff] %v22442_v41  ;;  %v13765_v18 = vmul.f32 %v22212_v40, %v22442_v41  ;;  %v13858_v26 = vsel %vm587_vm0, %v13766_v60, 0.0 }
 0x93e   : > { %13811 = vadd.xlane.f32.xlu0 %v13810_v33  ;;  %13814 = vadd.xlane.f32.xlu1 %v13813_v59  ;;  %v22418_v33 = vmax.f32 %v13691_v62, 0.0  ;;  %v22426_v59 = vmax.f32 %v13692_v37, 0.0  ;;  %v13840_v29 = vsel %vm587_vm0, %v13760_v2, 0.0  ;;  %v13852_v62 = vsel %vm587_vm0, %v13764_v16, 0.0 }
 0x940   : > { %23153 = vst [vmem:[#allocation27_spill] sm:$0xff] %v22418_v33  ;;  %23154 = vst [vmem:[#allocation50_spill] sm:$0xff] %v22426_v59  ;;  %v13761_v57 = vmul.f32 %v22212_v40, %v22418_v33  ;;  %v13762_v48 = vmul.f32 %v22212_v40, %v22426_v59 }
 0x942   : > { %13817 = vadd.xlane.f32.xlu0 %v13816_v23  ;;  %13820 = vadd.xlane.f32.xlu1 %v13819_v25  ;;  %v13837_v23 = vsel %vm587_vm0, %v13759_v54, 0.0  ;;  %v13843_v32 = vsel %vm587_vm0, %v13761_v57, 0.0  ;;  %v13763_v25 = vmul.f32 %v22212_v40, %v22432_v46  ;;  %v13846_v17 = vsel %vm587_vm0, %v13762_v48, 0.0 }
 0x944   : > { %v13849_v0 = vsel %vm587_vm0, %v13763_v25, 0.0 }
 0x946   : > { %13823 = vadd.xlane.f32.xlu0 %v13822_v19  ;;  %13826 = vadd.xlane.f32.xlu1 %v13825_v51  ;;  %v22454_v19 = vmax.f32 %v22221_v53, 0.0  ;;  %v22465_v51 = vrot.slane %v22203_v6, %v13626_v39  ;;  %v13855_v53 = vsel %vm587_vm0, %v13765_v18, 0.0 }
 0x948   : > { %23159 = vst [vmem:[#allocation31_spill] sm:$0xff] %v22454_v19  ;;  %v13767_v30 = vmul.f32 %v22212_v40, %v22454_v19  ;;  %v13906_v37 = vmul.f32 %v22465_v51, %v22236_v8  ;;  %v13907_v7 = vmul.f32 %v22465_v51, %v22223_v9  ;;  %v13908_v6 = vmul.f32 %v22465_v51, %v22249_v3 }
 0x949   : > { %v13909_v31 = vmul.f32 %v22465_v51, %v22242_v24  ;;  %v13910_v42 = vmul.f32 %v22465_v51, %v22254_v22  ;;  %v13911_v54 = vmul.f32 %v22465_v51, %v22256_v58  ;;  %v13912_v36 = vmul.f32 %v22465_v51, %v22269_v61 }
 0x94a   : > { %13829 = vadd.xlane.f32.xlu0 %v13828_v38  ;;  %13832 = vadd.xlane.f32.xlu1 %v13831_v28  ;;  %v13861_v38 = vsel %vm587_vm0, %v13767_v30, 0.0  ;;  %v13938_v39 = vsel %vm587_vm0, %v13906_v37, 0.0  ;;  %v13941_v40 = vsel %vm587_vm0, %v13907_v7, 0.0  ;;  %v13944_v11 = vsel %vm587_vm0, %v13908_v6, 0.0 }
 0x94b   : > { %v13947_v28 = vsel %vm587_vm0, %v13909_v31, 0.0  ;;  %v13950_v12 = vsel %vm587_vm0, %v13910_v42, 0.0  ;;  %v13913_v2 = vmul.f32 %v22465_v51, %v22274_v14  ;;  %v13956_v5 = vsel %vm587_vm0, %v13912_v36, 0.0 }
 0x94d   : > { %v13959_v57 = vsel %vm587_vm0, %v13913_v2, 0.0 }
 0x94e   : > { %13835 = vadd.xlane.f32.xlu0 %v13834_v44  ;;  %13838 = vadd.xlane.f32.xlu1 %v13837_v23  ;;  %v13953_v44 = vsel %vm587_vm0, %v13911_v54, 0.0  ;;  %v13914_v23 = vmul.f32 %v22465_v51, %v22282_v21 }
 0x950   : > { %v13962_v48 = vsel %vm587_vm0, %v13914_v23, 0.0 }
 0x952   : > { %13841 = vadd.xlane.f32.xlu0 %v13840_v29  ;;  %13844 = vadd.xlane.f32.xlu1 %v13843_v32  ;;  %v13915_v29 = vmul.f32 %v22465_v51, %v22290_v4  ;;  %v13916_v32 = vmul.f32 %v22465_v51, %v22298_v35 }
 0x954   : > { %v13965_v25 = vsel %vm587_vm0, %v13915_v29, 0.0  ;;  %v13968_v16 = vsel %vm587_vm0, %v13916_v32, 0.0 }
 0x956   : > { %13847 = vadd.xlane.f32.xlu0 %v13846_v17  ;;  %13850 = vadd.xlane.f32.xlu1 %v13849_v0  ;;  %v13917_v17 = vmul.f32 %v22465_v51, %v22306_v56  ;;  %v13918_v0 = vmul.f32 %v22465_v51, %v22314_v1 }
 0x958   : > { %v13971_v18 = vsel %vm587_vm0, %v13917_v17, 0.0  ;;  %v13974_v60 = vsel %vm587_vm0, %v13918_v0, 0.0 }
 0x95a   : > { %13853 = vadd.xlane.f32.xlu0 %v13852_v62  ;;  %13856 = vadd.xlane.f32.xlu1 %v13855_v53  ;;  %v13919_v62 = vmul.f32 %v22465_v51, %v22322_v63  ;;  %v13920_v53 = vmul.f32 %v22465_v51, %v22330_v55 }
 0x95c   : > { %v13977_v30 = vsel %vm587_vm0, %v13919_v62, 0.0  ;;  %v13980_v37 = vsel %vm587_vm0, %v13920_v53, 0.0 }
 0x95e   : > { %13859 = vadd.xlane.f32.xlu0 %v13858_v26  ;;  %13862 = vadd.xlane.f32.xlu1 %v13861_v38  ;;  %v13921_v26 = vmul.f32 %v22465_v51, %v22338_v43  ;;  %v13922_v38 = vmul.f32 %v22465_v51, %v22346_v20 }
 0x960   : > { %v13983_v7 = vsel %vm587_vm0, %v13921_v26, 0.0  ;;  %v13986_v6 = vsel %vm587_vm0, %v13922_v38, 0.0 }
 0x962   : > { %13939 = vadd.xlane.f32.xlu0 %v13938_v39  ;;  %13942 = vadd.xlane.f32.xlu1 %v13941_v40  ;;  %v13923_v39 = vmul.f32 %v22465_v51, %v22354_v45  ;;  %v13924_v40 = vmul.f32 %v22465_v51, %v22362_v49 }
 0x964   : > { %v13989_v31 = vsel %vm587_vm0, %v13923_v39, 0.0  ;;  %v13992_v42 = vsel %vm587_vm0, %v13924_v40, 0.0  ;;  %v22571_v39 = vld [vmem:[%s23160_s2] ss:$0 sm:$0xff] }
 0x966   : > { %13945 = vadd.xlane.f32.xlu0 %v13944_v11  ;;  %13948 = vadd.xlane.f32.xlu1 %v13947_v28  ;;  %v13925_v11 = vmul.f32 %v22465_v51, %v22370_v13  ;;  %v13926_v28 = vmul.f32 %v22465_v51, %v22378_v50 }
 0x968   : > { %v13995_v54 = vsel %vm587_vm0, %v13925_v11, 0.0  ;;  %v13998_v36 = vsel %vm587_vm0, %v13926_v28, 0.0 }
 0x96a   : > { %13951 = vadd.xlane.f32.xlu0 %v13950_v12  ;;  %13954 = vadd.xlane.f32.xlu1 %v13953_v44  ;;  %v13927_v12 = vmul.f32 %v22465_v51, %v22386_v15  ;;  %v13928_v44 = vmul.f32 %v22465_v51, %v22394_v34 }
 0x96c   : > { %v14001_v2 = vsel %vm587_vm0, %v13927_v12, 0.0  ;;  %v14004_v23 = vsel %vm587_vm0, %v13928_v44, 0.0 }
 0x96e   : > { %13957 = vadd.xlane.f32.xlu0 %v13956_v5  ;;  %13960 = vadd.xlane.f32.xlu1 %v13959_v57  ;;  %v13929_v5 = vmul.f32 %v22465_v51, %v22402_v27  ;;  %v13930_v57 = vmul.f32 %v22465_v51, %v22410_v47 }
 0x970   : > { %v14007_v29 = vsel %vm587_vm0, %v13929_v5, 0.0  ;;  %v14010_v32 = vsel %vm587_vm0, %v13930_v57, 0.0 }
 0x972   : > { %13963 = vadd.xlane.f32.xlu0 %v13962_v48  ;;  %13966 = vadd.xlane.f32.xlu1 %v13965_v25  ;;  %v13931_v48 = vmul.f32 %v22465_v51, %v22418_v33  ;;  %v13932_v25 = vmul.f32 %v22465_v51, %v22426_v59 }
 0x974   : > { %v14013_v17 = vsel %vm587_vm0, %v13931_v48, 0.0  ;;  %v14016_v0 = vsel %vm587_vm0, %v13932_v25, 0.0 }
 0x976   : > { %13969 = vadd.xlane.f32.xlu0 %v13968_v16  ;;  %13972 = vadd.xlane.f32.xlu1 %v13971_v18  ;;  %v13933_v16 = vmul.f32 %v22465_v51, %v22432_v46  ;;  %v13934_v18 = vmul.f32 %v22465_v51, %v22437_v10 }
 0x978   : > { %v14019_v62 = vsel %vm587_vm0, %v13933_v16, 0.0  ;;  %v14022_v53 = vsel %vm587_vm0, %v13934_v18, 0.0 }
 0x97a   : > { %13975 = vadd.xlane.f32.xlu0 %v13974_v60  ;;  %13978 = vadd.xlane.f32.xlu1 %v13977_v30  ;;  %v13935_v60 = vmul.f32 %v22465_v51, %v22442_v41  ;;  %v13936_v30 = vmul.f32 %v22465_v51, %v22448_v52  ;;  %v18391_v52 = vld [vmem:[%s19056_s28] sm:$0xff] }
 0x97c   : > { %v14025_v26 = vsel %vm587_vm0, %v13935_v60, 0.0  ;;  %v14028_v38 = vsel %vm587_vm0, %v13936_v30, 0.0 }
 0x97e   : > { %13981 = vadd.xlane.f32.xlu0 %v13980_v37  ;;  %13984 = vadd.xlane.f32.xlu1 %v13983_v7  ;;  %v13937_v37 = vmul.f32 %v22465_v51, %v22454_v19 }
 0x980   : > { %v14031_v7 = vsel %vm587_vm0, %v13937_v37, 0.0 }
 0x982   : > { %13987 = vadd.xlane.f32.xlu0 %v13986_v6  ;;  %13990 = vadd.xlane.f32.xlu1 %v13989_v31 }
 0x986   : > { %13993 = vadd.xlane.f32.xlu0 %v13992_v42  ;;  %13996 = vadd.xlane.f32.xlu1 %v13995_v54 }
 0x98a   : > { %13999 = vadd.xlane.f32.xlu0 %v13998_v36  ;;  %14002 = vadd.xlane.f32.xlu1 %v14001_v2 }
 0x98e   : > { %14005 = vadd.xlane.f32.xlu0 %v14004_v23  ;;  %14008 = vadd.xlane.f32.xlu1 %v14007_v29 }
 0x992   : > { %14011 = vadd.xlane.f32.xlu0 %v14010_v32  ;;  %14014 = vadd.xlane.f32.xlu1 %v14013_v17 }
 0x996   : > { %14017 = vadd.xlane.f32.xlu0 %v14016_v0  ;;  %14020 = vadd.xlane.f32.xlu1 %v14019_v62 }
 0x99a   : > { %14023 = vadd.xlane.f32.xlu0 %v14022_v53  ;;  %14026 = vadd.xlane.f32.xlu1 %v14025_v26 }
 0x99e   : > { %14029 = vadd.xlane.f32.xlu0 %v14028_v38  ;;  %14032 = vadd.xlane.f32.xlu1 %v14031_v7 }
 0x9af   : > { %v13773_v6 = vpop.xlane.xlu0 %13772  ;;  %v13770_v42 = vpop.xlane.xlu1 %13769 }
 0x9b0   : > { %v13871_v40 = vadd.f32 %v22571_v39, %v13773_v6  ;;  %v13870_v51 = vadd.f32 %v22571_v39, %v13770_v42 }
 0x9b2   : > { %v14067_v31 = vadd.f32 3.0, %v13871_v40  ;;  %v14066_v36 = vadd.f32 3.0, %v13870_v51 }
 0x9b3   : > { %v13776_v54 = vpop.xlane.xlu0 %13775  ;;  %v13779_v2 = vpop.xlane.xlu1 %13778 }
 0x9b4   : > { %v14099_v11 = vmax.f32 %v14067_v31, 0.0  ;;  %v13872_v44 = vadd.f32 %v22571_v39, %v13776_v54  ;;  %v14098_v5 = vmax.f32 %v14066_v36, 0.0  ;;  %v13873_v57 = vadd.f32 %v22571_v39, %v13779_v2 }
 0x9b6   : > { %v14131_v28 = vmin.f32 %v14099_v11, 6.0  ;;  %v14068_v23 = vadd.f32 3.0, %v13872_v44  ;;  %v14130_v48 = vmin.f32 %v14098_v5, 6.0  ;;  %v14069_v25 = vadd.f32 3.0, %v13873_v57 }
 0x9b7   : > { %v13782_v29 = vpop.xlane.xlu0 %13781  ;;  %v13785_v16 = vpop.xlane.xlu1 %13784 }
 0x9b8   : > { %v14163_v12 = vmul.f32 0.16666667, %v14131_v28  ;;  %v14100_v32 = vmax.f32 %v14068_v23, 0.0  ;;  %v13874_v17 = vadd.f32 %v22571_v39, %v13782_v29  ;;  %v14162_v0 = vmul.f32 0.16666667, %v14130_v48 }
 0x9b9   : > { %v14101_v62 = vmax.f32 %v14069_v25, 0.0  ;;  %v13875_v53 = vadd.f32 %v22571_v39, %v13785_v16 }
 0x9ba   : > { %14329 = vperm.xlu1 %18098, %v14163_v12   ;;  %v14132_v18 = vmin.f32 %v14100_v32, 6.0  ;;  %v14070_v60 = vadd.f32 3.0, %v13874_v17  ;;  %14324 = vperm.xlu0 %18097, %v14162_v0  }
 0x9bb   : > { %v13788_v30 = vpop.xlane.xlu0 %13787  ;;  %v14133_v37 = vmin.f32 %v14101_v62, 6.0  ;;  %v14071_v6 = vadd.f32 3.0, %v13875_v53  ;;  %v13791_v40 = vpop.xlane.xlu1 %13790 }
 0x9bc   : > { %v14164_v26 = vmul.f32 0.16666667, %v14132_v18  ;;  %v14102_v38 = vmax.f32 %v14070_v60, 0.0  ;;  %v13876_v7 = vadd.f32 %v22571_v39, %v13788_v30  ;;  %v13877_v28 = vadd.f32 %v22571_v39, %v13791_v40 }
 0x9bd   : > { %v14165_v31 = vmul.f32 0.16666667, %v14133_v37  ;;  %v14103_v51 = vmax.f32 %v14071_v6, 0.0 }
 0x9be   : > { %v14134_v11 = vmin.f32 %v14102_v38, 6.0  ;;  %v14072_v42 = vadd.f32 3.0, %v13876_v7  ;;  %14334 = vperm.xlu1 %18098, %v14164_v26   ;;  %v14073_v44 = vadd.f32 3.0, %v13877_v28 }
 0x9bf   : > { %v13794_v54 = vpop.xlane.xlu0 %13793  ;;  %14339 = vperm.xlu0 %18097, %v14165_v31   ;;  %v14135_v5 = vmin.f32 %v14103_v51, 6.0  ;;  %v13797_v23 = vpop.xlane.xlu1 %13796 }
 0x9c0   : > { %v14166_v12 = vmul.f32 0.16666667, %v14134_v11  ;;  %v14104_v36 = vmax.f32 %v14072_v42, 0.0  ;;  %v13878_v2 = vadd.f32 %v22571_v39, %v13794_v54  ;;  %v14105_v29 = vmax.f32 %v14073_v44, 0.0 }
 0x9c1   : > { %v13879_v32 = vadd.f32 %v22571_v39, %v13797_v23  ;;  %v14167_v25 = vmul.f32 0.16666667, %v14135_v5 }
 0x9c2   : > { %v14136_v57 = vmin.f32 %v14104_v36, 6.0  ;;  %v14074_v48 = vadd.f32 3.0, %v13878_v2  ;;  %14344 = vperm.xlu1 %18098, %v14166_v12   ;;  %v14137_v0 = vmin.f32 %v14105_v29, 6.0 }
 0x9c3   : > { %v13800_v17 = vpop.xlane.xlu0 %13799  ;;  %v14075_v62 = vadd.f32 3.0, %v13879_v32  ;;  %14349 = vperm.xlu0 %18097, %v14167_v25   ;;  %v13803_v53 = vpop.xlane.xlu1 %13802 }
 0x9c4   : > { %v14168_v16 = vmul.f32 0.16666667, %v14136_v57  ;;  %v14106_v18 = vmax.f32 %v14074_v48, 0.0  ;;  %v13880_v60 = vadd.f32 %v22571_v39, %v13800_v17  ;;  %v14169_v30 = vmul.f32 0.16666667, %v14137_v0 }
 0x9c5   : > { %v14107_v37 = vmax.f32 %v14075_v62, 0.0  ;;  %v13881_v38 = vadd.f32 %v22571_v39, %v13803_v53 }
 0x9c6   : > { %v14138_v26 = vmin.f32 %v14106_v18, 6.0  ;;  %14354 = vperm.xlu1 %18098, %v14168_v16   ;;  %v14076_v7 = vadd.f32 3.0, %v13880_v60 }
 0x9c7   : > { %v13806_v6 = vpop.xlane.xlu0 %13805  ;;  %v14139_v31 = vmin.f32 %v14107_v37, 6.0  ;;  %v14077_v11 = vadd.f32 3.0, %v13881_v38  ;;  %14359 = vperm.xlu0 %18097, %v14169_v30   ;;  %v13809_v51 = vpop.xlane.xlu1 %13808 }
 0x9c8   : > { %v14170_v40 = vmul.f32 0.16666667, %v14138_v26  ;;  %v13882_v42 = vadd.f32 %v22571_v39, %v13806_v6  ;;  %v14108_v28 = vmax.f32 %v14076_v7, 0.0  ;;  %v13883_v44 = vadd.f32 %v22571_v39, %v13809_v51 }
 0x9c9   : > { %v14171_v54 = vmul.f32 0.16666667, %v14139_v31  ;;  %v14109_v12 = vmax.f32 %v14077_v11, 0.0 }
 0x9ca   : > { %v14078_v36 = vadd.f32 3.0, %v13882_v42  ;;  %14364 = vperm.xlu1 %18098, %v14170_v40   ;;  %v14140_v2 = vmin.f32 %v14108_v28, 6.0  ;;  %v14079_v29 = vadd.f32 3.0, %v13883_v44 }
 0x9cb   : > { %v13812_v5 = vpop.xlane.xlu0 %13811  ;;  %v14141_v23 = vmin.f32 %v14109_v12, 6.0  ;;  %14369 = vperm.xlu0 %18097, %v14171_v54   ;;  %v13815_v25 = vpop.xlane.xlu1 %13814 }
 0x9cc   : > { %v14110_v57 = vmax.f32 %v14078_v36, 0.0  ;;  %v13884_v48 = vadd.f32 %v22571_v39, %v13812_v5  ;;  %v14172_v32 = vmul.f32 0.16666667, %v14140_v2  ;;  %v14111_v0 = vmax.f32 %v14079_v29, 0.0 }
 0x9cd   : > { %v14173_v17 = vmul.f32 0.16666667, %v14141_v23  ;;  %v13885_v62 = vadd.f32 %v22571_v39, %v13815_v25 }
 0x9ce   : > { %v14142_v16 = vmin.f32 %v14110_v57, 6.0  ;;  %v14080_v18 = vadd.f32 3.0, %v13884_v48  ;;  %14374 = vperm.xlu1 %18098, %v14172_v32   ;;  %v14143_v30 = vmin.f32 %v14111_v0, 6.0 }
 0x9cf   : > { %v13818_v60 = vpop.xlane.xlu0 %13817  ;;  %v14081_v38 = vadd.f32 3.0, %v13885_v62  ;;  %14379 = vperm.xlu0 %18097, %v14173_v17   ;;  %v13821_v7 = vpop.xlane.xlu1 %13820 }
 0x9d0   : > { %v14174_v53 = vmul.f32 0.16666667, %v14142_v16  ;;  %v14112_v26 = vmax.f32 %v14080_v18, 0.0  ;;  %v13886_v37 = vadd.f32 %v22571_v39, %v13818_v60  ;;  %v14175_v6 = vmul.f32 0.16666667, %v14143_v30 }
 0x9d1   : > { %v13887_v11 = vadd.f32 %v22571_v39, %v13821_v7  ;;  %v14113_v42 = vmax.f32 %v14081_v38, 0.0 }
 0x9d2   : > { %v14144_v40 = vmin.f32 %v14112_v26, 6.0  ;;  %v14082_v31 = vadd.f32 3.0, %v13886_v37  ;;  %14384 = vperm.xlu1 %18098, %v14174_v53  }
 0x9d3   : > { %v13824_v28 = vpop.xlane.xlu0 %13823  ;;  %v14083_v12 = vadd.f32 3.0, %v13887_v11  ;;  %v14145_v44 = vmin.f32 %v14113_v42, 6.0  ;;  %14389 = vperm.xlu0 %18097, %v14175_v6   ;;  %v13827_v2 = vpop.xlane.xlu1 %13826 }
 0x9d4   : > { %v14176_v51 = vmul.f32 0.16666667, %v14144_v40  ;;  %v14114_v54 = vmax.f32 %v14082_v31, 0.0  ;;  %v13888_v36 = vadd.f32 %v22571_v39, %v13824_v28  ;;  %v13889_v29 = vadd.f32 %v22571_v39, %v13827_v2 }
 0x9d5   : > { %v14115_v23 = vmax.f32 %v14083_v12, 0.0  ;;  %v14177_v48 = vmul.f32 0.16666667, %v14145_v44 }
 0x9d6   : > { %v14146_v5 = vmin.f32 %v14114_v54, 6.0  ;;  %v14084_v57 = vadd.f32 3.0, %v13888_v36  ;;  %14394 = vperm.xlu1 %18098, %v14176_v51   ;;  %v14085_v0 = vadd.f32 3.0, %v13889_v29 }
 0x9d7   : > { %v13830_v32 = vpop.xlane.xlu0 %13829  ;;  %v14147_v17 = vmin.f32 %v14115_v23, 6.0  ;;  %14399 = vperm.xlu0 %18097, %v14177_v48   ;;  %v13833_v62 = vpop.xlane.xlu1 %13832 }
 0x9d8   : > { %v14178_v25 = vmul.f32 0.16666667, %v14146_v5  ;;  %v14116_v16 = vmax.f32 %v14084_v57, 0.0  ;;  %v13890_v18 = vadd.f32 %v22571_v39, %v13830_v32  ;;  %v14117_v30 = vmax.f32 %v14085_v0, 0.0 }
 0x9d9   : > { %v14179_v60 = vmul.f32 0.16666667, %v14147_v17  ;;  %v13891_v26 = vadd.f32 %v22571_v39, %v13833_v62 }
 0x9da   : > { %v14148_v53 = vmin.f32 %v14116_v16, 6.0  ;;  %v14086_v37 = vadd.f32 3.0, %v13890_v18  ;;  %14404 = vperm.xlu1 %18098, %v14178_v25   ;;  %v14149_v6 = vmin.f32 %v14117_v30, 6.0 }
 0x9db   : > { %v13836_v38 = vpop.xlane.xlu0 %13835  ;;  %v14087_v40 = vadd.f32 3.0, %v13891_v26  ;;  %14409 = vperm.xlu0 %18097, %v14179_v60   ;;  %v13839_v42 = vpop.xlane.xlu1 %13838 }
 0x9dc   : > { %v14180_v7 = vmul.f32 0.16666667, %v14148_v53  ;;  %v13892_v31 = vadd.f32 %v22571_v39, %v13836_v38  ;;  %v14118_v11 = vmax.f32 %v14086_v37, 0.0  ;;  %v14181_v28 = vmul.f32 0.16666667, %v14149_v6 }
 0x9dd   : > { %v14119_v51 = vmax.f32 %v14087_v40, 0.0  ;;  %v13893_v12 = vadd.f32 %v22571_v39, %v13839_v42 }
 0x9de   : > { %v14088_v54 = vadd.f32 3.0, %v13892_v31  ;;  %v14150_v36 = vmin.f32 %v14118_v11, 6.0  ;;  %14414 = vperm.xlu1 %18098, %v14180_v7  }
 0x9df   : > { %v13842_v44 = vpop.xlane.xlu0 %13841  ;;  %v14151_v2 = vmin.f32 %v14119_v51, 6.0  ;;  %v14089_v23 = vadd.f32 3.0, %v13893_v12  ;;  %14419 = vperm.xlu0 %18097, %v14181_v28   ;;  %v13845_v48 = vpop.xlane.xlu1 %13844 }
 0x9e0   : > { %v14120_v5 = vmax.f32 %v14088_v54, 0.0  ;;  %v13894_v57 = vadd.f32 %v22571_v39, %v13842_v44  ;;  %v14182_v29 = vmul.f32 0.16666667, %v14150_v36  ;;  %v13895_v0 = vadd.f32 %v22571_v39, %v13845_v48 }
 0x9e1   : > { %v14183_v32 = vmul.f32 0.16666667, %v14151_v2  ;;  %v14121_v17 = vmax.f32 %v14089_v23, 0.0 }
 0x9e2   : > { %v14152_v25 = vmin.f32 %v14120_v5, 6.0  ;;  %v14090_v16 = vadd.f32 3.0, %v13894_v57  ;;  %14424 = vperm.xlu1 %18098, %v14182_v29   ;;  %v14091_v26 = vadd.f32 3.0, %v13895_v0 }
 0x9e3   : > { %v13848_v18 = vpop.xlane.xlu0 %13847  ;;  %v14153_v60 = vmin.f32 %v14121_v17, 6.0  ;;  %14429 = vperm.xlu0 %18097, %v14183_v32   ;;  %v13851_v37 = vpop.xlane.xlu1 %13850 }
 0x9e4   : > { %v14184_v62 = vmul.f32 0.16666667, %v14152_v25  ;;  %v14122_v53 = vmax.f32 %v14090_v16, 0.0  ;;  %v13896_v30 = vadd.f32 %v22571_v39, %v13848_v18  ;;  %v13897_v40 = vadd.f32 %v22571_v39, %v13851_v37 }
 0x9e5   : > { %v14185_v38 = vmul.f32 0.16666667, %v14153_v60  ;;  %v14123_v31 = vmax.f32 %v14091_v26, 0.0 }
 0x9e6   : > { %v14154_v7 = vmin.f32 %v14122_v53, 6.0  ;;  %v14092_v6 = vadd.f32 3.0, %v13896_v30  ;;  %14434 = vperm.xlu1 %18098, %v14184_v62   ;;  %v14093_v51 = vadd.f32 3.0, %v13897_v40 }
 0x9e7   : > { %v13854_v11 = vpop.xlane.xlu0 %13853  ;;  %v14155_v12 = vmin.f32 %v14123_v31, 6.0  ;;  %14439 = vperm.xlu0 %18097, %v14185_v38   ;;  %v13857_v36 = vpop.xlane.xlu1 %13856 }
 0x9e8   : > { %v14186_v42 = vmul.f32 0.16666667, %v14154_v7  ;;  %v14124_v28 = vmax.f32 %v14092_v6, 0.0  ;;  %v13898_v54 = vadd.f32 %v22571_v39, %v13854_v11  ;;  %v14125_v2 = vmax.f32 %v14093_v51, 0.0 }
 0x9e9   : > { %v13899_v23 = vadd.f32 %v22571_v39, %v13857_v36  ;;  %v14187_v57 = vmul.f32 0.16666667, %v14155_v12 }
 0x9ea   : > { %v14156_v44 = vmin.f32 %v14124_v28, 6.0  ;;  %v14094_v5 = vadd.f32 3.0, %v13898_v54  ;;  %14444 = vperm.xlu1 %18098, %v14186_v42   ;;  %v14157_v32 = vmin.f32 %v14125_v2, 6.0 }
 0x9eb   : > { %v13860_v29 = vpop.xlane.xlu0 %13859  ;;  %v14095_v17 = vadd.f32 3.0, %v13899_v23  ;;  %14449 = vperm.xlu0 %18097, %v14187_v57   ;;  %v13863_v0 = vpop.xlane.xlu1 %13862 }
 0x9ec   : > { %v14188_v48 = vmul.f32 0.16666667, %v14156_v44  ;;  %v14126_v25 = vmax.f32 %v14094_v5, 0.0  ;;  %v13900_v16 = vadd.f32 %v22571_v39, %v13860_v29  ;;  %v14189_v18 = vmul.f32 0.16666667, %v14157_v32 }
 0x9ed   : > { %v14127_v60 = vmax.f32 %v14095_v17, 0.0  ;;  %v13901_v53 = vadd.f32 %v22571_v39, %v13863_v0 }
 0x9ee   : > { %v14158_v62 = vmin.f32 %v14126_v25, 6.0  ;;  %v14096_v30 = vadd.f32 3.0, %v13900_v16  ;;  %14454 = vperm.xlu1 %18098, %v14188_v48  }
 0x9ef   : > { %v13940_v26 = vpop.xlane.xlu0 %13939  ;;  %v14159_v38 = vmin.f32 %v14127_v60, 6.0  ;;  %v14097_v7 = vadd.f32 3.0, %v13901_v53  ;;  %14459 = vperm.xlu0 %18097, %v14189_v18   ;;  %v13943_v31 = vpop.xlane.xlu1 %13942 }
 0x9f0   : > { %v14190_v37 = vmul.f32 0.16666667, %v14158_v62  ;;  %v14034_v6 = vadd.f32 %v22571_v39, %v13940_v26  ;;  %v14128_v40 = vmax.f32 %v14096_v30, 0.0  ;;  %v14035_v51 = vadd.f32 %v22571_v39, %v13943_v31 }
 0x9f1   : > { %v14191_v11 = vmul.f32 0.16666667, %v14159_v38  ;;  %v14129_v42 = vmax.f32 %v14097_v7, 0.0 }
 0x9f2   : > { %v14194_v28 = vadd.f32 3.0, %v14034_v6  ;;  %v14160_v54 = vmin.f32 %v14128_v40, 6.0  ;;  %14464 = vperm.xlu1 %18098, %v14190_v37   ;;  %v14195_v2 = vadd.f32 3.0, %v14035_v51  ;;  %v18693_v40 = vmov 1  }
 0x9f3   : > { %v13946_v12 = vpop.xlane.xlu0 %13945  ;;  %v14161_v36 = vmin.f32 %v14129_v42, 6.0  ;;  %14469 = vperm.xlu0 %18097, %v14191_v11   ;;  %v13949_v57 = vpop.xlane.xlu1 %13948 }
 0x9f4   : > { %v14226_v44 = vmax.f32 %v14194_v28, 0.0  ;;  %v14036_v5 = vadd.f32 %v22571_v39, %v13946_v12  ;;  %v14192_v23 = vmul.f32 0.16666667, %v14160_v54  ;;  %v14227_v32 = vmax.f32 %v14195_v2, 0.0 }
 0x9f5   : > { %v14193_v29 = vmul.f32 0.16666667, %v14161_v36  ;;  %v14037_v17 = vadd.f32 %v22571_v39, %v13949_v57 }
 0x9f6   : > { %v14258_v48 = vmin.f32 %v14226_v44, 6.0  ;;  %v14196_v25 = vadd.f32 3.0, %v14036_v5  ;;  %14474 = vperm.xlu1 %18098, %v14192_v23   ;;  %v14259_v18 = vmin.f32 %v14227_v32, 6.0 }
 0x9f7   : > { %v13952_v16 = vpop.xlane.xlu0 %13951  ;;  %v14197_v53 = vadd.f32 3.0, %v14037_v17  ;;  %14479 = vperm.xlu0 %18097, %v14193_v29   ;;  %v13955_v30 = vpop.xlane.xlu1 %13954 }
 0x9f8   : > { %v14290_v0 = vmul.f32 0.16666667, %v14258_v48  ;;  %v14228_v62 = vmax.f32 %v14196_v25, 0.0  ;;  %v14038_v60 = vadd.f32 %v22571_v39, %v13952_v16  ;;  %v14291_v26 = vmul.f32 0.16666667, %v14259_v18 }
 0x9f9   : > { %v14039_v7 = vadd.f32 %v22571_v39, %v13955_v30  ;;  %v14229_v6 = vmax.f32 %v14197_v53, 0.0 }
 0x9fa   : > { %v14260_v37 = vmin.f32 %v14228_v62, 6.0  ;;  %v14198_v38 = vadd.f32 3.0, %v14038_v60  ;;  %18099 = vset.pattern.permute.xlu1 %v18693_v40 }
 0x9fb   : > { %v13958_v31 = vpop.xlane.xlu0 %13957  ;;  %v14199_v28 = vadd.f32 3.0, %v14039_v7  ;;  %14516 = vperm.xlu1 %18099, %v14290_v0   ;;  %v14261_v54 = vmin.f32 %v14229_v6, 6.0  ;;  %18100 = vset.pattern.permute.xlu0 %v18693_v40  ;;  %v13961_v12 = vpop.xlane.xlu1 %13960 }
 0x9fc   : > { %v14292_v11 = vmul.f32 0.16666667, %v14260_v37  ;;  %v14230_v42 = vmax.f32 %v14198_v38, 0.0  ;;  %v14040_v51 = vadd.f32 %v22571_v39, %v13958_v31  ;;  %14521 = vperm.xlu0 %18100, %v14291_v26   ;;  %v14041_v5 = vadd.f32 %v22571_v39, %v13961_v12 }
 0x9fd   : > { %v14231_v44 = vmax.f32 %v14199_v28, 0.0  ;;  %v14293_v32 = vmul.f32 0.16666667, %v14261_v54 }
 0x9fe   : > { %v14262_v36 = vmin.f32 %v14230_v42, 6.0  ;;  %v14200_v2 = vadd.f32 3.0, %v14040_v51  ;;  %v14201_v48 = vadd.f32 3.0, %v14041_v5 }
 0x9ff   : > { %v13964_v23 = vpop.xlane.xlu0 %13963  ;;  %14526 = vperm.xlu1 %18099, %v14292_v11   ;;  %v13967_v17 = vpop.xlane.xlu1 %13966  ;;  %v14263_v16 = vmin.f32 %v14231_v44, 6.0 }
 0xa00   : > { %v14294_v57 = vmul.f32 0.16666667, %v14262_v36  ;;  %v14232_v29 = vmax.f32 %v14200_v2, 0.0  ;;  %v14042_v25 = vadd.f32 %v22571_v39, %v13964_v23  ;;  %v14233_v18 = vmax.f32 %v14201_v48, 0.0 }
 0xa01   : > { %v14043_v62 = vadd.f32 %v22571_v39, %v13967_v17  ;;  %v14295_v40 = vmul.f32 0.16666667, %v14263_v16 }
 0xa02   : > { %v14264_v0 = vmin.f32 %v14232_v29, 6.0  ;;  %14536 = vperm.xlu0 %18100, %v14294_v57   ;;  %v14202_v60 = vadd.f32 3.0, %v14042_v25  ;;  %v14265_v38 = vmin.f32 %v14233_v18, 6.0 }
 0xa03   : > { %v13970_v53 = vpop.xlane.xlu0 %13969  ;;  %v14203_v26 = vadd.f32 3.0, %v14043_v62  ;;  %14531 = vperm.xlu1 %18099, %v14293_v32   ;;  %v13973_v6 = vpop.xlane.xlu1 %13972 }
 0xa04   : > { %v14296_v30 = vmul.f32 0.16666667, %v14264_v0  ;;  %v14044_v37 = vadd.f32 %v22571_v39, %v13970_v53  ;;  %v14234_v7 = vmax.f32 %v14202_v60, 0.0  ;;  %v14045_v42 = vadd.f32 %v22571_v39, %v13973_v6 }
 0xa05   : > { %v14235_v31 = vmax.f32 %v14203_v26, 0.0  ;;  %v14297_v44 = vmul.f32 0.16666667, %v14265_v38 }
 0xa06   : > { %v14204_v11 = vadd.f32 3.0, %v14044_v37  ;;  %14546 = vperm.xlu0 %18100, %v14296_v30   ;;  %v14266_v28 = vmin.f32 %v14234_v7, 6.0  ;;  %v14205_v12 = vadd.f32 3.0, %v14045_v42 }
 0xa07   : > { %v13976_v51 = vpop.xlane.xlu0 %13975  ;;  %14541 = vperm.xlu1 %18099, %v14295_v40   ;;  %v13979_v5 = vpop.xlane.xlu1 %13978  ;;  %v14267_v23 = vmin.f32 %v14235_v31, 6.0 }
 0xa08   : > { %v14236_v54 = vmax.f32 %v14204_v11, 0.0  ;;  %v14046_v36 = vadd.f32 %v22571_v39, %v13976_v51  ;;  %v14298_v2 = vmul.f32 0.16666667, %v14266_v28  ;;  %v14237_v29 = vmax.f32 %v14205_v12, 0.0 }
 0xa09   : > { %v14047_v32 = vadd.f32 %v22571_v39, %v13979_v5  ;;  %v14299_v53 = vmul.f32 0.16666667, %v14267_v23 }
 0xa0a   : > { %v14268_v57 = vmin.f32 %v14236_v54, 6.0  ;;  %v14206_v48 = vadd.f32 3.0, %v14046_v36  ;;  %14556 = vperm.xlu0 %18100, %v14298_v2   ;;  %v14269_v18 = vmin.f32 %v14237_v29, 6.0 }
 0xa0b   : > { %v13982_v25 = vpop.xlane.xlu0 %13981  ;;  %14551 = vperm.xlu1 %18099, %v14297_v44   ;;  %v14207_v62 = vadd.f32 3.0, %v14047_v32  ;;  %v13985_v60 = vpop.xlane.xlu1 %13984 }
 0xa0c   : > { %v14300_v17 = vmul.f32 0.16666667, %v14268_v57  ;;  %v14238_v16 = vmax.f32 %v14206_v48, 0.0  ;;  %v14048_v0 = vadd.f32 %v22571_v39, %v13982_v25  ;;  %v14049_v37 = vadd.f32 %v22571_v39, %v13985_v60 }
 0xa0d   : > { %v14239_v38 = vmax.f32 %v14207_v62, 0.0  ;;  %v14301_v42 = vmul.f32 0.16666667, %v14269_v18 }
 0xa0e   : > { %v14270_v30 = vmin.f32 %v14238_v16, 6.0  ;;  %v14208_v26 = vadd.f32 3.0, %v14048_v0  ;;  %14566 = vperm.xlu0 %18100, %v14300_v17   ;;  %v14209_v31 = vadd.f32 3.0, %v14049_v37 }
 0xa0f   : > { %v13988_v7 = vpop.xlane.xlu0 %13987  ;;  %14561 = vperm.xlu1 %18099, %v14299_v53   ;;  %v14271_v28 = vmin.f32 %v14239_v38, 6.0  ;;  %v13991_v51 = vpop.xlane.xlu1 %13990 }
 0xa10   : > { %v14302_v6 = vmul.f32 0.16666667, %v14270_v30  ;;  %v14240_v40 = vmax.f32 %v14208_v26, 0.0  ;;  %v14050_v11 = vadd.f32 %v22571_v39, %v13988_v7  ;;  %v14241_v12 = vmax.f32 %v14209_v31, 0.0 }
 0xa11   : > { %v14051_v44 = vadd.f32 %v22571_v39, %v13991_v51  ;;  %v14303_v29 = vmul.f32 0.16666667, %v14271_v28 }
 0xa12   : > { %v14272_v54 = vmin.f32 %v14240_v40, 6.0  ;;  %v14210_v36 = vadd.f32 3.0, %v14050_v11  ;;  %14576 = vperm.xlu0 %18100, %v14302_v6   ;;  %v14273_v25 = vmin.f32 %v14241_v12, 6.0 }
 0xa13   : > { %v13994_v2 = vpop.xlane.xlu0 %13993  ;;  %v14211_v57 = vadd.f32 3.0, %v14051_v44  ;;  %14571 = vperm.xlu1 %18099, %v14301_v42   ;;  %v13997_v32 = vpop.xlane.xlu1 %13996 }
 0xa14   : > { %v14304_v5 = vmul.f32 0.16666667, %v14272_v54  ;;  %v14242_v23 = vmax.f32 %v14210_v36, 0.0  ;;  %v14052_v48 = vadd.f32 %v22571_v39, %v13994_v2  ;;  %v14053_v0 = vadd.f32 %v22571_v39, %v13997_v32 }
 0xa15   : > { %v14243_v16 = vmax.f32 %v14211_v57, 0.0  ;;  %v14305_v7 = vmul.f32 0.16666667, %v14273_v25 }
 0xa16   : > { %v14274_v17 = vmin.f32 %v14242_v23, 6.0  ;;  %v14212_v18 = vadd.f32 3.0, %v14052_v48  ;;  %14586 = vperm.xlu0 %18100, %v14304_v5   ;;  %v14213_v53 = vadd.f32 3.0, %v14053_v0 }
 0xa17   : > { %v14000_v62 = vpop.xlane.xlu0 %13999  ;;  %14581 = vperm.xlu1 %18099, %v14303_v29   ;;  %v14275_v26 = vmin.f32 %v14243_v16, 6.0  ;;  %v14003_v38 = vpop.xlane.xlu1 %14002 }
 0xa18   : > { %v14306_v60 = vmul.f32 0.16666667, %v14274_v17  ;;  %v14054_v30 = vadd.f32 %v22571_v39, %v14000_v62  ;;  %v14244_v37 = vmax.f32 %v14212_v18, 0.0  ;;  %v14245_v6 = vmax.f32 %v14213_v53, 0.0 }
 0xa19   : > { %v14055_v31 = vadd.f32 %v22571_v39, %v14003_v38  ;;  %v14307_v12 = vmul.f32 0.16666667, %v14275_v26 }
 0xa1a   : > { %v14214_v40 = vadd.f32 3.0, %v14054_v30  ;;  %v14276_v11 = vmin.f32 %v14244_v37, 6.0  ;;  %14596 = vperm.xlu0 %18100, %v14306_v60   ;;  %v14277_v2 = vmin.f32 %v14245_v6, 6.0 }
 0xa1b   : > { %v14006_v42 = vpop.xlane.xlu0 %14005  ;;  %v14215_v51 = vadd.f32 3.0, %v14055_v31  ;;  %14591 = vperm.xlu1 %18099, %v14305_v7   ;;  %v14009_v44 = vpop.xlane.xlu1 %14008 }
 0xa1c   : > { %v14246_v28 = vmax.f32 %v14214_v40, 0.0  ;;  %v14056_v54 = vadd.f32 %v22571_v39, %v14006_v42  ;;  %v14308_v36 = vmul.f32 0.16666667, %v14276_v11  ;;  %v14057_v29 = vadd.f32 %v22571_v39, %v14009_v44 }
 0xa1d   : > { %v14247_v23 = vmax.f32 %v14215_v51, 0.0  ;;  %v14309_v62 = vmul.f32 0.16666667, %v14277_v2 }
 0xa1e   : > { %v14278_v5 = vmin.f32 %v14246_v28, 6.0  ;;  %v14216_v57 = vadd.f32 3.0, %v14056_v54  ;;  %14606 = vperm.xlu0 %18100, %v14308_v36   ;;  %v14217_v0 = vadd.f32 3.0, %v14057_v29 }
 0xa1f   : > { %v14012_v48 = vpop.xlane.xlu0 %14011  ;;  %14601 = vperm.xlu1 %18099, %v14307_v12   ;;  %v14279_v16 = vmin.f32 %v14247_v23, 6.0  ;;  %v14015_v18 = vpop.xlane.xlu1 %14014 }
 0xa20   : > { %v14310_v32 = vmul.f32 0.16666667, %v14278_v5  ;;  %v14248_v25 = vmax.f32 %v14216_v57, 0.0  ;;  %v14058_v17 = vadd.f32 %v22571_v39, %v14012_v48  ;;  %v14059_v30 = vadd.f32 %v22571_v39, %v14015_v18 }
 0xa21   : > { %v14249_v26 = vmax.f32 %v14217_v0, 0.0  ;;  %v14311_v31 = vmul.f32 0.16666667, %v14279_v16 }
 0xa22   : > { %v14280_v60 = vmin.f32 %v14248_v25, 6.0  ;;  %v14218_v53 = vadd.f32 3.0, %v14058_v17  ;;  %14616 = vperm.xlu0 %18100, %v14310_v32   ;;  %v14219_v6 = vadd.f32 3.0, %v14059_v30 }
 0xa23   : > { %v14018_v37 = vpop.xlane.xlu0 %14017  ;;  %14611 = vperm.xlu1 %18099, %v14309_v62   ;;  %v14281_v11 = vmin.f32 %v14249_v26, 6.0  ;;  %v14021_v42 = vpop.xlane.xlu1 %14020 }
 0xa24   : > { %v14312_v38 = vmul.f32 0.16666667, %v14280_v60  ;;  %v14250_v7 = vmax.f32 %v14218_v53, 0.0  ;;  %v14060_v40 = vadd.f32 %v22571_v39, %v14018_v37  ;;  %v14251_v51 = vmax.f32 %v14219_v6, 0.0 }
 0xa25   : > { %v14061_v12 = vadd.f32 %v22571_v39, %v14021_v42  ;;  %v14313_v48 = vmul.f32 0.16666667, %v14281_v11 }
 0xa26   : > { %v14282_v28 = vmin.f32 %v14250_v7, 6.0  ;;  %v14220_v54 = vadd.f32 3.0, %v14060_v40  ;;  %14626 = vperm.xlu0 %18100, %v14312_v38   ;;  %v14283_v23 = vmin.f32 %v14251_v51, 6.0 }
 0xa27   : > { %v14024_v36 = vpop.xlane.xlu0 %14023  ;;  %v14221_v5 = vadd.f32 3.0, %v14061_v12  ;;  %14621 = vperm.xlu1 %18099, %v14311_v31   ;;  %v14027_v29 = vpop.xlane.xlu1 %14026 }
 0xa28   : > { %v14314_v44 = vmul.f32 0.16666667, %v14282_v28  ;;  %v14252_v2 = vmax.f32 %v14220_v54, 0.0  ;;  %v14062_v57 = vadd.f32 %v22571_v39, %v14024_v36  ;;  %v14063_v17 = vadd.f32 %v22571_v39, %v14027_v29 }
 0xa29   : > { %v14253_v25 = vmax.f32 %v14221_v5, 0.0  ;;  %v14315_v53 = vmul.f32 0.16666667, %v14283_v23 }
 0xa2a   : > { %v14284_v32 = vmin.f32 %v14252_v2, 6.0  ;;  %v14222_v16 = vadd.f32 3.0, %v14062_v57  ;;  %14636 = vperm.xlu0 %18100, %v14314_v44   ;;  %v14223_v62 = vadd.f32 3.0, %v14063_v17 }
 0xa2b   : > { %v14030_v0 = vpop.xlane.xlu0 %14029  ;;  %14631 = vperm.xlu1 %18099, %v14313_v48   ;;  %v14033_v26 = vpop.xlane.xlu1 %14032  ;;  %v14285_v37 = vmin.f32 %v14253_v25, 6.0 }
 0xa2c   : > { %v14316_v18 = vmul.f32 0.16666667, %v14284_v32  ;;  %v14064_v60 = vadd.f32 %v22571_v39, %v14030_v0  ;;  %v14254_v30 = vmax.f32 %v14222_v16, 0.0  ;;  %v14255_v38 = vmax.f32 %v14223_v62, 0.0 }
 0xa2d   : > { %v14065_v6 = vadd.f32 %v22571_v39, %v14033_v26  ;;  %v14317_v28 = vmul.f32 0.16666667, %v14285_v37 }
 0xa2e   : > { %v14224_v7 = vadd.f32 3.0, %v14064_v60  ;;  %v14286_v40 = vmin.f32 %v14254_v30, 6.0  ;;  %14646 = vperm.xlu0 %18100, %v14316_v18   ;;  %v14287_v51 = vmin.f32 %v14255_v38, 6.0 }
 0xa2f   : > { %v14225_v11 = vadd.f32 3.0, %v14065_v6  ;;  %14641 = vperm.xlu1 %18099, %v14315_v53  }
 0xa30   : > { %v14256_v31 = vmax.f32 %v14224_v7, 0.0  ;;  %v14318_v42 = vmul.f32 0.16666667, %v14286_v40  ;;  %v14319_v44 = vmul.f32 0.16666667, %v14287_v51 }
 0xa31   : > { %v14257_v12 = vmax.f32 %v14225_v11, 0.0 }
 0xa32   : > { %v14288_v54 = vmin.f32 %v14256_v31, 6.0  ;;  %14656 = vperm.xlu0 %18100, %v14318_v42  }
 0xa33   : > { %14651 = vperm.xlu1 %18099, %v14317_v28   ;;  %v14289_v2 = vmin.f32 %v14257_v12, 6.0 }
 0xa34   : > { %v14320_v36 = vmul.f32 0.16666667, %v14288_v54 }
 0xa35   : > { %v14321_v23 = vmul.f32 0.16666667, %v14289_v2 }
 0xa36   : > { %14666 = vperm.xlu0 %18100, %v14320_v36  }
 0xa37   : > { %14661 = vperm.xlu1 %18099, %v14319_v44  }
 0xa39   : > { %v14330_v5 = vpop.permute.xlu1 %14329  ;;  %v14325_v39 = vpop.permute.xlu0 %14324 }
 0xa3a   : > { %v14482_v41 = vmul.f32 %v14325_v39, %v22236_v8 }
 0xa3b   : > { %14671 = vperm.xlu1 %18099, %v14321_v23  }
 0xa3d   : > { %v14335_v57 = vpop.permute.xlu1 %14334 }
 0xa3e   : > { %v14340_v29 = vpop.permute.xlu0 %14339 }
 0xa41   : > { %v14345_v48 = vpop.permute.xlu1 %14344 }
 0xa42   : > { %v22637_v32 = vpop.permute.xlu0 %14349  ;;  %v14486_v8 = vmul.f32 %v14345_v48, %v22254_v22  ;;  %v18396_v48 = vld [vmem:[%s19056_s28 + $0x30] sm:$0xff] }
 0xa45   : > { %v14355_v25 = vpop.permute.xlu1 %14354 }
 0xa46   : > { %v22639_v17 = vpop.permute.xlu0 %14359 }
 0xa49   : > { %v22641_v16 = vpop.permute.xlu1 %14364 }
 0xa4a   : > { %v22643_v0 = vpop.permute.xlu0 %14369 }
 0xa4d   : > { %v22645_v18 = vpop.permute.xlu1 %14374 }
 0xa4e   : > { %v22647_v62 = vpop.permute.xlu0 %14379 }
 0xa51   : > { %v22649_v60 = vpop.permute.xlu1 %14384 }
 0xa52   : > { %v22651_v53 = vpop.permute.xlu0 %14389 }
 0xa55   : > { %v22653_v30 = vpop.permute.xlu1 %14394 }
 0xa56   : > { %v22655_v26 = vpop.permute.xlu0 %14399 }
 0xa59   : > { %v22657_v37 = vpop.permute.xlu1 %14404 }
 0xa5a   : > { %v22659_v38 = vpop.permute.xlu0 %14409 }
 0xa5d   : > { %v22661_v7 = vpop.permute.xlu1 %14414 }
 0xa5e   : > { %v22663_v6 = vpop.permute.xlu0 %14419 }
 0xa61   : > { %v22665_v40 = vpop.permute.xlu1 %14424 }
 0xa62   : > { %v22667_v31 = vpop.permute.xlu0 %14429 }
 0xa65   : > { %v22669_v11 = vpop.permute.xlu1 %14434 }
 0xa66   : > { %v22671_v42 = vpop.permute.xlu0 %14439 }
 0xa67   : > { %23161 = vst [vmem:[#allocation56_spill] sm:$0xff] %v22671_v42 }
 0xa69   : > { %v22673_v28 = vpop.permute.xlu1 %14444 }
 0xa6a   : > { %v22675_v51 = vpop.permute.xlu0 %14449 }
 0xa6b   : > { %23162 = vst [vmem:[#allocation29_spill] sm:$0xff] %v22675_v51  ;;  %v14483_v51 = vmul.f32 %v14330_v5, %v22223_v9  ;;  %v14488_v5 = vmul.f32 %v14355_v25, %v22269_v61 }
 0xa6d   : > { %v22677_v54 = vpop.permute.xlu1 %14454 }
 0xa6e   : > { %23163 = vst [vmem:[#allocation54_spill] sm:$0xff] %v22677_v54  ;;  %v22679_v12 = vpop.permute.xlu0 %14459 }
 0xa6f   : > { %23164 = vst [vmem:[#allocation28_spill] sm:$0xff] %v22679_v12  ;;  %v18392_v12 = vld [vmem:[%s19056_s28 + $0x8] sm:$0xff] }
 0xa71   : > { %v22681_v36 = vpop.permute.xlu1 %14464 }
 0xa72   : > { %23165 = vst [vmem:[#allocation47_spill] sm:$0xff] %v22681_v36  ;;  %v22683_v44 = vpop.permute.xlu0 %14469 }
 0xa73   : > { %23166 = vst [vmem:[#allocation26_spill] sm:$0xff] %v22683_v44  ;;  %v14484_v44 = vmul.f32 %v14335_v57, %v22249_v3 }
 0xa75   : > { %v22685_v2 = vpop.permute.xlu1 %14474 }
 0xa76   : > { %23167 = vst [vmem:[#allocation46_spill] sm:$0xff] %v22685_v2  ;;  %v22687_v23 = vpop.permute.xlu0 %14479 }
 0xa77   : > { %23168 = vst [vmem:[#allocation75_spill] sm:$0xff] %v22687_v23  ;;  %v18393_v23 = vld [vmem:[%s19056_s28 + $0x10] sm:$0xff] }
 0xa7a   : > { %v14517_v19 = vpop.permute.xlu1 %14516 }
 0xa7b   : > { %v14674_v46 = vmul.f32 %v18391_v52, %v14517_v19  ;;  %v14522_v10 = vpop.permute.xlu0 %14521 }
 0xa7c   : > { %v14675_v33 = vmul.f32 %v18392_v12, %v14522_v10  ;;  %v14485_v10 = vmul.f32 %v14340_v29, %v22242_v24  ;;  %v14487_v24 = vmul.f32 %v22637_v32, %v22256_v58  ;;  %v18397_v12 = vld [vmem:[%s19056_s28 + $0x28] sm:$0xff]  ;;  %v14489_v32 = vmul.f32 %v22639_v17, %v22274_v14 }
 0xa7d   : > { %v14706_v36 = vadd.f32 %v14674_v46, %v14482_v41  ;;  %v18394_v46 = vld [vmem:[%s19056_s28 + $0x20] sm:$0xff] }
 0xa7e   : > { %v14527_v54 = vpop.permute.xlu1 %14526  ;;  %v14707_v59 = vadd.f32 %v14675_v33, %v14483_v51 }
 0xa7f   : > { %v14738_v2 = vmax.f32 %v14706_v36, 0.0  ;;  %v14676_v42 = vmul.f32 %v18393_v23, %v14527_v54  ;;  %v18398_v23 = vld [vmem:[%s19056_s28 + $0x40] sm:$0xff] }
 0xa80   : > { %v14739_v39 = vmax.f32 %v14707_v59, 0.0  ;;  %v18395_v59 = vld [vmem:[%s19056_s28 + $0x18] sm:$0xff] }
 0xa81   : > { %v14537_v27 = vpop.permute.xlu0 %14536  ;;  %14770 = vst.msk [vmem:[%s22697_s3] sm:$0xff] %vm587_vm0, %v14738_v2  ;;  %v14708_v9 = vadd.f32 %v14676_v42, %v14484_v44  ;;  %v14490_v2 = vmul.f32 %v22641_v16, %v22282_v21  ;;  %v14492_v21 = vmul.f32 %v22645_v18, %v22298_v35 }
 0xa82   : > { %v14678_v3 = vmul.f32 %v18394_v46, %v14537_v27  ;;  %v14532_v33 = vpop.permute.xlu1 %14531  ;;  %14771 = vst.msk [vmem:[%s22697_s3 + $0x8] sm:$0xff] %vm587_vm0, %v14739_v39 }
 0xa83   : > { %v14740_v41 = vmax.f32 %v14708_v9, 0.0  ;;  %v14677_v52 = vmul.f32 %v18395_v59, %v14532_v33  ;;  %v18399_v9 = vld [vmem:[%s19056_s28 + $0x38] sm:$0xff] }
 0xa84   : > { %v14710_v22 = vadd.f32 %v14678_v3, %v14486_v8 }
 0xa85   : > { %v14547_v19 = vpop.permute.xlu0 %14546  ;;  %14772 = vst.msk [vmem:[%s22697_s3 + $0x10] sm:$0xff] %vm587_vm0, %v14740_v41  ;;  %v14709_v27 = vadd.f32 %v14677_v52, %v14485_v10  ;;  %v18400_v41 = vld [vmem:[%s19056_s28 + $0x50] sm:$0xff]  ;;  %v18401_v52 = vld [vmem:[%s19056_s28 + $0x48] sm:$0xff] }
 0xa86   : > { %v14742_v57 = vmax.f32 %v14710_v22, 0.0  ;;  %v14680_v42 = vmul.f32 %v18396_v48, %v14547_v19  ;;  %v14542_v51 = vpop.permute.xlu1 %14541  ;;  %v14491_v22 = vmul.f32 %v22643_v0, %v22290_v4  ;;  %v18402_v48 = vld [vmem:[%s19056_s28 + $0x60] sm:$0xff] }
 0xa87   : > { %v14741_v29 = vmax.f32 %v14709_v27, 0.0  ;;  %v14679_v61 = vmul.f32 %v18397_v12, %v14542_v51  ;;  %v14496_v12 = vmul.f32 %v22653_v30, %v22330_v55 }
 0xa88   : > { %14774 = vst.msk [vmem:[%s22697_s3 + $0x20] sm:$0xff] %vm587_vm0, %v14742_v57  ;;  %v14712_v54 = vadd.f32 %v14680_v42, %v14488_v5  ;;  %v14494_v57 = vmul.f32 %v22649_v60, %v22314_v1  ;;  %v14493_v42 = vmul.f32 %v22647_v62, %v22306_v56 }
 0xa89   : > { %14773 = vst.msk [vmem:[%s22697_s3 + $0x18] sm:$0xff] %vm587_vm0, %v14741_v29  ;;  %v14711_v36 = vadd.f32 %v14679_v61, %v14487_v24  ;;  %v14557_v44 = vpop.permute.xlu0 %14556  ;;  %v18403_v24 = vld [vmem:[%s19056_s28 + $0x58] sm:$0xff] }
 0xa8a   : > { %v14744_v25 = vmax.f32 %v14712_v54, 0.0  ;;  %v14682_v8 = vmul.f32 %v18398_v23, %v14557_v44  ;;  %v14552_v58 = vpop.permute.xlu1 %14551 }
 0xa8b   : > { %v14743_v39 = vmax.f32 %v14711_v36, 0.0  ;;  %v14681_v46 = vmul.f32 %v18399_v9, %v14552_v58  ;;  %v14495_v36 = vmul.f32 %v22651_v53, %v22322_v63  ;;  %v14498_v58 = vmul.f32 %v22657_v37, %v22346_v20 }
 0xa8c   : > { %14776 = vst.msk [vmem:[%s22697_s3 + $0x30] sm:$0xff] %vm587_vm0, %v14744_v25  ;;  %v14714_v3 = vadd.f32 %v14682_v8, %v14490_v2  ;;  %v18404_v25 = vld [vmem:[%s19056_s28 + $0x70] sm:$0xff]  ;;  %v18405_v2 = vld [vmem:[%s19056_s28 + $0x68] sm:$0xff]  ;;  %v14497_v9 = vmul.f32 %v22655_v26, %v22338_v43 }
 0xa8d   : > { %14775 = vst.msk [vmem:[%s22697_s3 + $0x28] sm:$0xff] %vm587_vm0, %v14743_v39  ;;  %v14713_v33 = vadd.f32 %v14681_v46, %v14489_v32  ;;  %v14567_v10 = vpop.permute.xlu0 %14566  ;;  %v18406_v39 = vld [vmem:[%s19056_s28 + $0x80] sm:$0xff] }
 0xa8e   : > { %v14746_v16 = vmax.f32 %v14714_v3, 0.0  ;;  %v14684_v14 = vmul.f32 %v18400_v41, %v14567_v10  ;;  %v14562_v17 = vpop.permute.xlu1 %14561  ;;  %v18407_v3 = vld [vmem:[%s19056_s28 + $0x78] sm:$0xff]  ;;  %v18408_v41 = vld [vmem:[%s19056_s28 + $0x90] sm:$0xff] }
 0xa8f   : > { %v14745_v59 = vmax.f32 %v14713_v33, 0.0  ;;  %v14683_v19 = vmul.f32 %v18401_v52, %v14562_v17 }
 0xa90   : > { %14778 = vst.msk [vmem:[%s22697_s3 + $0x40] sm:$0xff] %vm587_vm0, %v14746_v16  ;;  %v14716_v5 = vadd.f32 %v14684_v14, %v14492_v21  ;;  %v14500_v21 = vmul.f32 %v22661_v7, %v22362_v49  ;;  %v14499_v14 = vmul.f32 %v22659_v38, %v22354_v45 }
 0xa91   : > { %14777 = vst.msk [vmem:[%s22697_s3 + $0x38] sm:$0xff] %vm587_vm0, %v14745_v59  ;;  %v14715_v35 = vadd.f32 %v14683_v19, %v14491_v22  ;;  %v14577_v18 = vpop.permute.xlu0 %14576  ;;  %v18409_v22 = vld [vmem:[%s19056_s28 + $0x88] sm:$0xff]  ;;  %v14502_v19 = vmul.f32 %v22665_v40, %v22378_v50 }
 0xa92   : > { %v14748_v27 = vmax.f32 %v14716_v5, 0.0  ;;  %v14686_v4 = vmul.f32 %v18402_v48, %v14577_v18  ;;  %v14572_v0 = vpop.permute.xlu1 %14571  ;;  %v14501_v18 = vmul.f32 %v22663_v6, %v22370_v13 }
 0xa93   : > { %v14747_v51 = vmax.f32 %v14715_v35, 0.0  ;;  %v14685_v29 = vmul.f32 %v18403_v24, %v14572_v0  ;;  %v18410_v35 = vld [vmem:[%s19056_s28 + $0xa0] sm:$0xff]  ;;  %v14504_v0 = vmul.f32 %v22669_v11, %v22394_v34  ;;  %v14503_v24 = vmul.f32 %v22667_v31, %v22386_v15 }
 0xa94   : > { %14780 = vst.msk [vmem:[%s22697_s3 + $0x50] sm:$0xff] %vm587_vm0, %v14748_v27  ;;  %v14718_v54 = vadd.f32 %v14686_v4, %v14494_v57  ;;  %v18411_v27 = vld [vmem:[%s19056_s28 + $0x98] sm:$0xff] }
 0xa95   : > { %14779 = vst.msk [vmem:[%s22697_s3 + $0x48] sm:$0xff] %vm587_vm0, %v14747_v51  ;;  %v14717_v1 = vadd.f32 %v14685_v29, %v14493_v42  ;;  %v14587_v60 = vpop.permute.xlu0 %14586  ;;  %v18412_v51 = vld [vmem:[%s19056_s28 + $0xb0] sm:$0xff] }
 0xa96   : > { %v14750_v61 = vmax.f32 %v14718_v54, 0.0  ;;  %v14688_v56 = vmul.f32 %v18404_v25, %v14587_v60  ;;  %v14582_v62 = vpop.permute.xlu1 %14581  ;;  %v18413_v54 = vld [vmem:[%s19056_s28 + $0xa8] sm:$0xff]  ;;  %v18414_v25 = vld [vmem:[%s19056_s28 + $0xc0] sm:$0xff] }
 0xa97   : > { %v14749_v44 = vmax.f32 %v14717_v1, 0.0  ;;  %v14687_v23 = vmul.f32 %v18405_v2, %v14582_v62  ;;  %v23170_v62 = vld [vmem:[#allocation56_spill] sm:$0xff]  ;;  %v18415_v2 = vld [vmem:[%s19056_s28 + $0xb8] sm:$0xff] }
 0xa98   : > { %14782 = vst.msk [vmem:[%s22697_s3 + $0x60] sm:$0xff] %vm587_vm0, %v14750_v61  ;;  %v14720_v8 = vadd.f32 %v14688_v56, %v14496_v12  ;;  %v14506_v12 = vmul.f32 %v22673_v28, %v22410_v47  ;;  %v23169_v56 = vld [vmem:[#allocation52_spill] sm:$0xff] }
 0xa99   : > { %14781 = vst.msk [vmem:[%s22697_s3 + $0x58] sm:$0xff] %vm587_vm0, %v14749_v44  ;;  %v14719_v55 = vadd.f32 %v14687_v23, %v14495_v36  ;;  %v14597_v30 = vpop.permute.xlu0 %14596  ;;  %v14505_v36 = vmul.f32 %v23170_v62, %v23169_v56 }
 0xa9a   : > { %v14752_v32 = vmax.f32 %v14720_v8, 0.0  ;;  %v14690_v63 = vmul.f32 %v18406_v39, %v14597_v30  ;;  %v14592_v53 = vpop.permute.xlu1 %14591  ;;  %v23172_v30 = vld [vmem:[#allocation54_spill] sm:$0xff] }
 0xa9b   : > { %v14751_v46 = vmax.f32 %v14719_v55, 0.0  ;;  %v14689_v33 = vmul.f32 %v18407_v3, %v14592_v53  ;;  %v23171_v55 = vld [vmem:[#allocation50_spill] sm:$0xff] }
 0xa9c   : > { %14784 = vst.msk [vmem:[%s22697_s3 + $0x70] sm:$0xff] %vm587_vm0, %v14752_v32  ;;  %v14722_v10 = vadd.f32 %v14690_v63, %v14498_v58  ;;  %v14508_v58 = vmul.f32 %v23172_v30, %v23171_v55  ;;  %v18416_v39 = vld [vmem:[%s19056_s28 + $0xd0] sm:$0xff] }
 0xa9d   : > { %14783 = vst.msk [vmem:[%s22697_s3 + $0x68] sm:$0xff] %vm587_vm0, %v14751_v46  ;;  %v14721_v20 = vadd.f32 %v14689_v33, %v14497_v9  ;;  %v14607_v37 = vpop.permute.xlu0 %14606  ;;  %v23173_v9 = vld [vmem:[#allocation27_spill] sm:$0xff]  ;;  %v23174_v46 = vld [vmem:[#allocation29_spill] sm:$0xff] }
 0xa9e   : > { %v14754_v16 = vmax.f32 %v14722_v10, 0.0  ;;  %v14692_v43 = vmul.f32 %v18408_v41, %v14607_v37  ;;  %v14602_v26 = vpop.permute.xlu1 %14601  ;;  %v14507_v3 = vmul.f32 %v23174_v46, %v23173_v9  ;;  %v18417_v10 = vld [vmem:[%s19056_s28 + $0xc8] sm:$0xff] }
 0xa9f   : > { %v14753_v17 = vmax.f32 %v14721_v20, 0.0  ;;  %v14691_v59 = vmul.f32 %v18409_v22, %v14602_v26  ;;  %v23175_v41 = vld [vmem:[#allocation45_spill] sm:$0xff] }
 0xaa0   : > { %14786 = vst.msk [vmem:[%s22697_s3 + $0x80] sm:$0xff] %vm587_vm0, %v14754_v16  ;;  %v14724_v52 = vadd.f32 %v14692_v43, %v14500_v21  ;;  %v23176_v43 = vld [vmem:[#allocation47_spill] sm:$0xff] }
 0xaa1   : > { %14785 = vst.msk [vmem:[%s22697_s3 + $0x78] sm:$0xff] %vm587_vm0, %v14753_v17  ;;  %v14723_v49 = vadd.f32 %v14691_v59, %v14499_v14  ;;  %v14617_v7 = vpop.permute.xlu0 %14616  ;;  %v14510_v26 = vmul.f32 %v23176_v43, %v23175_v41  ;;  %v18418_v17 = vld [vmem:[%s19056_s28 + $0xe0] sm:$0xff] }
 0xaa2   : > { %v14756_v5 = vmax.f32 %v14724_v52, 0.0  ;;  %v14694_v45 = vmul.f32 %v18410_v35, %v14617_v7  ;;  %v14612_v38 = vpop.permute.xlu1 %14611  ;;  %v23177_v52 = vld [vmem:[#allocation25_spill] sm:$0xff] }
 0xaa3   : > { %v14755_v57 = vmax.f32 %v14723_v49, 0.0  ;;  %v14693_v48 = vmul.f32 %v18411_v27, %v14612_v38  ;;  %v23178_v49 = vld [vmem:[#allocation28_spill] sm:$0xff]  ;;  %v23180_v27 = vld [vmem:[#allocation46_spill] sm:$0xff] }
 0xaa4   : > { %14788 = vst.msk [vmem:[%s22697_s3 + $0x90] sm:$0xff] %vm587_vm0, %v14756_v5  ;;  %v14726_v4 = vadd.f32 %v14694_v45, %v14502_v19  ;;  %v14509_v7 = vmul.f32 %v23178_v49, %v23177_v52  ;;  %v18419_v5 = vld [vmem:[%s19056_s28 + $0xd8] sm:$0xff] }
 0xaa5   : > { %14787 = vst.msk [vmem:[%s22697_s3 + $0x88] sm:$0xff] %vm587_vm0, %v14755_v57  ;;  %v14725_v50 = vadd.f32 %v14693_v48, %v14501_v18  ;;  %v14627_v40 = vpop.permute.xlu0 %14626  ;;  %v23179_v57 = vld [vmem:[#allocation43_spill] sm:$0xff] }
 0xaa6   : > { %v14758_v42 = vmax.f32 %v14726_v4, 0.0  ;;  %v14696_v13 = vmul.f32 %v18412_v51, %v14627_v40  ;;  %v14622_v6 = vpop.permute.xlu1 %14621  ;;  %v14512_v48 = vmul.f32 %v23180_v27, %v23179_v57  ;;  %v23182_v51 = vld [vmem:[#allocation26_spill] sm:$0xff] }
 0xaa7   : > { %v14757_v29 = vmax.f32 %v14725_v50, 0.0  ;;  %v14695_v1 = vmul.f32 %v18413_v54, %v14622_v6  ;;  %v18420_v50 = vld [vmem:[%s19056_s28 + $0xf0] sm:$0xff] }
 0xaa8   : > { %14790 = vst.msk [vmem:[%s22697_s3 + $0xa0] sm:$0xff] %vm587_vm0, %v14758_v42  ;;  %v14728_v60 = vadd.f32 %v14696_v13, %v14504_v0  ;;  %v23181_v42 = vld [vmem:[#allocation24_spill] sm:$0xff] }
 0xaa9   : > { %14789 = vst.msk [vmem:[%s22697_s3 + $0x98] sm:$0xff] %vm587_vm0, %v14757_v29  ;;  %v14727_v34 = vadd.f32 %v14695_v1, %v14503_v24  ;;  %v14637_v11 = vpop.permute.xlu0 %14636  ;;  %v14511_v13 = vmul.f32 %v23182_v51, %v23181_v42  ;;  %v18421_v24 = vld [vmem:[%s19056_s28 + $0xe8] sm:$0xff] }
 0xaaa   : > { %v14760_v61 = vmax.f32 %v14728_v60, 0.0  ;;  %v14698_v15 = vmul.f32 %v18414_v25, %v14637_v11  ;;  %v14632_v31 = vpop.permute.xlu1 %14631  ;;  %v23183_v11 = vld [vmem:[#allocation31_spill] sm:$0xff] }
 0xaab   : > { %v14759_v44 = vmax.f32 %v14727_v34, 0.0  ;;  %v14697_v23 = vmul.f32 %v18415_v2, %v14632_v31 }
 0xaac   : > { %14792 = vst.msk [vmem:[%s22697_s3 + $0xb0] sm:$0xff] %vm587_vm0, %v14760_v61  ;;  %v14730_v8 = vadd.f32 %v14698_v15, %v14506_v12  ;;  %v23184_v12 = vld [vmem:[#allocation75_spill] sm:$0xff] }
 0xaad   : > { %14791 = vst.msk [vmem:[%s22697_s3 + $0xa8] sm:$0xff] %vm587_vm0, %v14759_v44  ;;  %v14729_v47 = vadd.f32 %v14697_v23, %v14505_v36  ;;  %v14647_v28 = vpop.permute.xlu0 %14646  ;;  %v14513_v61 = vmul.f32 %v23184_v12, %v23183_v11  ;;  %v18422_v15 = vld [vmem:[%s19056_s28 + $0xf8] sm:$0xff]  ;;  %s18595_s28 = scalar_lea.vmem %s22851_s26, 4096 }
 0xaae   : > { %v14762_v32 = vmax.f32 %v14730_v8, 0.0  ;;  %v14700_v63 = vmul.f32 %v18416_v39, %v14647_v28  ;;  %v14642_v53 = vpop.permute.xlu1 %14641  ;;  %p18596_p0 = scmp.ne.s32.totalorder %s22851_s26, %s18595_s28  ;;  %p18603_p5 = scmp.lt.s32.totalorder %s18601_s22, %s18595_s28 }
 0xaaf   : > { %v14761_v33 = vmax.f32 %v14729_v47, 0.0  ;;  %v14699_v20 = vmul.f32 %v18417_v10, %v14642_v53 }
 0xab0   : > { %14794 = vst.msk [vmem:[%s22697_s3 + $0xc0] sm:$0xff] %vm587_vm0, %v14762_v32  ;;  %v14732_v37 = vadd.f32 %v14700_v63, %v14508_v58  ;;  %p18597_p4 = pnand %p18596_p0, %p18949_p3  ;;  %p18604_p9 = por %p18603_p5, %p18602_p10 }
 0xab1   : > { %14793 = vst.msk [vmem:[%s22697_s3 + $0xb8] sm:$0xff] %vm587_vm0, %v14761_v33  ;;  %v14731_v21 = vadd.f32 %v14699_v20, %v14507_v3  ;;  %v14657_v16 = vpop.permute.xlu0 %14656 }
 0xab2   : > { %v14764_v14 = vmax.f32 %v14732_v37, 0.0  ;;  %v14702_v22 = vmul.f32 %v18418_v17, %v14657_v16  ;;  %v14652_v59 = vpop.permute.xlu1 %14651  ;;  %p18598_p6 = pneg %p18597_p4 }
 0xab3   : > { %v14763_v19 = vmax.f32 %v14731_v21, 0.0  ;;  %v14701_v35 = vmul.f32 %v18419_v5, %v14652_v59 }
 0xab4   : > { %14796 = vst.msk [vmem:[%s22697_s3 + $0xd0] sm:$0xff] %vm587_vm0, %v14764_v14  ;;  %v14734_v45 = vadd.f32 %v14702_v22, %v14510_v26  ;;  %p18605_p8 = pnand %p18604_p9, %p18598_p6 }
 0xab5   : > { %14795 = vst.msk [vmem:[%s22697_s3 + $0xc8] sm:$0xff] %vm587_vm0, %v14763_v19  ;;  %v14733_v38 = vadd.f32 %v14701_v35, %v14509_v7  ;;  %v14667_v18 = vpop.permute.xlu0 %14666 }
 0xab6   : > { %v14766_v4 = vmax.f32 %v14734_v45, 0.0  ;;  %v14704_v40 = vmul.f32 %v18420_v50, %v14667_v18  ;;  %v14662_v0 = vpop.permute.xlu1 %14661 }
 0xab7   : > { %v14765_v6 = vmax.f32 %v14733_v38, 0.0  ;;  %v14703_v29 = vmul.f32 %v18421_v24, %v14662_v0 }
 0xab8   : > { %14798 = vst.msk [vmem:[%s22697_s3 + $0xe0] sm:$0xff] %vm587_vm0, %v14766_v4  ;;  %v14736_v54 = vadd.f32 %v14704_v40, %v14512_v48 }
 0xab9   : > { %14797 = vst.msk [vmem:[%s22697_s3 + $0xd8] sm:$0xff] %vm587_vm0, %v14765_v6  ;;  %v14735_v1 = vadd.f32 %v14703_v29, %v14511_v13 }
 0xaba   : > { %v14768_v60 = vmax.f32 %v14736_v54, 0.0  ;;  %v14672_v34 = vpop.permute.xlu1 %14671 }
 0xabb   : > { %v14767_v25 = vmax.f32 %v14735_v1, 0.0  ;;  %v14705_v31 = vmul.f32 %v18422_v15, %v14672_v34 }
 0xabc   : > { %14800 = vst.msk [vmem:[%s22697_s3 + $0xf0] sm:$0xff] %vm587_vm0, %v14768_v60 }
 0xabd   : > { %14799 = vst.msk [vmem:[%s22697_s3 + $0xe8] sm:$0xff] %vm587_vm0, %v14767_v25  ;;  %v14737_v56 = vadd.f32 %v14705_v31, %v14513_v61 }
 0xabf   : > { %v14769_v62 = vmax.f32 %v14737_v56, 0.0 }
 0xac1   : > { %14801 = vst.msk [vmem:[%s22697_s3 + $0xf8] sm:$0xff] %vm587_vm0, %v14769_v62 }
 0xac2   : > { %18608 = shalt.err (!%p18605_p8)
}
 0xac3   : > { %s18609_s21 = scalar_lea.hbm %s22849_s0, 4096  ;;  %s18613_s29 = scalar_lea.hbm %s23185_s30, 8192 }
 0xac4   : > { %p18610_p11 = scmp.ne.s32.totalorder %s22849_s0, %s18609_s21  ;;  %p18614_p1 = scmp.lt.u32.totalorder %s22849_s0, %s23185_s30 }
 0xac5   : > { %p18615_p2 = scmp.lt.u32.totalorder %s18613_s29, %s18609_s21  ;;  %p18617_p0 = scmp.lt.u32.totalorder %s18609_s21, %s22849_s0 }
 0xac6   : > { %p18611_p7 = pnand %p18610_p11, %p18949_p3 }
 0xac7   : > { %p18616_p13 = por %p18615_p2, %p18614_p1 }
 0xac8   : > { %p18612_p12 = pneg %p18611_p7 }
 0xac9   : > { %p18618_p4 = por %p18617_p0, %p18616_p13 }
 0xacb   : > { %p18619_p6 = pnand %p18618_p4, %p18612_p12 }
 0xacd   : > { %18622 = shalt.err (!%p18619_p6)
}
 0xace   : > { %s18695_s3 = smov 128   ;;  %s18696_s12 = smov 8  }
 0xacf   : > { %18014 = dma.vmem_to_hbm [thread:$0]  (%p18949_p3), %s22851_s26, 4096, %s22849_s0, %s14803_s6, %s18695_s3, %s18695_s3, %s18696_s12  }
 0xad0 PF: > { %s23186_s14 = sld [smem:[#allocation22_spill]]  ;;  %s23187_s24 = sld [smem:[#allocation23_spill]] }
 0xad1   : > { %p23189_p5 = scmp.ge.s32.totalorder %s18677_s18, 2 }
 0xad6   : > { %s14831_s28 = sand.u32 1, %s23186_s14   ;;  %p23188_p10 = scmp.ne.s32.totalorder %s23187_s24, 0 }
 0xad7   : > { %s14832_s27 = scalar_lea.sflag [#allocation6], %s14831_s28 }
 0xad8   : > { %p18037_p9 = pnand %p23189_p5, %p23188_p10 }
 0xada   : > { %18660 = dma.done.wait (!%p18037_p9), %s14832_s27, 4096  }
 0xadb   : > { %18662 = vsyncadd (!%p18037_p9), %s14832_s27, 4294963200  ;;  %p34_p8 = scmp.ge.s32.totalorder %s18936_s9, 4   ;;  %s23190_s15 = smov %s18669_s16 }
 0xadc   : > { %s23191_s16 = smov %s18673_s17  ;;  %s23192_s17 = smov %s18945_s19 }
 0xadd   : > { %s23193_s18 = smov %s18936_s9  ;;  %36 = sbr.rel (!%p34_p8) target bundleno = 18 (0x12), region = 178 }
 0xae4   :  { %14837 = vsyncpa [#allocation5], 1 }
 0xae5   :  { %14839 = vsyncpa [#allocation5 + $0x1], 1 }
 0xae6   :  { %14840 = vsyncpa [#allocation8], 1 }
 0xae7   :  { %14842 = vsyncpa [#allocation8 + $0x1], 1 }
 0xae8   :  { %14843 = vsyncpa [#allocation11], 1 }
 0xae9   :  { %14844 = vsyncpa [#allocation14], 1 }
 0xaea   :  { %14845 = vsyncpa [#allocation6], 1 }
 0xaeb   :  { %14847 = vsyncpa [#allocation6 + $0x1], 1 }

</bundles_post_ra>
